<compile_context>
chip_gen: v5e
topology: v5e:2x2
jax: 0.10.0
libtpu: 0.0.40
codegen_flags: <defaults>
</compile_context>

<pallas_src>
import functools
import math

import jax
import jax.numpy as jnp
from jax.experimental import pallas as pl
from jax.experimental.pallas import tpu as pltpu

# ----------------------------- config (small synthetic BERT) ----------------
VOCAB = 100
HIDDEN = 128          # bert.config.hidden_size
N_LAYERS = 2
N_HEADS = 2
HEAD_DIM = HIDDEN // N_HEADS
HEAD_PAD = 128        # lane-aligned per-head width (zero padded 64 -> 128)
INTERMEDIATE = 256
MAX_POS = 32
LN_EPS = 1e-12
CLS_H1 = 2048         # classifier dims are literal in the PyTorch module
CLS_H2 = 768
OUT_PAD = 128         # lane-dense padded width of the final Linear(768,1)
_INV_SQRT2 = 1.0 / math.sqrt(2.0)


# ----------------------------- in-kernel helpers -----------------------------
def _ln_f32(x, g, b, eps):
    mu = jnp.mean(x, axis=-1, keepdims=True)
    xc = x - mu
    var = jnp.mean(xc * xc, axis=-1, keepdims=True)
    return xc * jax.lax.rsqrt(var + eps) * g + b


def _mm(x_f32, w_ref):
    """bf16 MXU operands, f32 accumulation."""
    return jnp.dot(x_f32.astype(jnp.bfloat16), w_ref[...],
                   preferred_element_type=jnp.float32)


def _gelu(x):
    # exact (erf) GELU, matching BERT; f32 math.
    return 0.5 * x * (1.0 + jax.lax.erf(x * _INV_SQRT2))


# ----------------------------- fused megakernel ------------------------------
def _fused_forward_kernel(*refs, n_layers, n_heads, head_dim, head_pad,
                          seq_len, batch, eps):
    """Whole ClinicalBERT-readmission forward for one batch, entirely in VMEM."""
    it = iter(refs)
    emb_ref = next(it)                        # (B*S, H) f32
    mask_ref = next(it)                       # (B, 1, S) f32 additive
    emb_g = next(it); emb_b = next(it)        # (1, H)
    layers = [tuple(next(it) for _ in range(12)) for _ in range(n_layers)]
    pw, pb, w1, b1, w2, b2, w3, b3 = (next(it) for _ in range(8))
    out_ref = next(it)                        # (B, OUT_PAD) f32

    scale = 1.0 / math.sqrt(head_dim)
    amask = mask_ref[...]                     # (B, 1, S)

    # ---- embedding LayerNorm ----
    x = _ln_f32(emb_ref[...].astype(jnp.float32), emb_g[...], emb_b[...], eps)

    # ---- encoder layers (static loop, all intermediates stay in VMEM/vregs) ----
    for (qkv_w, qkv_b, o_w, o_b, ln1_g, ln1_b,
         f1_w, f1_b, f2_w, f2_b, ln2_g, ln2_b) in layers:
        # fused QKV projection at M = B*S; columns are head-padded (lane aligned)
        qkv = _mm(x, qkv_w) + qkv_b[...]      # (B*S, 3*n_heads*head_pad) f32

        # per-(batch, head) scaled-dot-product attention; tiles are (S, 128)
        ctx_rows = []
        for b in range(batch):
            r0 = b * seq_len
            m_b = amask[b]                    # (1, S)
            head_ctx = []
            for h in range(n_heads):
                q = qkv[r0:r0 + seq_len, h * head_pad:(h + 1) * head_pad]
                k = qkv[r0:r0 + seq_len,
                        (n_heads + h) * head_pad:(n_heads + h + 1) * head_pad]
                v = qkv[r0:r0 + seq_len,
                        (2 * n_heads + h) * head_pad:(2 * n_heads + h + 1) * head_pad]
                s = jnp.dot(q.astype(jnp.bfloat16), k.astype(jnp.bfloat16).T,
                            preferred_element_type=jnp.float32) * scale
                s = s + m_b                   # broadcast over queries
                s = s - jnp.max(s, axis=-1, keepdims=True)
                p = jnp.exp(s)
                p = p * pl.reciprocal(jnp.sum(p, axis=-1, keepdims=True),
                                      approx=True)
                head_ctx.append(
                    jnp.dot(p.astype(jnp.bfloat16), v.astype(jnp.bfloat16),
                            preferred_element_type=jnp.float32))
            ctx_rows.append(jnp.concatenate(head_ctx, axis=-1))  # (S, nH*128)
        ctx = jnp.concatenate(ctx_rows, axis=0)                  # (B*S, nH*128)

        # output projection (padded rows of o_w are zero) + residual + LN1
        attn_out = _mm(ctx, o_w) + o_b[...]
        x1 = _ln_f32(attn_out + x, ln1_g[...], ln1_b[...], eps)

        # FFN (GELU) + residual + LN2
        h1 = _gelu(_mm(x1, f1_w) + f1_b[...])
        h2 = _mm(h1, f2_w) + f2_b[...]
        x = _ln_f32(h2 + x1, ln2_g[...], ln2_b[...], eps)

    # ---- pooler (tanh on [CLS]) + classifier MLP ----
    cls = jnp.concatenate(
        [x[b * seq_len:b * seq_len + 1, :] for b in range(batch)], axis=0)  # (B,H)
    pooled = jnp.tanh(_mm(cls, pw) + pb[...])
    h = jnp.maximum(_mm(pooled, w1) + b1[...], 0.0)            # (B, 2048)
    h = jnp.maximum(_mm(h, w2) + b2[...], 0.0)                 # (B, 768)
    out_ref[...] = (_mm(h, w3) + b3[...]).astype(out_ref.dtype)  # (B, 128) lane-dense


# ----------------------------- parameter init --------------------------------
def _w(key, din, dout):
    return (jax.random.normal(key, (din, dout), jnp.float32)
            * 0.02).astype(jnp.bfloat16)


def _pad_head_cols(w, n_heads, head_dim, head_pad):
    """(din, n_heads*head_dim) -> (din, n_heads*head_pad), zero pad per head."""
    din = w.shape[0]
    w = w.reshape(din, n_heads, head_dim)
    pad = jnp.zeros((din, n_heads, head_pad - head_dim), w.dtype)
    return jnp.concatenate([w, pad], axis=-1).reshape(din, n_heads * head_pad)


def _pad_head_rows(w, n_heads, head_dim, head_pad):
    """(n_heads*head_dim, dout) -> (n_heads*head_pad, dout), zero pad per head."""
    dout = w.shape[1]
    w = w.reshape(n_heads, head_dim, dout)
    pad = jnp.zeros((n_heads, head_pad - head_dim, dout), w.dtype)
    return jnp.concatenate([w, pad], axis=1).reshape(n_heads * head_pad, dout)


def init_params(key):
    keys = iter(jax.random.split(key, 7 + 6 * N_LAYERS))
    cls3 = _w(next(keys), CLS_H2, 1)
    cls3_padded = jnp.concatenate(
        [cls3, jnp.zeros((CLS_H2, OUT_PAD - 1), cls3.dtype)], axis=1)
    params = {
        "word_emb": jax.random.normal(next(keys), (VOCAB, HIDDEN),
                                      jnp.float32) * 0.02,
        "pos_emb": jax.random.normal(next(keys), (MAX_POS, HIDDEN),
                                     jnp.float32) * 0.02,
        "type_emb": jax.random.normal(next(keys), (2, HIDDEN),
                                      jnp.float32) * 0.02,
        "emb_ln_g": jnp.ones((1, HIDDEN), jnp.float32),
        "emb_ln_b": jnp.zeros((1, HIDDEN), jnp.float32),
        "layers": [],
        "pooler_w": _w(next(keys), HIDDEN, HIDDEN),
        "pooler_b": jnp.zeros((1, HIDDEN), jnp.float32),
        "cls1_w": _w(next(keys), HIDDEN, CLS_H1),
        "cls1_b": jnp.zeros((1, CLS_H1), jnp.float32),
        "cls2_w": _w(next(keys), CLS_H1, CLS_H2),
        "cls2_b": jnp.zeros((1, CLS_H2), jnp.float32),
        "cls3_w": cls3_padded,                               # (768, 128) lane-dense
        "cls3_b": jnp.zeros((1, OUT_PAD), jnp.float32),
    }
    for _ in range(N_LAYERS):
        qw = _w(next(keys), HIDDEN, HIDDEN)
        kw = _w(next(keys), HIDDEN, HIDDEN)
        vw = _w(next(keys), HIDDEN, HIDDEN)
        ow = _w(next(keys), HIDDEN, HIDDEN)
        params["layers"].append({
            # head-padded, lane-aligned layouts
            "qkv_w": jnp.concatenate(
                [_pad_head_cols(w, N_HEADS, HEAD_DIM, HEAD_PAD)
                 for w in (qw, kw, vw)], axis=1),            # (H, 3*nH*128) bf16
            "qkv_b": jnp.zeros((1, 3 * N_HEADS * HEAD_PAD), jnp.float32),
            "o_w": _pad_head_rows(ow, N_HEADS, HEAD_DIM, HEAD_PAD),  # (nH*128, H)
            "o_b": jnp.zeros((1, HIDDEN), jnp.float32),
            "ln1_g": jnp.ones((1, HIDDEN), jnp.float32),
            "ln1_b": jnp.zeros((1, HIDDEN), jnp.float32),
            "f1_w": _w(next(keys), HIDDEN, INTERMEDIATE),
            "f1_b": jnp.zeros((1, INTERMEDIATE), jnp.float32),
            "f2_w": _w(next(keys), INTERMEDIATE, HIDDEN),
            "f2_b": jnp.zeros((1, HIDDEN), jnp.float32),
            "ln2_g": jnp.ones((1, HIDDEN), jnp.float32),
            "ln2_b": jnp.zeros((1, HIDDEN), jnp.float32),
        })
    return params


# ----------------------------- model forward ---------------------------------
_LAYER_KEYS = ("qkv_w", "qkv_b", "o_w", "o_b", "ln1_g", "ln1_b",
               "f1_w", "f1_b", "f2_w", "f2_b", "ln2_g", "ln2_b")


def readmission_forward(params, input_ids, attention_mask):
    B, S = input_ids.shape
    # embeddings (gathers are plain-JAX glue); token_type_ids fixed to 0.
    emb = (params["word_emb"][input_ids]
           + params["pos_emb"][jnp.arange(S)][None, :, :]
           + params["type_emb"][0][None, None, :])
    emb = emb.reshape(B * S, HIDDEN)

    # BERT additive attention mask, kept at (B, 1, S) -- no per-head broadcast.
    add_mask = ((1.0 - attention_mask.astype(jnp.float32))
                * -10000.0).reshape(B, 1, S)

    flat_weights = [params["emb_ln_g"], params["emb_ln_b"]]
    for lp in params["layers"]:
        flat_weights += [lp[k] for k in _LAYER_KEYS]
    flat_weights += [params["pooler_w"], params["pooler_b"],
                     params["cls1_w"], params["cls1_b"],
                     params["cls2_w"], params["cls2_b"],
                     params["cls3_w"], params["cls3_b"]]

    kernel = functools.partial(
        _fused_forward_kernel, n_layers=N_LAYERS, n_heads=N_HEADS,
        head_dim=HEAD_DIM, head_pad=HEAD_PAD, seq_len=S, batch=B, eps=LN_EPS)

    # ONE pallas_call for the entire forward pass (no grid: single invocation,
    # everything single-buffered in VMEM; ~4.6 MB of weights resident).
    padded_logits = pl.pallas_call(
        kernel,
        out_shape=jax.ShapeDtypeStruct((B, OUT_PAD), jnp.float32),
        compiler_params=pltpu.CompilerParams(
            vmem_limit_bytes=32 * 1024 * 1024),
    )(emb, add_mask, *flat_weights)

    return padded_logits[:, :1]                                # (B, 1)


# ----------------------------- main -------------------------------------------
if __name__ == "__main__":
    key = jax.random.PRNGKey(0)
    kp, ki = jax.random.split(key)
    params = init_params(kp)

    B, S = 2, 8
    input_ids = jax.random.randint(ki, (B, S), 0, VOCAB, dtype=jnp.int32)
    attention_mask = jnp.ones((B, S), dtype=jnp.int32)
    # TODO(synk): pretrained ClinicalBERT weights are not loadable here; weights
    # are deterministic synthetic initializations with the same structure.

    logits = jax.jit(readmission_forward)(params, input_ids, attention_mask)
    logits = jax.block_until_ready(logits)
    assert logits.shape == (B, 1) and logits.dtype == jnp.float32
    print("KERNEL_OK")
</pallas_src>

<mosaic_0001>
module attributes {stable_mosaic.version = 11 : i64} {
  func.func @_fused_forward_kernel(%arg0: memref<16x128xf32, #tpu.memory_space<vmem>>, %arg1: memref<2x1x8xf32, #tpu.memory_space<vmem>>, %arg2: memref<1x128xf32, #tpu.memory_space<vmem>>, %arg3: memref<1x128xf32, #tpu.memory_space<vmem>>, %arg4: memref<128x768xbf16, #tpu.memory_space<vmem>>, %arg5: memref<1x768xf32, #tpu.memory_space<vmem>>, %arg6: memref<256x128xbf16, #tpu.memory_space<vmem>>, %arg7: memref<1x128xf32, #tpu.memory_space<vmem>>, %arg8: memref<1x128xf32, #tpu.memory_space<vmem>>, %arg9: memref<1x128xf32, #tpu.memory_space<vmem>>, %arg10: memref<128x256xbf16, #tpu.memory_space<vmem>>, %arg11: memref<1x256xf32, #tpu.memory_space<vmem>>, %arg12: memref<256x128xbf16, #tpu.memory_space<vmem>>, %arg13: memref<1x128xf32, #tpu.memory_space<vmem>>, %arg14: memref<1x128xf32, #tpu.memory_space<vmem>>, %arg15: memref<1x128xf32, #tpu.memory_space<vmem>>, %arg16: memref<128x768xbf16, #tpu.memory_space<vmem>>, %arg17: memref<1x768xf32, #tpu.memory_space<vmem>>, %arg18: memref<256x128xbf16, #tpu.memory_space<vmem>>, %arg19: memref<1x128xf32, #tpu.memory_space<vmem>>, %arg20: memref<1x128xf32, #tpu.memory_space<vmem>>, %arg21: memref<1x128xf32, #tpu.memory_space<vmem>>, %arg22: memref<128x256xbf16, #tpu.memory_space<vmem>>, %arg23: memref<1x256xf32, #tpu.memory_space<vmem>>, %arg24: memref<256x128xbf16, #tpu.memory_space<vmem>>, %arg25: memref<1x128xf32, #tpu.memory_space<vmem>>, %arg26: memref<1x128xf32, #tpu.memory_space<vmem>>, %arg27: memref<1x128xf32, #tpu.memory_space<vmem>>, %arg28: memref<128x128xbf16, #tpu.memory_space<vmem>>, %arg29: memref<1x128xf32, #tpu.memory_space<vmem>>, %arg30: memref<128x2048xbf16, #tpu.memory_space<vmem>>, %arg31: memref<1x2048xf32, #tpu.memory_space<vmem>>, %arg32: memref<2048x768xbf16, #tpu.memory_space<vmem>>, %arg33: memref<1x768xf32, #tpu.memory_space<vmem>>, %arg34: memref<768x128xbf16, #tpu.memory_space<vmem>>, %arg35: memref<1x128xf32, #tpu.memory_space<vmem>>, %arg36: memref<2x128xf32, #tpu.memory_space<vmem>>) attributes {dimension_semantics = [], scalar_prefetch = 0 : i64, scratch_operands = 0 : i64, tpu.core_type = #tpu.core_type<tc>} {
    %c0 = arith.constant 0 : index
    %c0_0 = arith.constant 0 : index
    %c0_1 = arith.constant 0 : index
    %0 = vector.load %arg1[%c0, %c0_0, %c0_1] : memref<2x1x8xf32, #tpu.memory_space<vmem>>, vector<2x1x8xf32>
    %c0_2 = arith.constant 0 : index
    %c0_3 = arith.constant 0 : index
    %1 = vector.load %arg0[%c0_2, %c0_3] : memref<16x128xf32, #tpu.memory_space<vmem>>, vector<16x128xf32>
    %c0_4 = arith.constant 0 : index
    %c0_5 = arith.constant 0 : index
    %2 = vector.load %arg2[%c0_4, %c0_5] : memref<1x128xf32, #tpu.memory_space<vmem>>, vector<1x128xf32>
    %c0_6 = arith.constant 0 : index
    %c0_7 = arith.constant 0 : index
    %3 = vector.load %arg3[%c0_6, %c0_7] : memref<1x128xf32, #tpu.memory_space<vmem>>, vector<1x128xf32>
    %cst = arith.constant dense<0.000000e+00> : vector<16xf32>
    %4 = vector.multi_reduction <add>, %1, %cst [1] : vector<16x128xf32> to vector<16xf32>
    %5 = vector.shape_cast %4 : vector<16xf32> to vector<16x1xf32>
    %cst_8 = arith.constant 1.280000e+02 : f32
    %6 = vector.broadcast %cst_8 : f32 to vector<16x1xf32>
    %7 = arith.divf %5, %6 : vector<16x1xf32>
    %8 = vector.broadcast %7 : vector<16x1xf32> to vector<16x128xf32>
    %9 = arith.subf %1, %8 : vector<16x128xf32>
    %10 = arith.mulf %9, %9 : vector<16x128xf32>
    %cst_9 = arith.constant dense<0.000000e+00> : vector<16xf32>
    %11 = vector.multi_reduction <add>, %10, %cst_9 [1] : vector<16x128xf32> to vector<16xf32>
    %12 = vector.shape_cast %11 : vector<16xf32> to vector<16x1xf32>
    %cst_10 = arith.constant 1.280000e+02 : f32
    %13 = vector.broadcast %cst_10 : f32 to vector<16x1xf32>
    %14 = arith.divf %12, %13 : vector<16x1xf32>
    %cst_11 = arith.constant 9.99999996E-13 : f32
    %15 = vector.broadcast %cst_11 : f32 to vector<16x1xf32>
    %16 = arith.addf %14, %15 : vector<16x1xf32>
    %17 = math.rsqrt %16 : vector<16x1xf32>
    %18 = vector.broadcast %17 : vector<16x1xf32> to vector<16x128xf32>
    %19 = arith.mulf %9, %18 : vector<16x128xf32>
    %20 = vector.broadcast %2 : vector<1x128xf32> to vector<16x128xf32>
    %21 = arith.mulf %19, %20 : vector<16x128xf32>
    %22 = vector.broadcast %3 : vector<1x128xf32> to vector<16x128xf32>
    %23 = arith.addf %21, %22 : vector<16x128xf32>
    %24 = arith.truncf %23 : vector<16x128xf32> to vector<16x128xbf16>
    %c0_12 = arith.constant 0 : index
    %c0_13 = arith.constant 0 : index
    %25 = vector.load %arg4[%c0_12, %c0_13] : memref<128x768xbf16, #tpu.memory_space<vmem>>, vector<128x768xbf16>
    %cst_14 = arith.constant dense<0.000000e+00> : vector<16x768xf32>
    %26 = tpu.matmul %24, %25, %cst_14 {dimension_numbers = #tpu.dot_dimension_numbers<[1], [0], [0], [1], [0, 0, 1, 1], [], []>} : vector<16x128xbf16>, vector<128x768xbf16>, vector<16x768xf32> -> vector<16x768xf32>
    %c0_15 = arith.constant 0 : index
    %c0_16 = arith.constant 0 : index
    %27 = vector.load %arg5[%c0_15, %c0_16] : memref<1x768xf32, #tpu.memory_space<vmem>>, vector<1x768xf32>
    %28 = vector.broadcast %27 : vector<1x768xf32> to vector<16x768xf32>
    %29 = arith.addf %26, %28 : vector<16x768xf32>
    %30 = vector.extract_strided_slice %0 {offsets = [0, 0, 0], sizes = [1, 1, 8], strides = [1, 1, 1]} : vector<2x1x8xf32> to vector<1x1x8xf32>
    %31 = vector.shape_cast %30 : vector<1x1x8xf32> to vector<1x8xf32>
    %32 = vector.extract_strided_slice %29 {offsets = [0, 0], sizes = [8, 128], strides = [1, 1]} : vector<16x768xf32> to vector<8x128xf32>
    %33 = vector.extract_strided_slice %29 {offsets = [0, 256], sizes = [8, 128], strides = [1, 1]} : vector<16x768xf32> to vector<8x128xf32>
    %34 = vector.extract_strided_slice %29 {offsets = [0, 512], sizes = [8, 128], strides = [1, 1]} : vector<16x768xf32> to vector<8x128xf32>
    %35 = arith.truncf %32 : vector<8x128xf32> to vector<8x128xbf16>
    %36 = arith.truncf %33 : vector<8x128xf32> to vector<8x128xbf16>
    %37 = tpu.transpose %36, [1, 0] : vector<8x128xbf16> -> vector<128x8xbf16>
    %cst_17 = arith.constant dense<0.000000e+00> : vector<8x8xf32>
    %38 = tpu.matmul %35, %37, %cst_17 {dimension_numbers = #tpu.dot_dimension_numbers<[1], [0], [0], [1], [0, 0, 1, 1], [], []>} : vector<8x128xbf16>, vector<128x8xbf16>, vector<8x8xf32> -> vector<8x8xf32>
    %cst_18 = arith.constant 1.250000e-01 : f32
    %39 = vector.broadcast %cst_18 : f32 to vector<8x8xf32>
    %40 = arith.mulf %38, %39 : vector<8x8xf32>
    %41 = vector.broadcast %31 : vector<1x8xf32> to vector<8x8xf32>
    %42 = arith.addf %40, %41 : vector<8x8xf32>
    %cst_19 = arith.constant dense<0xFF800000> : vector<8xf32>
    %43 = vector.multi_reduction <maximumf>, %42, %cst_19 [1] : vector<8x8xf32> to vector<8xf32>
    %44 = vector.shape_cast %43 : vector<8xf32> to vector<8x1xf32>
    %45 = vector.broadcast %44 : vector<8x1xf32> to vector<8x8xf32>
    %46 = arith.subf %42, %45 : vector<8x8xf32>
    %47 = math.exp %46 : vector<8x8xf32>
    %cst_20 = arith.constant dense<0.000000e+00> : vector<8xf32>
    %48 = vector.multi_reduction <add>, %47, %cst_20 [1] : vector<8x8xf32> to vector<8xf32>
    %49 = vector.shape_cast %48 : vector<8xf32> to vector<8x1xf32>
    %50 = tpu.reciprocal %49 {approx = true} : vector<8x1xf32> -> vector<8x1xf32>
    %51 = vector.broadcast %50 : vector<8x1xf32> to vector<8x8xf32>
    %52 = arith.mulf %47, %51 : vector<8x8xf32>
    %53 = arith.truncf %52 : vector<8x8xf32> to vector<8x8xbf16>
    %54 = arith.truncf %34 : vector<8x128xf32> to vector<8x128xbf16>
    %cst_21 = arith.constant dense<0.000000e+00> : vector<8x128xf32>
    %55 = tpu.matmul %53, %54, %cst_21 {dimension_numbers = #tpu.dot_dimension_numbers<[1], [0], [0], [1], [0, 0, 1, 1], [], []>} : vector<8x8xbf16>, vector<8x128xbf16>, vector<8x128xf32> -> vector<8x128xf32>
    %56 = vector.extract_strided_slice %29 {offsets = [0, 128], sizes = [8, 128], strides = [1, 1]} : vector<16x768xf32> to vector<8x128xf32>
    %57 = vector.extract_strided_slice %29 {offsets = [0, 384], sizes = [8, 128], strides = [1, 1]} : vector<16x768xf32> to vector<8x128xf32>
    %58 = vector.extract_strided_slice %29 {offsets = [0, 640], sizes = [8, 128], strides = [1, 1]} : vector<16x768xf32> to vector<8x128xf32>
    %59 = arith.truncf %56 : vector<8x128xf32> to vector<8x128xbf16>
    %60 = arith.truncf %57 : vector<8x128xf32> to vector<8x128xbf16>
    %61 = tpu.transpose %60, [1, 0] : vector<8x128xbf16> -> vector<128x8xbf16>
    %cst_22 = arith.constant dense<0.000000e+00> : vector<8x8xf32>
    %62 = tpu.matmul %59, %61, %cst_22 {dimension_numbers = #tpu.dot_dimension_numbers<[1], [0], [0], [1], [0, 0, 1, 1], [], []>} : vector<8x128xbf16>, vector<128x8xbf16>, vector<8x8xf32> -> vector<8x8xf32>
    %cst_23 = arith.constant 1.250000e-01 : f32
    %63 = vector.broadcast %cst_23 : f32 to vector<8x8xf32>
    %64 = arith.mulf %62, %63 : vector<8x8xf32>
    %65 = vector.broadcast %31 : vector<1x8xf32> to vector<8x8xf32>
    %66 = arith.addf %64, %65 : vector<8x8xf32>
    %cst_24 = arith.constant dense<0xFF800000> : vector<8xf32>
    %67 = vector.multi_reduction <maximumf>, %66, %cst_24 [1] : vector<8x8xf32> to vector<8xf32>
    %68 = vector.shape_cast %67 : vector<8xf32> to vector<8x1xf32>
    %69 = vector.broadcast %68 : vector<8x1xf32> to vector<8x8xf32>
    %70 = arith.subf %66, %69 : vector<8x8xf32>
    %71 = math.exp %70 : vector<8x8xf32>
    %cst_25 = arith.constant dense<0.000000e+00> : vector<8xf32>
    %72 = vector.multi_reduction <add>, %71, %cst_25 [1] : vector<8x8xf32> to vector<8xf32>
    %73 = vector.shape_cast %72 : vector<8xf32> to vector<8x1xf32>
    %74 = tpu.reciprocal %73 {approx = true} : vector<8x1xf32> -> vector<8x1xf32>
    %75 = vector.broadcast %74 : vector<8x1xf32> to vector<8x8xf32>
    %76 = arith.mulf %71, %75 : vector<8x8xf32>
    %77 = arith.truncf %76 : vector<8x8xf32> to vector<8x8xbf16>
    %78 = arith.truncf %58 : vector<8x128xf32> to vector<8x128xbf16>
    %cst_26 = arith.constant dense<0.000000e+00> : vector<8x128xf32>
    %79 = tpu.matmul %77, %78, %cst_26 {dimension_numbers = #tpu.dot_dimension_numbers<[1], [0], [0], [1], [0, 0, 1, 1], [], []>} : vector<8x8xbf16>, vector<8x128xbf16>, vector<8x128xf32> -> vector<8x128xf32>
    %80 = tpu.concatenate %55, %79 in 1 : vector<8x128xf32>, vector<8x128xf32> -> vector<8x256xf32>
    %81 = vector.extract_strided_slice %0 {offsets = [1, 0, 0], sizes = [1, 1, 8], strides = [1, 1, 1]} : vector<2x1x8xf32> to vector<1x1x8xf32>
    %82 = vector.shape_cast %81 : vector<1x1x8xf32> to vector<1x8xf32>
    %83 = vector.extract_strided_slice %29 {offsets = [8, 0], sizes = [8, 128], strides = [1, 1]} : vector<16x768xf32> to vector<8x128xf32>
    %84 = vector.extract_strided_slice %29 {offsets = [8, 256], sizes = [8, 128], strides = [1, 1]} : vector<16x768xf32> to vector<8x128xf32>
    %85 = vector.extract_strided_slice %29 {offsets = [8, 512], sizes = [8, 128], strides = [1, 1]} : vector<16x768xf32> to vector<8x128xf32>
    %86 = arith.truncf %83 : vector<8x128xf32> to vector<8x128xbf16>
    %87 = arith.truncf %84 : vector<8x128xf32> to vector<8x128xbf16>
    %88 = tpu.transpose %87, [1, 0] : vector<8x128xbf16> -> vector<128x8xbf16>
    %cst_27 = arith.constant dense<0.000000e+00> : vector<8x8xf32>
    %89 = tpu.matmul %86, %88, %cst_27 {dimension_numbers = #tpu.dot_dimension_numbers<[1], [0], [0], [1], [0, 0, 1, 1], [], []>} : vector<8x128xbf16>, vector<128x8xbf16>, vector<8x8xf32> -> vector<8x8xf32>
    %cst_28 = arith.constant 1.250000e-01 : f32
    %90 = vector.broadcast %cst_28 : f32 to vector<8x8xf32>
    %91 = arith.mulf %89, %90 : vector<8x8xf32>
    %92 = vector.broadcast %82 : vector<1x8xf32> to vector<8x8xf32>
    %93 = arith.addf %91, %92 : vector<8x8xf32>
    %cst_29 = arith.constant dense<0xFF800000> : vector<8xf32>
    %94 = vector.multi_reduction <maximumf>, %93, %cst_29 [1] : vector<8x8xf32> to vector<8xf32>
    %95 = vector.shape_cast %94 : vector<8xf32> to vector<8x1xf32>
    %96 = vector.broadcast %95 : vector<8x1xf32> to vector<8x8xf32>
    %97 = arith.subf %93, %96 : vector<8x8xf32>
    %98 = math.exp %97 : vector<8x8xf32>
    %cst_30 = arith.constant dense<0.000000e+00> : vector<8xf32>
    %99 = vector.multi_reduction <add>, %98, %cst_30 [1] : vector<8x8xf32> to vector<8xf32>
    %100 = vector.shape_cast %99 : vector<8xf32> to vector<8x1xf32>
    %101 = tpu.reciprocal %100 {approx = true} : vector<8x1xf32> -> vector<8x1xf32>
    %102 = vector.broadcast %101 : vector<8x1xf32> to vector<8x8xf32>
    %103 = arith.mulf %98, %102 : vector<8x8xf32>
    %104 = arith.truncf %103 : vector<8x8xf32> to vector<8x8xbf16>
    %105 = arith.truncf %85 : vector<8x128xf32> to vector<8x128xbf16>
    %cst_31 = arith.constant dense<0.000000e+00> : vector<8x128xf32>
    %106 = tpu.matmul %104, %105, %cst_31 {dimension_numbers = #tpu.dot_dimension_numbers<[1], [0], [0], [1], [0, 0, 1, 1], [], []>} : vector<8x8xbf16>, vector<8x128xbf16>, vector<8x128xf32> -> vector<8x128xf32>
    %107 = vector.extract_strided_slice %29 {offsets = [8, 128], sizes = [8, 128], strides = [1, 1]} : vector<16x768xf32> to vector<8x128xf32>
    %108 = vector.extract_strided_slice %29 {offsets = [8, 384], sizes = [8, 128], strides = [1, 1]} : vector<16x768xf32> to vector<8x128xf32>
    %109 = vector.extract_strided_slice %29 {offsets = [8, 640], sizes = [8, 128], strides = [1, 1]} : vector<16x768xf32> to vector<8x128xf32>
    %110 = arith.truncf %107 : vector<8x128xf32> to vector<8x128xbf16>
    %111 = arith.truncf %108 : vector<8x128xf32> to vector<8x128xbf16>
    %112 = tpu.transpose %111, [1, 0] : vector<8x128xbf16> -> vector<128x8xbf16>
    %cst_32 = arith.constant dense<0.000000e+00> : vector<8x8xf32>
    %113 = tpu.matmul %110, %112, %cst_32 {dimension_numbers = #tpu.dot_dimension_numbers<[1], [0], [0], [1], [0, 0, 1, 1], [], []>} : vector<8x128xbf16>, vector<128x8xbf16>, vector<8x8xf32> -> vector<8x8xf32>
    %cst_33 = arith.constant 1.250000e-01 : f32
    %114 = vector.broadcast %cst_33 : f32 to vector<8x8xf32>
    %115 = arith.mulf %113, %114 : vector<8x8xf32>
    %116 = vector.broadcast %82 : vector<1x8xf32> to vector<8x8xf32>
    %117 = arith.addf %115, %116 : vector<8x8xf32>
    %cst_34 = arith.constant dense<0xFF800000> : vector<8xf32>
    %118 = vector.multi_reduction <maximumf>, %117, %cst_34 [1] : vector<8x8xf32> to vector<8xf32>
    %119 = vector.shape_cast %118 : vector<8xf32> to vector<8x1xf32>
    %120 = vector.broadcast %119 : vector<8x1xf32> to vector<8x8xf32>
    %121 = arith.subf %117, %120 : vector<8x8xf32>
    %122 = math.exp %121 : vector<8x8xf32>
    %cst_35 = arith.constant dense<0.000000e+00> : vector<8xf32>
    %123 = vector.multi_reduction <add>, %122, %cst_35 [1] : vector<8x8xf32> to vector<8xf32>
    %124 = vector.shape_cast %123 : vector<8xf32> to vector<8x1xf32>
    %125 = tpu.reciprocal %124 {approx = true} : vector<8x1xf32> -> vector<8x1xf32>
    %126 = vector.broadcast %125 : vector<8x1xf32> to vector<8x8xf32>
    %127 = arith.mulf %122, %126 : vector<8x8xf32>
    %128 = arith.truncf %127 : vector<8x8xf32> to vector<8x8xbf16>
    %129 = arith.truncf %109 : vector<8x128xf32> to vector<8x128xbf16>
    %cst_36 = arith.constant dense<0.000000e+00> : vector<8x128xf32>
    %130 = tpu.matmul %128, %129, %cst_36 {dimension_numbers = #tpu.dot_dimension_numbers<[1], [0], [0], [1], [0, 0, 1, 1], [], []>} : vector<8x8xbf16>, vector<8x128xbf16>, vector<8x128xf32> -> vector<8x128xf32>
    %131 = tpu.concatenate %106, %130 in 1 : vector<8x128xf32>, vector<8x128xf32> -> vector<8x256xf32>
    %132 = tpu.concatenate %80, %131 in 0 : vector<8x256xf32>, vector<8x256xf32> -> vector<16x256xf32>
    %133 = arith.truncf %132 : vector<16x256xf32> to vector<16x256xbf16>
    %c0_37 = arith.constant 0 : index
    %c0_38 = arith.constant 0 : index
    %134 = vector.load %arg6[%c0_37, %c0_38] : memref<256x128xbf16, #tpu.memory_space<vmem>>, vector<256x128xbf16>
    %cst_39 = arith.constant dense<0.000000e+00> : vector<16x128xf32>
    %135 = tpu.matmul %133, %134, %cst_39 {dimension_numbers = #tpu.dot_dimension_numbers<[1], [0], [0], [1], [0, 0, 1, 1], [], []>} : vector<16x256xbf16>, vector<256x128xbf16>, vector<16x128xf32> -> vector<16x128xf32>
    %c0_40 = arith.constant 0 : index
    %c0_41 = arith.constant 0 : index
    %136 = vector.load %arg7[%c0_40, %c0_41] : memref<1x128xf32, #tpu.memory_space<vmem>>, vector<1x128xf32>
    %137 = vector.broadcast %136 : vector<1x128xf32> to vector<16x128xf32>
    %138 = arith.addf %135, %137 : vector<16x128xf32>
    %139 = arith.addf %138, %23 : vector<16x128xf32>
    %c0_42 = arith.constant 0 : index
    %c0_43 = arith.constant 0 : index
    %140 = vector.load %arg8[%c0_42, %c0_43] : memref<1x128xf32, #tpu.memory_space<vmem>>, vector<1x128xf32>
    %c0_44 = arith.constant 0 : index
    %c0_45 = arith.constant 0 : index
    %141 = vector.load %arg9[%c0_44, %c0_45] : memref<1x128xf32, #tpu.memory_space<vmem>>, vector<1x128xf32>
    %cst_46 = arith.constant dense<0.000000e+00> : vector<16xf32>
    %142 = vector.multi_reduction <add>, %139, %cst_46 [1] : vector<16x128xf32> to vector<16xf32>
    %143 = vector.shape_cast %142 : vector<16xf32> to vector<16x1xf32>
    %cst_47 = arith.constant 1.280000e+02 : f32
    %144 = vector.broadcast %cst_47 : f32 to vector<16x1xf32>
    %145 = arith.divf %143, %144 : vector<16x1xf32>
    %146 = vector.broadcast %145 : vector<16x1xf32> to vector<16x128xf32>
    %147 = arith.subf %139, %146 : vector<16x128xf32>
    %148 = arith.mulf %147, %147 : vector<16x128xf32>
    %cst_48 = arith.constant dense<0.000000e+00> : vector<16xf32>
    %149 = vector.multi_reduction <add>, %148, %cst_48 [1] : vector<16x128xf32> to vector<16xf32>
    %150 = vector.shape_cast %149 : vector<16xf32> to vector<16x1xf32>
    %cst_49 = arith.constant 1.280000e+02 : f32
    %151 = vector.broadcast %cst_49 : f32 to vector<16x1xf32>
    %152 = arith.divf %150, %151 : vector<16x1xf32>
    %cst_50 = arith.constant 9.99999996E-13 : f32
    %153 = vector.broadcast %cst_50 : f32 to vector<16x1xf32>
    %154 = arith.addf %152, %153 : vector<16x1xf32>
    %155 = math.rsqrt %154 : vector<16x1xf32>
    %156 = vector.broadcast %155 : vector<16x1xf32> to vector<16x128xf32>
    %157 = arith.mulf %147, %156 : vector<16x128xf32>
    %158 = vector.broadcast %140 : vector<1x128xf32> to vector<16x128xf32>
    %159 = arith.mulf %157, %158 : vector<16x128xf32>
    %160 = vector.broadcast %141 : vector<1x128xf32> to vector<16x128xf32>
    %161 = arith.addf %159, %160 : vector<16x128xf32>
    %162 = arith.truncf %161 : vector<16x128xf32> to vector<16x128xbf16>
    %c0_51 = arith.constant 0 : index
    %c0_52 = arith.constant 0 : index
    %163 = vector.load %arg10[%c0_51, %c0_52] : memref<128x256xbf16, #tpu.memory_space<vmem>>, vector<128x256xbf16>
    %cst_53 = arith.constant dense<0.000000e+00> : vector<16x256xf32>
    %164 = tpu.matmul %162, %163, %cst_53 {dimension_numbers = #tpu.dot_dimension_numbers<[1], [0], [0], [1], [0, 0, 1, 1], [], []>} : vector<16x128xbf16>, vector<128x256xbf16>, vector<16x256xf32> -> vector<16x256xf32>
    %c0_54 = arith.constant 0 : index
    %c0_55 = arith.constant 0 : index
    %165 = vector.load %arg11[%c0_54, %c0_55] : memref<1x256xf32, #tpu.memory_space<vmem>>, vector<1x256xf32>
    %166 = vector.broadcast %165 : vector<1x256xf32> to vector<16x256xf32>
    %167 = arith.addf %164, %166 : vector<16x256xf32>
    %cst_56 = arith.constant 5.000000e-01 : f32
    %168 = vector.broadcast %cst_56 : f32 to vector<16x256xf32>
    %169 = arith.mulf %168, %167 : vector<16x256xf32>
    %cst_57 = arith.constant 0.707106769 : f32
    %170 = vector.broadcast %cst_57 : f32 to vector<16x256xf32>
    %171 = arith.mulf %167, %170 : vector<16x256xf32>
    %172 = math.erf %171 : vector<16x256xf32>
    %cst_58 = arith.constant 1.000000e+00 : f32
    %173 = vector.broadcast %cst_58 : f32 to vector<16x256xf32>
    %174 = arith.addf %173, %172 : vector<16x256xf32>
    %175 = arith.mulf %169, %174 : vector<16x256xf32>
    %176 = arith.truncf %175 : vector<16x256xf32> to vector<16x256xbf16>
    %c0_59 = arith.constant 0 : index
    %c0_60 = arith.constant 0 : index
    %177 = vector.load %arg12[%c0_59, %c0_60] : memref<256x128xbf16, #tpu.memory_space<vmem>>, vector<256x128xbf16>
    %cst_61 = arith.constant dense<0.000000e+00> : vector<16x128xf32>
    %178 = tpu.matmul %176, %177, %cst_61 {dimension_numbers = #tpu.dot_dimension_numbers<[1], [0], [0], [1], [0, 0, 1, 1], [], []>} : vector<16x256xbf16>, vector<256x128xbf16>, vector<16x128xf32> -> vector<16x128xf32>
    %c0_62 = arith.constant 0 : index
    %c0_63 = arith.constant 0 : index
    %179 = vector.load %arg13[%c0_62, %c0_63] : memref<1x128xf32, #tpu.memory_space<vmem>>, vector<1x128xf32>
    %180 = vector.broadcast %179 : vector<1x128xf32> to vector<16x128xf32>
    %181 = arith.addf %178, %180 : vector<16x128xf32>
    %182 = arith.addf %181, %161 : vector<16x128xf32>
    %c0_64 = arith.constant 0 : index
    %c0_65 = arith.constant 0 : index
    %183 = vector.load %arg14[%c0_64, %c0_65] : memref<1x128xf32, #tpu.memory_space<vmem>>, vector<1x128xf32>
    %c0_66 = arith.constant 0 : index
    %c0_67 = arith.constant 0 : index
    %184 = vector.load %arg15[%c0_66, %c0_67] : memref<1x128xf32, #tpu.memory_space<vmem>>, vector<1x128xf32>
    %cst_68 = arith.constant dense<0.000000e+00> : vector<16xf32>
    %185 = vector.multi_reduction <add>, %182, %cst_68 [1] : vector<16x128xf32> to vector<16xf32>
    %186 = vector.shape_cast %185 : vector<16xf32> to vector<16x1xf32>
    %cst_69 = arith.constant 1.280000e+02 : f32
    %187 = vector.broadcast %cst_69 : f32 to vector<16x1xf32>
    %188 = arith.divf %186, %187 : vector<16x1xf32>
    %189 = vector.broadcast %188 : vector<16x1xf32> to vector<16x128xf32>
    %190 = arith.subf %182, %189 : vector<16x128xf32>
    %191 = arith.mulf %190, %190 : vector<16x128xf32>
    %cst_70 = arith.constant dense<0.000000e+00> : vector<16xf32>
    %192 = vector.multi_reduction <add>, %191, %cst_70 [1] : vector<16x128xf32> to vector<16xf32>
    %193 = vector.shape_cast %192 : vector<16xf32> to vector<16x1xf32>
    %cst_71 = arith.constant 1.280000e+02 : f32
    %194 = vector.broadcast %cst_71 : f32 to vector<16x1xf32>
    %195 = arith.divf %193, %194 : vector<16x1xf32>
    %cst_72 = arith.constant 9.99999996E-13 : f32
    %196 = vector.broadcast %cst_72 : f32 to vector<16x1xf32>
    %197 = arith.addf %195, %196 : vector<16x1xf32>
    %198 = math.rsqrt %197 : vector<16x1xf32>
    %199 = vector.broadcast %198 : vector<16x1xf32> to vector<16x128xf32>
    %200 = arith.mulf %190, %199 : vector<16x128xf32>
    %201 = vector.broadcast %183 : vector<1x128xf32> to vector<16x128xf32>
    %202 = arith.mulf %200, %201 : vector<16x128xf32>
    %203 = vector.broadcast %184 : vector<1x128xf32> to vector<16x128xf32>
    %204 = arith.addf %202, %203 : vector<16x128xf32>
    %205 = arith.truncf %204 : vector<16x128xf32> to vector<16x128xbf16>
    %c0_73 = arith.constant 0 : index
    %c0_74 = arith.constant 0 : index
    %206 = vector.load %arg16[%c0_73, %c0_74] : memref<128x768xbf16, #tpu.memory_space<vmem>>, vector<128x768xbf16>
    %cst_75 = arith.constant dense<0.000000e+00> : vector<16x768xf32>
    %207 = tpu.matmul %205, %206, %cst_75 {dimension_numbers = #tpu.dot_dimension_numbers<[1], [0], [0], [1], [0, 0, 1, 1], [], []>} : vector<16x128xbf16>, vector<128x768xbf16>, vector<16x768xf32> -> vector<16x768xf32>
    %c0_76 = arith.constant 0 : index
    %c0_77 = arith.constant 0 : index
    %208 = vector.load %arg17[%c0_76, %c0_77] : memref<1x768xf32, #tpu.memory_space<vmem>>, vector<1x768xf32>
    %209 = vector.broadcast %208 : vector<1x768xf32> to vector<16x768xf32>
    %210 = arith.addf %207, %209 : vector<16x768xf32>
    %211 = vector.extract_strided_slice %0 {offsets = [0, 0, 0], sizes = [1, 1, 8], strides = [1, 1, 1]} : vector<2x1x8xf32> to vector<1x1x8xf32>
    %212 = vector.shape_cast %211 : vector<1x1x8xf32> to vector<1x8xf32>
    %213 = vector.extract_strided_slice %210 {offsets = [0, 0], sizes = [8, 128], strides = [1, 1]} : vector<16x768xf32> to vector<8x128xf32>
    %214 = vector.extract_strided_slice %210 {offsets = [0, 256], sizes = [8, 128], strides = [1, 1]} : vector<16x768xf32> to vector<8x128xf32>
    %215 = vector.extract_strided_slice %210 {offsets = [0, 512], sizes = [8, 128], strides = [1, 1]} : vector<16x768xf32> to vector<8x128xf32>
    %216 = arith.truncf %213 : vector<8x128xf32> to vector<8x128xbf16>
    %217 = arith.truncf %214 : vector<8x128xf32> to vector<8x128xbf16>
    %218 = tpu.transpose %217, [1, 0] : vector<8x128xbf16> -> vector<128x8xbf16>
    %cst_78 = arith.constant dense<0.000000e+00> : vector<8x8xf32>
    %219 = tpu.matmul %216, %218, %cst_78 {dimension_numbers = #tpu.dot_dimension_numbers<[1], [0], [0], [1], [0, 0, 1, 1], [], []>} : vector<8x128xbf16>, vector<128x8xbf16>, vector<8x8xf32> -> vector<8x8xf32>
    %cst_79 = arith.constant 1.250000e-01 : f32
    %220 = vector.broadcast %cst_79 : f32 to vector<8x8xf32>
    %221 = arith.mulf %219, %220 : vector<8x8xf32>
    %222 = vector.broadcast %212 : vector<1x8xf32> to vector<8x8xf32>
    %223 = arith.addf %221, %222 : vector<8x8xf32>
    %cst_80 = arith.constant dense<0xFF800000> : vector<8xf32>
    %224 = vector.multi_reduction <maximumf>, %223, %cst_80 [1] : vector<8x8xf32> to vector<8xf32>
    %225 = vector.shape_cast %224 : vector<8xf32> to vector<8x1xf32>
    %226 = vector.broadcast %225 : vector<8x1xf32> to vector<8x8xf32>
    %227 = arith.subf %223, %226 : vector<8x8xf32>
    %228 = math.exp %227 : vector<8x8xf32>
    %cst_81 = arith.constant dense<0.000000e+00> : vector<8xf32>
    %229 = vector.multi_reduction <add>, %228, %cst_81 [1] : vector<8x8xf32> to vector<8xf32>
    %230 = vector.shape_cast %229 : vector<8xf32> to vector<8x1xf32>
    %231 = tpu.reciprocal %230 {approx = true} : vector<8x1xf32> -> vector<8x1xf32>
    %232 = vector.broadcast %231 : vector<8x1xf32> to vector<8x8xf32>
    %233 = arith.mulf %228, %232 : vector<8x8xf32>
    %234 = arith.truncf %233 : vector<8x8xf32> to vector<8x8xbf16>
    %235 = arith.truncf %215 : vector<8x128xf32> to vector<8x128xbf16>
    %cst_82 = arith.constant dense<0.000000e+00> : vector<8x128xf32>
    %236 = tpu.matmul %234, %235, %cst_82 {dimension_numbers = #tpu.dot_dimension_numbers<[1], [0], [0], [1], [0, 0, 1, 1], [], []>} : vector<8x8xbf16>, vector<8x128xbf16>, vector<8x128xf32> -> vector<8x128xf32>
    %237 = vector.extract_strided_slice %210 {offsets = [0, 128], sizes = [8, 128], strides = [1, 1]} : vector<16x768xf32> to vector<8x128xf32>
    %238 = vector.extract_strided_slice %210 {offsets = [0, 384], sizes = [8, 128], strides = [1, 1]} : vector<16x768xf32> to vector<8x128xf32>
    %239 = vector.extract_strided_slice %210 {offsets = [0, 640], sizes = [8, 128], strides = [1, 1]} : vector<16x768xf32> to vector<8x128xf32>
    %240 = arith.truncf %237 : vector<8x128xf32> to vector<8x128xbf16>
    %241 = arith.truncf %238 : vector<8x128xf32> to vector<8x128xbf16>
    %242 = tpu.transpose %241, [1, 0] : vector<8x128xbf16> -> vector<128x8xbf16>
    %cst_83 = arith.constant dense<0.000000e+00> : vector<8x8xf32>
    %243 = tpu.matmul %240, %242, %cst_83 {dimension_numbers = #tpu.dot_dimension_numbers<[1], [0], [0], [1], [0, 0, 1, 1], [], []>} : vector<8x128xbf16>, vector<128x8xbf16>, vector<8x8xf32> -> vector<8x8xf32>
    %cst_84 = arith.constant 1.250000e-01 : f32
    %244 = vector.broadcast %cst_84 : f32 to vector<8x8xf32>
    %245 = arith.mulf %243, %244 : vector<8x8xf32>
    %246 = vector.broadcast %212 : vector<1x8xf32> to vector<8x8xf32>
    %247 = arith.addf %245, %246 : vector<8x8xf32>
    %cst_85 = arith.constant dense<0xFF800000> : vector<8xf32>
    %248 = vector.multi_reduction <maximumf>, %247, %cst_85 [1] : vector<8x8xf32> to vector<8xf32>
    %249 = vector.shape_cast %248 : vector<8xf32> to vector<8x1xf32>
    %250 = vector.broadcast %249 : vector<8x1xf32> to vector<8x8xf32>
    %251 = arith.subf %247, %250 : vector<8x8xf32>
    %252 = math.exp %251 : vector<8x8xf32>
    %cst_86 = arith.constant dense<0.000000e+00> : vector<8xf32>
    %253 = vector.multi_reduction <add>, %252, %cst_86 [1] : vector<8x8xf32> to vector<8xf32>
    %254 = vector.shape_cast %253 : vector<8xf32> to vector<8x1xf32>
    %255 = tpu.reciprocal %254 {approx = true} : vector<8x1xf32> -> vector<8x1xf32>
    %256 = vector.broadcast %255 : vector<8x1xf32> to vector<8x8xf32>
    %257 = arith.mulf %252, %256 : vector<8x8xf32>
    %258 = arith.truncf %257 : vector<8x8xf32> to vector<8x8xbf16>
    %259 = arith.truncf %239 : vector<8x128xf32> to vector<8x128xbf16>
    %cst_87 = arith.constant dense<0.000000e+00> : vector<8x128xf32>
    %260 = tpu.matmul %258, %259, %cst_87 {dimension_numbers = #tpu.dot_dimension_numbers<[1], [0], [0], [1], [0, 0, 1, 1], [], []>} : vector<8x8xbf16>, vector<8x128xbf16>, vector<8x128xf32> -> vector<8x128xf32>
    %261 = tpu.concatenate %236, %260 in 1 : vector<8x128xf32>, vector<8x128xf32> -> vector<8x256xf32>
    %262 = vector.extract_strided_slice %0 {offsets = [1, 0, 0], sizes = [1, 1, 8], strides = [1, 1, 1]} : vector<2x1x8xf32> to vector<1x1x8xf32>
    %263 = vector.shape_cast %262 : vector<1x1x8xf32> to vector<1x8xf32>
    %264 = vector.extract_strided_slice %210 {offsets = [8, 0], sizes = [8, 128], strides = [1, 1]} : vector<16x768xf32> to vector<8x128xf32>
    %265 = vector.extract_strided_slice %210 {offsets = [8, 256], sizes = [8, 128], strides = [1, 1]} : vector<16x768xf32> to vector<8x128xf32>
    %266 = vector.extract_strided_slice %210 {offsets = [8, 512], sizes = [8, 128], strides = [1, 1]} : vector<16x768xf32> to vector<8x128xf32>
    %267 = arith.truncf %264 : vector<8x128xf32> to vector<8x128xbf16>
    %268 = arith.truncf %265 : vector<8x128xf32> to vector<8x128xbf16>
    %269 = tpu.transpose %268, [1, 0] : vector<8x128xbf16> -> vector<128x8xbf16>
    %cst_88 = arith.constant dense<0.000000e+00> : vector<8x8xf32>
    %270 = tpu.matmul %267, %269, %cst_88 {dimension_numbers = #tpu.dot_dimension_numbers<[1], [0], [0], [1], [0, 0, 1, 1], [], []>} : vector<8x128xbf16>, vector<128x8xbf16>, vector<8x8xf32> -> vector<8x8xf32>
    %cst_89 = arith.constant 1.250000e-01 : f32
    %271 = vector.broadcast %cst_89 : f32 to vector<8x8xf32>
    %272 = arith.mulf %270, %271 : vector<8x8xf32>
    %273 = vector.broadcast %263 : vector<1x8xf32> to vector<8x8xf32>
    %274 = arith.addf %272, %273 : vector<8x8xf32>
    %cst_90 = arith.constant dense<0xFF800000> : vector<8xf32>
    %275 = vector.multi_reduction <maximumf>, %274, %cst_90 [1] : vector<8x8xf32> to vector<8xf32>
    %276 = vector.shape_cast %275 : vector<8xf32> to vector<8x1xf32>
    %277 = vector.broadcast %276 : vector<8x1xf32> to vector<8x8xf32>
    %278 = arith.subf %274, %277 : vector<8x8xf32>
    %279 = math.exp %278 : vector<8x8xf32>
    %cst_91 = arith.constant dense<0.000000e+00> : vector<8xf32>
    %280 = vector.multi_reduction <add>, %279, %cst_91 [1] : vector<8x8xf32> to vector<8xf32>
    %281 = vector.shape_cast %280 : vector<8xf32> to vector<8x1xf32>
    %282 = tpu.reciprocal %281 {approx = true} : vector<8x1xf32> -> vector<8x1xf32>
    %283 = vector.broadcast %282 : vector<8x1xf32> to vector<8x8xf32>
    %284 = arith.mulf %279, %283 : vector<8x8xf32>
    %285 = arith.truncf %284 : vector<8x8xf32> to vector<8x8xbf16>
    %286 = arith.truncf %266 : vector<8x128xf32> to vector<8x128xbf16>
    %cst_92 = arith.constant dense<0.000000e+00> : vector<8x128xf32>
    %287 = tpu.matmul %285, %286, %cst_92 {dimension_numbers = #tpu.dot_dimension_numbers<[1], [0], [0], [1], [0, 0, 1, 1], [], []>} : vector<8x8xbf16>, vector<8x128xbf16>, vector<8x128xf32> -> vector<8x128xf32>
    %288 = vector.extract_strided_slice %210 {offsets = [8, 128], sizes = [8, 128], strides = [1, 1]} : vector<16x768xf32> to vector<8x128xf32>
    %289 = vector.extract_strided_slice %210 {offsets = [8, 384], sizes = [8, 128], strides = [1, 1]} : vector<16x768xf32> to vector<8x128xf32>
    %290 = vector.extract_strided_slice %210 {offsets = [8, 640], sizes = [8, 128], strides = [1, 1]} : vector<16x768xf32> to vector<8x128xf32>
    %291 = arith.truncf %288 : vector<8x128xf32> to vector<8x128xbf16>
    %292 = arith.truncf %289 : vector<8x128xf32> to vector<8x128xbf16>
    %293 = tpu.transpose %292, [1, 0] : vector<8x128xbf16> -> vector<128x8xbf16>
    %cst_93 = arith.constant dense<0.000000e+00> : vector<8x8xf32>
    %294 = tpu.matmul %291, %293, %cst_93 {dimension_numbers = #tpu.dot_dimension_numbers<[1], [0], [0], [1], [0, 0, 1, 1], [], []>} : vector<8x128xbf16>, vector<128x8xbf16>, vector<8x8xf32> -> vector<8x8xf32>
    %cst_94 = arith.constant 1.250000e-01 : f32
    %295 = vector.broadcast %cst_94 : f32 to vector<8x8xf32>
    %296 = arith.mulf %294, %295 : vector<8x8xf32>
    %297 = vector.broadcast %263 : vector<1x8xf32> to vector<8x8xf32>
    %298 = arith.addf %296, %297 : vector<8x8xf32>
    %cst_95 = arith.constant dense<0xFF800000> : vector<8xf32>
    %299 = vector.multi_reduction <maximumf>, %298, %cst_95 [1] : vector<8x8xf32> to vector<8xf32>
    %300 = vector.shape_cast %299 : vector<8xf32> to vector<8x1xf32>
    %301 = vector.broadcast %300 : vector<8x1xf32> to vector<8x8xf32>
    %302 = arith.subf %298, %301 : vector<8x8xf32>
    %303 = math.exp %302 : vector<8x8xf32>
    %cst_96 = arith.constant dense<0.000000e+00> : vector<8xf32>
    %304 = vector.multi_reduction <add>, %303, %cst_96 [1] : vector<8x8xf32> to vector<8xf32>
    %305 = vector.shape_cast %304 : vector<8xf32> to vector<8x1xf32>
    %306 = tpu.reciprocal %305 {approx = true} : vector<8x1xf32> -> vector<8x1xf32>
    %307 = vector.broadcast %306 : vector<8x1xf32> to vector<8x8xf32>
    %308 = arith.mulf %303, %307 : vector<8x8xf32>
    %309 = arith.truncf %308 : vector<8x8xf32> to vector<8x8xbf16>
    %310 = arith.truncf %290 : vector<8x128xf32> to vector<8x128xbf16>
    %cst_97 = arith.constant dense<0.000000e+00> : vector<8x128xf32>
    %311 = tpu.matmul %309, %310, %cst_97 {dimension_numbers = #tpu.dot_dimension_numbers<[1], [0], [0], [1], [0, 0, 1, 1], [], []>} : vector<8x8xbf16>, vector<8x128xbf16>, vector<8x128xf32> -> vector<8x128xf32>
    %312 = tpu.concatenate %287, %311 in 1 : vector<8x128xf32>, vector<8x128xf32> -> vector<8x256xf32>
    %313 = tpu.concatenate %261, %312 in 0 : vector<8x256xf32>, vector<8x256xf32> -> vector<16x256xf32>
    %314 = arith.truncf %313 : vector<16x256xf32> to vector<16x256xbf16>
    %c0_98 = arith.constant 0 : index
    %c0_99 = arith.constant 0 : index
    %315 = vector.load %arg18[%c0_98, %c0_99] : memref<256x128xbf16, #tpu.memory_space<vmem>>, vector<256x128xbf16>
    %cst_100 = arith.constant dense<0.000000e+00> : vector<16x128xf32>
    %316 = tpu.matmul %314, %315, %cst_100 {dimension_numbers = #tpu.dot_dimension_numbers<[1], [0], [0], [1], [0, 0, 1, 1], [], []>} : vector<16x256xbf16>, vector<256x128xbf16>, vector<16x128xf32> -> vector<16x128xf32>
    %c0_101 = arith.constant 0 : index
    %c0_102 = arith.constant 0 : index
    %317 = vector.load %arg19[%c0_101, %c0_102] : memref<1x128xf32, #tpu.memory_space<vmem>>, vector<1x128xf32>
    %318 = vector.broadcast %317 : vector<1x128xf32> to vector<16x128xf32>
    %319 = arith.addf %316, %318 : vector<16x128xf32>
    %320 = arith.addf %319, %204 : vector<16x128xf32>
    %c0_103 = arith.constant 0 : index
    %c0_104 = arith.constant 0 : index
    %321 = vector.load %arg20[%c0_103, %c0_104] : memref<1x128xf32, #tpu.memory_space<vmem>>, vector<1x128xf32>
    %c0_105 = arith.constant 0 : index
    %c0_106 = arith.constant 0 : index
    %322 = vector.load %arg21[%c0_105, %c0_106] : memref<1x128xf32, #tpu.memory_space<vmem>>, vector<1x128xf32>
    %cst_107 = arith.constant dense<0.000000e+00> : vector<16xf32>
    %323 = vector.multi_reduction <add>, %320, %cst_107 [1] : vector<16x128xf32> to vector<16xf32>
    %324 = vector.shape_cast %323 : vector<16xf32> to vector<16x1xf32>
    %cst_108 = arith.constant 1.280000e+02 : f32
    %325 = vector.broadcast %cst_108 : f32 to vector<16x1xf32>
    %326 = arith.divf %324, %325 : vector<16x1xf32>
    %327 = vector.broadcast %326 : vector<16x1xf32> to vector<16x128xf32>
    %328 = arith.subf %320, %327 : vector<16x128xf32>
    %329 = arith.mulf %328, %328 : vector<16x128xf32>
    %cst_109 = arith.constant dense<0.000000e+00> : vector<16xf32>
    %330 = vector.multi_reduction <add>, %329, %cst_109 [1] : vector<16x128xf32> to vector<16xf32>
    %331 = vector.shape_cast %330 : vector<16xf32> to vector<16x1xf32>
    %cst_110 = arith.constant 1.280000e+02 : f32
    %332 = vector.broadcast %cst_110 : f32 to vector<16x1xf32>
    %333 = arith.divf %331, %332 : vector<16x1xf32>
    %cst_111 = arith.constant 9.99999996E-13 : f32
    %334 = vector.broadcast %cst_111 : f32 to vector<16x1xf32>
    %335 = arith.addf %333, %334 : vector<16x1xf32>
    %336 = math.rsqrt %335 : vector<16x1xf32>
    %337 = vector.broadcast %336 : vector<16x1xf32> to vector<16x128xf32>
    %338 = arith.mulf %328, %337 : vector<16x128xf32>
    %339 = vector.broadcast %321 : vector<1x128xf32> to vector<16x128xf32>
    %340 = arith.mulf %338, %339 : vector<16x128xf32>
    %341 = vector.broadcast %322 : vector<1x128xf32> to vector<16x128xf32>
    %342 = arith.addf %340, %341 : vector<16x128xf32>
    %343 = arith.truncf %342 : vector<16x128xf32> to vector<16x128xbf16>
    %c0_112 = arith.constant 0 : index
    %c0_113 = arith.constant 0 : index
    %344 = vector.load %arg22[%c0_112, %c0_113] : memref<128x256xbf16, #tpu.memory_space<vmem>>, vector<128x256xbf16>
    %cst_114 = arith.constant dense<0.000000e+00> : vector<16x256xf32>
    %345 = tpu.matmul %343, %344, %cst_114 {dimension_numbers = #tpu.dot_dimension_numbers<[1], [0], [0], [1], [0, 0, 1, 1], [], []>} : vector<16x128xbf16>, vector<128x256xbf16>, vector<16x256xf32> -> vector<16x256xf32>
    %c0_115 = arith.constant 0 : index
    %c0_116 = arith.constant 0 : index
    %346 = vector.load %arg23[%c0_115, %c0_116] : memref<1x256xf32, #tpu.memory_space<vmem>>, vector<1x256xf32>
    %347 = vector.broadcast %346 : vector<1x256xf32> to vector<16x256xf32>
    %348 = arith.addf %345, %347 : vector<16x256xf32>
    %cst_117 = arith.constant 5.000000e-01 : f32
    %349 = vector.broadcast %cst_117 : f32 to vector<16x256xf32>
    %350 = arith.mulf %349, %348 : vector<16x256xf32>
    %cst_118 = arith.constant 0.707106769 : f32
    %351 = vector.broadcast %cst_118 : f32 to vector<16x256xf32>
    %352 = arith.mulf %348, %351 : vector<16x256xf32>
    %353 = math.erf %352 : vector<16x256xf32>
    %cst_119 = arith.constant 1.000000e+00 : f32
    %354 = vector.broadcast %cst_119 : f32 to vector<16x256xf32>
    %355 = arith.addf %354, %353 : vector<16x256xf32>
    %356 = arith.mulf %350, %355 : vector<16x256xf32>
    %357 = arith.truncf %356 : vector<16x256xf32> to vector<16x256xbf16>
    %c0_120 = arith.constant 0 : index
    %c0_121 = arith.constant 0 : index
    %358 = vector.load %arg24[%c0_120, %c0_121] : memref<256x128xbf16, #tpu.memory_space<vmem>>, vector<256x128xbf16>
    %cst_122 = arith.constant dense<0.000000e+00> : vector<16x128xf32>
    %359 = tpu.matmul %357, %358, %cst_122 {dimension_numbers = #tpu.dot_dimension_numbers<[1], [0], [0], [1], [0, 0, 1, 1], [], []>} : vector<16x256xbf16>, vector<256x128xbf16>, vector<16x128xf32> -> vector<16x128xf32>
    %c0_123 = arith.constant 0 : index
    %c0_124 = arith.constant 0 : index
    %360 = vector.load %arg25[%c0_123, %c0_124] : memref<1x128xf32, #tpu.memory_space<vmem>>, vector<1x128xf32>
    %361 = vector.broadcast %360 : vector<1x128xf32> to vector<16x128xf32>
    %362 = arith.addf %359, %361 : vector<16x128xf32>
    %363 = arith.addf %362, %342 : vector<16x128xf32>
    %c0_125 = arith.constant 0 : index
    %c0_126 = arith.constant 0 : index
    %364 = vector.load %arg26[%c0_125, %c0_126] : memref<1x128xf32, #tpu.memory_space<vmem>>, vector<1x128xf32>
    %c0_127 = arith.constant 0 : index
    %c0_128 = arith.constant 0 : index
    %365 = vector.load %arg27[%c0_127, %c0_128] : memref<1x128xf32, #tpu.memory_space<vmem>>, vector<1x128xf32>
    %cst_129 = arith.constant dense<0.000000e+00> : vector<16xf32>
    %366 = vector.multi_reduction <add>, %363, %cst_129 [1] : vector<16x128xf32> to vector<16xf32>
    %367 = vector.shape_cast %366 : vector<16xf32> to vector<16x1xf32>
    %cst_130 = arith.constant 1.280000e+02 : f32
    %368 = vector.broadcast %cst_130 : f32 to vector<16x1xf32>
    %369 = arith.divf %367, %368 : vector<16x1xf32>
    %370 = vector.broadcast %369 : vector<16x1xf32> to vector<16x128xf32>
    %371 = arith.subf %363, %370 : vector<16x128xf32>
    %372 = arith.mulf %371, %371 : vector<16x128xf32>
    %cst_131 = arith.constant dense<0.000000e+00> : vector<16xf32>
    %373 = vector.multi_reduction <add>, %372, %cst_131 [1] : vector<16x128xf32> to vector<16xf32>
    %374 = vector.shape_cast %373 : vector<16xf32> to vector<16x1xf32>
    %cst_132 = arith.constant 1.280000e+02 : f32
    %375 = vector.broadcast %cst_132 : f32 to vector<16x1xf32>
    %376 = arith.divf %374, %375 : vector<16x1xf32>
    %cst_133 = arith.constant 9.99999996E-13 : f32
    %377 = vector.broadcast %cst_133 : f32 to vector<16x1xf32>
    %378 = arith.addf %376, %377 : vector<16x1xf32>
    %379 = math.rsqrt %378 : vector<16x1xf32>
    %380 = vector.broadcast %379 : vector<16x1xf32> to vector<16x128xf32>
    %381 = arith.mulf %371, %380 : vector<16x128xf32>
    %382 = vector.broadcast %364 : vector<1x128xf32> to vector<16x128xf32>
    %383 = arith.mulf %381, %382 : vector<16x128xf32>
    %384 = vector.broadcast %365 : vector<1x128xf32> to vector<16x128xf32>
    %385 = arith.addf %383, %384 : vector<16x128xf32>
    %386 = vector.extract_strided_slice %385 {offsets = [0, 0], sizes = [1, 128], strides = [1, 1]} : vector<16x128xf32> to vector<1x128xf32>
    %387 = vector.extract_strided_slice %385 {offsets = [8, 0], sizes = [1, 128], strides = [1, 1]} : vector<16x128xf32> to vector<1x128xf32>
    %388 = tpu.concatenate %386, %387 in 0 : vector<1x128xf32>, vector<1x128xf32> -> vector<2x128xf32>
    %389 = arith.truncf %388 : vector<2x128xf32> to vector<2x128xbf16>
    %c0_134 = arith.constant 0 : index
    %c0_135 = arith.constant 0 : index
    %390 = vector.load %arg28[%c0_134, %c0_135] : memref<128x128xbf16, #tpu.memory_space<vmem>>, vector<128x128xbf16>
    %cst_136 = arith.constant dense<0.000000e+00> : vector<2x128xf32>
    %391 = tpu.matmul %389, %390, %cst_136 {dimension_numbers = #tpu.dot_dimension_numbers<[1], [0], [0], [1], [0, 0, 1, 1], [], []>} : vector<2x128xbf16>, vector<128x128xbf16>, vector<2x128xf32> -> vector<2x128xf32>
    %c0_137 = arith.constant 0 : index
    %c0_138 = arith.constant 0 : index
    %392 = vector.load %arg29[%c0_137, %c0_138] : memref<1x128xf32, #tpu.memory_space<vmem>>, vector<1x128xf32>
    %393 = vector.broadcast %392 : vector<1x128xf32> to vector<2x128xf32>
    %394 = arith.addf %391, %393 : vector<2x128xf32>
    %395 = math.tanh %394 : vector<2x128xf32>
    %396 = arith.truncf %395 : vector<2x128xf32> to vector<2x128xbf16>
    %c0_139 = arith.constant 0 : index
    %c0_140 = arith.constant 0 : index
    %397 = vector.load %arg30[%c0_139, %c0_140] : memref<128x2048xbf16, #tpu.memory_space<vmem>>, vector<128x2048xbf16>
    %cst_141 = arith.constant dense<0.000000e+00> : vector<2x2048xf32>
    %398 = tpu.matmul %396, %397, %cst_141 {dimension_numbers = #tpu.dot_dimension_numbers<[1], [0], [0], [1], [0, 0, 1, 1], [], []>} : vector<2x128xbf16>, vector<128x2048xbf16>, vector<2x2048xf32> -> vector<2x2048xf32>
    %c0_142 = arith.constant 0 : index
    %c0_143 = arith.constant 0 : index
    %399 = vector.load %arg31[%c0_142, %c0_143] : memref<1x2048xf32, #tpu.memory_space<vmem>>, vector<1x2048xf32>
    %400 = vector.broadcast %399 : vector<1x2048xf32> to vector<2x2048xf32>
    %401 = arith.addf %398, %400 : vector<2x2048xf32>
    %cst_144 = arith.constant 0.000000e+00 : f32
    %402 = vector.broadcast %cst_144 : f32 to vector<2x2048xf32>
    %403 = arith.maximumf %401, %402 : vector<2x2048xf32>
    %404 = arith.truncf %403 : vector<2x2048xf32> to vector<2x2048xbf16>
    %c0_145 = arith.constant 0 : index
    %c0_146 = arith.constant 0 : index
    %405 = vector.load %arg32[%c0_145, %c0_146] : memref<2048x768xbf16, #tpu.memory_space<vmem>>, vector<2048x768xbf16>
    %cst_147 = arith.constant dense<0.000000e+00> : vector<2x768xf32>
    %406 = tpu.matmul %404, %405, %cst_147 {dimension_numbers = #tpu.dot_dimension_numbers<[1], [0], [0], [1], [0, 0, 1, 1], [], []>} : vector<2x2048xbf16>, vector<2048x768xbf16>, vector<2x768xf32> -> vector<2x768xf32>
    %c0_148 = arith.constant 0 : index
    %c0_149 = arith.constant 0 : index
    %407 = vector.load %arg33[%c0_148, %c0_149] : memref<1x768xf32, #tpu.memory_space<vmem>>, vector<1x768xf32>
    %408 = vector.broadcast %407 : vector<1x768xf32> to vector<2x768xf32>
    %409 = arith.addf %406, %408 : vector<2x768xf32>
    %cst_150 = arith.constant 0.000000e+00 : f32
    %410 = vector.broadcast %cst_150 : f32 to vector<2x768xf32>
    %411 = arith.maximumf %409, %410 : vector<2x768xf32>
    %412 = arith.truncf %411 : vector<2x768xf32> to vector<2x768xbf16>
    %c0_151 = arith.constant 0 : index
    %c0_152 = arith.constant 0 : index
    %413 = vector.load %arg34[%c0_151, %c0_152] : memref<768x128xbf16, #tpu.memory_space<vmem>>, vector<768x128xbf16>
    %cst_153 = arith.constant dense<0.000000e+00> : vector<2x128xf32>
    %414 = tpu.matmul %412, %413, %cst_153 {dimension_numbers = #tpu.dot_dimension_numbers<[1], [0], [0], [1], [0, 0, 1, 1], [], []>} : vector<2x768xbf16>, vector<768x128xbf16>, vector<2x128xf32> -> vector<2x128xf32>
    %c0_154 = arith.constant 0 : index
    %c0_155 = arith.constant 0 : index
    %415 = vector.load %arg35[%c0_154, %c0_155] : memref<1x128xf32, #tpu.memory_space<vmem>>, vector<1x128xf32>
    %416 = vector.broadcast %415 : vector<1x128xf32> to vector<2x128xf32>
    %417 = arith.addf %414, %416 : vector<2x128xf32>
    %c0_156 = arith.constant 0 : index
    %c0_157 = arith.constant 0 : index
    %418 = vector.load %arg36[%c0_156, %c0_157] : memref<2x128xf32, #tpu.memory_space<vmem>>, vector<2x128xf32>
    tpu.vector_store %arg36[%c0_156, %c0_157], %417 {strides = array<i32>} : memref<2x128xf32, #tpu.memory_space<vmem>>, vector<2x128xf32>,
    return
  }
}

</mosaic_0001>

<bundles_post_ra>
// kernel: readmission_forward.1
= control target key start
LH: loop header
LB: loop body
LE: loop exit
PB: predicated region body
PF: predicated region fallthrough
CT: control target
= control target key end

     0   :  { %s17651_s6 = smov 1   ;;  %s17652_s10 = smov 2   ;;  %s18874_s0 = inlined_call_operand.smem [shape: u32[37], index: -1, kind: input, shape index: {}] }
   0x1   :  { %s17737_s5 = sld [smem:[%s18874_s0]]   ;;  %s17653_s14 = smov 3  }
   0x2   :  { %s17742_s9 = sld [smem:[%s18874_s0 + %s17651_s6]]   ;;  %s17654_s18 = smov 4  }
   0x3   :  { %s17747_s13 = sld [smem:[%s18874_s0 + %s17652_s10]]   ;;  %s17655_s22 = smov 5  }
   0x4   :  { %s17752_s17 = sld [smem:[%s18874_s0 + %s17653_s14]]   ;;  %s17656_s26 = smov 6  }
   0x5   :  { %s17757_s21 = sld [smem:[%s18874_s0 + %s17654_s18]]   ;;  %s17657_s30 = smov 7  }
   0x6   :  { %s17762_s25 = sld [smem:[%s18874_s0 + %s17655_s22]]   ;;  %s17658_s4 = smov 8  }
   0x7   :  { %18894 = sst [smem:[#allocation72_spill]] %s17737_s5  ;;  %s17659_s10 = smov 9  }
   0x8   :  { %18895 = sst [smem:[#allocation73_spill]] %s17742_s9  ;;  %s17660_s15 = smov 10  }
   0x9   :  { %18896 = sst [smem:[#allocation74_spill]] %s17747_s13  ;;  %s17661_s20 = smov 11  }
   0xa   :  { %s17767_s29 = sld [smem:[%s18874_s0 + %s17656_s26]]   ;;  %s17662_s26 = smov 12  }
   0xb   :  { %18897 = sst [smem:[#allocation75_spill]] %s17757_s21  ;;  %s17663_s1 = smov 13  }
   0xc   :  { %s17772_s3 = sld [smem:[%s18874_s0 + %s17657_s30]]   ;;  %s17664_s7 = smov 14  }
   0xd   :  { %s17777_s8 = sld [smem:[%s18874_s0 + %s17658_s4]]   ;;  %s17666_s22 = smov 16  }
   0xe   :  { %s17782_s14 = sld [smem:[%s18874_s0 + %s17659_s10]]   ;;  %s17667_s28 = smov 17  }
   0xf   :  { %s17787_s19 = sld [smem:[%s18874_s0 + %s17660_s15]]   ;;  %s17665_s15 = smov 15  }
  0x10   :  { %18898 = sst [smem:[#allocation76_spill]] %s17767_s29 }
  0x11   :  { %s17792_s24 = sld [smem:[%s18874_s0 + %s17661_s20]]  }
  0x12   :  { %s17797_s30 = sld [smem:[%s18874_s0 + %s17662_s26]]  }
  0x13   :  { %18899 = sst [smem:[#allocation77_spill]] %s17777_s8 }
  0x14   :  { %s17802_s6 = sld [smem:[%s18874_s0 + %s17663_s1]]  }
  0x15   :  { %18900 = sst [smem:[#allocation78_spill]] %s17787_s19 }
  0x16   :  { %s17807_s12 = sld [smem:[%s18874_s0 + %s17664_s7]]   ;;  %s17668_s7 = smov 18  }
  0x17   :  { %s17812_s20 = sld [smem:[%s18874_s0 + %s17665_s15]]   ;;  %s17669_s15 = smov 19  }
  0x18   :  { %18901 = sst [smem:[#allocation79_spill]] %s17797_s30 }
  0x19   :  { %s17817_s27 = sld [smem:[%s18874_s0 + %s17666_s22]]   ;;  %s17670_s22 = smov 20  }
  0x1a   :  { %s17822_s4 = sld [smem:[%s18874_s0 + %s17667_s28]]   ;;  %s17671_s28 = smov 21  }
  0x1b   :  { %s17827_s9 = sld [smem:[%s18874_s0 + %s17668_s7]]   ;;  %s17672_s7 = smov 22  }
  0x1c   :  { %18902 = sst [smem:[#allocation80_spill]] %s17807_s12 }
  0x1d   :  { %s17832_s5 = sld [smem:[%s18874_s0 + %s17669_s15]]   ;;  %s17673_s15 = smov 23  }
  0x1e   :  { %s17842_s12 = sld [smem:[%s18874_s0 + %s17671_s28]]   ;;  %s17675_s28 = smov 25  }
  0x1f   :  { %18903 = sst [smem:[#allocation81_spill]] %s17817_s27 }
  0x20   :  { %s17837_s27 = sld [smem:[%s18874_s0 + %s17670_s22]]   ;;  %s17674_s22 = smov 24  }
  0x21   :  { %18904 = sst [smem:[#allocation82_spill]] %s17827_s9 }
  0x22   :  { %s17847_s9 = sld [smem:[%s18874_s0 + %s17672_s7]]   ;;  %s17676_s7 = smov 26  }
  0x23   :  { %s17852_s30 = sld [smem:[%s18874_s0 + %s17673_s15]]   ;;  %s17677_s15 = smov 27  }
  0x24   :  { %s17862_s19 = sld [smem:[%s18874_s0 + %s17675_s28]]   ;;  %s17679_s28 = smov 29  }
  0x25   :  { %s17872_s8 = sld [smem:[%s18874_s0 + %s17677_s15]]   ;;  %s17681_s15 = smov 31  }
  0x26   :  { %18905 = sst [smem:[#allocation83_spill]] %s17837_s27 }
  0x27   :  { %s17857_s27 = sld [smem:[%s18874_s0 + %s17674_s22]]   ;;  %s17678_s22 = smov 28  }
  0x28   :  { %18906 = sst [smem:[#allocation84_spill]] %s17847_s9 }
  0x29   :  { %s17867_s9 = sld [smem:[%s18874_s0 + %s17676_s7]]   ;;  %s17680_s7 = smov 30  }
  0x2a   :  { %s17882_s29 = sld [smem:[%s18874_s0 + %s17679_s28]]   ;;  %s17683_s28 = smov 33  }
  0x2b   :  { %s17892_s21 = sld [smem:[%s18874_s0 + %s17681_s15]]   ;;  %s17685_s15 = smov 35  }
  0x2c   :  { %s17902_s13 = sld [smem:[%s18874_s0 + %s17683_s28]]  }
  0x2d   :  { %18907 = sst [smem:[#allocation85_spill]] %s17857_s27 }
  0x2e   :  { %s17877_s27 = sld [smem:[%s18874_s0 + %s17678_s22]]   ;;  %s17682_s22 = smov 32  }
  0x2f   :  { %18908 = sst [smem:[#allocation86_spill]] %s17867_s9 }
  0x30   :  { %s17887_s9 = sld [smem:[%s18874_s0 + %s17680_s7]]   ;;  %s17684_s7 = smov 34  }
  0x31   :  { %18911 = sst [smem:[#allocation89_spill]] %s17892_s21 }
  0x32   :  { %s17912_s21 = sld [smem:[%s18874_s0 + %s17685_s15]]  }
  0x34   :  { %18909 = sst [smem:[#allocation87_spill]] %s17877_s27 }
  0x35   :  { %s17897_s27 = sld [smem:[%s18874_s0 + %s17682_s22]]   ;;  %s17686_s22 = smov 36  }
  0x36   :  { %18910 = sst [smem:[#allocation88_spill]] %s17887_s9 }
  0x37   :  { %s17907_s9 = sld [smem:[%s18874_s0 + %s17684_s7]]  }
  0x3b   :  { %18912 = sst [smem:[#allocation90_spill]] %s17897_s27 }
  0x3c   :  { %s17917_s27 = sld [smem:[%s18874_s0 + %s17686_s22]]  }
  0x3d   :  { %78 = vsyncpa [#allocation3], 0 }
  0x3e   :  { %79 = vsyncpa [#allocation5], 0 }
  0x3f   :  { %80 = vsyncpa [#allocation8], 0 }
  0x40   :  { %81 = vsyncpa [#allocation11], 0 }
  0x41   :  { %82 = vsyncpa [#allocation14], 0 }
  0x42   :  { %83 = vsyncpa [#allocation17], 0 }
  0x43   :  { %84 = vsyncpa [#allocation20], 0 }
  0x44   :  { %85 = vsyncpa [#allocation23], 0 }
  0x45   :  { %86 = vsyncpa [#allocation26], 0 }
  0x46   :  { %87 = vsyncpa [#allocation29], 0 }
  0x47   :  { %88 = vsyncpa [#allocation32], 0 }
  0x48   :  { %89 = vsyncpa [#allocation35], 0 }
  0x49   :  { %90 = vsyncpa [#allocation38], 0 }
  0x4a   :  { %91 = vsyncpa [#allocation41], 0 }
  0x4b   :  { %92 = vsyncpa [#allocation44], 0 }
  0x4c   :  { %93 = vsyncpa [#allocation47], 0 }
  0x4d   :  { %94 = vsyncpa [#allocation50], 0  ;;  %s116_s0 = sshll.u32 %s17752_s17, 4  ;;  %s117_s0 = int_to_ptr.hbm [resolvable:$true] %s116_s0 }
  0x4e   :  { %95 = vsyncpa [#allocation53], 0  ;;  %s17687_s28 = smov [#allocation4]   ;;  %s140_s2 = sshll.u32 %s17762_s25, 4  ;;  %s141_s2 = int_to_ptr.hbm [resolvable:$true] %s140_s2 }
  0x4f   :  { %s118_s1 = sshll.u32 %s17687_s28, 4  ;;  %s16799_s7 = sshra.s32 %s117_s0, 4  ;;  %s119_s1 = int_to_ptr.vmem [resolvable:$true] %s118_s1  ;;  %s16800_s7 = int_to_ptr.hbm [resolvable:$true] %s16799_s7 }
  0x50   :  { %s16801_s10 = scalar_lea.hbm %s16800_s7, 1  ;;  %s16803_s11 = scalar_lea.hbm %s17752_s17, 1 }
  0x51   :  { %p16802_p0 = scmp.ne.s32.totalorder %s16800_s7, %s16801_s10  ;;  %p16804_p1 = scmp.lt.s32.totalorder %s16800_s7, %s17752_s17 }
  0x52   :  { %p16805_p2 = scmp.lt.s32.totalorder %s16803_s11, %s16801_s10 }
  0x54   :  { %p16806_p3 = por %p16805_p2, %p16804_p1 }
  0x56   :  { %p16807_p4 = pnand %p16806_p3, %p16802_p0 }
  0x58   :  { %16810 = shalt.err (!%p16807_p4)
}
  0x59   :  { %121 = dma.hbm_to_vmem [thread:$0]  %s117_s0, 16, %s119_s1, [#allocation5]  }
  0x5a   :  { %s17688_s15 = smov [#allocation7]   ;;  %s164_s18 = sshll.u32 %s17772_s3, 4  ;;  %s165_s18 = int_to_ptr.hbm [resolvable:$true] %s164_s18 }
  0x5b   :  { %s142_s16 = sshll.u32 %s17688_s15, 4  ;;  %s16823_s22 = sshra.s32 %s141_s2, 4  ;;  %s143_s16 = int_to_ptr.vmem [resolvable:$true] %s142_s16  ;;  %s16824_s22 = int_to_ptr.hbm [resolvable:$true] %s16823_s22 }
  0x5c   :  { %s16825_s23 = scalar_lea.hbm %s16824_s22, 6  ;;  %s16827_s26 = scalar_lea.hbm %s17762_s25, 6 }
  0x5d   :  { %p16826_p5 = scmp.ne.s32.totalorder %s16824_s22, %s16825_s23  ;;  %p16828_p6 = scmp.lt.s32.totalorder %s16824_s22, %s17762_s25 }
  0x5e   :  { %p16829_p7 = scmp.lt.s32.totalorder %s16827_s26, %s16825_s23 }
  0x60   :  { %p16830_p8 = por %p16829_p7, %p16828_p6 }
  0x62   :  { %p16831_p9 = pnand %p16830_p8, %p16826_p5 }
  0x64   :  { %16834 = shalt.err (!%p16831_p9)
}
  0x65   :  { %145 = dma.hbm_to_vmem [thread:$0]  %s141_s2, 96, %s143_s16, [#allocation8]  }
  0x66   :  { %s186_s17 = sshll.u32 %s17782_s14, 4  ;;  %s17689_s0 = smov [#allocation10]   ;;  %s187_s17 = int_to_ptr.hbm [resolvable:$true] %s186_s17 }
  0x67   :  { %s166_s28 = sshll.u32 %s17689_s0, 4  ;;  %s16847_s1 = sshra.s32 %s165_s18, 4  ;;  %s167_s28 = int_to_ptr.vmem [resolvable:$true] %s166_s28  ;;  %s16848_s1 = int_to_ptr.hbm [resolvable:$true] %s16847_s1 }
  0x68   :  { %s16849_s7 = scalar_lea.hbm %s16848_s1, 1  ;;  %s16851_s10 = scalar_lea.hbm %s17772_s3, 1 }
  0x69   :  { %p16850_p10 = scmp.ne.s32.totalorder %s16848_s1, %s16849_s7  ;;  %p16852_p11 = scmp.lt.s32.totalorder %s16848_s1, %s17772_s3 }
  0x6a   :  { %p16853_p12 = scmp.lt.s32.totalorder %s16851_s10, %s16849_s7 }
  0x6c   :  { %p16854_p13 = por %p16853_p12, %p16852_p11 }
  0x6e   :  { %p16855_p0 = pnand %p16854_p13, %p16850_p10 }
  0x70   :  { %16858 = shalt.err (!%p16855_p0)
}
  0x71   :  { %169 = dma.hbm_to_vmem [thread:$0]  %s165_s18, 16, %s167_s28, [#allocation11]  }
  0x72   :  { %s17690_s25 = smov [#allocation13]   ;;  %s210_s11 = sshll.u32 %s17792_s24, 4  ;;  %s211_s11 = int_to_ptr.hbm [resolvable:$true] %s210_s11 }
  0x73   :  { %s188_s2 = sshll.u32 %s17690_s25, 4  ;;  %s16871_s15 = sshra.s32 %s187_s17, 4  ;;  %s189_s2 = int_to_ptr.vmem [resolvable:$true] %s188_s2  ;;  %s16872_s15 = int_to_ptr.hbm [resolvable:$true] %s16871_s15 }
  0x74   :  { %s16873_s16 = scalar_lea.hbm %s16872_s15, 1  ;;  %s16875_s22 = scalar_lea.hbm %s17782_s14, 1 }
  0x75   :  { %p16874_p1 = scmp.ne.s32.totalorder %s16872_s15, %s16873_s16  ;;  %p16876_p2 = scmp.lt.s32.totalorder %s16872_s15, %s17782_s14 }
  0x76   :  { %p16877_p3 = scmp.lt.s32.totalorder %s16875_s22, %s16873_s16 }
  0x78   :  { %p16878_p4 = por %p16877_p3, %p16876_p2 }
  0x7a   :  { %p16879_p5 = pnand %p16878_p4, %p16874_p1 }
  0x7c   :  { %16882 = shalt.err (!%p16879_p5)
}
  0x7d   :  { %191 = dma.hbm_to_vmem [thread:$0]  %s187_s17, 16, %s189_s2, [#allocation14]  }
  0x7e   :  { %s234_s3 = sshll.u32 %s17802_s6, 4  ;;  %s17691_s18 = smov [#allocation16]   ;;  %s235_s3 = int_to_ptr.hbm [resolvable:$true] %s234_s3 }
  0x7f   :  { %s212_s23 = sshll.u32 %s17691_s18, 4  ;;  %s16895_s26 = sshra.s32 %s211_s11, 4  ;;  %s213_s23 = int_to_ptr.vmem [resolvable:$true] %s212_s23  ;;  %s16896_s26 = int_to_ptr.hbm [resolvable:$true] %s16895_s26 }
  0x80   :  { %s16897_s0 = scalar_lea.hbm %s16896_s26, 2  ;;  %s16899_s28 = scalar_lea.hbm %s17792_s24, 2 }
  0x81   :  { %p16898_p6 = scmp.ne.s32.totalorder %s16896_s26, %s16897_s0  ;;  %p16900_p7 = scmp.lt.s32.totalorder %s16896_s26, %s17792_s24 }
  0x82   :  { %p16901_p8 = scmp.lt.s32.totalorder %s16899_s28, %s16897_s0 }
  0x84   :  { %p16902_p9 = por %p16901_p8, %p16900_p7 }
  0x86   :  { %p16903_p10 = pnand %p16902_p9, %p16898_p6 }
  0x88   :  { %16906 = shalt.err (!%p16903_p10)
}
  0x89   :  { %215 = dma.hbm_to_vmem [thread:$0]  %s211_s11, 32, %s213_s23, [#allocation17]  }
  0x8a   :  { %s17692_s14 = smov [#allocation19]   ;;  %s256_s1 = sshll.u32 %s17812_s20, 4  ;;  %s257_s1 = int_to_ptr.hbm [resolvable:$true] %s256_s1 }
  0x8b   :  { %s236_s17 = sshll.u32 %s17692_s14, 4  ;;  %s16919_s7 = sshra.s32 %s235_s3, 4  ;;  %s237_s17 = int_to_ptr.vmem [resolvable:$true] %s236_s17  ;;  %s16920_s7 = int_to_ptr.hbm [resolvable:$true] %s16919_s7 }
  0x8c   :  { %s16921_s10 = scalar_lea.hbm %s16920_s7, 1  ;;  %s16923_s25 = scalar_lea.hbm %s17802_s6, 1 }
  0x8d   :  { %p16922_p11 = scmp.ne.s32.totalorder %s16920_s7, %s16921_s10  ;;  %p16924_p12 = scmp.lt.s32.totalorder %s16920_s7, %s17802_s6 }
  0x8e   :  { %p16925_p13 = scmp.lt.s32.totalorder %s16923_s25, %s16921_s10 }
  0x90   :  { %p16926_p0 = por %p16925_p13, %p16924_p12 }
  0x92   :  { %p16927_p1 = pnand %p16926_p0, %p16922_p11 }
  0x94   :  { %16930 = shalt.err (!%p16927_p1)
}
  0x95   :  { %239 = dma.hbm_to_vmem [thread:$0]  %s235_s3, 16, %s237_s17, [#allocation20]  }
  0x96   :  { %s280_s24 = sshll.u32 %s17822_s4, 4  ;;  %s17693_s2 = smov [#allocation22]   ;;  %s281_s24 = int_to_ptr.hbm [resolvable:$true] %s280_s24 }
  0x97   :  { %s258_s11 = sshll.u32 %s17693_s2, 4  ;;  %s16943_s15 = sshra.s32 %s257_s1, 4  ;;  %s259_s11 = int_to_ptr.vmem [resolvable:$true] %s258_s11  ;;  %s16944_s15 = int_to_ptr.hbm [resolvable:$true] %s16943_s15 }
  0x98   :  { %s16945_s16 = scalar_lea.hbm %s16944_s15, 1  ;;  %s16947_s22 = scalar_lea.hbm %s17812_s20, 1 }
  0x99   :  { %p16946_p2 = scmp.ne.s32.totalorder %s16944_s15, %s16945_s16  ;;  %p16948_p3 = scmp.lt.s32.totalorder %s16944_s15, %s17812_s20 }
  0x9a   :  { %p16949_p4 = scmp.lt.s32.totalorder %s16947_s22, %s16945_s16 }
  0x9c   :  { %p16950_p5 = por %p16949_p4, %p16948_p3 }
  0x9e   :  { %p16951_p6 = pnand %p16950_p5, %p16946_p2 }
  0xa0   :  { %16954 = shalt.err (!%p16951_p6)
}
  0xa1   :  { %261 = dma.hbm_to_vmem [thread:$0]  %s257_s1, 16, %s259_s11, [#allocation23]  }
  0xa2   :  { %s17694_s6 = smov [#allocation25]   ;;  %s304_s18 = sshll.u32 %s17832_s5, 4  ;;  %s305_s18 = int_to_ptr.hbm [resolvable:$true] %s304_s18 }
  0xa3   :  { %s282_s3 = sshll.u32 %s17694_s6, 4  ;;  %s16967_s23 = sshra.s32 %s281_s24, 4  ;;  %s283_s3 = int_to_ptr.vmem [resolvable:$true] %s282_s3  ;;  %s16968_s23 = int_to_ptr.hbm [resolvable:$true] %s16967_s23 }
  0xa4   :  { %s16969_s26 = scalar_lea.hbm %s16968_s23, 6  ;;  %s16971_s0 = scalar_lea.hbm %s17822_s4, 6 }
  0xa5   :  { %p16970_p7 = scmp.ne.s32.totalorder %s16968_s23, %s16969_s26  ;;  %p16972_p8 = scmp.lt.s32.totalorder %s16968_s23, %s17822_s4 }
  0xa6   :  { %p16973_p9 = scmp.lt.s32.totalorder %s16971_s0, %s16969_s26 }
  0xa8   :  { %p16974_p10 = por %p16973_p9, %p16972_p8 }
  0xaa   :  { %p16975_p11 = pnand %p16974_p10, %p16970_p7 }
  0xac   :  { %16978 = shalt.err (!%p16975_p11)
}
  0xad   :  { %285 = dma.hbm_to_vmem [thread:$0]  %s281_s24, 96, %s283_s3, [#allocation26]  }
  0xae   :  { %s326_s20 = sshll.u32 %s17842_s12, 4  ;;  %s17695_s28 = smov [#allocation28]   ;;  %s327_s20 = int_to_ptr.hbm [resolvable:$true] %s326_s20 }
  0xaf   :  { %s306_s14 = sshll.u32 %s17695_s28, 4  ;;  %s16991_s17 = sshra.s32 %s305_s18, 4  ;;  %s307_s14 = int_to_ptr.vmem [resolvable:$true] %s306_s14  ;;  %s16992_s17 = int_to_ptr.hbm [resolvable:$true] %s16991_s17 }
  0xb0   :  { %s16993_s1 = scalar_lea.hbm %s16992_s17, 1  ;;  %s16995_s7 = scalar_lea.hbm %s17832_s5, 1 }
  0xb1   :  { %p16994_p12 = scmp.ne.s32.totalorder %s16992_s17, %s16993_s1  ;;  %p16996_p13 = scmp.lt.s32.totalorder %s16992_s17, %s17832_s5 }
  0xb2   :  { %p16997_p0 = scmp.lt.s32.totalorder %s16995_s7, %s16993_s1 }
  0xb4   :  { %p16998_p1 = por %p16997_p0, %p16996_p13 }
  0xb6   :  { %p16999_p2 = pnand %p16998_p1, %p16994_p12 }
  0xb8   :  { %17002 = shalt.err (!%p16999_p2)
}
  0xb9   :  { %309 = dma.hbm_to_vmem [thread:$0]  %s305_s18, 16, %s307_s14, [#allocation29]  }
  0xba   :  { %s17696_s4 = smov [#allocation31]   ;;  %s350_s25 = sshll.u32 %s17852_s30, 4  ;;  %s351_s25 = int_to_ptr.hbm [resolvable:$true] %s350_s25 }
  0xbb   :  { %s328_s10 = sshll.u32 %s17696_s4, 4  ;;  %s17015_s24 = sshra.s32 %s327_s20, 4  ;;  %s329_s10 = int_to_ptr.vmem [resolvable:$true] %s328_s10  ;;  %s17016_s24 = int_to_ptr.hbm [resolvable:$true] %s17015_s24 }
  0xbc   :  { %s17017_s2 = scalar_lea.hbm %s17016_s24, 1  ;;  %s17019_s11 = scalar_lea.hbm %s17842_s12, 1 }
  0xbd   :  { %p17018_p3 = scmp.ne.s32.totalorder %s17016_s24, %s17017_s2  ;;  %p17020_p4 = scmp.lt.s32.totalorder %s17016_s24, %s17842_s12 }
  0xbe   :  { %p17021_p5 = scmp.lt.s32.totalorder %s17019_s11, %s17017_s2 }
  0xc0   :  { %p17022_p6 = por %p17021_p5, %p17020_p4 }
  0xc2   :  { %p17023_p7 = pnand %p17022_p6, %p17018_p3 }
  0xc4   :  { %17026 = shalt.err (!%p17023_p7)
}
  0xc5   :  { %331 = dma.hbm_to_vmem [thread:$0]  %s327_s20, 16, %s329_s10, [#allocation32]  }
  0xc6   :  { %s374_s5 = sshll.u32 %s17862_s19, 4  ;;  %s17697_s15 = smov [#allocation34]   ;;  %s375_s5 = int_to_ptr.hbm [resolvable:$true] %s374_s5 }
  0xc7   :  { %s352_s16 = sshll.u32 %s17697_s15, 4  ;;  %s17039_s22 = sshra.s32 %s351_s25, 4  ;;  %s353_s16 = int_to_ptr.vmem [resolvable:$true] %s352_s16  ;;  %s17040_s22 = int_to_ptr.hbm [resolvable:$true] %s17039_s22 }
  0xc8   :  { %s17041_s6 = scalar_lea.hbm %s17040_s22, 2  ;;  %s17043_s3 = scalar_lea.hbm %s17852_s30, 2 }
  0xc9   :  { %p17042_p8 = scmp.ne.s32.totalorder %s17040_s22, %s17041_s6  ;;  %p17044_p9 = scmp.lt.s32.totalorder %s17040_s22, %s17852_s30 }
  0xca   :  { %p17045_p10 = scmp.lt.s32.totalorder %s17043_s3, %s17041_s6 }
  0xcc   :  { %p17046_p11 = por %p17045_p10, %p17044_p9 }
  0xce   :  { %p17047_p12 = pnand %p17046_p11, %p17042_p8 }
  0xd0   :  { %17050 = shalt.err (!%p17047_p12)
}
  0xd1   :  { %355 = dma.hbm_to_vmem [thread:$0]  %s351_s25, 32, %s353_s16, [#allocation35]  }
  0xd2   :  { %s17698_s12 = smov [#allocation37]   ;;  %s396_s23 = sshll.u32 %s17872_s8, 4  ;;  %s397_s23 = int_to_ptr.hbm [resolvable:$true] %s396_s23 }
  0xd3   :  { %s376_s18 = sshll.u32 %s17698_s12, 4  ;;  %s17063_s26 = sshra.s32 %s375_s5, 4  ;;  %s377_s18 = int_to_ptr.vmem [resolvable:$true] %s376_s18  ;;  %s17064_s26 = int_to_ptr.hbm [resolvable:$true] %s17063_s26 }
  0xd4   :  { %s17065_s0 = scalar_lea.hbm %s17064_s26, 1  ;;  %s17067_s20 = scalar_lea.hbm %s17862_s19, 1 }
  0xd5   :  { %p17066_p13 = scmp.ne.s32.totalorder %s17064_s26, %s17065_s0  ;;  %p17068_p0 = scmp.lt.s32.totalorder %s17064_s26, %s17862_s19 }
  0xd6   :  { %p17069_p1 = scmp.lt.s32.totalorder %s17067_s20, %s17065_s0 }
  0xd8   :  { %p17070_p2 = por %p17069_p1, %p17068_p0 }
  0xda   :  { %p17071_p3 = pnand %p17070_p2, %p17066_p13 }
  0xdc   :  { %17074 = shalt.err (!%p17071_p3)
}
  0xdd   :  { %379 = dma.hbm_to_vmem [thread:$0]  %s375_s5, 16, %s377_s18, [#allocation38]  }
  0xde   :  { %s420_s30 = sshll.u32 %s17882_s29, 4  ;;  %s17699_s28 = smov [#allocation40]   ;;  %s421_s30 = int_to_ptr.hbm [resolvable:$true] %s420_s30 }
  0xdf   :  { %s398_s14 = sshll.u32 %s17699_s28, 4  ;;  %s17087_s17 = sshra.s32 %s397_s23, 4  ;;  %s399_s14 = int_to_ptr.vmem [resolvable:$true] %s398_s14  ;;  %s17088_s17 = int_to_ptr.hbm [resolvable:$true] %s17087_s17 }
  0xe0   :  { %s17089_s1 = scalar_lea.hbm %s17088_s17, 1  ;;  %s17091_s7 = scalar_lea.hbm %s17872_s8, 1 }
  0xe1   :  { %p17090_p4 = scmp.ne.s32.totalorder %s17088_s17, %s17089_s1  ;;  %p17092_p5 = scmp.lt.s32.totalorder %s17088_s17, %s17872_s8 }
  0xe2   :  { %p17093_p6 = scmp.lt.s32.totalorder %s17091_s7, %s17089_s1 }
  0xe4   :  { %p17094_p7 = por %p17093_p6, %p17092_p5 }
  0xe6   :  { %p17095_p8 = pnand %p17094_p7, %p17090_p4 }
  0xe8   :  { %17098 = shalt.err (!%p17095_p8)
}
  0xe9   :  { %401 = dma.hbm_to_vmem [thread:$0]  %s397_s23, 16, %s399_s14, [#allocation41]  }
  0xea   :  { %s18913_s19 = sld [smem:[#allocation89_spill]]  ;;  %s17700_s4 = smov [#allocation43]  }
  0xeb   :  { %s422_s10 = sshll.u32 %s17700_s4, 4  ;;  %s17111_s24 = sshra.s32 %s421_s30, 4  ;;  %s423_s10 = int_to_ptr.vmem [resolvable:$true] %s422_s10  ;;  %s17112_s24 = int_to_ptr.hbm [resolvable:$true] %s17111_s24 }
  0xec   :  { %s17113_s2 = scalar_lea.hbm %s17112_s24, 1  ;;  %s17115_s11 = scalar_lea.hbm %s17882_s29, 1 }
  0xed   :  { %p17114_p9 = scmp.ne.s32.totalorder %s17112_s24, %s17113_s2  ;;  %p17116_p10 = scmp.lt.s32.totalorder %s17112_s24, %s17882_s29 }
  0xee   :  { %p17117_p11 = scmp.lt.s32.totalorder %s17115_s11, %s17113_s2 }
  0xf0   :  { %s444_s25 = sshll.u32 %s18913_s19, 4  ;;  %p17118_p12 = por %p17117_p11, %p17116_p10  ;;  %s445_s25 = int_to_ptr.hbm [resolvable:$true] %s444_s25 }
  0xf2   :  { %p17119_p13 = pnand %p17118_p12, %p17114_p9 }
  0xf4   :  { %17122 = shalt.err (!%p17119_p13)
}
  0xf5   :  { %425 = dma.hbm_to_vmem [thread:$0]  %s421_s30, 16, %s423_s10, [#allocation44]  }
  0xf6   :  { %s468_s8 = sshll.u32 %s17902_s13, 4  ;;  %s17701_s5 = smov [#allocation46]   ;;  %s469_s8 = int_to_ptr.hbm [resolvable:$true] %s468_s8 }
  0xf7   :  { %s446_s15 = sshll.u32 %s17701_s5, 4  ;;  %s17135_s16 = sshra.s32 %s445_s25, 4  ;;  %s447_s15 = int_to_ptr.vmem [resolvable:$true] %s446_s15  ;;  %s17136_s16 = int_to_ptr.hbm [resolvable:$true] %s17135_s16 }
  0xf8   :  { %s17137_s22 = scalar_lea.hbm %s17136_s16, 16  ;;  %s17139_s6 = scalar_lea.hbm %s18913_s19, 16 }
  0xf9   :  { %p17138_p0 = scmp.ne.s32.totalorder %s17136_s16, %s17137_s22  ;;  %p17140_p1 = scmp.lt.s32.totalorder %s17136_s16, %s18913_s19 }
  0xfa   :  { %p17141_p2 = scmp.lt.s32.totalorder %s17139_s6, %s17137_s22 }
  0xfc   :  { %p17142_p3 = por %p17141_p2, %p17140_p1 }
  0xfe   :  { %p17143_p4 = pnand %p17142_p3, %p17138_p0 }
 0x100   :  { %17146 = shalt.err (!%p17143_p4)
}
 0x101   :  { %449 = dma.hbm_to_vmem [thread:$0]  %s445_s25, 256, %s447_s15, [#allocation47]  }
 0x102   :  { %s18914_s29 = sld [smem:[#allocation74_spill]]  ;;  %s17702_s3 = smov [#allocation49]  }
 0x103   :  { %s470_s12 = sshll.u32 %s17702_s3, 4  ;;  %s17159_s23 = sshra.s32 %s469_s8, 4  ;;  %s471_s12 = int_to_ptr.vmem [resolvable:$true] %s470_s12  ;;  %s17160_s23 = int_to_ptr.hbm [resolvable:$true] %s17159_s23 }
 0x104   :  { %s17161_s26 = scalar_lea.hbm %s17160_s23, 6  ;;  %s17163_s0 = scalar_lea.hbm %s17902_s13, 6 }
 0x105   :  { %p17162_p5 = scmp.ne.s32.totalorder %s17160_s23, %s17161_s26  ;;  %p17164_p6 = scmp.lt.s32.totalorder %s17160_s23, %s17902_s13 }
 0x106   :  { %p17165_p7 = scmp.lt.s32.totalorder %s17163_s0, %s17161_s26 }
 0x108   :  { %s105_s18 = sshll.u32 %s18914_s29, 4  ;;  %p17166_p8 = por %p17165_p7, %p17164_p6  ;;  %s106_s18 = int_to_ptr.hbm [resolvable:$true] %s105_s18 }
 0x10a   :  { %p17167_p9 = pnand %p17166_p8, %p17162_p5 }
 0x10c   :  { %17170 = shalt.err (!%p17167_p9)
}
 0x10d   :  { %473 = dma.hbm_to_vmem [thread:$0]  %s469_s8, 96, %s471_s12, [#allocation50]  }
 0x10e   :  { %s18915_s20 = sld [smem:[#allocation75_spill]]  ;;  %s17703_s28 = smov [#allocation2]  }
 0x10f   :  { %s107_s14 = sshll.u32 %s17703_s28, 4  ;;  %s17183_s17 = sshra.s32 %s106_s18, 4  ;;  %s108_s14 = int_to_ptr.vmem [resolvable:$true] %s107_s14  ;;  %s17184_s17 = int_to_ptr.hbm [resolvable:$true] %s17183_s17 }
 0x110   :  { %s17185_s1 = scalar_lea.hbm %s17184_s17, 1  ;;  %s17187_s7 = scalar_lea.hbm %s18914_s29, 1 }
 0x111   :  { %p17186_p10 = scmp.ne.s32.totalorder %s17184_s17, %s17185_s1  ;;  %p17188_p11 = scmp.lt.s32.totalorder %s17184_s17, %s18914_s29 }
 0x112   :  { %p17189_p12 = scmp.lt.s32.totalorder %s17187_s7, %s17185_s1 }
 0x114   :  { %s126_s30 = sshll.u32 %s18915_s20, 4  ;;  %p17190_p13 = por %p17189_p12, %p17188_p11  ;;  %s17969_s30 = int_to_ptr.hbm [resolvable:$true] %s126_s30 }
 0x116   :  { %p17191_p0 = pnand %p17190_p13, %p17186_p10 }
 0x118   :  { %17194 = shalt.err (!%p17191_p0)
}
 0x119   :  { %110 = dma.hbm_to_vmem [thread:$0]  %s106_s18, 16, %s108_s14, [#allocation3]  }
 0x11a   :  { %s17704_s13 = smov [#allocation6]   ;;  %s17207_s4 = sshra.s32 %s17969_s30, 4  ;;  %s17208_s4 = int_to_ptr.hbm [resolvable:$true] %s17207_s4 }
 0x11b   :  { %s128_s19 = sshll.u32 %s17704_s13, 4  ;;  %s17209_s10 = scalar_lea.hbm %s17208_s4, 384  ;;  %s129_s19 = int_to_ptr.vmem [resolvable:$true] %s128_s19 }
 0x11c   :  { %p17210_p1 = scmp.ne.s32.totalorder %s17208_s4, %s17209_s10  ;;  %s17211_s25 = scalar_lea.hbm %s18915_s20, 384 }
 0x11d   :  { %p17212_p2 = scmp.lt.s32.totalorder %s17208_s4, %s18915_s20  ;;  %p17213_p3 = scmp.lt.s32.totalorder %s17211_s25, %s17209_s10 }
 0x11f   :  { %p17214_p4 = por %p17213_p3, %p17212_p2 }
 0x121   :  { %p17215_p5 = pnand %p17214_p4, %p17210_p1 }
 0x123   :  { %17218 = shalt.err (!%p17215_p5)
}
 0x124   :  { %s17705_s24 = smov 384   ;;  %s18916_s2 = sld [smem:[#allocation76_spill]] }
 0x125   :  { %s18917_s11 = sld [smem:[#allocation77_spill]]  ;;  %s17706_s8 = smov 24  }
 0x126   :  { %134 = dma.hbm_to_vmem [thread:$0]  %s17969_s30, 6144, %s129_s19, [#allocation5], %s17705_s24, %s17705_s24, %s17706_s8  }
 0x127   :  { %s17707_s15 = smov [#allocation9]  }
 0x128   :  { %s152_s16 = sshll.u32 %s17707_s15, 4  ;;  %s153_s16 = int_to_ptr.vmem [resolvable:$true] %s152_s16 }
 0x12a   :  { %s150_s5 = sshll.u32 %s18916_s2, 4  ;;  %s17235_s3 = scalar_lea.hbm %s18916_s2, 128  ;;  %s151_s5 = int_to_ptr.hbm [resolvable:$true] %s150_s5 }
 0x12b   :  { %s175_s22 = sshll.u32 %s18917_s11, 4  ;;  %s17231_s6 = sshra.s32 %s151_s5, 4  ;;  %s17232_s6 = int_to_ptr.hbm [resolvable:$true] %s17231_s6  ;;  %s176_s22 = int_to_ptr.hbm [resolvable:$true] %s175_s22 }
 0x12c   :  { %s17233_s29 = scalar_lea.hbm %s17232_s6, 128  ;;  %p17236_p7 = scmp.lt.s32.totalorder %s17232_s6, %s18916_s2 }
 0x12d   :  { %p17234_p6 = scmp.ne.s32.totalorder %s17232_s6, %s17233_s29  ;;  %p17237_p8 = scmp.lt.s32.totalorder %s17235_s3, %s17233_s29 }
 0x12f   :  { %p17238_p9 = por %p17237_p8, %p17236_p7 }
 0x131   :  { %p17239_p10 = pnand %p17238_p9, %p17234_p6 }
 0x133   :  { %17242 = shalt.err (!%p17239_p10)
}
 0x134   :  { %s17708_s12 = smov 64   ;;  %s18918_s18 = sld [smem:[#allocation78_spill]] }
 0x135   :  { %s17709_s23 = smov 4   ;;  %s17710_s26 = smov [#allocation12]  }
 0x136   :  { %158 = dma.hbm_to_vmem [thread:$0]  %s151_s5, 2048, %s153_s16, [#allocation8], %s17708_s12, %s17708_s12, %s17709_s23  }
 0x137   :  { %s177_s0 = sshll.u32 %s17710_s26, 4  ;;  %s17255_s30 = sshra.s32 %s176_s22, 4  ;;  %s178_s0 = int_to_ptr.vmem [resolvable:$true] %s177_s0  ;;  %s17256_s30 = int_to_ptr.hbm [resolvable:$true] %s17255_s30 }
 0x138   :  { %s17257_s28 = scalar_lea.hbm %s17256_s30, 1  ;;  %s17259_s14 = scalar_lea.hbm %s18917_s11, 1 }
 0x139   :  { %p17258_p11 = scmp.ne.s32.totalorder %s17256_s30, %s17257_s28  ;;  %p17260_p12 = scmp.lt.s32.totalorder %s17256_s30, %s18917_s11 }
 0x13a   :  { %s196_s20 = sshll.u32 %s18918_s18, 4  ;;  %p17261_p13 = scmp.lt.s32.totalorder %s17259_s14, %s17257_s28  ;;  %s17988_s20 = int_to_ptr.hbm [resolvable:$true] %s196_s20 }
 0x13c   :  { %p17262_p0 = por %p17261_p13, %p17260_p12 }
 0x13e   :  { %p17263_p1 = pnand %p17262_p0, %p17258_p11 }
 0x140   :  { %17266 = shalt.err (!%p17263_p1)
}
 0x141   :  { %180 = dma.hbm_to_vmem [thread:$0]  %s176_s22, 16, %s178_s0, [#allocation11]  }
 0x142   :  { %s18919_s17 = sld [smem:[#allocation79_spill]]  ;;  %s17711_s1 = smov [#allocation15]  }
 0x143   :  { %s198_s7 = sshll.u32 %s17711_s1, 4  ;;  %s17279_s19 = sshra.s32 %s17988_s20, 4  ;;  %s199_s7 = int_to_ptr.vmem [resolvable:$true] %s198_s7  ;;  %s17280_s19 = int_to_ptr.hbm [resolvable:$true] %s17279_s19 }
 0x144   :  { %s17281_s4 = scalar_lea.hbm %s17280_s19, 128  ;;  %s17283_s10 = scalar_lea.hbm %s18918_s18, 128 }
 0x145   :  { %p17282_p2 = scmp.ne.s32.totalorder %s17280_s19, %s17281_s4  ;;  %p17284_p3 = scmp.lt.s32.totalorder %s17280_s19, %s18918_s18 }
 0x146   :  { %p17285_p4 = scmp.lt.s32.totalorder %s17283_s10, %s17281_s4 }
 0x148   :  { %s220_s13 = sshll.u32 %s18919_s17, 4  ;;  %p17286_p5 = por %p17285_p4, %p17284_p3  ;;  %s221_s13 = int_to_ptr.hbm [resolvable:$true] %s220_s13 }
 0x14a   :  { %p17287_p6 = pnand %p17286_p5, %p17282_p2 }
 0x14c   :  { %17290 = shalt.err (!%p17287_p6)
}
 0x14d   :  { %s17712_s25 = smov 128   ;;  %s18920_s2 = sld [smem:[#allocation80_spill]] }
 0x14e   :  { %s17713_s11 = smov 8   ;;  %s17714_s5 = smov [#allocation18]  }
 0x14f   :  { %204 = dma.hbm_to_vmem [thread:$0]  %s17988_s20, 2048, %s199_s7, [#allocation14], %s17712_s25, %s17712_s25, %s17713_s11  }
 0x150   :  { %s222_s15 = sshll.u32 %s17714_s5, 4  ;;  %s17303_s22 = sshra.s32 %s221_s13, 4  ;;  %s223_s15 = int_to_ptr.vmem [resolvable:$true] %s222_s15  ;;  %s17304_s22 = int_to_ptr.hbm [resolvable:$true] %s17303_s22 }
 0x151   :  { %s17305_s6 = scalar_lea.hbm %s17304_s22, 128  ;;  %s17307_s29 = scalar_lea.hbm %s18919_s17, 128 }
 0x152   :  { %p17306_p7 = scmp.ne.s32.totalorder %s17304_s22, %s17305_s6  ;;  %p17308_p8 = scmp.lt.s32.totalorder %s17304_s22, %s18919_s17 }
 0x153   :  { %s245_s16 = sshll.u32 %s18920_s2, 4  ;;  %p17309_p9 = scmp.lt.s32.totalorder %s17307_s29, %s17305_s6  ;;  %s246_s16 = int_to_ptr.hbm [resolvable:$true] %s245_s16 }
 0x155   :  { %p17310_p10 = por %p17309_p9, %p17308_p8 }
 0x157   :  { %p17311_p11 = pnand %p17310_p10, %p17306_p7 }
 0x159   :  { %17314 = shalt.err (!%p17311_p11)
}
 0x15a   :  { %s18921_s3 = sld [smem:[#allocation81_spill]]  ;;  %s17715_s26 = smov [#allocation21]  }
 0x15b   :  { %228 = dma.hbm_to_vmem [thread:$0]  %s221_s13, 2048, %s223_s15, [#allocation17], %s17708_s12, %s17708_s12, %s17709_s23  }
 0x15c   :  { %s247_s0 = sshll.u32 %s17715_s26, 4  ;;  %s17327_s20 = sshra.s32 %s246_s16, 4  ;;  %s248_s0 = int_to_ptr.vmem [resolvable:$true] %s247_s0  ;;  %s17328_s20 = int_to_ptr.hbm [resolvable:$true] %s17327_s20 }
 0x15d   :  { %s17329_s30 = scalar_lea.hbm %s17328_s20, 1  ;;  %s17331_s28 = scalar_lea.hbm %s18920_s2, 1 }
 0x15e   :  { %p17330_p12 = scmp.ne.s32.totalorder %s17328_s20, %s17329_s30  ;;  %p17332_p13 = scmp.lt.s32.totalorder %s17328_s20, %s18920_s2 }
 0x15f   :  { %p17333_p0 = scmp.lt.s32.totalorder %s17331_s28, %s17329_s30 }
 0x160   :  { %s266_s18 = sshll.u32 %s18921_s3, 4  ;;  %s18007_s18 = int_to_ptr.hbm [resolvable:$true] %s266_s18 }
 0x161   :  { %p17334_p1 = por %p17333_p0, %p17332_p13 }
 0x163   :  { %p17335_p2 = pnand %p17334_p1, %p17330_p12 }
 0x165   :  { %17338 = shalt.err (!%p17335_p2)
}
 0x166   :  { %250 = dma.hbm_to_vmem [thread:$0]  %s246_s16, 16, %s248_s0, [#allocation20]  }
 0x167   :  { %s18922_s14 = sld [smem:[#allocation82_spill]]  ;;  %s17716_s17 = smov [#allocation24]  }
 0x168   :  { %s268_s1 = sshll.u32 %s17716_s17, 4  ;;  %s17351_s13 = sshra.s32 %s18007_s18, 4  ;;  %s269_s1 = int_to_ptr.vmem [resolvable:$true] %s268_s1  ;;  %s17352_s13 = int_to_ptr.hbm [resolvable:$true] %s17351_s13 }
 0x169   :  { %s17353_s19 = scalar_lea.hbm %s17352_s13, 384  ;;  %s17355_s4 = scalar_lea.hbm %s18921_s3, 384 }
 0x16a   :  { %p17354_p3 = scmp.ne.s32.totalorder %s17352_s13, %s17353_s19  ;;  %p17356_p4 = scmp.lt.s32.totalorder %s17352_s13, %s18921_s3 }
 0x16b   :  { %p17357_p5 = scmp.lt.s32.totalorder %s17355_s4, %s17353_s19 }
 0x16d   :  { %s290_s7 = sshll.u32 %s18922_s14, 4  ;;  %p17358_p6 = por %p17357_p5, %p17356_p4  ;;  %s18012_s7 = int_to_ptr.hbm [resolvable:$true] %s290_s7 }
 0x16f   :  { %p17359_p7 = pnand %p17358_p6, %p17354_p3 }
 0x171   :  { %17362 = shalt.err (!%p17359_p7)
}
 0x172   :  { %s18923_s10 = sld [smem:[#allocation83_spill]]  ;;  %s17717_s5 = smov [#allocation27]  }
 0x173   :  { %274 = dma.hbm_to_vmem [thread:$0]  %s18007_s18, 6144, %s269_s1, [#allocation23], %s17705_s24, %s17705_s24, %s17706_s8  }
 0x174   :  { %s292_s15 = sshll.u32 %s17717_s5, 4  ;;  %s17375_s16 = sshra.s32 %s18012_s7, 4  ;;  %s293_s15 = int_to_ptr.vmem [resolvable:$true] %s292_s15  ;;  %s17376_s16 = int_to_ptr.hbm [resolvable:$true] %s17375_s16 }
 0x175   :  { %s17377_s22 = scalar_lea.hbm %s17376_s16, 128  ;;  %s17379_s6 = scalar_lea.hbm %s18922_s14, 128 }
 0x176   :  { %p17378_p8 = scmp.ne.s32.totalorder %s17376_s16, %s17377_s22  ;;  %p17380_p9 = scmp.lt.s32.totalorder %s17376_s16, %s18922_s14 }
 0x177   :  { %p17381_p10 = scmp.lt.s32.totalorder %s17379_s6, %s17377_s22 }
 0x178   :  { %s315_s2 = sshll.u32 %s18923_s10, 4  ;;  %s316_s2 = int_to_ptr.hbm [resolvable:$true] %s315_s2 }
 0x179   :  { %p17382_p11 = por %p17381_p10, %p17380_p9 }
 0x17b   :  { %p17383_p12 = pnand %p17382_p11, %p17378_p8 }
 0x17d   :  { %17386 = shalt.err (!%p17383_p12)
}
 0x17e   :  { %s18924_s29 = sld [smem:[#allocation84_spill]]  ;;  %s17718_s3 = smov [#allocation30]  }
 0x17f   :  { %298 = dma.hbm_to_vmem [thread:$0]  %s18012_s7, 2048, %s293_s15, [#allocation26], %s17708_s12, %s17708_s12, %s17709_s23  }
 0x180   :  { %s317_s18 = sshll.u32 %s17718_s3, 4  ;;  %s17399_s0 = sshra.s32 %s316_s2, 4  ;;  %s318_s18 = int_to_ptr.vmem [resolvable:$true] %s317_s18  ;;  %s17400_s0 = int_to_ptr.hbm [resolvable:$true] %s17399_s0 }
 0x181   :  { %s17401_s20 = scalar_lea.hbm %s17400_s0, 1  ;;  %s17403_s30 = scalar_lea.hbm %s18923_s10, 1 }
 0x182   :  { %p17402_p13 = scmp.ne.s32.totalorder %s17400_s0, %s17401_s20  ;;  %p17404_p0 = scmp.lt.s32.totalorder %s17400_s0, %s18923_s10 }
 0x183   :  { %p17405_p1 = scmp.lt.s32.totalorder %s17403_s30, %s17401_s20 }
 0x184   :  { %s336_s26 = sshll.u32 %s18924_s29, 4  ;;  %s18030_s26 = int_to_ptr.hbm [resolvable:$true] %s336_s26 }
 0x185   :  { %p17406_p2 = por %p17405_p1, %p17404_p0 }
 0x187   :  { %p17407_p3 = pnand %p17406_p2, %p17402_p13 }
 0x189   :  { %17410 = shalt.err (!%p17407_p3)
}
 0x18a   :  { %320 = dma.hbm_to_vmem [thread:$0]  %s316_s2, 16, %s318_s18, [#allocation29]  }
 0x18b   :  { %s18925_s28 = sld [smem:[#allocation85_spill]]  ;;  %s17719_s17 = smov [#allocation33]  }
 0x18c   :  { %s338_s1 = sshll.u32 %s17719_s17, 4  ;;  %s17423_s7 = sshra.s32 %s18030_s26, 4  ;;  %s339_s1 = int_to_ptr.vmem [resolvable:$true] %s338_s1  ;;  %s17424_s7 = int_to_ptr.hbm [resolvable:$true] %s17423_s7 }
 0x18d   :  { %s17425_s13 = scalar_lea.hbm %s17424_s7, 128  ;;  %s17427_s19 = scalar_lea.hbm %s18924_s29, 128 }
 0x18e   :  { %p17426_p4 = scmp.ne.s32.totalorder %s17424_s7, %s17425_s13  ;;  %p17428_p5 = scmp.lt.s32.totalorder %s17424_s7, %s18924_s29 }
 0x18f   :  { %p17429_p6 = scmp.lt.s32.totalorder %s17427_s19, %s17425_s13 }
 0x191   :  { %s360_s14 = sshll.u32 %s18925_s28, 4  ;;  %p17430_p7 = por %p17429_p6, %p17428_p5  ;;  %s18035_s14 = int_to_ptr.hbm [resolvable:$true] %s360_s14 }
 0x193   :  { %p17431_p8 = pnand %p17430_p7, %p17426_p4 }
 0x195   :  { %17434 = shalt.err (!%p17431_p8)
}
 0x196   :  { %s18926_s4 = sld [smem:[#allocation86_spill]]  ;;  %s17720_s10 = smov [#allocation36]  }
 0x197   :  { %344 = dma.hbm_to_vmem [thread:$0]  %s18030_s26, 2048, %s339_s1, [#allocation32], %s17712_s25, %s17712_s25, %s17713_s11  }
 0x198   :  { %s362_s2 = sshll.u32 %s17720_s10, 4  ;;  %s17447_s15 = sshra.s32 %s18035_s14, 4  ;;  %s363_s2 = int_to_ptr.vmem [resolvable:$true] %s362_s2  ;;  %s17448_s15 = int_to_ptr.hbm [resolvable:$true] %s17447_s15 }
 0x199   :  { %s17449_s16 = scalar_lea.hbm %s17448_s15, 128  ;;  %s17451_s22 = scalar_lea.hbm %s18925_s28, 128 }
 0x19a   :  { %p17450_p9 = scmp.ne.s32.totalorder %s17448_s15, %s17449_s16  ;;  %p17452_p10 = scmp.lt.s32.totalorder %s17448_s15, %s18925_s28 }
 0x19b   :  { %p17453_p11 = scmp.lt.s32.totalorder %s17451_s22, %s17449_s16 }
 0x19c   :  { %s385_s5 = sshll.u32 %s18926_s4, 4  ;;  %s386_s5 = int_to_ptr.hbm [resolvable:$true] %s385_s5 }
 0x19d   :  { %p17454_p12 = por %p17453_p11, %p17452_p10 }
 0x19f   :  { %p17455_p13 = pnand %p17454_p12, %p17450_p9 }
 0x1a1   :  { %17458 = shalt.err (!%p17455_p13)
}
 0x1a2   :  { %s18927_s25 = sld [smem:[#allocation87_spill]]  ;;  %s17721_s6 = smov [#allocation39]  }
 0x1a3   :  { %368 = dma.hbm_to_vmem [thread:$0]  %s18035_s14, 2048, %s363_s2, [#allocation35], %s17708_s12, %s17708_s12, %s17709_s23  }
 0x1a4   :  { %s387_s29 = sshll.u32 %s17721_s6, 4  ;;  %s17471_s3 = sshra.s32 %s386_s5, 4  ;;  %s388_s29 = int_to_ptr.vmem [resolvable:$true] %s387_s29  ;;  %s17472_s3 = int_to_ptr.hbm [resolvable:$true] %s17471_s3 }
 0x1a5   :  { %s17473_s18 = scalar_lea.hbm %s17472_s3, 1  ;;  %s17475_s26 = scalar_lea.hbm %s18926_s4, 1 }
 0x1a6   :  { %p17474_p0 = scmp.ne.s32.totalorder %s17472_s3, %s17473_s18  ;;  %p17476_p1 = scmp.lt.s32.totalorder %s17472_s3, %s18926_s4 }
 0x1a7   :  { %p17477_p2 = scmp.lt.s32.totalorder %s17475_s26, %s17473_s18 }
 0x1a8   :  { %s406_s11 = sshll.u32 %s18927_s25, 4  ;;  %s18053_s11 = int_to_ptr.hbm [resolvable:$true] %s406_s11 }
 0x1a9   :  { %p17478_p3 = por %p17477_p2, %p17476_p1 }
 0x1ab   :  { %p17479_p4 = pnand %p17478_p3, %p17474_p0 }
 0x1ad   :  { %17482 = shalt.err (!%p17479_p4)
}
 0x1ae   :  { %390 = dma.hbm_to_vmem [thread:$0]  %s386_s5, 16, %s388_s29, [#allocation38]  }
 0x1af   :  { %s18928_s0 = sld [smem:[#allocation88_spill]]  ;;  %s17722_s20 = smov [#allocation42]  }
 0x1b0   :  { %s408_s30 = sshll.u32 %s17722_s20, 4  ;;  %s17495_s14 = sshra.s32 %s18053_s11, 4  ;;  %s409_s30 = int_to_ptr.vmem [resolvable:$true] %s408_s30  ;;  %s17496_s14 = int_to_ptr.hbm [resolvable:$true] %s17495_s14 }
 0x1b1   :  { %s17497_s17 = scalar_lea.hbm %s17496_s14, 64  ;;  %s17499_s1 = scalar_lea.hbm %s18927_s25, 64 }
 0x1b2   :  { %p17498_p5 = scmp.ne.s32.totalorder %s17496_s14, %s17497_s17  ;;  %p17500_p6 = scmp.lt.s32.totalorder %s17496_s14, %s18927_s25 }
 0x1b3   :  { %p17501_p7 = scmp.lt.s32.totalorder %s17499_s1, %s17497_s17 }
 0x1b5   :  { %s430_s28 = sshll.u32 %s18928_s0, 4  ;;  %p17502_p8 = por %p17501_p7, %p17500_p6  ;;  %s18058_s28 = int_to_ptr.hbm [resolvable:$true] %s430_s28 }
 0x1b7   :  { %p17503_p9 = pnand %p17502_p8, %p17498_p5 }
 0x1b9   :  { %17506 = shalt.err (!%p17503_p9)
}
 0x1ba   :  { %s18929_s7 = sld [smem:[#allocation90_spill]]  ;;  %s17723_s13 = smov [#allocation45]  }
 0x1bb   :  { %414 = dma.hbm_to_vmem [thread:$0]  %s18053_s11, 1024, %s409_s30, [#allocation41], %s17708_s12, %s17708_s12, %s17709_s23  }
 0x1bc   :  { %s432_s19 = sshll.u32 %s17723_s13, 4  ;;  %s17519_s10 = sshra.s32 %s18058_s28, 4  ;;  %s433_s19 = int_to_ptr.vmem [resolvable:$true] %s432_s19  ;;  %s17520_s10 = int_to_ptr.hbm [resolvable:$true] %s17519_s10 }
 0x1bd   :  { %s17521_s2 = scalar_lea.hbm %s17520_s10, 1024  ;;  %s17523_s5 = scalar_lea.hbm %s18928_s0, 1024 }
 0x1be   :  { %p17522_p10 = scmp.ne.s32.totalorder %s17520_s10, %s17521_s2  ;;  %p17524_p11 = scmp.lt.s32.totalorder %s17520_s10, %s18928_s0 }
 0x1bf   :  { %p17525_p12 = scmp.lt.s32.totalorder %s17523_s5, %s17521_s2 }
 0x1c0   :  { %s454_s4 = sshll.u32 %s18929_s7, 4  ;;  %s18068_s4 = int_to_ptr.hbm [resolvable:$true] %s454_s4 }
 0x1c1   :  { %p17526_p13 = por %p17525_p12, %p17524_p11 }
 0x1c3   :  { %p17527_p0 = pnand %p17526_p13, %p17522_p10 }
 0x1c5   :  { %17530 = shalt.err (!%p17527_p0)
}
 0x1c6   :  { %s17724_s15 = smov 1024   ;;  %s478_s16 = sshll.u32 %s17907_s9, 4  ;;  %s18076_s16 = int_to_ptr.hbm [resolvable:$true] %s478_s16 }
 0x1c7   :  { %438 = dma.hbm_to_vmem [thread:$0]  %s18058_s28, 16384, %s433_s19, [#allocation44], %s17724_s15, %s17724_s15, %s17708_s12  }
 0x1c8   :  { %s17725_s22 = smov [#allocation48]   ;;  %s17543_s11 = sshra.s32 %s18068_s4, 4  ;;  %s17544_s11 = int_to_ptr.hbm [resolvable:$true] %s17543_s11 }
 0x1c9   :  { %s456_s25 = sshll.u32 %s17725_s22, 4  ;;  %s17545_s6 = scalar_lea.hbm %s17544_s11, 6144  ;;  %s457_s25 = int_to_ptr.vmem [resolvable:$true] %s456_s25 }
 0x1ca   :  { %p17546_p1 = scmp.ne.s32.totalorder %s17544_s11, %s17545_s6  ;;  %s17547_s29 = scalar_lea.hbm %s18929_s7, 6144 }
 0x1cb   :  { %p17548_p2 = scmp.lt.s32.totalorder %s17544_s11, %s18929_s7  ;;  %p17549_p3 = scmp.lt.s32.totalorder %s17547_s29, %s17545_s6 }
 0x1cd   :  { %p17550_p4 = por %p17549_p3, %p17548_p2 }
 0x1cf   :  { %p17551_p5 = pnand %p17550_p4, %p17546_p1 }
 0x1d1   :  { %17554 = shalt.err (!%p17551_p5)
}
 0x1d2   :  { %462 = dma.hbm_to_vmem [thread:$0]  %s18068_s4, 98304, %s457_s25, [#allocation47], %s17705_s24, %s17705_s24, %s17706_s8  }
 0x1d3   :  { %s17726_s3 = smov [#allocation51]   ;;  %s492_s26 = sshll.u32 %s17912_s21, 4  ;;  %s493_s26 = int_to_ptr.hbm [resolvable:$true] %s492_s26 }
 0x1d4   :  { %s480_s18 = sshll.u32 %s17726_s3, 4  ;;  %s17567_s0 = sshra.s32 %s18076_s16, 4  ;;  %s481_s18 = int_to_ptr.vmem [resolvable:$true] %s480_s18  ;;  %s17568_s0 = int_to_ptr.hbm [resolvable:$true] %s17567_s0 }
 0x1d5   :  { %s17569_s20 = scalar_lea.hbm %s17568_s0, 384  ;;  %s17571_s30 = scalar_lea.hbm %s17907_s9, 384 }
 0x1d6   :  { %p17570_p6 = scmp.ne.s32.totalorder %s17568_s0, %s17569_s20  ;;  %p17572_p7 = scmp.lt.s32.totalorder %s17568_s0, %s17907_s9 }
 0x1d7   :  { %p17573_p8 = scmp.lt.s32.totalorder %s17571_s30, %s17569_s20 }
 0x1d9   :  { %p17574_p9 = por %p17573_p8, %p17572_p7 }
 0x1db   :  { %p17575_p10 = pnand %p17574_p9, %p17570_p6 }
 0x1dd   :  { %17578 = shalt.err (!%p17575_p10)
}
 0x1de   :  { %486 = dma.hbm_to_vmem [thread:$0]  %s18076_s16, 6144, %s481_s18, [#allocation50], %s17708_s12, %s17708_s12, %s17709_s23  }
 0x1df   :  { %s17727_s24 = smov [#allocation52]   ;;  %s17591_s28 = sshra.s32 %s493_s26, 4  ;;  %s17592_s28 = int_to_ptr.hbm [resolvable:$true] %s17591_s28 }
 0x1e0   :  { %s494_s8 = sshll.u32 %s17727_s24, 4  ;;  %s17593_s14 = scalar_lea.hbm %s17592_s28, 1  ;;  %s495_s8 = int_to_ptr.vmem [resolvable:$true] %s494_s8 }
 0x1e1   :  { %p17594_p11 = scmp.ne.s32.totalorder %s17592_s28, %s17593_s14  ;;  %s17595_s9 = scalar_lea.hbm %s17912_s21, 1 }
 0x1e2   :  { %p17596_p12 = scmp.lt.s32.totalorder %s17592_s28, %s17912_s21  ;;  %p17597_p13 = scmp.lt.s32.totalorder %s17595_s9, %s17593_s14 }
 0x1e4   :  { %p17598_p0 = por %p17597_p13, %p17596_p12 }
 0x1e6   :  { %p17599_p1 = pnand %p17598_p0, %p17594_p11 }
 0x1e8   :  { %17602 = shalt.err (!%p17599_p1)
}
 0x1e9   :  { %497 = dma.hbm_to_vmem [thread:$0]  %s493_s26, 16, %s495_s8, [#allocation53]  }
 0x1ea   :  { %17615 = dma.done.wait [#allocation3], 16  }
 0x1eb   :  { %17616 = vsyncadd [#allocation3], 4294967280 }
 0x1ec   :  { %17617 = dma.done.wait [#allocation5], 6160  }
 0x1ed   :  { %17618 = vsyncadd [#allocation5], 4294961136 }
 0x1ee   :  { %17619 = dma.done.wait [#allocation8], 2144  }
 0x1ef   :  { %17620 = vsyncadd [#allocation8], 4294965152 }
 0x1f0   :  { %17621 = dma.done.wait [#allocation11], 32  }
 0x1f1   :  { %17622 = vsyncadd [#allocation11], 4294967264 }
 0x1f2   :  { %17623 = dma.done.wait [#allocation14], 2064  }
 0x1f3   :  { %17624 = vsyncadd [#allocation14], 4294965232 }
 0x1f4   :  { %17625 = dma.done.wait [#allocation17], 2080  }
 0x1f5   :  { %17626 = vsyncadd [#allocation17], 4294965216 }
 0x1f6   :  { %17627 = dma.done.wait [#allocation20], 32  }
 0x1f7   :  { %17628 = vsyncadd [#allocation20], 4294967264 }
 0x1f8   :  { %17629 = dma.done.wait [#allocation23], 6160  }
 0x1f9   :  { %17630 = vsyncadd [#allocation23], 4294961136 }
 0x1fa   :  { %17631 = dma.done.wait [#allocation26], 2144  }
 0x1fb   :  { %17632 = vsyncadd [#allocation26], 4294965152 }
 0x1fc   :  { %17633 = dma.done.wait [#allocation29], 32  }
 0x1fd   :  { %17634 = vsyncadd [#allocation29], 4294967264 }
 0x1fe   :  { %17635 = dma.done.wait [#allocation32], 2064  }
 0x1ff   :  { %17636 = vsyncadd [#allocation32], 4294965232 }
 0x200   :  { %17637 = dma.done.wait [#allocation35], 2080  }
 0x201   :  { %17638 = vsyncadd [#allocation35], 4294965216 }
 0x202   :  { %17639 = dma.done.wait [#allocation38], 32  }
 0x203   :  { %17640 = vsyncadd [#allocation38], 4294967264 }
 0x204   :  { %17641 = dma.done.wait [#allocation41], 1040  }
 0x205   :  { %17642 = vsyncadd [#allocation41], 4294966256 }
 0x206   :  { %17643 = dma.done.wait [#allocation44], 16400  }
 0x207   :  { %17644 = vsyncadd [#allocation44], 4294950896 }
 0x208   :  { %17645 = dma.done.wait [#allocation47], 98560  }
 0x209   :  { %17646 = vsyncadd [#allocation47], 4294868736 }
 0x20a   :  { %17647 = dma.done.wait [#allocation50], 6240  }
 0x20b   :  { %17648 = vsyncadd [#allocation50], 4294961056 }
 0x20c   :  { %17649 = dma.done.wait [#allocation53], 16  }
 0x20d   :  { %17650 = vsyncadd [#allocation53], 4294967280  ;;  %s18930_s21 = sld [smem:[#allocation72_spill]]  ;;  %v17728_v2 = vmov 128.0   ;;  %v11060_v5 = vld [vmem:[#allocation6 + $0x150] sm:$0xf] }
 0x20e   :  { %16722 = vrcp.f32 %v17728_v2  ;;  %v15527_v6 = vld [vmem:[#allocation6 + $0x164] sm:$0xf0]  ;;  %v15524_v7 = vld [vmem:[#allocation6 + $0x154] sm:$0xf]  ;;  %v11062_v9 = vld [vmem:[#allocation6 + $0x168] sm:$0xf0] }
 0x20f   :  { %v11061_v8 = vor.u32 %v15527_v6, %v11060_v5  ;;  %v11036_v10 = vld [vmem:[#allocation6 + $0x120] sm:$0xf]  ;;  %v15521_v11 = vld [vmem:[#allocation6 + $0x134] sm:$0xf0]  ;;  %v11065_v12 = vor.u32 %v15524_v7, %v11062_v9  ;;  %v15518_v13 = vld [vmem:[#allocation6 + $0x124] sm:$0xf] }
 0x210   :  { %v11038_v14 = vld [vmem:[#allocation6 + $0x138] sm:$0xf0]  ;;  %v11037_v16 = vor.u32 %v15521_v11, %v11036_v10  ;;  %v11012_v29 = vld [vmem:[#allocation6 + $0xf0] sm:$0xf]  ;;  %v15515_v30 = vld [vmem:[#allocation6 + $0x104] sm:$0xf0] }
 0x211   :  { %1001 = vmatpush.bf16.msra.mxu0 %v11061_v8  ;;  %1015 = vmatpush.bf16.msra.mxu1 %v11065_v12  ;;  %v11041_v17 = vor.u32 %v15518_v13, %v11038_v14  ;;  %v15512_v31 = vld [vmem:[#allocation6 + $0xf4] sm:$0xf]  ;;  %v11013_v32 = vor.u32 %v15515_v30, %v11012_v29  ;;  %v11014_v33 = vld [vmem:[#allocation6 + $0x108] sm:$0xf0]  ;;  %v10988_v35 = vld [vmem:[#allocation6 + $0xc0] sm:$0xf] }
 0x212   :  { %v11017_v34 = vor.u32 %v15512_v31, %v11014_v33  ;;  %v15509_v36 = vld [vmem:[#allocation6 + $0xd4] sm:$0xf0]  ;;  %v15506_v37 = vld [vmem:[#allocation6 + $0xc4] sm:$0xf]  ;;  %v10990_v39 = vld [vmem:[#allocation6 + $0xd8] sm:$0xf0] }
 0x213   :  { %v637_v0 = vld [vmem:[%s18930_s21] sm:$0xff]  ;;  %v638_v1 = vld [vmem:[%s18930_s21 + $0x8] sm:$0xff]  ;;  %v10989_v38 = vor.u32 %v15509_v36, %v10988_v35  ;;  %v11068_v40 = vld [vmem:[#allocation6 + $0x158] sm:$0xf]  ;;  %v10993_v42 = vor.u32 %v15506_v37, %v10990_v39  ;;  %vm1122_vm7 = vcmask 1043456   ;;  %s18931_s12 = sld [smem:[#allocation73_spill]] }
 0x214   :  { %641 = vadd.xlane.f32.xlu0 %v637_v0  ;;  %v16723_v3 = vpop.eup %16722  ;;  %v15528_v41 = vld [vmem:[#allocation6 + $0x16c] sm:$0xf0]  ;;  %v15525_v44 = vld [vmem:[#allocation6 + $0x15c] sm:$0xf]  ;;  %v11070_v45 = vld [vmem:[#allocation6 + $0x170] sm:$0xf0] }
 0x215   :  { %v646_v4 = vmul.f32 128.0, %v16723_v3  ;;  %1002 = vmatpush.bf16.msra.mxu0 %v11037_v16  ;;  %1016 = vmatpush.bf16.msra.mxu1 %v11041_v17  ;;  %vm650_vm0 = vweird.f32 %v16723_v3  ;;  %v11069_v43 = vor.u32 %v15528_v41, %v11068_v40  ;;  %v11073_v46 = vor.u32 %v15525_v44, %v11070_v45  ;;  %v10964_v47 = vld [vmem:[#allocation6 + $0x90] sm:$0xf]  ;;  %v15503_v48 = vld [vmem:[#allocation6 + $0xa4] sm:$0xf0] }
 0x216   :  { %v15500_v49 = vld [vmem:[#allocation6 + $0x94] sm:$0xf]  ;;  %v10965_v50 = vor.u32 %v15503_v48, %v10964_v47  ;;  %v10966_v51 = vld [vmem:[#allocation6 + $0xa8] sm:$0xf0]  ;;  %v11044_v52 = vld [vmem:[#allocation6 + $0x128] sm:$0xf] }
 0x217   :  { %v647_v15 = vsub.f32 1.0, %v646_v4  ;;  %1029 = vmatpush.bf16.msra.mxu2 %v11069_v43  ;;  %1043 = vmatpush.bf16.msra.mxu3 %v11073_v46  ;;  %v15522_v53 = vld [vmem:[#allocation6 + $0x13c] sm:$0xf0]  ;;  %v10969_v54 = vor.u32 %v15500_v49, %v10966_v51  ;;  %v15519_v56 = vld [vmem:[#allocation6 + $0x12c] sm:$0xf]  ;;  %vm1105_vm8 = vcmask 64512  }
 0x218   :  { %v11045_v55 = vor.u32 %v15522_v53, %v11044_v52  ;;  %v11046_v57 = vld [vmem:[#allocation6 + $0x140] sm:$0xf0]  ;;  %v10940_v59 = vld [vmem:[#allocation6 + $0x60] sm:$0xf]  ;;  %v15497_v60 = vld [vmem:[#allocation6 + $0x74] sm:$0xf0] }
 0x219   :  { %v648_v18 = vmul.f32 %v16723_v3, %v647_v15  ;;  %1003 = vmatpush.bf16.msra.mxu0 %v11013_v32  ;;  %1017 = vmatpush.bf16.msra.mxu1 %v11017_v34  ;;  %v11049_v58 = vor.u32 %v15519_v56, %v11046_v57  ;;  %v15494_v61 = vld [vmem:[#allocation6 + $0x64] sm:$0xf]  ;;  %v10941_v62 = vor.u32 %v15497_v60, %v10940_v59  ;;  %v10942_v63 = vld [vmem:[#allocation6 + $0x78] sm:$0xf0]  ;;  %v11022_v5 = vld [vmem:[#allocation6 + $0x110] sm:$0xf0] }
 0x21a   :  { %v10945_v2 = vor.u32 %v15494_v61, %v10942_v63  ;;  %v15513_v4 = vld [vmem:[#allocation6 + $0xfc] sm:$0xf]  ;;  %v10916_v7 = vld [vmem:[#allocation6 + $0x30] sm:$0xf]  ;;  %v15491_v8 = vld [vmem:[#allocation6 + $0x44] sm:$0xf0] }
 0x21b   :  { %v649_v19 = vadd.f32 %v16723_v3, %v648_v18  ;;  %1030 = vmatpush.bf16.msra.mxu2 %v11045_v55  ;;  %1044 = vmatpush.bf16.msra.mxu3 %v11049_v58  ;;  %v11025_v6 = vor.u32 %v15513_v4, %v11022_v5  ;;  %v15488_v9 = vld [vmem:[#allocation6 + $0x34] sm:$0xf]  ;;  %v10917_v10 = vor.u32 %v15491_v8, %v10916_v7  ;;  %v10918_v11 = vld [vmem:[#allocation6 + $0x48] sm:$0xf0]  ;;  %v10996_v12 = vld [vmem:[#allocation6 + $0xc8] sm:$0xf] }
 0x21c   :  { %643 = vadd.xlane.f32.xlu0 %v638_v1  ;;  %v15510_v13 = vld [vmem:[#allocation6 + $0xdc] sm:$0xf0]  ;;  %v10921_v14 = vor.u32 %v15488_v9, %v10918_v11  ;;  %v15507_v16 = vld [vmem:[#allocation6 + $0xcc] sm:$0xf]  ;;  %v10998_v17 = vld [vmem:[#allocation6 + $0xe0] sm:$0xf0] }
 0x21d   :  { %v18097_v20 = vsel %vm650_vm0, %v16723_v3, %v649_v19  ;;  %1004 = vmatpush.bf16.msra.mxu0 %v10989_v38  ;;  %1018 = vmatpush.bf16.msra.mxu1 %v10993_v42  ;;  %v10997_v15 = vor.u32 %v15510_v13, %v10996_v12  ;;  %v11001_v18 = vor.u32 %v15507_v16, %v10998_v17  ;;  %v10892_v19 = vld [vmem:[#allocation6] sm:$0xf]  ;;  %v15501_v31 = vld [vmem:[#allocation6 + $0x9c] sm:$0xf]  ;;  %v10974_v32 = vld [vmem:[#allocation6 + $0xb0] sm:$0xf0] }
 0x21e   :  { %v11076_v33 = vld [vmem:[#allocation6 + $0x160] sm:$0xf]  ;;  %v10977_v34 = vor.u32 %v15501_v31, %v10974_v32  ;;  %v15529_v35 = vld [vmem:[#allocation6 + $0x174] sm:$0xf0]  ;;  %v15526_v36 = vld [vmem:[#allocation6 + $0x164] sm:$0xf] }
 0x21f   :  { %1045 = vmatpush.bf16.msra.mxu3 %v11025_v6  ;;  %v11078_v37 = vld [vmem:[#allocation6 + $0x178] sm:$0xf0]  ;;  %v11077_v38 = vor.u32 %v15529_v35, %v11076_v33  ;;  %v10948_v40 = vld [vmem:[#allocation6 + $0x68] sm:$0xf]  ;;  %v15498_v41 = vld [vmem:[#allocation6 + $0x7c] sm:$0xf0] }
 0x220   :  { %v11081_v39 = vor.u32 %v15526_v36, %v11078_v37  ;;  %v15495_v42 = vld [vmem:[#allocation6 + $0x6c] sm:$0xf]  ;;  %v10949_v43 = vor.u32 %v15498_v41, %v10948_v40  ;;  %v10950_v44 = vld [vmem:[#allocation6 + $0x80] sm:$0xf0]  ;;  %v11052_v45 = vld [vmem:[#allocation6 + $0x130] sm:$0xf] }
 0x221   :  { %1005 = vmatpush.bf16.msra.mxu0 %v10965_v50  ;;  %1019 = vmatpush.bf16.msra.mxu1 %v10969_v54  ;;  %v15523_v46 = vld [vmem:[#allocation6 + $0x144] sm:$0xf0]  ;;  %v10953_v47 = vor.u32 %v15495_v42, %v10950_v44  ;;  %v15520_v49 = vld [vmem:[#allocation6 + $0x134] sm:$0xf]  ;;  %v11054_v50 = vld [vmem:[#allocation6 + $0x148] sm:$0xf0] }
 0x222   :  { %v11053_v48 = vor.u32 %v15523_v46, %v11052_v45  ;;  %v11057_v51 = vor.u32 %v15520_v49, %v11054_v50  ;;  %v10924_v52 = vld [vmem:[#allocation6 + $0x38] sm:$0xf]  ;;  %v15492_v53 = vld [vmem:[#allocation6 + $0x4c] sm:$0xf0]  ;;  %v15489_v54 = vld [vmem:[#allocation6 + $0x3c] sm:$0xf] }
 0x223   :  { %1046 = vmatpush.bf16.msra.mxu3 %v11001_v18  ;;  %v10925_v55 = vor.u32 %v15492_v53, %v10924_v52  ;;  %v10926_v56 = vld [vmem:[#allocation6 + $0x50] sm:$0xf0]  ;;  %v11028_v57 = vld [vmem:[#allocation6 + $0x100] sm:$0xf]  ;;  %v15517_v58 = vld [vmem:[#allocation6 + $0x114] sm:$0xf0] }
 0x224   :  { %v10929_v59 = vor.u32 %v15489_v54, %v10926_v56  ;;  %v11029_v60 = vor.u32 %v15517_v58, %v11028_v57  ;;  %v15514_v61 = vld [vmem:[#allocation6 + $0x104] sm:$0xf]  ;;  %v15483_v4 = vld [vmem:[#allocation6 + $0xc] sm:$0xf]  ;;  %v11004_v7 = vld [vmem:[#allocation6 + $0xd0] sm:$0xf] }
 0x225   :  { %1006 = vmatpush.bf16.msra.mxu0 %v10941_v62  ;;  %1020 = vmatpush.bf16.msra.mxu1 %v10945_v2  ;;  %v11030_v62 = vld [vmem:[#allocation6 + $0x118] sm:$0xf0]  ;;  %v10900_v2 = vld [vmem:[#allocation6 + $0x8] sm:$0xf]  ;;  %v10902_v6 = vld [vmem:[#allocation6 + $0x20] sm:$0xf0] }
 0x226   :  { %v15511_v8 = vld [vmem:[#allocation6 + $0xe4] sm:$0xf0]  ;;  %v15508_v12 = vld [vmem:[#allocation6 + $0xd4] sm:$0xf]  ;;  %v11006_v13 = vld [vmem:[#allocation6 + $0xe8] sm:$0xf0] }
 0x227   :  { %1047 = vmatpush.bf16.msra.mxu3 %v10977_v34  ;;  %v11005_v11 = vor.u32 %v15511_v8, %v11004_v7  ;;  %v15505_v16 = vld [vmem:[#allocation6 + $0xb4] sm:$0xf0]  ;;  %v15502_v17 = vld [vmem:[#allocation6 + $0xa4] sm:$0xf]  ;;  %v10932_v32 = vld [vmem:[#allocation6 + $0x40] sm:$0xf] }
 0x228   :  { %v15493_v33 = vld [vmem:[#allocation6 + $0x54] sm:$0xf0]  ;;  %v15490_v36 = vld [vmem:[#allocation6 + $0x44] sm:$0xf]  ;;  %v10934_v37 = vld [vmem:[#allocation6 + $0x58] sm:$0xf0] }
 0x229   :  { %1007 = vmatpush.bf16.msra.mxu0 %v10917_v10  ;;  %1021 = vmatpush.bf16.msra.mxu1 %v10921_v14  ;;  %v10905_v10 = vor.u32 %v15483_v4, %v10902_v6  ;;  %v11009_v14 = vor.u32 %v15508_v12, %v11006_v13  ;;  %v10933_v40 = vor.u32 %v15493_v33, %v10932_v32  ;;  %v10908_v42 = vld [vmem:[#allocation6 + $0x10] sm:$0xf]  ;;  %v15484_v44 = vld [vmem:[#allocation6 + $0x14] sm:$0xf]  ;;  %v10910_v45 = vld [vmem:[#allocation6 + $0x28] sm:$0xf0] }
 0x22a   :  { %v10937_v41 = vor.u32 %v15490_v36, %v10934_v37  ;;  %v10913_v49 = vor.u32 %v15484_v44, %v10910_v45  ;;  %v16704_v57 = vld [vmem:[#allocation2] ss:$0 sm:$0xff] }
 0x22b   :  { %1048 = vmatpush.bf16.msra.mxu3 %v10953_v47 }
 0x22f   :  { %1049 = vmatpush.bf16.msra.mxu3 %v10929_v59 }
 0x233   :  { %1050 = vmatpush.bf16.msra.mxu3 %v10905_v10 }
 0x287   :  { %v642_v21 = vpop.xlane.xlu0 %641 }
 0x288   :  { %v652_v22 = vmul.f32 %v18097_v20, %v642_v21  ;;  %v15485_v21 = vld [vmem:[#allocation6 + $0x14] sm:$0xf0] }
 0x28a   :  { %v18100_v23 = vsub.f32 %v637_v0, %v652_v22  ;;  %v11020_v0 = vld [vmem:[#allocation6 + $0xf8] sm:$0xf]  ;;  %v15482_v22 = vld [vmem:[#allocation6 + $0x4] sm:$0xf] }
 0x28c   :  { %v656_v24 = vmul.f32 %v18100_v23, %v18100_v23 }
 0x28e   :  { %658 = vadd.xlane.f32.xlu1 %v656_v24  ;;  %v10893_v24 = vor.u32 %v15485_v21, %v10892_v19  ;;  %v10982_v19 = vld [vmem:[#allocation6 + $0xb8] sm:$0xf0] }
 0x28f   :  { %v644_v25 = vpop.xlane.xlu0 %643 }
 0x290   :  { %v653_v26 = vmul.f32 %v18097_v20, %v644_v25  ;;  %v10894_v25 = vld [vmem:[#allocation6 + $0x18] sm:$0xf0]  ;;  %1008 = vmatpush.bf16.msra.mxu0 %v10893_v24  ;;  %v10956_v24 = vld [vmem:[#allocation6 + $0x70] sm:$0xf] }
 0x291   :  { %v10897_v29 = vor.u32 %v15482_v22, %v10894_v25  ;;  %v10985_v22 = vor.u32 %v15502_v17, %v10982_v19  ;;  %v15499_v25 = vld [vmem:[#allocation6 + $0x84] sm:$0xf0] }
 0x292   :  { %v18105_v27 = vsub.f32 %v638_v1, %v653_v26  ;;  %v15516_v1 = vld [vmem:[#allocation6 + $0x10c] sm:$0xf0]  ;;  %v10972_v26 = vld [vmem:[#allocation6 + $0x98] sm:$0xf] }
 0x293   :  { %v11021_v3 = vor.u32 %v15516_v1, %v11020_v0  ;;  %1022 = vmatpush.bf16.msra.mxu1 %v10897_v29  ;;  %v11033_v0 = vor.u32 %v15514_v61, %v11030_v62  ;;  %v10958_v29 = vld [vmem:[#allocation6 + $0x88] sm:$0xf0]  ;;  %v16705_v61 = vld [vmem:[#allocation4] ss:$0 sm:$0xff] }
 0x294   :  { %v657_v28 = vmul.f32 %v18105_v27, %v18105_v27  ;;  %1057 = vmatpush.bf16.msrb.mxu0 %v11077_v38 }
 0x295   :  { %1031 = vmatpush.bf16.msra.mxu2 %v11021_v3  ;;  %v15486_v3 = vld [vmem:[#allocation6 + $0x1c] sm:$0xf0] }
 0x296   :  { %660 = vadd.xlane.f32.xlu1 %v657_v28  ;;  %v15504_v28 = vld [vmem:[#allocation6 + $0xac] sm:$0xf0]  ;;  %v10901_v5 = vor.u32 %v15486_v3, %v10900_v2 }
 0x297   :  { %v10973_v30 = vor.u32 %v15504_v28, %v10972_v26  ;;  %1071 = vmatpush.bf16.msrb.mxu1 %v11081_v39  ;;  %v15496_v26 = vld [vmem:[#allocation6 + $0x74] sm:$0xf] }
 0x298   :  { %1058 = vmatpush.bf16.msrb.mxu0 %v11053_v48  ;;  %v10961_v31 = vor.u32 %v15496_v26, %v10958_v29 }
 0x299   :  { %1032 = vmatpush.bf16.msra.mxu2 %v10997_v15  ;;  %v10980_v15 = vld [vmem:[#allocation6 + $0xa0] sm:$0xf] }
 0x29a   :  { %v10981_v18 = vor.u32 %v15505_v16, %v10980_v15 }
 0x29b   :  { %1072 = vmatpush.bf16.msrb.mxu1 %v11057_v51 }
 0x29c   :  { %1059 = vmatpush.bf16.msrb.mxu0 %v11029_v60 }
 0x29d   :  { %1033 = vmatpush.bf16.msra.mxu2 %v10973_v30  ;;  %v10957_v30 = vor.u32 %v15499_v25, %v10956_v24 }
 0x29f   :  { %1073 = vmatpush.bf16.msrb.mxu1 %v11033_v0 }
 0x2a0   :  { %1060 = vmatpush.bf16.msrb.mxu0 %v11005_v11 }
 0x2a1   :  { %1034 = vmatpush.bf16.msra.mxu2 %v10949_v43  ;;  %v15487_v43 = vld [vmem:[#allocation6 + $0x24] sm:$0xf0] }
 0x2a2   :  { %v10909_v48 = vor.u32 %v15487_v43, %v10908_v42 }
 0x2a3   :  { %1074 = vmatpush.bf16.msrb.mxu1 %v11009_v14 }
 0x2a4   :  { %1061 = vmatpush.bf16.msrb.mxu0 %v10981_v18 }
 0x2a5   :  { %1035 = vmatpush.bf16.msra.mxu2 %v10925_v55 }
 0x2a7   :  { %1075 = vmatpush.bf16.msrb.mxu1 %v10985_v22 }
 0x2a8   :  { %1062 = vmatpush.bf16.msrb.mxu0 %v10957_v30 }
 0x2a9   :  { %1036 = vmatpush.bf16.msra.mxu2 %v10901_v5  ;;  %v18119_v5 = vld [vmem:[#allocation7] sm:$0x3f] }
 0x2aa   :  { %v752_v6 = vperm.slane %v18119_v5, 3  ;;  %v749_v13 = vperm.slane %v18119_v5, 0  ;;  %v753_v17 = vperm.slane %v18119_v5, 4  ;;  %v754_v18 = vperm.slane %v18119_v5, 5 }
 0x2ab   :  { %1076 = vmatpush.bf16.msrb.mxu1 %v10961_v31 }
 0x2ac   :  { %1063 = vmatpush.bf16.msrb.mxu0 %v10933_v40 }
 0x2af   :  { %1077 = vmatpush.bf16.msrb.mxu1 %v10937_v41 }
 0x2b0   :  { %1064 = vmatpush.bf16.msrb.mxu0 %v10909_v48 }
 0x2b3   :  { %1078 = vmatpush.bf16.msrb.mxu1 %v10913_v49  ;;  %v16706_v49 = vld [vmem:[%s18931_s12] ss:$0 sm:$0xff] }
 0x301   :  { %v659_v63 = vpop.xlane.xlu1 %658 }
 0x302   :  { %v662_v1 = vmul.f32 %v659_v63, %v18097_v20 }
 0x304   :  { %v664_v9 = vadd.f32 1e-12, %v662_v1 }
 0x306   :  { %16724 = vrsqrt.f32 %v664_v9  ;;  %vm672_vm2 = vweird.f32 %v664_v9 }
 0x309   :  { %v661_v21 = vpop.xlane.xlu1 %660 }
 0x30a   :  { %v663_v28 = vmul.f32 %v661_v21, %v18097_v20 }
 0x30c   :  { %v16725_v34 = vpop.eup %16724  ;;  %v665_v35 = vadd.f32 1e-12, %v663_v28 }
 0x30d   :  { %v667_v38 = vmul.f32 %v16725_v34, %v664_v9  ;;  %vm673_vm1 = vweird.f32 %v16725_v34 }
 0x30e   :  { %16726 = vrsqrt.f32 %v665_v35  ;;  %vm674_vm3 = vmor %vm672_vm2, %vm673_vm1  ;;  %vm682_vm5 = vweird.f32 %v665_v35 }
 0x30f   :  { %v668_v39 = vmul.f32 %v16725_v34, %v667_v38 }
 0x311   :  { %v669_v46 = vmul.f32 0.5, %v668_v39  ;;  %v750_v39 = vperm.slane %v18119_v5, 1 }
 0x313   :  { %v670_v47 = vsub.f32 1.5, %v669_v46 }
 0x314   :  { %v16727_v50 = vpop.eup %16726 }
 0x315   :  { %v671_v51 = vmul.f32 %v16725_v34, %v670_v47  ;;  %v677_v52 = vmul.f32 %v16727_v50, %v665_v35  ;;  %vm683_vm4 = vweird.f32 %v16727_v50 }
 0x316   :  { %vm684_vm6 = vmor %vm682_vm5, %vm683_vm4 }
 0x317   :  { %v678_v53 = vmul.f32 %v16727_v50, %v677_v52  ;;  %v675_v54 = vsel %vm674_vm3, %v16725_v34, %v671_v51  ;;  %v16707_v52 = vld [vmem:[%s18931_s12 + $0x1] ss:$0 sm:$0xff] }
 0x318   :  { %v686_v58 = vmul.f32 %v675_v54, %v18100_v23 }
 0x319   :  { %v679_v55 = vmul.f32 0.5, %v678_v53 }
 0x31a   :  { %v691_v62 = vmul.f32 %v16704_v57, %v686_v58 }
 0x31b   :  { %v680_v56 = vsub.f32 1.5, %v679_v55 }
 0x31c   :  { %v18113_v1 = vadd.f32 %v16705_v61, %v691_v62 }
 0x31d   :  { %v681_v59 = vmul.f32 %v16727_v50, %v680_v56 }
 0x31f   :  { %v685_v60 = vsel %vm684_vm6, %v16727_v50, %v681_v59 }
 0x320   :  { %v687_v63 = vmul.f32 %v685_v60, %v18105_v27  ;;  %v751_v27 = vperm.slane %v18119_v5, 2 }
 0x322   :  { %v692_v0 = vmul.f32 %v16704_v57, %v687_v63 }
 0x324   :  { %v18115_v2 = vadd.f32 %v16705_v61, %v692_v0 }
 0x326   :  { %v698_v3 = vpack.c.bf16 %v18115_v2, %v18113_v1 }
 0x328   :  { %1009 = vmatmul.bf16.vlgmr.msra.gmra.mxu0 %v698_v3  ;;  %1023 = vmatmul.bf16.vlgmr.msra.gmra.mxu1 %v698_v3 }
 0x329   :  { %1037 = vmatmul.bf16.vlgmr.msra.gmra.mxu2 %v698_v3  ;;  %1051 = vmatmul.bf16.vlgmr.msra.gmra.mxu3 %v698_v3 }
 0x338   :  { %1065 = vmatmul.bf16.vlgmr.msrb.gmra.mxu0 %v698_v3  ;;  %1079 = vmatmul.bf16.vlgmr.msrb.gmra.mxu1 %v698_v3 }
 0x3a5   :  { %v1010_v23 = vpop.f32.mrf.mxu0  ;;  %v1024_v4 = vpop.f32.mrf.mxu1 }
 0x3a6   :  { %v1011_v16 = vadd.f32 %v1010_v23, %v749_v13  ;;  %v1025_v43 = vadd.f32 %v1024_v4, %v750_v39 }
 0x3a8   :  { %v1085_v28 = vpack.c.bf16 %v1011_v16, %v1011_v16  ;;  %v1139_v45 = vpack.c.bf16 %v1025_v43, %v1025_v43 }
 0x3ac   :  { %v1038_v7 = vpop.f32.mrf.mxu2  ;;  %v1052_v8 = vpop.f32.mrf.mxu3 }
 0x3ad   :  { %v1039_v9 = vadd.f32 %v1038_v7, %v751_v27  ;;  %v1053_v10 = vadd.f32 %v1052_v8, %v752_v6  ;;  %v1012_v11 = vpop.f32.mrf.mxu0  ;;  %v1026_v12 = vpop.f32.mrf.mxu1 }
 0x3ae   :  { %v1013_v35 = vadd.f32 %v1012_v11, %v749_v13  ;;  %v1027_v46 = vadd.f32 %v1026_v12, %v750_v39 }
 0x3af   :  { %v1086_v14 = vpack.c.bf16 %v1039_v9, %v1039_v9  ;;  %v1140_v15 = vpack.c.bf16 %v1053_v10, %v1053_v10 }
 0x3b0   :  { %v1188_v40 = vpack.c.bf16 %v1013_v35, %v1013_v35  ;;  %v1240_v47 = vpack.c.bf16 %v1027_v46, %v1027_v46 }
 0x3b1   :  { %1094 = vmatpush.bf16.xpose.msrb.mxu2 %v1086_v14 }
 0x3b4   :  { %v1040_v19 = vpop.f32.mrf.mxu2  ;;  %v1054_v21 = vpop.f32.mrf.mxu3 }
 0x3b5   :  { %v1041_v22 = vadd.f32 %v1040_v19, %v751_v27  ;;  %v1055_v24 = vadd.f32 %v1054_v21, %v752_v6  ;;  %v1066_v25 = vpop.f32.mrf.mxu0  ;;  %v1080_v26 = vpop.f32.mrf.mxu1 }
 0x3b6   :  { %v1067_v29 = vadd.f32 %v1066_v25, %v753_v17  ;;  %v1081_v30 = vadd.f32 %v1080_v26, %v754_v18 }
 0x3b7   :  { %v1189_v31 = vpack.c.bf16 %v1041_v22, %v1041_v22  ;;  %v1241_v32 = vpack.c.bf16 %v1055_v24, %v1055_v24 }
 0x3b8   :  { %v1118_v33 = vpack.c.bf16 %v1067_v29, %v1067_v29  ;;  %v1168_v34 = vpack.c.bf16 %v1081_v30, %v1081_v30  ;;  %1095 = vmatmul.bf16.vlgmr.msrb.gmra.mxu2 %v1085_v28 }
 0x3b9   :  { %1148 = vmatpush.bf16.xpose.msra.mxu2 %v1140_v15  ;;  %1197 = vmatpush.bf16.xpose.msra.mxu1 %v1189_v31 }
 0x3ba   :  { %v1173_v36 = vsel %vm1122_vm7, %v1168_v34, 0  ;;  %v1124_v37 = vsel %vm1122_vm7, %v1118_v33, 0 }
 0x3bb   :  { %1133 = vmatpush.bf16.msrb.mxu3 %v1124_v37 }
 0x3bd   :  { %v1068_v38 = vpop.f32.mrf.mxu0  ;;  %v1082_v48 = vpop.f32.mrf.mxu1 }
 0x3be   :  { %v1069_v41 = vadd.f32 %v1068_v38, %v753_v17  ;;  %v1083_v33 = vadd.f32 %v1082_v48, %v754_v18  ;;  %v15535_v18 = vld [vmem:[#allocation9 + $0x28] sm:$0xff] }
 0x3bf   :  { %1182 = vmatpush.bf16.msra.mxu3 %v1173_v36 }
 0x3c0   :  { %v1220_v42 = vpack.c.bf16 %v1069_v41, %v1069_v41  ;;  %1198 = vmatmul.bf16.vlgmr.msra.gmra.mxu1 %v1188_v40  ;;  %v1269_v35 = vpack.c.bf16 %v1083_v33, %v1083_v33  ;;  %v15537_v40 = vld [vmem:[#allocation9 + $0x38] sm:$0xff]  ;;  %v15536_v41 = vld [vmem:[#allocation9 + $0x30] sm:$0xff] }
 0x3c1   :  { %1249 = vmatpush.bf16.xpose.msrb.mxu2 %v1241_v32  ;;  %1423 = vmatpush.bf16.msra.mxu0 %v15537_v40  ;;  %v15559_v40 = vld [vmem:[#allocation15 + $0x64] sm:$0xf0] }
 0x3c2   :  { %v1225_v44 = vsel %vm1122_vm7, %v1220_v42, 0  ;;  %v1274_v39 = vsel %vm1122_vm7, %v1269_v35, 0  ;;  %v15560_v35 = vld [vmem:[#allocation15 + $0x74] sm:$0xf] }
 0x3c3   :  { %1234 = vmatpush.bf16.msrb.mxu1 %v1225_v44 }
 0x3c5   :  { %1424 = vmatpush.bf16.msra.mxu0 %v15536_v41  ;;  %v15558_v41 = vld [vmem:[#allocation15 + $0x64] sm:$0xf] }
 0x3c8   :  { %1149 = vmatmul.bf16.vlgmr.msra.gmra.mxu2 %v1139_v45  ;;  %v15534_v45 = vld [vmem:[#allocation9 + $0x20] sm:$0xff] }
 0x3c9   :  { %1425 = vmatpush.bf16.msra.mxu0 %v15535_v18  ;;  %v15557_v18 = vld [vmem:[#allocation15 + $0x54] sm:$0xf0] }
 0x3cd   :  { %1426 = vmatpush.bf16.msra.mxu0 %v15534_v45  ;;  %v15556_v45 = vld [vmem:[#allocation15 + $0x54] sm:$0xf] }
 0x3d8   :  { %1250 = vmatmul.bf16.vlgmr.msrb.gmra.mxu2 %v1240_v47 }
 0x43b   :  { %v1096_v50 = vpop.f32.mrf.mxu2 }
 0x43c   :  { %v1100_v51 = vmul.f32 0.125, %v1096_v50  ;;  %v15532_v50 = vld [vmem:[#allocation9 + $0x10] sm:$0xff] }
 0x43d   :  { %v1199_v53 = vpop.f32.mrf.mxu1 }
 0x43e   :  { %v1203_v54 = vmul.f32 0.125, %v1199_v53  ;;  %v1104_v55 = vadd.f32 %v16706_v49, %v1100_v51 }
 0x440   :  { %v1106_v56 = vsel %vm1105_vm8, %v1104_v55, -inf  ;;  %v1207_v57 = vadd.f32 %v16707_v52, %v1203_v54 }
 0x441   :  { %1107 = vmax.xlane.f32.xlu2 %v1106_v56  ;;  %v15530_v56 = vld [vmem:[#allocation9] sm:$0xff] }
 0x442   :  { %v1208_v58 = vsel %vm1105_vm8, %v1207_v57, -inf }
 0x443   :  { %v1098_v59 = vpop.f32.mrf.mxu2  ;;  %1209 = vmax.xlane.f32.xlu1 %v1208_v58  ;;  %v15544_v58 = vld [vmem:[#allocation9 + $0x70] sm:$0xff] }
 0x444   :  { %v15543_v59 = vld [vmem:[#allocation9 + $0x68] sm:$0xff] }
 0x445   :  { %v1201_v60 = vpop.f32.mrf.mxu1 }
 0x446   :  { %v15542_v60 = vld [vmem:[#allocation9 + $0x60] sm:$0xff] }
 0x44b   :  { %v1150_v61 = vpop.f32.mrf.mxu2 }
 0x44c   :  { %v1154_v62 = vmul.f32 0.125, %v1150_v61  ;;  %v15541_v61 = vld [vmem:[#allocation9 + $0x58] sm:$0xff] }
 0x44e   :  { %v1155_v63 = vadd.f32 %v16706_v49, %v1154_v62  ;;  %v15533_v49 = vld [vmem:[#allocation9 + $0x18] sm:$0xff]  ;;  %v15540_v62 = vld [vmem:[#allocation9 + $0x50] sm:$0xff] }
 0x44f   :  { %1427 = vmatpush.bf16.msra.mxu0 %v15533_v49  ;;  %v11184_v49 = vld [vmem:[#allocation15 + $0x40] sm:$0xf] }
 0x450   :  { %v1156_v0 = vsel %vm1105_vm8, %v1155_v63, -inf }
 0x451   :  { %1157 = vmax.xlane.f32.xlu2 %v1156_v0  ;;  %v15538_v0 = vld [vmem:[#allocation9 + $0x40] sm:$0xff] }
 0x453   :  { %v1152_v3 = vpop.f32.mrf.mxu2  ;;  %1428 = vmatpush.bf16.msra.mxu0 %v15532_v50  ;;  %v15555_v50 = vld [vmem:[#allocation15 + $0x44] sm:$0xf0] }
 0x45b   :  { %v1251_v23 = vpop.f32.mrf.mxu2 }
 0x45c   :  { %v1255_v4 = vmul.f32 0.125, %v1251_v23 }
 0x45e   :  { %v1256_v27 = vadd.f32 %v16707_v52, %v1255_v4  ;;  %v15531_v52 = vld [vmem:[#allocation9 + $0x8] sm:$0xff] }
 0x45f   :  { %1429 = vmatpush.bf16.msra.mxu0 %v15531_v52  ;;  %v11185_v52 = vor.u32 %v15555_v50, %v11184_v49 }
 0x460   :  { %v1257_v6 = vsel %vm1105_vm8, %v1256_v27, -inf }
 0x461   :  { %1258 = vmax.xlane.f32.xlu0 %v1257_v6 }
 0x463   :  { %v1253_v7 = vpop.f32.mrf.mxu2  ;;  %1430 = vmatpush.bf16.msra.mxu0 %v15530_v56  ;;  %v15553_v56 = vld [vmem:[#allocation15 + $0x34] sm:$0xf0] }
 0x4b4   :  { %v1108_v8 = vpop.xlane.xlu2 %1107 }
 0x4b5   :  { %v1109_v9 = vsub.f32 %v1104_v55, %v1108_v8 }
 0x4b6   :  { %v1210_v10 = vpop.xlane.xlu1 %1209 }
 0x4b7   :  { %v1110_v11 = vmul.f32 1.442695, %v1109_v9  ;;  %v1211_v12 = vsub.f32 %v1207_v57, %v1210_v10  ;;  %v15545_v57 = vld [vmem:[#allocation9 + $0x78] sm:$0xff] }
 0x4b8   :  { %1437 = vmatpush.bf16.msra.mxu1 %v15545_v57  ;;  %v15552_v57 = vld [vmem:[#allocation15 + $0x34] sm:$0xf] }
 0x4b9   :  { %16728 = vpow2.f32 %v1110_v11  ;;  %v1212_v13 = vmul.f32 1.442695, %v1211_v12 }
 0x4bb   :  { %16730 = vpow2.f32 %v1212_v13  ;;  %v16708_v13 = vld [vmem:[#allocation10] ss:$0 sm:$0xff] }
 0x4bc   :  { %1438 = vmatpush.bf16.msra.mxu1 %v15544_v58 }
 0x4bf   :  { %v16729_v14 = vpop.eup %16728 }
 0x4c0   :  { %v1112_v15 = vsel %vm1105_vm8, %v16729_v14, 0.0  ;;  %1439 = vmatpush.bf16.msra.mxu1 %v15543_v59  ;;  %v11178_v59 = vld [vmem:[#allocation15 + $0x38] sm:$0xf0] }
 0x4c1   :  { %1113 = vadd.xlane.f32.xlu2 %v1112_v15  ;;  %v16731_v17 = vpop.eup %16730 }
 0x4c2   :  { %v1214_v22 = vsel %vm1105_vm8, %v16731_v17, 0.0 }
 0x4c4   :  { %v1158_v16 = vpop.xlane.xlu2 %1157  ;;  %1440 = vmatpush.bf16.msra.mxu1 %v15542_v60  ;;  %v11181_v60 = vor.u32 %v15552_v57, %v11178_v59 }
 0x4c5   :  { %v1159_v19 = vsub.f32 %v1155_v63, %v1158_v16  ;;  %v15539_v63 = vld [vmem:[#allocation9 + $0x48] sm:$0xff] }
 0x4c7   :  { %v1160_v21 = vmul.f32 1.442695, %v1159_v19 }
 0x4c8   :  { %1441 = vmatpush.bf16.msra.mxu1 %v15541_v61  ;;  %v11168_v61 = vld [vmem:[#allocation15 + $0x20] sm:$0xf] }
 0x4c9   :  { %16732 = vpow2.f32 %v1160_v21  ;;  %1215 = vadd.xlane.f32.xlu2 %v1214_v22 }
 0x4cc   :  { %1442 = vmatpush.bf16.msra.mxu1 %v15540_v62  ;;  %v15551_v62 = vld [vmem:[#allocation15 + $0x24] sm:$0xf0] }
 0x4cf   :  { %v16733_v24 = vpop.eup %16732 }
 0x4d0   :  { %v1162_v25 = vsel %vm1105_vm8, %v16733_v24, 0.0  ;;  %1443 = vmatpush.bf16.msra.mxu1 %v15539_v63  ;;  %v15550_v63 = vld [vmem:[#allocation15 + $0x24] sm:$0xf] }
 0x4d1   :  { %1163 = vadd.xlane.f32.xlu0 %v1162_v25 }
 0x4d4   :  { %v1259_v26 = vpop.xlane.xlu0 %1258  ;;  %1444 = vmatpush.bf16.msra.mxu1 %v15538_v0  ;;  %v11169_v0 = vor.u32 %v15551_v62, %v11168_v61 }
 0x4d5   :  { %v1260_v28 = vsub.f32 %v1256_v27, %v1259_v26 }
 0x4d7   :  { %v1261_v29 = vmul.f32 1.442695, %v1260_v28 }
 0x4d9   :  { %16734 = vpow2.f32 %v1261_v29 }
 0x4df   :  { %v16735_v30 = vpop.eup %16734 }
 0x4e0   :  { %v1263_v31 = vsel %vm1105_vm8, %v16735_v30, 0.0 }
 0x4e1   :  { %1264 = vadd.xlane.f32.xlu1 %v1263_v31 }
 0x534   :  { %v1114_v32 = vpop.xlane.xlu2 %1113 }
 0x535   :  { %16736 = vrcp.f32 %v1114_v32 }
 0x53b   :  { %v16737_v34 = vpop.eup %16736 }
 0x53c   :  { %v1116_v36 = vmul.f32 %v16737_v34, %v16729_v14  ;;  %v1216_v37 = vpop.xlane.xlu2 %1215  ;;  %v15561_v34 = vld [vmem:[#allocation15 + $0x74] sm:$0xf0] }
 0x53d   :  { %16738 = vrcp.f32 %v1216_v37  ;;  %v11210_v37 = vld [vmem:[#allocation15 + $0x78] sm:$0xf0] }
 0x53e   :  { %v1117_v38 = vpack.c.bf16 %v1116_v36, %v1116_v36 }
 0x540   :  { %11082 = vmatmul.msk.bf16.vlgmr.msrb.gmra.mxu3 %vm1105_vm8, %v1117_v38  ;;  %v11213_v38 = vor.u32 %v15560_v35, %v11210_v37 }
 0x541   :  { %1283 = vmatpush.bf16.msrb.mxu3 %v1274_v39  ;;  %v11200_v39 = vld [vmem:[#allocation15 + $0x60] sm:$0xf] }
 0x543   :  { %v16739_v42 = vpop.eup %16738 }
 0x544   :  { %v1218_v43 = vmul.f32 %v16739_v42, %v16731_v17  ;;  %v1164_v44 = vpop.xlane.xlu0 %1163  ;;  %v11201_v42 = vor.u32 %v15559_v40, %v11200_v39  ;;  %v16709_v39 = vld [vmem:[#allocation12] ss:$0 sm:$0xff] }
 0x545   :  { %16740 = vrcp.f32 %v1164_v44 }
 0x546   :  { %v1219_v5 = vpack.c.bf16 %v1218_v43, %v1218_v43  ;;  %v11202_v43 = vld [vmem:[#allocation15 + $0x68] sm:$0xf0] }
 0x547   :  { %v11205_v44 = vor.u32 %v15558_v41, %v11202_v43 }
 0x548   :  { %11084 = vmatmul.msk.bf16.vlgmr.msrb.gmra.mxu1 %vm1105_vm8, %v1219_v5  ;;  %v11192_v5 = vld [vmem:[#allocation15 + $0x50] sm:$0xf] }
 0x54b   :  { %v16741_v46 = vpop.eup %16740 }
 0x54c   :  { %v1166_v47 = vmul.f32 %v16741_v46, %v16733_v24  ;;  %v11193_v46 = vor.u32 %v15557_v18, %v11192_v5 }
 0x54e   :  { %v1167_v48 = vpack.c.bf16 %v1166_v47, %v1166_v47  ;;  %v11194_v47 = vld [vmem:[#allocation15 + $0x58] sm:$0xf0] }
 0x550   :  { %11083 = vmatmul.msk.bf16.vlgmr.msra.gmra.mxu3 %vm1105_vm8, %v1167_v48  ;;  %v11197_v48 = vor.u32 %v15556_v45, %v11194_v47 }
 0x551   :  { %1622 = vmatpush.bf16.msra.mxu3 %v11213_v38 }
 0x554   :  { %v1265_v51 = vpop.xlane.xlu1 %1264 }
 0x555   :  { %16742 = vrcp.f32 %v1265_v51  ;;  %1623 = vmatpush.bf16.msra.mxu3 %v11205_v44  ;;  %v15554_v51 = vld [vmem:[#allocation15 + $0x44] sm:$0xf]  ;;  %v16710_v44 = vld [vmem:[#allocation13] ss:$0 sm:$0xff] }
 0x559   :  { %1624 = vmatpush.bf16.msra.mxu3 %v11197_v48 }
 0x55b   :  { %v16743_v53 = vpop.eup %16742 }
 0x55c   :  { %v1267_v54 = vmul.f32 %v16743_v53, %v16735_v30  ;;  %v11186_v53 = vld [vmem:[#allocation15 + $0x48] sm:$0xf0] }
 0x55e   :  { %v1268_v55 = vpack.c.bf16 %v1267_v54, %v1267_v54  ;;  %v11189_v54 = vor.u32 %v15554_v51, %v11186_v53 }
 0x560   :  { %11085 = vmatmul.msk.bf16.vlgmr.msrb.gmra.mxu3 %vm1105_vm8, %v1268_v55  ;;  %v11176_v55 = vld [vmem:[#allocation15 + $0x30] sm:$0xf] }
 0x561   :  { %1625 = vmatpush.bf16.msra.mxu3 %v11189_v54  ;;  %v11177_v58 = vor.u32 %v15553_v56, %v11176_v55 }
 0x565   :  { %1626 = vmatpush.bf16.msra.mxu3 %v11181_v60 }
 0x5c3   :  { %v1135_v3 = vpop.f32.mrf.mxu3 }
 0x5c5   :  { %v1236_v23 = vpop.f32.mrf.mxu1 }
 0x5c6   :  { %v1289_v4 = vpack.c.bf16 %v1236_v23, %v1135_v3  ;;  %v11170_v3 = vld [vmem:[#allocation15 + $0x28] sm:$0xf0] }
 0x5c7   :  { %v11173_v23 = vor.u32 %v15550_v63, %v11170_v3 }
 0x5c8   :  { %1431 = vmatmul.bf16.vlgmr.msra.gmra.mxu0 %v1289_v4  ;;  %v11160_v4 = vld [vmem:[#allocation15 + $0x10] sm:$0xf] }
 0x5c9   :  { %1627 = vmatpush.bf16.msra.mxu3 %v11173_v23 }
 0x5cb   :  { %v1137_v27 = vpop.f32.mrf.mxu3 }
 0x5cc   :  { %v15549_v27 = vld [vmem:[#allocation15 + $0x14] sm:$0xf0] }
 0x5cd   :  { %v1238_v6 = vpop.f32.mrf.mxu1 }
 0x5ce   :  { %v15548_v6 = vld [vmem:[#allocation15 + $0x14] sm:$0xf] }
 0x5d3   :  { %v1184_v7 = vpop.f32.mrf.mxu3 }
 0x5db   :  { %v1186_v8 = vpop.f32.mrf.mxu3 }
 0x5dc   :  { %v11162_v8 = vld [vmem:[#allocation15 + $0x18] sm:$0xf0] }
 0x5e3   :  { %v1285_v9 = vpop.f32.mrf.mxu3 }
 0x5e4   :  { %v1290_v10 = vpack.c.bf16 %v1285_v9, %v1184_v7  ;;  %v11161_v7 = vor.u32 %v15549_v27, %v11160_v4  ;;  %v11152_v9 = vld [vmem:[#allocation15] sm:$0xf] }
 0x5e6   :  { %1445 = vmatmul.bf16.vlgmr.msra.gmra.mxu1 %v1290_v10  ;;  %v15547_v10 = vld [vmem:[#allocation15 + $0x4] sm:$0xf0] }
 0x5eb   :  { %v1287_v11 = vpop.f32.mrf.mxu3 }
 0x645   :  { %v1432_v12 = vpop.f32.mrf.mxu0 }
 0x646   :  { %v1433_v14 = vadd.f32 %v16708_v13, %v1432_v12  ;;  %v11165_v12 = vor.u32 %v15548_v6, %v11162_v8 }
 0x648   :  { %1628 = vmatpush.bf16.msra.mxu3 %v11165_v12 }
 0x64d   :  { %v1434_v19 = vpop.f32.mrf.mxu0 }
 0x64e   :  { %v1435_v21 = vadd.f32 %v16708_v13, %v1434_v19  ;;  %v15546_v13 = vld [vmem:[#allocation15 + $0x4] sm:$0xf] }
 0x663   :  { %v1446_v15 = vpop.f32.mrf.mxu1 }
 0x664   :  { %v1447_v16 = vadd.f32 %v1446_v15, %v1433_v14  ;;  %v11154_v14 = vld [vmem:[#allocation15 + $0x8] sm:$0xf0] }
 0x666   :  { %v1451_v17 = vadd.f32 %v1447_v16, %v18113_v1  ;;  %v11153_v16 = vor.u32 %v15547_v10, %v11152_v9  ;;  %v15569_v9 = vld [vmem:[#allocation18 + $0x38] sm:$0xff] }
 0x667   :  { %v15577_v10 = vld [vmem:[#allocation18 + $0x78] sm:$0xff]  ;;  %1946 = vmatpush.bf16.msrb.mxu0 %v15569_v9 }
 0x668   :  { %1455 = vadd.xlane.f32.xlu0 %v1451_v17  ;;  %1960 = vmatpush.bf16.msrb.mxu1 %v15577_v10 }
 0x66b   :  { %v1448_v22 = vpop.f32.mrf.mxu1 }
 0x66c   :  { %v1449_v24 = vadd.f32 %v1448_v22, %v1435_v21 }
 0x66e   :  { %v1452_v25 = vadd.f32 %v1449_v24, %v18115_v2  ;;  %v11208_v2 = vld [vmem:[#allocation15 + $0x70] sm:$0xf] }
 0x66f   :  { %v11209_v36 = vor.u32 %v15561_v34, %v11208_v2 }
 0x670   :  { %1457 = vadd.xlane.f32.xlu1 %v1452_v25 }
 0x671   :  { %1608 = vmatpush.bf16.msra.mxu2 %v11209_v36 }
 0x675   :  { %1609 = vmatpush.bf16.msra.mxu2 %v11201_v42 }
 0x679   :  { %1610 = vmatpush.bf16.msra.mxu2 %v11193_v46 }
 0x67d   :  { %1611 = vmatpush.bf16.msra.mxu2 %v11185_v52 }
 0x681   :  { %1612 = vmatpush.bf16.msra.mxu2 %v11177_v58 }
 0x685   :  { %1613 = vmatpush.bf16.msra.mxu2 %v11169_v0 }
 0x689   :  { %1614 = vmatpush.bf16.msra.mxu2 %v11161_v7 }
 0x68d   :  { %1615 = vmatpush.bf16.msra.mxu2 %v11153_v16 }
 0x6db   :  { %v1456_v26 = vpop.xlane.xlu0 %1455 }
 0x6dc   :  { %v1459_v28 = vmul.f32 %v1456_v26, %v18097_v20 }
 0x6de   :  { %v18152_v29 = vsub.f32 %v1451_v17, %v1459_v28  ;;  %v11157_v17 = vor.u32 %v15546_v13, %v11154_v14 }
 0x6e0   :  { %v1463_v30 = vmul.f32 %v18152_v29, %v18152_v29  ;;  %1629 = vmatpush.bf16.msra.mxu3 %v11157_v17 }
 0x6e2   :  { %1465 = vadd.xlane.f32.xlu2 %v1463_v30 }
 0x6e3   :  { %v1458_v31 = vpop.xlane.xlu1 %1457 }
 0x6e4   :  { %v1460_v1 = vmul.f32 %v1458_v31, %v18097_v20 }
 0x6e6   :  { %v18157_v32 = vsub.f32 %v1452_v25, %v1460_v1 }
 0x6e8   :  { %v1464_v33 = vmul.f32 %v18157_v32, %v18157_v32 }
 0x6ea   :  { %1467 = vadd.xlane.f32.xlu0 %v1464_v33 }
 0x755   :  { %v1466_v11 = vpop.xlane.xlu2 %1465 }
 0x756   :  { %v1469_v15 = vmul.f32 %v1466_v11, %v18097_v20 }
 0x758   :  { %v1471_v19 = vadd.f32 1e-12, %v1469_v15 }
 0x75a   :  { %16744 = vrsqrt.f32 %v1471_v19  ;;  %vm1479_vm10 = vweird.f32 %v1471_v19 }
 0x75d   :  { %v1468_v21 = vpop.xlane.xlu0 %1467 }
 0x75e   :  { %v1470_v22 = vmul.f32 %v1468_v21, %v18097_v20  ;;  %v15576_v21 = vld [vmem:[#allocation18 + $0x70] sm:$0xff] }
 0x75f   :  { %1961 = vmatpush.bf16.msrb.mxu1 %v15576_v21 }
 0x760   :  { %v16745_v24 = vpop.eup %16744  ;;  %v1472_v25 = vadd.f32 1e-12, %v1470_v22 }
 0x761   :  { %v1474_v26 = vmul.f32 %v16745_v24, %v1471_v19  ;;  %vm1480_vm9 = vweird.f32 %v16745_v24  ;;  %v15568_v19 = vld [vmem:[#allocation18 + $0x30] sm:$0xff] }
 0x762   :  { %16746 = vrsqrt.f32 %v1472_v25  ;;  %vm1481_vm11 = vmor %vm1479_vm10, %vm1480_vm9  ;;  %vm1489_vm13 = vweird.f32 %v1472_v25  ;;  %1947 = vmatpush.bf16.msrb.mxu0 %v15568_v19 }
 0x763   :  { %v1475_v28 = vmul.f32 %v16745_v24, %v1474_v26 }
 0x765   :  { %v1476_v30 = vmul.f32 0.5, %v1475_v28 }
 0x767   :  { %v1477_v31 = vsub.f32 1.5, %v1476_v30 }
 0x768   :  { %v16747_v1 = vpop.eup %16746 }
 0x769   :  { %v1478_v33 = vmul.f32 %v16745_v24, %v1477_v31  ;;  %v1484_v2 = vmul.f32 %v16747_v1, %v1472_v25  ;;  %vm1490_vm12 = vweird.f32 %v16747_v1 }
 0x76a   :  { %vm1491_vm14 = vmor %vm1489_vm13, %vm1490_vm12 }
 0x76b   :  { %v1485_v34 = vmul.f32 %v16747_v1, %v1484_v2  ;;  %v1482_v35 = vsel %vm1481_vm11, %v16745_v24, %v1478_v33 }
 0x76c   :  { %v1493_v38 = vmul.f32 %v1482_v35, %v18152_v29  ;;  %v1522_v29 = vld [vmem:[#allocation16] sm:$0x3] }
 0x76d   :  { %v1486_v36 = vmul.f32 0.5, %v1485_v34  ;;  %v1524_v47 = vperm.slane %v1522_v29, 0  ;;  %v1525_v48 = vperm.slane %v1522_v29, 1 }
 0x76e   :  { %v1498_v43 = vmul.f32 %v16709_v39, %v1493_v38  ;;  %v15567_v38 = vld [vmem:[#allocation18 + $0x28] sm:$0xff] }
 0x76f   :  { %v1487_v37 = vsub.f32 1.5, %v1486_v36  ;;  %1948 = vmatpush.bf16.msrb.mxu0 %v15567_v38 }
 0x770   :  { %v18165_v18 = vadd.f32 %v16710_v44, %v1498_v43 }
 0x771   :  { %v1488_v40 = vmul.f32 %v16747_v1, %v1487_v37 }
 0x773   :  { %v1492_v41 = vsel %vm1491_vm14, %v16747_v1, %v1488_v40 }
 0x774   :  { %v1494_v42 = vmul.f32 %v1492_v41, %v18157_v32 }
 0x776   :  { %v1499_v5 = vmul.f32 %v16709_v39, %v1494_v42  ;;  %v15575_v39 = vld [vmem:[#allocation18 + $0x68] sm:$0xff] }
 0x777   :  { %1962 = vmatpush.bf16.msrb.mxu1 %v15575_v39 }
 0x778   :  { %v18167_v45 = vadd.f32 %v16710_v44, %v1499_v5 }
 0x77a   :  { %v1505_v46 = vpack.c.bf16 %v18167_v45, %v18165_v18 }
 0x77c   :  { %1616 = vmatmul.bf16.vlgmr.msra.gmra.mxu2 %v1505_v46  ;;  %1630 = vmatmul.bf16.vlgmr.msra.gmra.mxu3 %v1505_v46 }
 0x7ff   :  { %v1617_v49 = vpop.f32.mrf.mxu2  ;;  %v1631_v50 = vpop.f32.mrf.mxu3 }
 0x800   :  { %v18171_v51 = vadd.f32 %v1617_v49, %v1524_v47  ;;  %v18173_v32 = vadd.f32 %v1631_v50, %v1525_v48  ;;  %v15566_v50 = vld [vmem:[#allocation18 + $0x20] sm:$0xff] }
 0x801   :  { %1949 = vmatpush.bf16.msrb.mxu0 %v15566_v50 }
 0x802   :  { %v18176_v52 = vmul.f32 0.70710677, %v18171_v51  ;;  %v18179_v53 = vmul.f32 0.70710677, %v18173_v32 }
 0x804   :  { %v1644_v54 = vmul.f32 %v18176_v52, %v18176_v52  ;;  %v1684_v55 = vmul.f32 %v18179_v53, %v18179_v53 }
 0x806   :  { %v18185_v56 = vmin.f32 %v1644_v54, 16.0  ;;  %v18187_v57 = vmin.f32 %v1684_v55, 16.0  ;;  %v15574_v54 = vld [vmem:[#allocation18 + $0x60] sm:$0xff] }
 0x807   :  { %v1619_v58 = vpop.f32.mrf.mxu2  ;;  %v1633_v59 = vpop.f32.mrf.mxu3  ;;  %1963 = vmatpush.bf16.msrb.mxu1 %v15574_v54 }
 0x808   :  { %v1646_v60 = vmul.f32 2.1237322e-06, %v18185_v56  ;;  %v1657_v61 = vmul.f32 3.8918573e-05, %v18185_v56  ;;  %v18191_v62 = vadd.f32 %v1619_v58, %v1524_v47  ;;  %v1697_v63 = vmul.f32 3.8918573e-05, %v18187_v57 }
 0x809   :  { %v18194_v0 = vadd.f32 %v1633_v59, %v1525_v48  ;;  %v1686_v7 = vmul.f32 2.1237322e-06, %v18187_v57 }
 0x80a   :  { %v1647_v3 = vadd.f32 0.00028619796, %v1646_v60  ;;  %v1658_v23 = vadd.f32 0.001143296, %v1657_v61  ;;  %v1698_v4 = vadd.f32 0.001143296, %v1697_v63 }
 0x80b   :  { %v18197_v27 = vmul.f32 0.70710677, %v18191_v62  ;;  %v18202_v8 = vmul.f32 0.70710677, %v18194_v0  ;;  %v1687_v24 = vadd.f32 0.00028619796, %v1686_v7 }
 0x80c   :  { %v1659_v6 = vmul.f32 %v1658_v23, %v18185_v56  ;;  %v1699_v11 = vmul.f32 %v1698_v4, %v18187_v57  ;;  %v1648_v13 = vmul.f32 %v1647_v3, %v18185_v56  ;;  %v15565_v3 = vld [vmem:[#allocation18 + $0x18] sm:$0xff] }
 0x80d   :  { %v1724_v12 = vmul.f32 %v18197_v27, %v18197_v27  ;;  %v1764_v15 = vmul.f32 %v18202_v8, %v18202_v8  ;;  %v1688_v36 = vmul.f32 %v1687_v24, %v18187_v57  ;;  %v15573_v7 = vld [vmem:[#allocation18 + $0x58] sm:$0xff]  ;;  %1950 = vmatpush.bf16.msrb.mxu0 %v15565_v3 }
 0x80e   :  { %v1660_v14 = vadd.f32 0.014752088, %v1659_v6  ;;  %v1700_v16 = vadd.f32 0.014752088, %v1699_v11  ;;  %v1649_v31 = vadd.f32 0.0036580483, %v1648_v13  ;;  %1964 = vmatpush.bf16.msrb.mxu1 %v15573_v7 }
 0x80f   :  { %v18210_v17 = vmin.f32 %v1724_v12, 16.0  ;;  %v18213_v25 = vmin.f32 %v1764_v15, 16.0  ;;  %v1689_v48 = vadd.f32 0.0036580483, %v1688_v36  ;;  %v15564_v13 = vld [vmem:[#allocation18 + $0x10] sm:$0xff] }
 0x810   :  { %v1661_v22 = vmul.f32 %v1660_v14, %v18185_v56  ;;  %v1701_v26 = vmul.f32 %v1700_v16, %v18187_v57  ;;  %v1650_v44 = vmul.f32 %v1649_v31, %v18185_v56  ;;  %v15572_v14 = vld [vmem:[#allocation18 + $0x50] sm:$0xff]  ;;  %v15563_v31 = vld [vmem:[#allocation18 + $0x8] sm:$0xff] }
 0x811   :  { %v1726_v28 = vmul.f32 2.1237322e-06, %v18210_v17  ;;  %v1737_v30 = vmul.f32 3.8918573e-05, %v18210_v17  ;;  %v1766_v37 = vmul.f32 2.1237322e-06, %v18213_v25  ;;  %v1690_v10 = vmul.f32 %v1689_v48, %v18187_v57  ;;  %1951 = vmatpush.bf16.msrb.mxu0 %v15564_v13 }
 0x812   :  { %v1662_v1 = vadd.f32 0.112945676, %v1661_v22  ;;  %v1702_v33 = vadd.f32 0.112945676, %v1701_v26  ;;  %v1777_v43 = vmul.f32 3.8918573e-05, %v18213_v25  ;;  %1965 = vmatpush.bf16.msrb.mxu1 %v15572_v14 }
 0x813   :  { %v1727_v2 = vadd.f32 0.00028619796, %v1726_v28  ;;  %v1738_v34 = vadd.f32 0.001143296, %v1737_v30  ;;  %v1767_v59 = vadd.f32 0.00028619796, %v1766_v37 }
 0x814   :  { %v1663_v35 = vmul.f32 %v1662_v1, %v18185_v56  ;;  %v1703_v40 = vmul.f32 %v1702_v33, %v18187_v57  ;;  %v1778_v60 = vadd.f32 0.001143296, %v1777_v43  ;;  %v1651_v61 = vadd.f32 0.05243302, %v1650_v44  ;;  %v15571_v1 = vld [vmem:[#allocation18 + $0x48] sm:$0xff]  ;;  %v15562_v44 = vld [vmem:[#allocation18] sm:$0xff] }
 0x815   :  { %v1728_v41 = vmul.f32 %v1727_v2, %v18210_v17  ;;  %v1739_v42 = vmul.f32 %v1738_v34, %v18210_v17  ;;  %v1768_v11 = vmul.f32 %v1767_v59, %v18213_v25  ;;  %v1691_v21 = vadd.f32 0.05243302, %v1690_v10  ;;  %1952 = vmatpush.bf16.msrb.mxu0 %v15563_v31 }
 0x816   :  { %v1664_v5 = vadd.f32 0.4994258, %v1663_v35  ;;  %v1704_v46 = vadd.f32 0.4994258, %v1703_v40  ;;  %v1779_v6 = vmul.f32 %v1778_v60, %v18213_v25  ;;  %v1652_v12 = vmul.f32 %v1651_v61, %v18185_v56  ;;  %1966 = vmatpush.bf16.msrb.mxu1 %v15571_v1 }
 0x817   :  { %v1740_v29 = vadd.f32 0.014752088, %v1739_v42  ;;  %v1729_v49 = vadd.f32 0.0036580483, %v1728_v41  ;;  %v1769_v24 = vadd.f32 0.0036580483, %v1768_v11  ;;  %v1692_v39 = vmul.f32 %v1691_v21, %v18187_v57 }
 0x818   :  { %v1665_v47 = vmul.f32 %v1664_v5, %v18185_v56  ;;  %v1705_v55 = vmul.f32 %v1704_v46, %v18187_v57  ;;  %v1780_v16 = vadd.f32 0.014752088, %v1779_v6  ;;  %v1653_v30 = vadd.f32 0.18741608, %v1652_v12  ;;  %v15570_v5 = vld [vmem:[#allocation18 + $0x40] sm:$0xff] }
 0x819   :  { %v1741_v58 = vmul.f32 %v1740_v29, %v18210_v17  ;;  %v1730_v9 = vmul.f32 %v1729_v49, %v18210_v17  ;;  %v1770_v41 = vmul.f32 %v1769_v24, %v18213_v25  ;;  %v1693_v54 = vadd.f32 0.18741608, %v1692_v39  ;;  %1953 = vmatpush.bf16.msrb.mxu0 %v15562_v44 }
 0x81a   :  { %v18229_v63 = vadd.f32 1.0, %v1665_v47  ;;  %v18231_v23 = vadd.f32 1.0, %v1705_v55  ;;  %v1781_v26 = vmul.f32 %v1780_v16, %v18213_v25  ;;  %v1654_v42 = vmul.f32 %v1653_v30, %v18185_v56  ;;  %1967 = vmatpush.bf16.msrb.mxu1 %v15570_v5 }
 0x81b   :  { %v1742_v4 = vadd.f32 0.112945676, %v1741_v58  ;;  %v1731_v19 = vadd.f32 0.05243302, %v1730_v9  ;;  %v1771_v55 = vadd.f32 0.05243302, %v1770_v41 }
 0x81c   :  { %16748 = vrcp.f32 %v18229_v63  ;;  %v1782_v37 = vadd.f32 0.112945676, %v1781_v26  ;;  %v1678_v50 = vand.u32 2147483648, %v18229_v63  ;;  %v1655_v58 = vadd.f32 1.1283791, %v1654_v42 }
 0x81d   :  { %16750 = vrcp.f32 %v18231_v23  ;;  %v1743_v15 = vmul.f32 %v1742_v4, %v18210_v17  ;;  %v1732_v36 = vmul.f32 %v1731_v19, %v18210_v17  ;;  %vm1672_vm0 = vweird.f32 %v18229_v63 }
 0x81e   :  { %v1783_v43 = vmul.f32 %v1782_v37, %v18213_v25  ;;  %v1676_v56 = vand.u32 2147483647, %v18229_v63  ;;  %v1679_v7 = vor.u32 1.1754944e-38, %v1678_v50  ;;  %v1772_v9 = vmul.f32 %v1771_v55, %v18213_v25 }
 0x81f   :  { %v1744_v22 = vadd.f32 0.4994258, %v1743_v15  ;;  %v1733_v47 = vadd.f32 0.18741608, %v1732_v36  ;;  %v1656_v10 = vmul.f32 %v1655_v58, %v18176_v52  ;;  %v1718_v14 = vand.u32 2147483648, %v18231_v23 }
 0x820   :  { %v1784_v48 = vadd.f32 0.4994258, %v1783_v43  ;;  %vm1677_vm2 = vcmp.eq.f32.partialorder %v1676_v56, 8.507059e+37  ;;  %vm1712_vm4 = vweird.f32 %v18231_v23  ;;  %v1773_v21 = vadd.f32 0.18741608, %v1772_v9 }
 0x821   :  { %v1745_v34 = vmul.f32 %v1744_v22, %v18210_v17  ;;  %v1734_v3 = vmul.f32 %v1733_v47, %v18210_v17  ;;  %v1716_v17 = vand.u32 2147483647, %v18231_v23  ;;  %v1719_v30 = vor.u32 1.1754944e-38, %v1718_v14  ;;  %v11454_v22 = vld [vmem:[#allocation24 + $0x168] sm:$0xf0] }
 0x822   :  { %v16749_v28 = vpop.eup %16748  ;;  %v1785_v59 = vmul.f32 %v1784_v48, %v18213_v25  ;;  %v1638_v47 = vmul.f32 0.5, %v18191_v62  ;;  %v1637_v62 = vmul.f32 0.5, %v18173_v32 }
 0x823   :  { %v18242_v33 = vpop.eup %16750  ;;  %v1668_v2 = vmul.f32 %v16749_v28, %v18229_v63  ;;  %v1746_v40 = vadd.f32 1.0, %v1745_v34  ;;  %vm1673_vm15 = vweird.f32 %v16749_v28  ;;  %v1694_v63 = vmul.f32 %v1693_v54, %v18187_v57 }
 0x824   :  { %v1708_v35 = vmul.f32 %v18242_v33, %v18231_v23  ;;  %vm1674_vm1 = vmor %vm1672_vm0, %vm1673_vm15  ;;  %v18259_v4 = vadd.f32 1.0, %v1785_v59  ;;  %vm1713_vm3 = vweird.f32 %v18242_v33  ;;  %v1735_v15 = vadd.f32 1.1283791, %v1734_v3 }
 0x825   :  { %v1669_v38 = vsub.f32 1.0, %v1668_v2  ;;  %16752 = vrcp.f32 %v1746_v40  ;;  %v1756_v52 = vand.u32 2147483647, %v1746_v40  ;;  %v1758_v19 = vand.u32 2147483648, %v1746_v40  ;;  %vm18270_vm5 = vmor %vm1712_vm4, %vm1713_vm3 }
 0x826   :  { %v1709_v29 = vsub.f32 1.0, %v1708_v35  ;;  %16754 = vrcp.f32 %v18259_v4  ;;  %v1695_v26 = vadd.f32 1.1283791, %v1694_v63  ;;  %vm1717_vm9 = vcmp.eq.f32.partialorder %v1716_v17, 8.507059e+37  ;;  %v16711_v63 = vld [vmem:[#allocation19] ss:$0 sm:$0xff] }
 0x827   :  { %v1670_v46 = vmul.f32 %v16749_v28, %v1669_v38  ;;  %vm1752_vm10 = vweird.f32 %v1746_v40  ;;  %v1736_v1 = vmul.f32 %v1735_v15, %v18197_v27  ;;  %vm1757_vm12 = vcmp.eq.f32.partialorder %v1756_v52, 8.507059e+37 }
 0x828   :  { %v1710_v60 = vmul.f32 %v18242_v33, %v1709_v29  ;;  %v1759_v2 = vor.u32 1.1754944e-38, %v1758_v19  ;;  %v1774_v34 = vmul.f32 %v1773_v21, %v18213_v25  ;;  %v1696_v39 = vmul.f32 %v1695_v26, %v18179_v53  ;;  %v15623_v19 = vld [vmem:[#allocation24 + $0x164] sm:$0xf0]  ;;  %v15620_v21 = vld [vmem:[#allocation24 + $0x154] sm:$0xf] }
 0x829   :  { %v1671_v49 = vadd.f32 %v16749_v28, %v1670_v46  ;;  %v1796_v44 = vand.u32 2147483647, %v18259_v4  ;;  %v1798_v27 = vand.u32 2147483648, %v18259_v4  ;;  %v1636_v25 = vmul.f32 0.5, %v18171_v51  ;;  %v15617_v26 = vld [vmem:[#allocation24 + $0x134] sm:$0xf0] }
 0x82a   :  { %v1711_v13 = vadd.f32 %v18242_v33, %v1710_v60  ;;  %vm1792_vm14 = vweird.f32 %v18259_v4 }
 0x82b   :  { %v1675_v61 = vsel %vm1674_vm1, %v16749_v28, %v1671_v49  ;;  %v16753_v6 = vpop.eup %16752  ;;  %v1799_v54 = vor.u32 1.1754944e-38, %v1798_v27  ;;  %vm1797_vm0 = vcmp.eq.f32.partialorder %v1796_v44, 8.507059e+37  ;;  %v11380_v44 = vld [vmem:[#allocation24 + $0xc0] sm:$0xf]  ;;  %v15605_v27 = vld [vmem:[#allocation24 + $0xd4] sm:$0xf0] }
 0x82c   :  { %v1748_v11 = vmul.f32 %v16753_v6, %v1746_v40  ;;  %v1680_v12 = vsel %vm1677_vm2, %v1679_v7, %v1675_v61  ;;  %vm1753_vm6 = vweird.f32 %v16753_v6  ;;  %v1715_v28 = vsel %vm18270_vm5, %v18242_v33, %v1711_v13  ;;  %v16755_v23 = vpop.eup %16754 }
 0x82d   :  { %v1681_v57 = vmul.f32 %v1680_v12, %v1656_v10  ;;  %vm1754_vm11 = vmor %vm1752_vm10, %vm1753_vm6  ;;  %v1720_v36 = vsel %vm1717_vm9, %v1719_v30, %v1715_v28  ;;  %v1788_v38 = vmul.f32 %v16755_v23, %v18259_v4  ;;  %v1775_v40 = vadd.f32 1.1283791, %v1774_v34  ;;  %v15614_v30 = vld [vmem:[#allocation24 + $0x124] sm:$0xf] }
 0x82e   :  { %v1749_v16 = vsub.f32 1.0, %v1748_v11  ;;  %v1721_v43 = vmul.f32 %v1720_v36, %v1696_v39  ;;  %vm1793_vm13 = vweird.f32 %v16755_v23  ;;  %v11457_v28 = vor.u32 %v15620_v21, %v11454_v22  ;;  %v11404_v39 = vld [vmem:[#allocation24 + $0xf0] sm:$0xf]  ;;  %v11388_v22 = vld [vmem:[#allocation24 + $0xc8] sm:$0xf] }
 0x82f   :  { %v11214_v35 = vclamps-f32 %v1681_v57, 1.0  ;;  %v1789_v42 = vsub.f32 1.0, %v1788_v38  ;;  %v1776_v50 = vmul.f32 %v1775_v40, %v18202_v8  ;;  %vm1794_vm15 = vmor %vm1792_vm14, %vm1793_vm13 }
 0x830   :  { %v1750_v24 = vmul.f32 %v16753_v6, %v1749_v16  ;;  %v11215_v53 = vclamps-f32 %v1721_v43, 1.0  ;;  %2345 = vmatpush.bf16.msrb.mxu3 %v11457_v28  ;;  %v11406_v43 = vld [vmem:[#allocation24 + $0x108] sm:$0xf0] }
 0x831   :  { %v1804_v5 = vadd.f32 1.0, %v11214_v35  ;;  %v1790_v29 = vmul.f32 %v16755_v23, %v1789_v42 }
 0x832   :  { %v1751_v31 = vadd.f32 %v16753_v6, %v1750_v24  ;;  %v1805_v3 = vadd.f32 1.0, %v11215_v53  ;;  %v11428_v24 = vld [vmem:[#allocation24 + $0x120] sm:$0xf]  ;;  %v15621_v53 = vld [vmem:[#allocation24 + $0x15c] sm:$0xf] }
 0x833   :  { %v1791_v49 = vadd.f32 %v16755_v23, %v1790_v29  ;;  %v1808_v55 = vmul.f32 %v1804_v5, %v1636_v25  ;;  %v15602_v5 = vld [vmem:[#allocation24 + $0xc4] sm:$0xf]  ;;  %v11382_v29 = vld [vmem:[#allocation24 + $0xd8] sm:$0xf0]  ;;  %v11460_v25 = vld [vmem:[#allocation24 + $0x158] sm:$0xf] }
 0x834   :  { %v1755_v37 = vsel %vm1754_vm11, %v16753_v6, %v1751_v31  ;;  %v1639_v6 = vmul.f32 0.5, %v18194_v0  ;;  %v1809_v7 = vmul.f32 %v1805_v3, %v1637_v62  ;;  %v11452_v0 = vld [vmem:[#allocation24 + $0x150] sm:$0xf]  ;;  %v11430_v31 = vld [vmem:[#allocation24 + $0x138] sm:$0xf0] }
 0x835   :  { %v1760_v33 = vsel %vm1757_vm12, %v1759_v2, %v1755_v37  ;;  %v1795_v56 = vsel %vm1794_vm15, %v16755_v23, %v1791_v49  ;;  %v11453_v57 = vor.u32 %v15623_v19, %v11452_v0  ;;  %v11429_v23 = vor.u32 %v15617_v26, %v11428_v24  ;;  %v15618_v3 = vld [vmem:[#allocation24 + $0x13c] sm:$0xf0]  ;;  %v15587_v0 = vld [vmem:[#allocation24 + $0x44] sm:$0xf0]  ;;  %v15584_v19 = vld [vmem:[#allocation24 + $0x34] sm:$0xf] }
 0x836   :  { %v1761_v41 = vmul.f32 %v1760_v33, %v1736_v1  ;;  %v1800_v59 = vsel %vm1797_vm0, %v1799_v54, %v1795_v56  ;;  %v15611_v33 = vld [vmem:[#allocation24 + $0x104] sm:$0xf0]  ;;  %v15596_v56 = vld [vmem:[#allocation24 + $0x94] sm:$0xf]  ;;  %v15606_v24 = vld [vmem:[#allocation24 + $0xdc] sm:$0xf0] }
 0x837   :  { %v1801_v60 = vmul.f32 %v1800_v59, %v1776_v50  ;;  %2331 = vmatpush.bf16.msrb.mxu2 %v11453_v57  ;;  %v11405_v42 = vor.u32 %v15611_v33, %v11404_v39  ;;  %v11462_v50 = vld [vmem:[#allocation24 + $0x170] sm:$0xf0]  ;;  %v11310_v57 = vld [vmem:[#allocation24 + $0x48] sm:$0xf0]  ;;  %v11389_v28 = vor.u32 %v15606_v24, %v11388_v22 }
 0x838   :  { %v11216_v46 = vclamps-f32 %v1761_v41, 1.0  ;;  %v15608_v41 = vld [vmem:[#allocation24 + $0xf4] sm:$0xf]  ;;  %v11465_v54 = vor.u32 %v15621_v53, %v11462_v50  ;;  %v11313_v26 = vor.u32 %v15584_v19, %v11310_v57  ;;  %v11342_v53 = vld [vmem:[#allocation24 + $0x80] sm:$0xf0] }
 0x839   :  { %v11217_v51 = vclamps-f32 %v1801_v60, 1.0  ;;  %v11409_v40 = vor.u32 %v15608_v41, %v11406_v43  ;;  %v11358_v60 = vld [vmem:[#allocation24 + $0xa8] sm:$0xf0]  ;;  %v15597_v41 = vld [vmem:[#allocation24 + $0x9c] sm:$0xf] }
 0x83a   :  { %v1806_v48 = vadd.f32 1.0, %v11216_v46  ;;  %v11381_v46 = vor.u32 %v15605_v27, %v11380_v44  ;;  %2373 = vmatpush.bf16.msra.mxu1 %v11465_v54  ;;  %v11468_v43 = vld [vmem:[#allocation24 + $0x160] sm:$0xf]  ;;  %v15625_v44 = vld [vmem:[#allocation24 + $0x174] sm:$0xf0] }
 0x83b   :  { %v1807_v4 = vadd.f32 1.0, %v11217_v51  ;;  %2332 = vmatpush.bf16.msrb.mxu2 %v11429_v23  ;;  %v11361_v51 = vor.u32 %v15596_v56, %v11358_v60  ;;  %v15622_v27 = vld [vmem:[#allocation24 + $0x164] sm:$0xf]  ;;  %v11444_v50 = vld [vmem:[#allocation24 + $0x130] sm:$0xf] }
 0x83c   :  { %v1810_v58 = vmul.f32 %v1806_v48, %v1638_v47  ;;  %v15624_v47 = vld [vmem:[#allocation24 + $0x16c] sm:$0xf0]  ;;  %v11385_v48 = vor.u32 %v15602_v5, %v11382_v29  ;;  %v11470_v5 = vld [vmem:[#allocation24 + $0x178] sm:$0xf0]  ;;  %v15619_v54 = vld [vmem:[#allocation24 + $0x144] sm:$0xf0] }
 0x83d   :  { %v1811_v9 = vmul.f32 %v1807_v4, %v1639_v6  ;;  %v11461_v49 = vor.u32 %v15624_v47, %v11460_v25  ;;  %v15615_v6 = vld [vmem:[#allocation24 + $0x12c] sm:$0xf]  ;;  %v11438_v4 = vld [vmem:[#allocation24 + $0x140] sm:$0xf0]  ;;  %v11473_v29 = vor.u32 %v15622_v27, %v11470_v5  ;;  %v11340_v25 = vld [vmem:[#allocation24 + $0x68] sm:$0xf] }
 0x83e   :  { %v1812_v61 = vpack.c.bf16 %v1810_v58, %v1808_v55  ;;  %v11356_v55 = vld [vmem:[#allocation24 + $0x90] sm:$0xf]  ;;  %v15599_v58 = vld [vmem:[#allocation24 + $0xa4] sm:$0xf0]  ;;  %v15594_v47 = vld [vmem:[#allocation24 + $0x7c] sm:$0xf0] }
 0x83f   :  { %v1813_v8 = vpack.c.bf16 %v1811_v9, %v1809_v7  ;;  %2333 = vmatpush.bf16.msrb.mxu2 %v11405_v42  ;;  %2359 = vmatpush.bf16.msra.mxu0 %v11461_v49  ;;  %v11357_v59 = vor.u32 %v15599_v58, %v11356_v55  ;;  %v11441_v7 = vor.u32 %v15615_v6, %v11438_v4  ;;  %v11332_v9 = vld [vmem:[#allocation24 + $0x60] sm:$0xf]  ;;  %v11366_v42 = vld [vmem:[#allocation24 + $0xb0] sm:$0xf0]  ;;  %v15607_v19 = vld [vmem:[#allocation24 + $0xe4] sm:$0xf0] }
 0x840   :  { %1954 = vmatmul.bf16.vlgmr.msrb.gmra.mxu0 %v1812_v61  ;;  %v11436_v61 = vld [vmem:[#allocation24 + $0x128] sm:$0xf]  ;;  %v11341_v49 = vor.u32 %v15594_v47, %v11340_v25  ;;  %v11445_v58 = vor.u32 %v15619_v54, %v11444_v50  ;;  %v15616_v56 = vld [vmem:[#allocation24 + $0x134] sm:$0xf]  ;;  %v11398_v24 = vld [vmem:[#allocation24 + $0xe8] sm:$0xf0] }
 0x841   :  { %1968 = vmatmul.bf16.vlgmr.msrb.gmra.mxu1 %v1813_v8  ;;  %v11437_v62 = vor.u32 %v15618_v3, %v11436_v61  ;;  %v15593_v8 = vld [vmem:[#allocation24 + $0x74] sm:$0xf0]  ;;  %v15604_v22 = vld [vmem:[#allocation24 + $0xd4] sm:$0xf] }
 0x842   :  { %2374 = vmatpush.bf16.msra.mxu1 %v11441_v7  ;;  %v11316_v3 = vld [vmem:[#allocation24 + $0x38] sm:$0xf]  ;;  %v11318_v7 = vld [vmem:[#allocation24 + $0x50] sm:$0xf0] }
 0x843   :  { %2334 = vmatpush.bf16.msrb.mxu2 %v11381_v46  ;;  %2360 = vmatpush.bf16.msra.mxu0 %v11437_v62  ;;  %v11469_v46 = vor.u32 %v15625_v44, %v11468_v43  ;;  %v15585_v62 = vld [vmem:[#allocation24 + $0x3c] sm:$0xf]  ;;  %v11324_v44 = vld [vmem:[#allocation24 + $0x40] sm:$0xf]  ;;  %v15589_v5 = vld [vmem:[#allocation24 + $0x54] sm:$0xf0] }
 0x844   :  { %v11325_v47 = vor.u32 %v15589_v5, %v11324_v44  ;;  %v15580_v54 = vld [vmem:[#allocation24 + $0x14] sm:$0xf] }
 0x847   :  { %2335 = vmatpush.bf16.msrb.mxu2 %v11357_v59  ;;  %v11446_v59 = vld [vmem:[#allocation24 + $0x148] sm:$0xf0] }
 0x848   :  { %v11449_v60 = vor.u32 %v15616_v56, %v11446_v59 }
 0x8bd   :  { %v1955_v10 = vpop.f32.mrf.mxu0 }
 0x8be   :  { %v1956_v11 = vadd.f32 %v16711_v63, %v1955_v10  ;;  %v1969_v12 = vpop.f32.mrf.mxu1  ;;  %v15590_v10 = vld [vmem:[#allocation24 + $0x64] sm:$0xf] }
 0x8c0   :  { %v1970_v13 = vadd.f32 %v1969_v12, %v1956_v11  ;;  %v11334_v11 = vld [vmem:[#allocation24 + $0x78] sm:$0xf0]  ;;  %v11412_v12 = vld [vmem:[#allocation24 + $0xf8] sm:$0xf] }
 0x8c2   :  { %v1974_v14 = vadd.f32 %v1970_v13, %v18165_v18  ;;  %v11433_v18 = vor.u32 %v15614_v30, %v11430_v31  ;;  %v15612_v13 = vld [vmem:[#allocation24 + $0x10c] sm:$0xf0]  ;;  %v15603_v30 = vld [vmem:[#allocation24 + $0xcc] sm:$0xf]  ;;  %v11390_v31 = vld [vmem:[#allocation24 + $0xe0] sm:$0xf0] }
 0x8c3   :  { %v11393_v23 = vor.u32 %v15603_v30, %v11390_v31  ;;  %v11372_v30 = vld [vmem:[#allocation24 + $0xa0] sm:$0xf]  ;;  %v15601_v31 = vld [vmem:[#allocation24 + $0xb4] sm:$0xf0] }
 0x8c4   :  { %1978 = vadd.xlane.f32.xlu1 %v1974_v14  ;;  %2346 = vmatpush.bf16.msrb.mxu3 %v11433_v18  ;;  %v11284_v18 = vld [vmem:[#allocation24] sm:$0xf] }
 0x8c5   :  { %v1957_v17 = vpop.f32.mrf.mxu0 }
 0x8c6   :  { %v1958_v15 = vadd.f32 %v16711_v63, %v1957_v17  ;;  %v1971_v16 = vpop.f32.mrf.mxu1  ;;  %v11333_v63 = vor.u32 %v15593_v8, %v11332_v9  ;;  %v11337_v17 = vor.u32 %v15590_v10, %v11334_v11  ;;  %v11420_v9 = vld [vmem:[#allocation24 + $0x100] sm:$0xf]  ;;  %v15613_v8 = vld [vmem:[#allocation24 + $0x114] sm:$0xf0]  ;;  %v11321_v10 = vor.u32 %v15585_v62, %v11318_v7  ;;  %v15610_v11 = vld [vmem:[#allocation24 + $0x104] sm:$0xf] }
 0x8c8   :  { %v1972_v52 = vadd.f32 %v1971_v16, %v1958_v15  ;;  %2347 = vmatpush.bf16.msrb.mxu3 %v11409_v40  ;;  %v15609_v15 = vld [vmem:[#allocation24 + $0xfc] sm:$0xf]  ;;  %v11414_v16 = vld [vmem:[#allocation24 + $0x110] sm:$0xf0]  ;;  %2336 = vmatpush.bf16.msrb.mxu2 %v11333_v63  ;;  %v11369_v40 = vor.u32 %v15597_v41, %v11366_v42  ;;  %v11421_v63 = vor.u32 %v15613_v8, %v11420_v9 }
 0x8ca   :  { %v1975_v32 = vadd.f32 %v1972_v52, %v18167_v45  ;;  %v11417_v52 = vor.u32 %v15609_v15, %v11414_v16  ;;  %v15582_v15 = vld [vmem:[#allocation24 + $0x1c] sm:$0xf0]  ;;  %v15579_v16 = vld [vmem:[#allocation24 + $0xc] sm:$0xf] }
 0x8cc   :  { %1980 = vadd.xlane.f32.xlu2 %v1975_v32  ;;  %2348 = vmatpush.bf16.msrb.mxu3 %v11385_v48  ;;  %v15591_v48 = vld [vmem:[#allocation24 + $0x6c] sm:$0xf] }
 0x8cd   :  { %2375 = vmatpush.bf16.msra.mxu1 %v11417_v52  ;;  %v11345_v55 = vor.u32 %v15591_v48, %v11342_v53  ;;  %v15583_v53 = vld [vmem:[#allocation24 + $0x24] sm:$0xf0] }
 0x8d0   :  { %2349 = vmatpush.bf16.msrb.mxu3 %v11361_v51  ;;  %v15588_v51 = vld [vmem:[#allocation24 + $0x4c] sm:$0xf0] }
 0x8d1   :  { %2376 = vmatpush.bf16.msra.mxu1 %v11393_v23  ;;  %v11317_v4 = vor.u32 %v15588_v51, %v11316_v3  ;;  %v15598_v23 = vld [vmem:[#allocation24 + $0xa4] sm:$0xf] }
 0x8d4   :  { %2350 = vmatpush.bf16.msrb.mxu3 %v11337_v17 }
 0x8d5   :  { %2377 = vmatpush.bf16.msra.mxu1 %v11369_v40 }
 0x8d8   :  { %2351 = vmatpush.bf16.msrb.mxu3 %v11313_v26  ;;  %v11401_v26 = vor.u32 %v15604_v22, %v11398_v24 }
 0x8d9   :  { %2378 = vmatpush.bf16.msra.mxu1 %v11345_v55  ;;  %v11302_v55 = vld [vmem:[#allocation24 + $0x28] sm:$0xf0] }
 0x8dd   :  { %2379 = vmatpush.bf16.msra.mxu1 %v11321_v10  ;;  %v16713_v10 = vld [vmem:[#allocation22] ss:$0 sm:$0xff] }
 0x937   :  { %v1979_v1 = vpop.xlane.xlu1 %1978 }
 0x938   :  { %v1982_v45 = vmul.f32 %v1979_v1, %v18097_v20  ;;  %v15581_v1 = vld [vmem:[#allocation24 + $0x14] sm:$0xf0] }
 0x93a   :  { %v18292_v2 = vsub.f32 %v1974_v14, %v1982_v45  ;;  %v11413_v14 = vor.u32 %v15612_v13, %v11412_v12  ;;  %v15578_v45 = vld [vmem:[#allocation24 + $0x4] sm:$0xf]  ;;  %v11422_v12 = vld [vmem:[#allocation24 + $0x118] sm:$0xf0] }
 0x93b   :  { %v11425_v17 = vor.u32 %v15610_v11, %v11422_v12 }
 0x93c   :  { %v1986_v34 = vmul.f32 %v18292_v2, %v18292_v2  ;;  %2361 = vmatpush.bf16.msra.mxu0 %v11413_v14  ;;  %v11292_v14 = vld [vmem:[#allocation24 + $0x8] sm:$0xf] }
 0x93d   :  { %v11293_v52 = vor.u32 %v15582_v15, %v11292_v14 }
 0x93e   :  { %1988 = vadd.xlane.f32.xlu0 %v1986_v34  ;;  %v11285_v34 = vor.u32 %v15581_v1, %v11284_v18  ;;  %v11373_v1 = vor.u32 %v15601_v31, %v11372_v30 }
 0x93f   :  { %v1981_v35 = vpop.xlane.xlu2 %1980 }
 0x940   :  { %v1983_v36 = vmul.f32 %v1981_v35, %v18097_v20  ;;  %2362 = vmatpush.bf16.msra.mxu0 %v11389_v28  ;;  %v11286_v35 = vld [vmem:[#allocation24 + $0x18] sm:$0xf0] }
 0x941   :  { %v11289_v39 = vor.u32 %v15578_v45, %v11286_v35  ;;  %v11374_v45 = vld [vmem:[#allocation24 + $0xb8] sm:$0xf0] }
 0x942   :  { %v18297_v37 = vsub.f32 %v1975_v32, %v1983_v36  ;;  %v11308_v32 = vld [vmem:[#allocation24 + $0x30] sm:$0xf]  ;;  %v11364_v36 = vld [vmem:[#allocation24 + $0x98] sm:$0xf]  ;;  %v11377_v35 = vor.u32 %v15598_v23, %v11374_v45 }
 0x943   :  { %v11309_v21 = vor.u32 %v15587_v0, %v11308_v32  ;;  %2352 = vmatpush.bf16.msrb.mxu3 %v11289_v39  ;;  %v11294_v32 = vld [vmem:[#allocation24 + $0x20] sm:$0xf0]  ;;  %v11396_v0 = vld [vmem:[#allocation24 + $0xd0] sm:$0xf]  ;;  %v11350_v39 = vld [vmem:[#allocation24 + $0x88] sm:$0xf0] }
 0x944   :  { %v1987_v38 = vmul.f32 %v18297_v37, %v18297_v37  ;;  %v11397_v57 = vor.u32 %v15607_v19, %v11396_v0 }
 0x945   :  { %2337 = vmatpush.bf16.msrb.mxu2 %v11309_v21  ;;  %v11297_v21 = vor.u32 %v15579_v16, %v11294_v32 }
 0x946   :  { %1990 = vadd.xlane.f32.xlu1 %v1987_v38  ;;  %v15600_v38 = vld [vmem:[#allocation24 + $0xac] sm:$0xf0] }
 0x947   :  { %v11365_v33 = vor.u32 %v15600_v38, %v11364_v36  ;;  %2401 = vmatpush.bf16.msra.mxu3 %v11473_v29  ;;  %2380 = vmatpush.bf16.msra.mxu1 %v11297_v21  ;;  %v15595_v36 = vld [vmem:[#allocation24 + $0x84] sm:$0xf0]  ;;  %v15592_v38 = vld [vmem:[#allocation24 + $0x74] sm:$0xf]  ;;  %v11326_v29 = vld [vmem:[#allocation24 + $0x58] sm:$0xf0] }
 0x948   :  { %v11353_v40 = vor.u32 %v15592_v38, %v11350_v39 }
 0x949   :  { %2338 = vmatpush.bf16.msrb.mxu2 %v11285_v34  ;;  %2363 = vmatpush.bf16.msra.mxu0 %v11365_v33  ;;  %v11348_v34 = vld [vmem:[#allocation24 + $0x70] sm:$0xf] }
 0x94a   :  { %v11349_v43 = vor.u32 %v15595_v36, %v11348_v34 }
 0x94b   :  { %2402 = vmatpush.bf16.msra.mxu3 %v11449_v60 }
 0x94d   :  { %2387 = vmatpush.bf16.msra.mxu2 %v11469_v46  ;;  %2364 = vmatpush.bf16.msra.mxu0 %v11341_v49  ;;  %v15586_v46 = vld [vmem:[#allocation24 + $0x44] sm:$0xf]  ;;  %v11300_v49 = vld [vmem:[#allocation24 + $0x10] sm:$0xf] }
 0x94e   :  { %v11329_v48 = vor.u32 %v15586_v46, %v11326_v29  ;;  %v11301_v60 = vor.u32 %v15583_v53, %v11300_v49 }
 0x94f   :  { %2403 = vmatpush.bf16.msra.mxu3 %v11425_v17 }
 0x951   :  { %2388 = vmatpush.bf16.msra.mxu2 %v11445_v58  ;;  %2365 = vmatpush.bf16.msra.mxu0 %v11317_v4  ;;  %v16712_v4 = vld [vmem:[#allocation21] ss:$0 sm:$0xff] }
 0x953   :  { %2404 = vmatpush.bf16.msra.mxu3 %v11401_v26 }
 0x955   :  { %2389 = vmatpush.bf16.msra.mxu2 %v11421_v63  ;;  %2366 = vmatpush.bf16.msra.mxu0 %v11293_v52 }
 0x957   :  { %2405 = vmatpush.bf16.msra.mxu3 %v11377_v35 }
 0x959   :  { %2390 = vmatpush.bf16.msra.mxu2 %v11397_v57 }
 0x95b   :  { %2406 = vmatpush.bf16.msra.mxu3 %v11353_v40 }
 0x95d   :  { %2391 = vmatpush.bf16.msra.mxu2 %v11373_v1 }
 0x95f   :  { %2407 = vmatpush.bf16.msra.mxu3 %v11329_v48 }
 0x961   :  { %2392 = vmatpush.bf16.msra.mxu2 %v11349_v43 }
 0x965   :  { %2393 = vmatpush.bf16.msra.mxu2 %v11325_v47 }
 0x969   :  { %2394 = vmatpush.bf16.msra.mxu2 %v11301_v60 }
 0x9b1   :  { %v1989_v61 = vpop.xlane.xlu0 %1988 }
 0x9b2   :  { %v1992_v6 = vmul.f32 %v1989_v61, %v18097_v20  ;;  %v11305_v61 = vor.u32 %v15580_v54, %v11302_v55 }
 0x9b4   :  { %v18302_v13 = vadd.f32 1e-12, %v1992_v6  ;;  %2408 = vmatpush.bf16.msra.mxu3 %v11305_v61 }
 0x9b6   :  { %16756 = vrsqrt.f32 %v18302_v13  ;;  %vm2002_vm2 = vweird.f32 %v18302_v13 }
 0x9b9   :  { %v1991_v28 = vpop.xlane.xlu1 %1990 }
 0x9ba   :  { %v1993_v18 = vmul.f32 %v1991_v28, %v18097_v20 }
 0x9bc   :  { %v16757_v33 = vpop.eup %16756  ;;  %v1995_v41 = vadd.f32 1e-12, %v1993_v18 }
 0x9bd   :  { %v1997_v42 = vmul.f32 %v16757_v33, %v18302_v13  ;;  %vm2003_vm1 = vweird.f32 %v16757_v33 }
 0x9be   :  { %16758 = vrsqrt.f32 %v1995_v41  ;;  %vm2004_vm3 = vmor %vm2002_vm2, %vm2003_vm1  ;;  %vm2012_vm5 = vweird.f32 %v1995_v41 }
 0x9bf   :  { %v1998_v27 = vmul.f32 %v16757_v33, %v1997_v42 }
 0x9c1   :  { %v1999_v25 = vmul.f32 0.5, %v1998_v27 }
 0x9c3   :  { %v2000_v50 = vsub.f32 1.5, %v1999_v25 }
 0x9c4   :  { %v16759_v58 = vpop.eup %16758 }
 0x9c5   :  { %v2001_v56 = vmul.f32 %v16757_v33, %v2000_v50  ;;  %v2007_v59 = vmul.f32 %v16759_v58, %v1995_v41  ;;  %vm2013_vm4 = vweird.f32 %v16759_v58 }
 0x9c6   :  { %vm2014_vm6 = vmor %vm2012_vm5, %vm2013_vm4 }
 0x9c7   :  { %v2008_v3 = vmul.f32 %v16759_v58, %v2007_v59  ;;  %v2005_v51 = vsel %vm2004_vm3, %v16757_v33, %v2001_v56 }
 0x9c8   :  { %v2016_v7 = vmul.f32 %v2005_v51, %v18292_v2  ;;  %v2077_v2 = vld [vmem:[#allocation25] sm:$0x3f]  ;;  %v16794_v51 = vld [vmem:[%s18931_s12] ss:$0 sm:$0xff] }
 0x9c9   :  { %v2009_v62 = vmul.f32 0.5, %v2008_v3  ;;  %v2081_v15 = vperm.slane %v2077_v2, 2  ;;  %v2082_v16 = vperm.slane %v2077_v2, 3  ;;  %v2079_v19 = vperm.slane %v2077_v2, 0 }
 0x9ca   :  { %v2021_v63 = vmul.f32 %v16712_v4, %v2016_v7  ;;  %v2080_v21 = vperm.slane %v2077_v2, 1  ;;  %v2083_v33 = vperm.slane %v2077_v2, 4  ;;  %v2084_v41 = vperm.slane %v2077_v2, 5 }
 0x9cb   :  { %v2010_v6 = vsub.f32 1.5, %v2009_v62 }
 0x9cc   :  { %v18310_v13 = vadd.f32 %v16713_v10, %v2021_v63 }
 0x9cd   :  { %v2011_v9 = vmul.f32 %v16759_v58, %v2010_v6 }
 0x9cf   :  { %v2015_v8 = vsel %vm2014_vm6, %v16759_v58, %v2011_v9 }
 0x9d0   :  { %v2017_v11 = vmul.f32 %v2015_v8, %v18297_v37 }
 0x9d2   :  { %v2022_v12 = vmul.f32 %v16712_v4, %v2017_v11 }
 0x9d4   :  { %v18312_v17 = vadd.f32 %v16713_v10, %v2022_v12 }
 0x9d6   :  { %v2028_v14 = vpack.c.bf16 %v18312_v17, %v18310_v13 }
 0x9d8   :  { %2339 = vmatmul.bf16.vlgmr.msrb.gmra.mxu2 %v2028_v14  ;;  %2353 = vmatmul.bf16.vlgmr.msrb.gmra.mxu3 %v2028_v14 }
 0x9d9   :  { %2367 = vmatmul.bf16.vlgmr.msra.gmra.mxu0 %v2028_v14  ;;  %2381 = vmatmul.bf16.vlgmr.msra.gmra.mxu1 %v2028_v14 }
 0x9e8   :  { %2395 = vmatmul.bf16.vlgmr.msra.gmra.mxu2 %v2028_v14  ;;  %2409 = vmatmul.bf16.vlgmr.msra.gmra.mxu3 %v2028_v14  ;;  %v16795_v14 = vld [vmem:[%s18931_s12 + $0x1] ss:$0 sm:$0xff] }
 0xa56   :  { %v2368_v52 = vpop.f32.mrf.mxu0  ;;  %v2382_v32 = vpop.f32.mrf.mxu1 }
 0xa57   :  { %v2369_v37 = vadd.f32 %v2368_v52, %v2081_v15  ;;  %v2383_v0 = vadd.f32 %v2382_v32, %v2082_v16 }
 0xa59   :  { %v2416_v57 = vpack.c.bf16 %v2369_v37, %v2369_v37  ;;  %v2465_v22 = vpack.c.bf16 %v2383_v0, %v2383_v0 }
 0xa5b   :  { %2424 = vmatpush.bf16.xpose.msrb.mxu0 %v2416_v57  ;;  %2473 = vmatpush.bf16.xpose.msrb.mxu2 %v2465_v22  ;;  %v2340_v24 = vpop.f32.mrf.mxu2  ;;  %v2354_v26 = vpop.f32.mrf.mxu3 }
 0xa5c   :  { %v2341_v28 = vadd.f32 %v2340_v24, %v2079_v19  ;;  %v2355_v30 = vadd.f32 %v2354_v26, %v2080_v21 }
 0xa5e   :  { %v2415_v31 = vpack.c.bf16 %v2341_v28, %v2341_v28  ;;  %v2464_v23 = vpack.c.bf16 %v2355_v30, %v2355_v30  ;;  %v2370_v18 = vpop.f32.mrf.mxu0  ;;  %v2384_v1 = vpop.f32.mrf.mxu1 }
 0xa5f   :  { %v2371_v45 = vadd.f32 %v2370_v18, %v2081_v15  ;;  %v2385_v34 = vadd.f32 %v2384_v1, %v2082_v16 }
 0xa61   :  { %v2514_v35 = vpack.c.bf16 %v2371_v45, %v2371_v45  ;;  %v2563_v36 = vpack.c.bf16 %v2385_v34, %v2385_v34 }
 0xa62   :  { %2425 = vmatmul.bf16.vlgmr.msrb.gmra.mxu0 %v2415_v31  ;;  %2474 = vmatmul.bf16.vlgmr.msrb.gmra.mxu2 %v2464_v23 }
 0xa63   :  { %2522 = vmatpush.bf16.xpose.msra.mxu0 %v2514_v35  ;;  %2571 = vmatpush.bf16.xpose.msra.mxu2 %v2563_v36  ;;  %v2342_v38 = vpop.f32.mrf.mxu2  ;;  %v2356_v39 = vpop.f32.mrf.mxu3 }
 0xa64   :  { %v2343_v40 = vadd.f32 %v2342_v38, %v2079_v19  ;;  %v2357_v44 = vadd.f32 %v2356_v39, %v2080_v21 }
 0xa66   :  { %v2513_v25 = vpack.c.bf16 %v2343_v40, %v2343_v40  ;;  %v2562_v47 = vpack.c.bf16 %v2357_v44, %v2357_v44  ;;  %v15633_v40 = vld [vmem:[#allocation27 + $0x38] sm:$0xff]  ;;  %v15632_v44 = vld [vmem:[#allocation27 + $0x30] sm:$0xff] }
 0xa6b   :  { %v2396_v42 = vpop.f32.mrf.mxu2  ;;  %v2410_v43 = vpop.f32.mrf.mxu3  ;;  %2745 = vmatpush.bf16.msrb.mxu0 %v15633_v40 }
 0xa6c   :  { %v2397_v27 = vadd.f32 %v2396_v42, %v2083_v33  ;;  %v2411_v5 = vadd.f32 %v2410_v43, %v2084_v41 }
 0xa6e   :  { %v2444_v46 = vpack.c.bf16 %v2397_v27, %v2397_v27  ;;  %v2493_v29 = vpack.c.bf16 %v2411_v5, %v2411_v5 }
 0xa6f   :  { %2746 = vmatpush.bf16.msrb.mxu0 %v15632_v44  ;;  %v11602_v44 = vld [vmem:[#allocation33 + $0x78] sm:$0xf0] }
 0xa70   :  { %v2449_v48 = vsel %vm1122_vm7, %v2444_v46, 0  ;;  %v2498_v49 = vsel %vm1122_vm7, %v2493_v29, 0  ;;  %v15631_v29 = vld [vmem:[#allocation27 + $0x28] sm:$0xff] }
 0xa71   :  { %2458 = vmatpush.bf16.msrb.mxu1 %v2449_v48  ;;  %2507 = vmatpush.bf16.msrb.mxu3 %v2498_v49 }
 0xa72   :  { %2523 = vmatmul.bf16.vlgmr.msra.gmra.mxu0 %v2513_v25  ;;  %2572 = vmatmul.bf16.vlgmr.msra.gmra.mxu2 %v2562_v47 }
 0xa73   :  { %v2398_v53 = vpop.f32.mrf.mxu2  ;;  %v2412_v50 = vpop.f32.mrf.mxu3  ;;  %2747 = vmatpush.bf16.msrb.mxu0 %v15631_v29  ;;  %v15654_v29 = vld [vmem:[#allocation33 + $0x64] sm:$0xf] }
 0xa74   :  { %v2399_v54 = vadd.f32 %v2398_v53, %v2083_v33  ;;  %v2413_v55 = vadd.f32 %v2412_v50, %v2084_v41 }
 0xa76   :  { %v2542_v58 = vpack.c.bf16 %v2399_v54, %v2399_v54  ;;  %v2591_v56 = vpack.c.bf16 %v2413_v55, %v2413_v55 }
 0xa78   :  { %v2547_v59 = vsel %vm1122_vm7, %v2542_v58, 0  ;;  %v2596_v60 = vsel %vm1122_vm7, %v2591_v56, 0 }
 0xa79   :  { %2556 = vmatpush.bf16.msra.mxu1 %v2547_v59  ;;  %2605 = vmatpush.bf16.msra.mxu3 %v2596_v60 }
 0xadf   :  { %v2426_v61 = vpop.f32.mrf.mxu0 }
 0xae0   :  { %v2430_v3 = vmul.f32 0.125, %v2426_v61  ;;  %v15630_v61 = vld [vmem:[#allocation27 + $0x20] sm:$0xff] }
 0xae1   :  { %2748 = vmatpush.bf16.msrb.mxu0 %v15630_v61 }
 0xae2   :  { %v2431_v62 = vadd.f32 %v16794_v51, %v2430_v3  ;;  %v15641_v3 = vld [vmem:[#allocation27 + $0x78] sm:$0xff] }
 0xae4   :  { %v2432_v6 = vsel %vm1105_vm8, %v2431_v62, -inf }
 0xae5   :  { %v2475_v4 = vpop.f32.mrf.mxu2  ;;  %2433 = vmax.xlane.f32.xlu0 %v2432_v6  ;;  %v15628_v6 = vld [vmem:[#allocation27 + $0x10] sm:$0xff] }
 0xae6   :  { %v2479_v7 = vmul.f32 0.125, %v2475_v4  ;;  %v15639_v4 = vld [vmem:[#allocation27 + $0x68] sm:$0xff] }
 0xae7   :  { %v2428_v9 = vpop.f32.mrf.mxu0 }
 0xae8   :  { %v2480_v8 = vadd.f32 %v16794_v51, %v2479_v7  ;;  %v15629_v51 = vld [vmem:[#allocation27 + $0x18] sm:$0xff]  ;;  %v15627_v7 = vld [vmem:[#allocation27 + $0x8] sm:$0xff]  ;;  %v15638_v9 = vld [vmem:[#allocation27 + $0x60] sm:$0xff] }
 0xae9   :  { %2749 = vmatpush.bf16.msrb.mxu0 %v15629_v51 }
 0xaea   :  { %v2481_v10 = vsel %vm1105_vm8, %v2480_v8, -inf }
 0xaeb   :  { %2482 = vmax.xlane.f32.xlu2 %v2481_v10  ;;  %v15637_v10 = vld [vmem:[#allocation27 + $0x58] sm:$0xff] }
 0xaed   :  { %v2477_v63 = vpop.f32.mrf.mxu2  ;;  %2750 = vmatpush.bf16.msrb.mxu0 %v15628_v6  ;;  %v15649_v6 = vld [vmem:[#allocation33 + $0x34] sm:$0xf0] }
 0xaee   :  { %v15636_v63 = vld [vmem:[#allocation27 + $0x50] sm:$0xff] }
 0xaef   :  { %v2524_v11 = vpop.f32.mrf.mxu0 }
 0xaf0   :  { %v2528_v12 = vmul.f32 0.125, %v2524_v11  ;;  %v15635_v11 = vld [vmem:[#allocation27 + $0x48] sm:$0xff] }
 0xaf1   :  { %2751 = vmatpush.bf16.msrb.mxu0 %v15627_v7 }
 0xaf2   :  { %v2529_v2 = vadd.f32 %v16795_v14, %v2528_v12  ;;  %v15634_v12 = vld [vmem:[#allocation27 + $0x40] sm:$0xff] }
 0xaf4   :  { %v2530_v15 = vsel %vm1105_vm8, %v2529_v2, -inf }
 0xaf5   :  { %v2573_v16 = vpop.f32.mrf.mxu2  ;;  %2531 = vmax.xlane.f32.xlu2 %v2530_v15 }
 0xaf6   :  { %v2577_v52 = vmul.f32 0.125, %v2573_v16 }
 0xaf7   :  { %v2526_v32 = vpop.f32.mrf.mxu0 }
 0xaf8   :  { %v2578_v37 = vadd.f32 %v16795_v14, %v2577_v52 }
 0xafa   :  { %v2579_v0 = vsel %vm1105_vm8, %v2578_v37, -inf }
 0xafb   :  { %2580 = vmax.xlane.f32.xlu1 %v2579_v0 }
 0xafd   :  { %v2575_v19 = vpop.f32.mrf.mxu2 }
 0xb58   :  { %v2434_v21 = vpop.xlane.xlu0 %2433 }
 0xb59   :  { %v2435_v57 = vsub.f32 %v2431_v62, %v2434_v21  ;;  %v15640_v62 = vld [vmem:[#allocation27 + $0x70] sm:$0xff] }
 0xb5b   :  { %v2436_v22 = vmul.f32 1.442695, %v2435_v57 }
 0xb5d   :  { %16760 = vpow2.f32 %v2436_v22  ;;  %v16714_v22 = vld [vmem:[#allocation28] ss:$0 sm:$0xff] }
 0xb5e   :  { %v2483_v24 = vpop.xlane.xlu2 %2482 }
 0xb5f   :  { %v2484_v26 = vsub.f32 %v2480_v8, %v2483_v24  ;;  %v15626_v8 = vld [vmem:[#allocation27] sm:$0xff] }
 0xb60   :  { %2752 = vmatpush.bf16.msrb.mxu0 %v15626_v8 }
 0xb61   :  { %v2485_v28 = vmul.f32 1.442695, %v2484_v26 }
 0xb63   :  { %v16761_v30 = vpop.eup %16760  ;;  %16762 = vpow2.f32 %v2485_v28 }
 0xb64   :  { %v2438_v31 = vsel %vm1105_vm8, %v16761_v30, 0.0 }
 0xb65   :  { %2439 = vadd.xlane.f32.xlu1 %v2438_v31 }
 0xb68   :  { %v2532_v23 = vpop.xlane.xlu2 %2531 }
 0xb69   :  { %v16763_v18 = vpop.eup %16762  ;;  %v2533_v1 = vsub.f32 %v2529_v2, %v2532_v23 }
 0xb6a   :  { %v2487_v45 = vsel %vm1105_vm8, %v16763_v18, 0.0 }
 0xb6b   :  { %v2534_v34 = vmul.f32 1.442695, %v2533_v1  ;;  %2488 = vadd.xlane.f32.xlu0 %v2487_v45 }
 0xb6d   :  { %16764 = vpow2.f32 %v2534_v34 }
 0xb6e   :  { %v2581_v35 = vpop.xlane.xlu1 %2580 }
 0xb6f   :  { %v2582_v36 = vsub.f32 %v2578_v37, %v2581_v35 }
 0xb71   :  { %v2583_v38 = vmul.f32 1.442695, %v2582_v36 }
 0xb73   :  { %v16765_v39 = vpop.eup %16764  ;;  %16766 = vpow2.f32 %v2583_v38 }
 0xb74   :  { %v2536_v33 = vsel %vm1105_vm8, %v16765_v39, 0.0 }
 0xb75   :  { %2537 = vadd.xlane.f32.xlu0 %v2536_v33 }
 0xb79   :  { %v16767_v41 = vpop.eup %16766 }
 0xb7a   :  { %v2585_v42 = vsel %vm1105_vm8, %v16767_v41, 0.0 }
 0xb7b   :  { %2586 = vadd.xlane.f32.xlu2 %v2585_v42  ;;  %v15657_v42 = vld [vmem:[#allocation33 + $0x74] sm:$0xf0] }
 0xbd8   :  { %v2440_v43 = vpop.xlane.xlu1 %2439 }
 0xbd9   :  { %16768 = vrcp.f32 %v2440_v43  ;;  %v15656_v43 = vld [vmem:[#allocation33 + $0x74] sm:$0xf] }
 0xbde   :  { %v2489_v27 = vpop.xlane.xlu0 %2488 }
 0xbdf   :  { %v16769_v5 = vpop.eup %16768  ;;  %16770 = vrcp.f32 %v2489_v27  ;;  %v11605_v27 = vor.u32 %v15656_v43, %v11602_v44 }
 0xbe0   :  { %v2442_v46 = vmul.f32 %v16769_v5, %v16761_v30  ;;  %v11592_v5 = vld [vmem:[#allocation33 + $0x60] sm:$0xf] }
 0xbe2   :  { %v2443_v25 = vpack.c.bf16 %v2442_v46, %v2442_v46  ;;  %v15655_v46 = vld [vmem:[#allocation33 + $0x64] sm:$0xf0] }
 0xbe4   :  { %11474 = vmatmul.msk.bf16.vlgmr.msrb.gmra.mxu1 %vm1105_vm8, %v2443_v25  ;;  %v11593_v25 = vor.u32 %v15655_v46, %v11592_v5  ;;  %v16715_v5 = vld [vmem:[#allocation30] ss:$0 sm:$0xff] }
 0xbe5   :  { %v16771_v47 = vpop.eup %16770  ;;  %2759 = vmatpush.bf16.msrb.mxu1 %v15641_v3  ;;  %v11578_v3 = vld [vmem:[#allocation33 + $0x48] sm:$0xf0] }
 0xbe6   :  { %v2491_v48 = vmul.f32 %v16771_v47, %v16763_v18  ;;  %v11594_v47 = vld [vmem:[#allocation33 + $0x68] sm:$0xf0] }
 0xbe8   :  { %v2492_v49 = vpack.c.bf16 %v2491_v48, %v2491_v48  ;;  %v2538_v53 = vpop.xlane.xlu0 %2537  ;;  %v11597_v48 = vor.u32 %v15654_v29, %v11594_v47 }
 0xbe9   :  { %16772 = vrcp.f32 %v2538_v53  ;;  %2760 = vmatpush.bf16.msrb.mxu1 %v15640_v62  ;;  %v15653_v53 = vld [vmem:[#allocation33 + $0x54] sm:$0xf0]  ;;  %v11568_v62 = vld [vmem:[#allocation33 + $0x30] sm:$0xf] }
 0xbea   :  { %11475 = vmatmul.msk.bf16.vlgmr.msrb.gmra.mxu3 %vm1105_vm8, %v2492_v49  ;;  %v11584_v49 = vld [vmem:[#allocation33 + $0x50] sm:$0xf]  ;;  %v11569_v7 = vor.u32 %v15649_v6, %v11568_v62 }
 0xbeb   :  { %2944 = vmatpush.bf16.msrb.mxu3 %v11605_v27 }
 0xbed   :  { %2761 = vmatpush.bf16.msrb.mxu1 %v15639_v4  ;;  %v15648_v4 = vld [vmem:[#allocation33 + $0x34] sm:$0xf] }
 0xbee   :  { %v2587_v50 = vpop.xlane.xlu2 %2586 }
 0xbef   :  { %v16773_v54 = vpop.eup %16772  ;;  %16774 = vrcp.f32 %v2587_v50  ;;  %2945 = vmatpush.bf16.msrb.mxu3 %v11597_v48  ;;  %v15652_v50 = vld [vmem:[#allocation33 + $0x54] sm:$0xf]  ;;  %v16716_v48 = vld [vmem:[#allocation31] ss:$0 sm:$0xff] }
 0xbf0   :  { %v2540_v55 = vmul.f32 %v16773_v54, %v16765_v39  ;;  %v11585_v54 = vor.u32 %v15653_v53, %v11584_v49 }
 0xbf1   :  { %2762 = vmatpush.bf16.msrb.mxu1 %v15638_v9  ;;  %v11570_v9 = vld [vmem:[#allocation33 + $0x38] sm:$0xf0] }
 0xbf2   :  { %v2541_v58 = vpack.c.bf16 %v2540_v55, %v2540_v55  ;;  %v11586_v55 = vld [vmem:[#allocation33 + $0x58] sm:$0xf0]  ;;  %v11573_v8 = vor.u32 %v15648_v4, %v11570_v9 }
 0xbf4   :  { %11476 = vmatmul.msk.bf16.vlgmr.msra.gmra.mxu1 %vm1105_vm8, %v2541_v58  ;;  %v11589_v58 = vor.u32 %v15652_v50, %v11586_v55 }
 0xbf5   :  { %v16775_v56 = vpop.eup %16774  ;;  %2763 = vmatpush.bf16.msrb.mxu1 %v15637_v10  ;;  %v11560_v10 = vld [vmem:[#allocation33 + $0x20] sm:$0xf] }
 0xbf6   :  { %v2589_v59 = vmul.f32 %v16775_v56, %v16767_v41  ;;  %2946 = vmatpush.bf16.msrb.mxu3 %v11589_v58  ;;  %v11576_v56 = vld [vmem:[#allocation33 + $0x40] sm:$0xf] }
 0xbf8   :  { %v2590_v60 = vpack.c.bf16 %v2589_v59, %v2589_v59  ;;  %v15651_v59 = vld [vmem:[#allocation33 + $0x44] sm:$0xf0] }
 0xbf9   :  { %2764 = vmatpush.bf16.msrb.mxu1 %v15636_v63  ;;  %v11577_v61 = vor.u32 %v15651_v59, %v11576_v56  ;;  %v15647_v63 = vld [vmem:[#allocation33 + $0x24] sm:$0xf0] }
 0xbfa   :  { %11477 = vmatmul.msk.bf16.vlgmr.msra.gmra.mxu3 %vm1105_vm8, %v2590_v60  ;;  %v15650_v60 = vld [vmem:[#allocation33 + $0x44] sm:$0xf] }
 0xbfb   :  { %v11581_v51 = vor.u32 %v15650_v60, %v11578_v3 }
 0xbfd   :  { %2765 = vmatpush.bf16.msrb.mxu1 %v15635_v11  ;;  %2947 = vmatpush.bf16.msrb.mxu3 %v11581_v51  ;;  %v15646_v11 = vld [vmem:[#allocation33 + $0x24] sm:$0xf] }
 0xc01   :  { %2766 = vmatpush.bf16.msrb.mxu1 %v15634_v12  ;;  %2948 = vmatpush.bf16.msrb.mxu3 %v11573_v8  ;;  %v11561_v12 = vor.u32 %v15647_v63, %v11560_v10 }
 0xc61   :  { %v2460_v14 = vpop.f32.mrf.mxu1 }
 0xc69   :  { %v2462_v2 = vpop.f32.mrf.mxu1 }
 0xc6d   :  { %v2509_v15 = vpop.f32.mrf.mxu3 }
 0xc71   :  { %v2558_v16 = vpop.f32.mrf.mxu1 }
 0xc72   :  { %v2611_v52 = vpack.c.bf16 %v2558_v16, %v2460_v14  ;;  %v11562_v14 = vld [vmem:[#allocation33 + $0x28] sm:$0xf0]  ;;  %v15645_v16 = vld [vmem:[#allocation33 + $0x14] sm:$0xf0] }
 0xc73   :  { %v11565_v2 = vor.u32 %v15646_v11, %v11562_v14 }
 0xc74   :  { %2753 = vmatmul.bf16.vlgmr.msrb.gmra.mxu0 %v2611_v52  ;;  %v15644_v52 = vld [vmem:[#allocation33 + $0x14] sm:$0xf] }
 0xc75   :  { %v2511_v32 = vpop.f32.mrf.mxu3  ;;  %2949 = vmatpush.bf16.msrb.mxu3 %v11565_v2 }
 0xc79   :  { %v2560_v37 = vpop.f32.mrf.mxu1 }
 0xc7d   :  { %v2607_v0 = vpop.f32.mrf.mxu3 }
 0xc7e   :  { %v2612_v19 = vpack.c.bf16 %v2607_v0, %v2509_v15  ;;  %v11552_v15 = vld [vmem:[#allocation33 + $0x10] sm:$0xf]  ;;  %v11554_v0 = vld [vmem:[#allocation33 + $0x18] sm:$0xf0] }
 0xc7f   :  { %v11553_v37 = vor.u32 %v15645_v16, %v11552_v15 }
 0xc80   :  { %2767 = vmatmul.bf16.vlgmr.msrb.gmra.mxu1 %v2612_v19  ;;  %v11544_v19 = vld [vmem:[#allocation33] sm:$0xf] }
 0xc85   :  { %v2609_v21 = vpop.f32.mrf.mxu3 }
 0xc86   :  { %v15643_v21 = vld [vmem:[#allocation33 + $0x4] sm:$0xf0] }
 0xcf1   :  { %v2754_v57 = vpop.f32.mrf.mxu0 }
 0xcf2   :  { %v2755_v24 = vadd.f32 %v16714_v22, %v2754_v57 }
 0xcf9   :  { %v2756_v31 = vpop.f32.mrf.mxu0 }
 0xcfa   :  { %v2757_v23 = vadd.f32 %v16714_v22, %v2756_v31  ;;  %v11557_v22 = vor.u32 %v15644_v52, %v11554_v0  ;;  %v15665_v0 = vld [vmem:[#allocation36 + $0x38] sm:$0xff] }
 0xcfb   :  { %3268 = vmatpush.bf16.msra.mxu0 %v15665_v0 }
 0xcfc   :  { %2950 = vmatpush.bf16.msrb.mxu3 %v11557_v22 }
 0xcfd   :  { %v2768_v26 = vpop.f32.mrf.mxu1 }
 0xcfe   :  { %v2769_v28 = vadd.f32 %v2768_v26, %v2755_v24  ;;  %v15642_v24 = vld [vmem:[#allocation33 + $0x4] sm:$0xf]  ;;  %v11546_v26 = vld [vmem:[#allocation33 + $0x8] sm:$0xf0] }
 0xcff   :  { %v11549_v31 = vor.u32 %v15642_v24, %v11546_v26 }
 0xd00   :  { %v2773_v30 = vadd.f32 %v2769_v28, %v18310_v13  ;;  %v11545_v28 = vor.u32 %v15643_v21, %v11544_v19  ;;  %v15673_v19 = vld [vmem:[#allocation36 + $0x78] sm:$0xff] }
 0xd01   :  { %2951 = vmatpush.bf16.msrb.mxu3 %v11549_v31  ;;  %3282 = vmatpush.bf16.msra.mxu1 %v15673_v19  ;;  %v15664_v31 = vld [vmem:[#allocation36 + $0x30] sm:$0xff] }
 0xd02   :  { %2777 = vadd.xlane.f32.xlu1 %v2773_v30  ;;  %3269 = vmatpush.bf16.msra.mxu0 %v15664_v31 }
 0xd05   :  { %v2770_v18 = vpop.f32.mrf.mxu1 }
 0xd06   :  { %v2771_v1 = vadd.f32 %v2770_v18, %v2757_v23 }
 0xd08   :  { %v2774_v45 = vadd.f32 %v2771_v1, %v18312_v17  ;;  %v11600_v17 = vld [vmem:[#allocation33 + $0x70] sm:$0xf] }
 0xd09   :  { %v11601_v40 = vor.u32 %v15657_v42, %v11600_v17 }
 0xd0a   :  { %2779 = vadd.xlane.f32.xlu2 %v2774_v45 }
 0xd0b   :  { %2930 = vmatpush.bf16.msrb.mxu2 %v11601_v40 }
 0xd0f   :  { %2931 = vmatpush.bf16.msrb.mxu2 %v11593_v25 }
 0xd13   :  { %2932 = vmatpush.bf16.msrb.mxu2 %v11585_v54 }
 0xd17   :  { %2933 = vmatpush.bf16.msrb.mxu2 %v11577_v61 }
 0xd1b   :  { %2934 = vmatpush.bf16.msrb.mxu2 %v11569_v7 }
 0xd1f   :  { %2935 = vmatpush.bf16.msrb.mxu2 %v11561_v12 }
 0xd23   :  { %2936 = vmatpush.bf16.msrb.mxu2 %v11553_v37 }
 0xd27   :  { %2937 = vmatpush.bf16.msrb.mxu2 %v11545_v28 }
 0xd75   :  { %v2778_v34 = vpop.xlane.xlu1 %2777 }
 0xd76   :  { %v2781_v35 = vmul.f32 %v2778_v34, %v18097_v20 }
 0xd78   :  { %v18337_v36 = vsub.f32 %v2773_v30, %v2781_v35 }
 0xd7a   :  { %v2785_v38 = vmul.f32 %v18337_v36, %v18337_v36 }
 0xd7c   :  { %2787 = vadd.xlane.f32.xlu0 %v2785_v38 }
 0xd7d   :  { %v2780_v39 = vpop.xlane.xlu2 %2779 }
 0xd7e   :  { %v2782_v13 = vmul.f32 %v2780_v39, %v18097_v20 }
 0xd80   :  { %v18342_v33 = vsub.f32 %v2774_v45, %v2782_v13 }
 0xd82   :  { %v2786_v41 = vmul.f32 %v18342_v33, %v18342_v33 }
 0xd84   :  { %2789 = vadd.xlane.f32.xlu1 %v2786_v41 }
 0xdef   :  { %v2788_v32 = vpop.xlane.xlu0 %2787 }
 0xdf0   :  { %v2791_v57 = vmul.f32 %v2788_v32, %v18097_v20 }
 0xdf2   :  { %v2793_v30 = vadd.f32 1e-12, %v2791_v57 }
 0xdf4   :  { %16776 = vrsqrt.f32 %v2793_v30  ;;  %vm2801_vm8 = vweird.f32 %v2793_v30 }
 0xdf7   :  { %v2790_v23 = vpop.xlane.xlu1 %2789 }
 0xdf8   :  { %v2792_v18 = vmul.f32 %v2790_v23, %v18097_v20  ;;  %v15672_v23 = vld [vmem:[#allocation36 + $0x70] sm:$0xff] }
 0xdf9   :  { %3283 = vmatpush.bf16.msra.mxu1 %v15672_v23 }
 0xdfa   :  { %v16777_v1 = vpop.eup %16776  ;;  %v2794_v45 = vadd.f32 1e-12, %v2792_v18 }
 0xdfb   :  { %v2796_v34 = vmul.f32 %v16777_v1, %v2793_v30  ;;  %vm2802_vm7 = vweird.f32 %v16777_v1 }
 0xdfc   :  { %16778 = vrsqrt.f32 %v2794_v45  ;;  %vm2803_vm9 = vmor %vm2801_vm8, %vm2802_vm7  ;;  %vm2811_vm11 = vweird.f32 %v2794_v45 }
 0xdfd   :  { %v2797_v35 = vmul.f32 %v16777_v1, %v2796_v34 }
 0xdff   :  { %v2798_v38 = vmul.f32 0.5, %v2797_v35 }
 0xe01   :  { %v2799_v39 = vsub.f32 1.5, %v2798_v38 }
 0xe02   :  { %v16779_v13 = vpop.eup %16778 }
 0xe03   :  { %v2800_v41 = vmul.f32 %v16777_v1, %v2799_v39  ;;  %v2806_v17 = vmul.f32 %v16779_v13, %v2794_v45  ;;  %vm2812_vm10 = vweird.f32 %v16779_v13 }
 0xe04   :  { %vm2813_vm12 = vmor %vm2811_vm11, %vm2812_vm10 }
 0xe05   :  { %v2807_v42 = vmul.f32 %v16779_v13, %v2806_v17  ;;  %v2804_v43 = vsel %vm2803_vm9, %v16777_v1, %v2800_v41 }
 0xe06   :  { %v2815_v27 = vmul.f32 %v2804_v43, %v18337_v36  ;;  %v2844_v36 = vld [vmem:[#allocation34] sm:$0x3] }
 0xe07   :  { %v2808_v40 = vmul.f32 0.5, %v2807_v42  ;;  %v2846_v55 = vperm.slane %v2844_v36, 0  ;;  %v2847_v58 = vperm.slane %v2844_v36, 1 }
 0xe08   :  { %v2820_v47 = vmul.f32 %v16715_v5, %v2815_v27  ;;  %v15663_v27 = vld [vmem:[#allocation36 + $0x28] sm:$0xff] }
 0xe09   :  { %v2809_v44 = vsub.f32 1.5, %v2808_v40  ;;  %3270 = vmatpush.bf16.msra.mxu0 %v15663_v27 }
 0xe0a   :  { %v18350_v53 = vadd.f32 %v16716_v48, %v2820_v47 }
 0xe0b   :  { %v2810_v46 = vmul.f32 %v16779_v13, %v2809_v44 }
 0xe0d   :  { %v2814_v29 = vsel %vm2813_vm12, %v16779_v13, %v2810_v46 }
 0xe0e   :  { %v2816_v25 = vmul.f32 %v2814_v29, %v18342_v33 }
 0xe10   :  { %v2821_v49 = vmul.f32 %v16715_v5, %v2816_v25  ;;  %v15671_v5 = vld [vmem:[#allocation36 + $0x68] sm:$0xff] }
 0xe11   :  { %3284 = vmatpush.bf16.msra.mxu1 %v15671_v5 }
 0xe12   :  { %v18352_v50 = vadd.f32 %v16716_v48, %v2821_v49 }
 0xe14   :  { %v2827_v54 = vpack.c.bf16 %v18352_v50, %v18350_v53 }
 0xe16   :  { %2938 = vmatmul.bf16.vlgmr.msrb.gmra.mxu2 %v2827_v54  ;;  %2952 = vmatmul.bf16.vlgmr.msrb.gmra.mxu3 %v2827_v54 }
 0xe99   :  { %v2939_v56 = vpop.f32.mrf.mxu2  ;;  %v2953_v59 = vpop.f32.mrf.mxu3 }
 0xe9a   :  { %v18356_v60 = vadd.f32 %v2939_v56, %v2846_v55  ;;  %v18358_v33 = vadd.f32 %v2953_v59, %v2847_v58  ;;  %v15662_v59 = vld [vmem:[#allocation36 + $0x20] sm:$0xff] }
 0xe9b   :  { %3271 = vmatpush.bf16.msra.mxu0 %v15662_v59 }
 0xe9c   :  { %v18361_v61 = vmul.f32 0.70710677, %v18356_v60  ;;  %v18364_v3 = vmul.f32 0.70710677, %v18358_v33 }
 0xe9e   :  { %v2966_v51 = vmul.f32 %v18361_v61, %v18361_v61  ;;  %v3006_v62 = vmul.f32 %v18364_v3, %v18364_v3 }
 0xea0   :  { %v18370_v6 = vmin.f32 %v2966_v51, 16.0  ;;  %v18372_v4 = vmin.f32 %v3006_v62, 16.0  ;;  %v15670_v51 = vld [vmem:[#allocation36 + $0x60] sm:$0xff] }
 0xea1   :  { %v2941_v7 = vpop.f32.mrf.mxu2  ;;  %v2955_v9 = vpop.f32.mrf.mxu3  ;;  %3285 = vmatpush.bf16.msra.mxu1 %v15670_v51 }
 0xea2   :  { %v2968_v8 = vmul.f32 2.1237322e-06, %v18370_v6  ;;  %v2979_v10 = vmul.f32 3.8918573e-05, %v18370_v6  ;;  %v18376_v63 = vadd.f32 %v2941_v7, %v2846_v55  ;;  %v3019_v11 = vmul.f32 3.8918573e-05, %v18372_v4 }
 0xea3   :  { %v18379_v12 = vadd.f32 %v2955_v9, %v2847_v58  ;;  %v3008_v32 = vmul.f32 2.1237322e-06, %v18372_v4 }
 0xea4   :  { %v2969_v14 = vadd.f32 0.00028619796, %v2968_v8  ;;  %v2980_v2 = vadd.f32 0.001143296, %v2979_v10  ;;  %v3020_v15 = vadd.f32 0.001143296, %v3019_v11 }
 0xea5   :  { %v18382_v16 = vmul.f32 0.70710677, %v18376_v63  ;;  %v18387_v37 = vmul.f32 0.70710677, %v18379_v12  ;;  %v3009_v1 = vadd.f32 0.00028619796, %v3008_v32 }
 0xea6   :  { %v2981_v52 = vmul.f32 %v2980_v2, %v18370_v6  ;;  %v3021_v21 = vmul.f32 %v3020_v15, %v18372_v4  ;;  %v2970_v22 = vmul.f32 %v2969_v14, %v18370_v6  ;;  %v15661_v14 = vld [vmem:[#allocation36 + $0x18] sm:$0xff] }
 0xea7   :  { %v3046_v57 = vmul.f32 %v18382_v16, %v18382_v16  ;;  %v3086_v26 = vmul.f32 %v18387_v37, %v18387_v37  ;;  %v3010_v40 = vmul.f32 %v3009_v1, %v18372_v4  ;;  %v15669_v32 = vld [vmem:[#allocation36 + $0x58] sm:$0xff]  ;;  %3272 = vmatpush.bf16.msra.mxu0 %v15661_v14 }
 0xea8   :  { %v2982_v24 = vadd.f32 0.014752088, %v2981_v52  ;;  %v3022_v28 = vadd.f32 0.014752088, %v3021_v21  ;;  %v2971_v39 = vadd.f32 0.0036580483, %v2970_v22  ;;  %3286 = vmatpush.bf16.msra.mxu1 %v15669_v32 }
 0xea9   :  { %v18395_v30 = vmin.f32 %v3046_v57, 16.0  ;;  %v18398_v45 = vmin.f32 %v3086_v26, 16.0  ;;  %v3011_v58 = vadd.f32 0.0036580483, %v3010_v40  ;;  %v15660_v22 = vld [vmem:[#allocation36 + $0x10] sm:$0xff] }
 0xeaa   :  { %v2983_v18 = vmul.f32 %v2982_v24, %v18370_v6  ;;  %v3023_v34 = vmul.f32 %v3022_v28, %v18372_v4  ;;  %v2972_v48 = vmul.f32 %v2971_v39, %v18370_v6  ;;  %v15668_v24 = vld [vmem:[#allocation36 + $0x50] sm:$0xff]  ;;  %v15659_v39 = vld [vmem:[#allocation36 + $0x8] sm:$0xff] }
 0xeab   :  { %v3048_v35 = vmul.f32 2.1237322e-06, %v18395_v30  ;;  %v3059_v38 = vmul.f32 3.8918573e-05, %v18395_v30  ;;  %v3088_v44 = vmul.f32 2.1237322e-06, %v18398_v45  ;;  %v3012_v19 = vmul.f32 %v3011_v58, %v18372_v4  ;;  %3273 = vmatpush.bf16.msra.mxu0 %v15660_v22 }
 0xeac   :  { %v2984_v13 = vadd.f32 0.112945676, %v2983_v18  ;;  %v3024_v41 = vadd.f32 0.112945676, %v3023_v34  ;;  %v3099_v47 = vmul.f32 3.8918573e-05, %v18398_v45  ;;  %3287 = vmatpush.bf16.msra.mxu1 %v15668_v24 }
 0xead   :  { %v3049_v17 = vadd.f32 0.00028619796, %v3048_v35  ;;  %v3060_v42 = vadd.f32 0.001143296, %v3059_v38  ;;  %v3089_v9 = vadd.f32 0.00028619796, %v3088_v44 }
 0xeae   :  { %v2985_v43 = vmul.f32 %v2984_v13, %v18370_v6  ;;  %v3025_v46 = vmul.f32 %v3024_v41, %v18372_v4  ;;  %v3100_v8 = vadd.f32 0.001143296, %v3099_v47  ;;  %v2973_v10 = vadd.f32 0.05243302, %v2972_v48  ;;  %v15667_v13 = vld [vmem:[#allocation36 + $0x48] sm:$0xff]  ;;  %v15658_v48 = vld [vmem:[#allocation36] sm:$0xff] }
 0xeaf   :  { %v3050_v29 = vmul.f32 %v3049_v17, %v18395_v30  ;;  %v3061_v25 = vmul.f32 %v3060_v42, %v18395_v30  ;;  %v3090_v21 = vmul.f32 %v3089_v9, %v18398_v45  ;;  %v3013_v23 = vadd.f32 0.05243302, %v3012_v19  ;;  %3274 = vmatpush.bf16.msra.mxu0 %v15659_v39 }
 0xeb0   :  { %v2986_v49 = vadd.f32 0.4994258, %v2985_v43  ;;  %v3026_v54 = vadd.f32 0.4994258, %v3025_v46  ;;  %v3101_v52 = vmul.f32 %v3100_v8, %v18398_v45  ;;  %v2974_v57 = vmul.f32 %v2973_v10, %v18370_v6  ;;  %3288 = vmatpush.bf16.msra.mxu1 %v15667_v13 }
 0xeb1   :  { %v3062_v36 = vadd.f32 0.014752088, %v3061_v25  ;;  %v3051_v56 = vadd.f32 0.0036580483, %v3050_v29  ;;  %v3091_v1 = vadd.f32 0.0036580483, %v3090_v21  ;;  %v3014_v5 = vmul.f32 %v3013_v23, %v18372_v4 }
 0xeb2   :  { %v2987_v55 = vmul.f32 %v2986_v49, %v18370_v6  ;;  %v3027_v62 = vmul.f32 %v3026_v54, %v18372_v4  ;;  %v3102_v28 = vadd.f32 0.014752088, %v3101_v52  ;;  %v2975_v38 = vadd.f32 0.18741608, %v2974_v57  ;;  %v15666_v49 = vld [vmem:[#allocation36 + $0x40] sm:$0xff] }
 0xeb3   :  { %v3063_v7 = vmul.f32 %v3062_v36, %v18395_v30  ;;  %v3052_v0 = vmul.f32 %v3051_v56, %v18395_v30  ;;  %v3092_v29 = vmul.f32 %v3091_v1, %v18398_v45  ;;  %v3015_v51 = vadd.f32 0.18741608, %v3014_v5  ;;  %3275 = vmatpush.bf16.msra.mxu0 %v15658_v48 }
 0xeb4   :  { %v18414_v11 = vadd.f32 1.0, %v2987_v55  ;;  %v18416_v2 = vadd.f32 1.0, %v3027_v62  ;;  %v3103_v34 = vmul.f32 %v3102_v28, %v18398_v45  ;;  %v2976_v25 = vmul.f32 %v2975_v38, %v18370_v6  ;;  %3289 = vmatpush.bf16.msra.mxu1 %v15666_v49 }
 0xeb5   :  { %v3064_v15 = vadd.f32 0.112945676, %v3063_v7  ;;  %v3053_v31 = vadd.f32 0.05243302, %v3052_v0  ;;  %v3093_v62 = vadd.f32 0.05243302, %v3092_v29 }
 0xeb6   :  { %16780 = vrcp.f32 %v18414_v11  ;;  %v3104_v44 = vadd.f32 0.112945676, %v3103_v34  ;;  %v3000_v59 = vand.u32 2147483648, %v18414_v11  ;;  %v2977_v7 = vadd.f32 1.1283791, %v2976_v25 }
 0xeb7   :  { %16782 = vrcp.f32 %v18416_v2  ;;  %v3065_v26 = vmul.f32 %v3064_v15, %v18395_v30  ;;  %v3054_v40 = vmul.f32 %v3053_v31, %v18395_v30  ;;  %vm2994_vm14 = vweird.f32 %v18414_v11 }
 0xeb8   :  { %v3105_v47 = vmul.f32 %v3104_v44, %v18398_v45  ;;  %v2998_v6 = vand.u32 2147483647, %v18414_v11  ;;  %v3001_v32 = vor.u32 1.1754944e-38, %v3000_v59  ;;  %v3094_v0 = vmul.f32 %v3093_v62, %v18398_v45 }
 0xeb9   :  { %v3066_v18 = vadd.f32 0.4994258, %v3065_v26  ;;  %v3055_v55 = vadd.f32 0.18741608, %v3054_v40  ;;  %v2978_v19 = vmul.f32 %v2977_v7, %v18361_v61  ;;  %v3040_v24 = vand.u32 2147483648, %v18416_v2 }
 0xeba   :  { %v3106_v58 = vadd.f32 0.4994258, %v3105_v47  ;;  %vm2999_vm0 = vcmp.eq.f32.partialorder %v2998_v6, 8.507059e+37  ;;  %vm3034_vm2 = vweird.f32 %v18416_v2  ;;  %v3095_v23 = vadd.f32 0.18741608, %v3094_v0 }
 0xebb   :  { %v3067_v42 = vmul.f32 %v3066_v18, %v18395_v30  ;;  %v3056_v14 = vmul.f32 %v3055_v55, %v18395_v30  ;;  %v3038_v30 = vand.u32 2147483647, %v18416_v2  ;;  %v3041_v38 = vor.u32 1.1754944e-38, %v3040_v24 }
 0xebc   :  { %v16781_v35 = vpop.eup %16780  ;;  %v3107_v9 = vmul.f32 %v3106_v58, %v18398_v45  ;;  %v2960_v55 = vmul.f32 0.5, %v18376_v63  ;;  %v2959_v63 = vmul.f32 0.5, %v18358_v33 }
 0xebd   :  { %v18427_v41 = vpop.eup %16782  ;;  %v2990_v17 = vmul.f32 %v16781_v35, %v18414_v11  ;;  %v3068_v46 = vadd.f32 1.0, %v3067_v42  ;;  %vm2995_vm13 = vweird.f32 %v16781_v35  ;;  %v3016_v11 = vmul.f32 %v3015_v51, %v18372_v4 }
 0xebe   :  { %v3030_v43 = vmul.f32 %v18427_v41, %v18416_v2  ;;  %vm2996_vm15 = vmor %vm2994_vm14, %vm2995_vm13  ;;  %v18444_v15 = vadd.f32 1.0, %v3107_v9  ;;  %vm3035_vm1 = vweird.f32 %v18427_v41  ;;  %v3057_v26 = vadd.f32 1.1283791, %v3056_v14 }
 0xebf   :  { %v2991_v27 = vsub.f32 1.0, %v2990_v17  ;;  %16784 = vrcp.f32 %v3068_v46  ;;  %v3078_v61 = vand.u32 2147483647, %v3068_v46  ;;  %v3080_v31 = vand.u32 2147483648, %v3068_v46  ;;  %vm18455_vm3 = vmor %vm3034_vm2, %vm3035_vm1 }
 0xec0   :  { %v3031_v36 = vsub.f32 1.0, %v3030_v43  ;;  %16786 = vrcp.f32 %v18444_v15  ;;  %v3017_v34 = vadd.f32 1.1283791, %v3016_v11  ;;  %vm3039_vm5 = vcmp.eq.f32.partialorder %v3038_v30, 8.507059e+37  ;;  %v16717_v11 = vld [vmem:[#allocation37] ss:$0 sm:$0xff] }
 0xec1   :  { %v2992_v54 = vmul.f32 %v16781_v35, %v2991_v27  ;;  %vm3074_vm6 = vweird.f32 %v3068_v46  ;;  %v3058_v13 = vmul.f32 %v3057_v26, %v18382_v16  ;;  %vm3079_vm8 = vcmp.eq.f32.partialorder %v3078_v61, 8.507059e+37 }
 0xec2   :  { %v3032_v8 = vmul.f32 %v18427_v41, %v3031_v36  ;;  %v3081_v17 = vor.u32 1.1754944e-38, %v3080_v31  ;;  %v3096_v42 = vmul.f32 %v3095_v23, %v18398_v45  ;;  %v3018_v5 = vmul.f32 %v3017_v34, %v18364_v3 }
 0xec3   :  { %v2993_v56 = vadd.f32 %v16781_v35, %v2992_v54  ;;  %v3118_v48 = vand.u32 2147483647, %v18444_v15  ;;  %v3120_v16 = vand.u32 2147483648, %v18444_v15  ;;  %v2958_v45 = vmul.f32 0.5, %v18356_v60 }
 0xec4   :  { %v3033_v22 = vadd.f32 %v18427_v41, %v3032_v8  ;;  %vm3114_vm10 = vweird.f32 %v18444_v15 }
 0xec5   :  { %v2997_v10 = vsel %vm2996_vm15, %v16781_v35, %v2993_v56  ;;  %v16785_v52 = vpop.eup %16784  ;;  %v3121_v51 = vor.u32 1.1754944e-38, %v3120_v16  ;;  %vm3119_vm12 = vcmp.eq.f32.partialorder %v3118_v48, 8.507059e+37  ;;  %v12158_v16 = vld [vmem:[#allocation45 + $0x3c0] sm:$0xf0] }
 0xec6   :  { %v3070_v21 = vmul.f32 %v16785_v52, %v3068_v46  ;;  %v3002_v57 = vsel %vm2999_vm0, %v3001_v32, %v2997_v10  ;;  %vm3075_vm4 = vweird.f32 %v16785_v52  ;;  %v3037_v35 = vsel %vm18455_vm3, %v18427_v41, %v3033_v22  ;;  %v16787_v2 = vpop.eup %16786 }
 0xec7   :  { %v3003_v4 = vmul.f32 %v3002_v57, %v2978_v19  ;;  %vm3076_vm7 = vmor %vm3074_vm6, %vm3075_vm4  ;;  %v3042_v40 = vsel %vm3039_vm5, %v3041_v38, %v3037_v35  ;;  %v3110_v27 = vmul.f32 %v16787_v2, %v18444_v15  ;;  %v3097_v46 = vadd.f32 1.1283791, %v3096_v42  ;;  %v15680_v35 = vld [vmem:[#allocation42 + $0x30] sm:$0xff]  ;;  %v15679_v38 = vld [vmem:[#allocation42 + $0x28] sm:$0xff] }
 0xec8   :  { %v3071_v28 = vsub.f32 1.0, %v3070_v21  ;;  %v3043_v47 = vmul.f32 %v3042_v40, %v3018_v5  ;;  %vm3115_vm9 = vweird.f32 %v16787_v2  ;;  %vm3353_vm3 = vcmask 1040384  }
 0xec9   :  { %v11606_v43 = vclamps-f32 %v3003_v4, 1.0  ;;  %v3111_v25 = vsub.f32 1.0, %v3110_v27  ;;  %v3098_v59 = vmul.f32 %v3097_v46, %v18387_v37  ;;  %vm3116_vm11 = vmor %vm3114_vm10, %vm3115_vm9 }
 0xeca   :  { %v3072_v1 = vmul.f32 %v16785_v52, %v3071_v28  ;;  %v11607_v3 = vclamps-f32 %v3043_v47, 1.0 }
 0xecb   :  { %v3126_v49 = vadd.f32 1.0, %v11606_v43  ;;  %v3112_v36 = vmul.f32 %v16787_v2, %v3111_v25  ;;  %v15675_v43 = vld [vmem:[#allocation42 + $0x8] sm:$0xff] }
 0xecc   :  { %v3073_v39 = vadd.f32 %v16785_v52, %v3072_v1  ;;  %v3127_v14 = vadd.f32 1.0, %v11607_v3  ;;  %v15794_v25 = vld [vmem:[#allocation45 + $0x384] sm:$0xf]  ;;  %v12092_v3 = vld [vmem:[#allocation45 + $0x300] sm:$0xf] }
 0xecd   :  { %v3113_v56 = vadd.f32 %v16787_v2, %v3112_v36  ;;  %v3130_v62 = vmul.f32 %v3126_v49, %v2958_v45  ;;  %v12164_v49 = vld [vmem:[#allocation45 + $0x388] sm:$0xf]  ;;  %v12161_v36 = vor.u32 %v15794_v25, %v12158_v16  ;;  %v15731_v16 = vld [vmem:[#allocation45 + $0x18c] sm:$0xf] }
 0xece   :  { %v3077_v44 = vsel %vm3076_vm7, %v16785_v52, %v3073_v39  ;;  %v2961_v52 = vmul.f32 0.5, %v18379_v12  ;;  %v3131_v32 = vmul.f32 %v3127_v14, %v2959_v63  ;;  %v15678_v39 = vld [vmem:[#allocation42 + $0x20] sm:$0xff]  ;;  %v15803_v45 = vld [vmem:[#allocation45 + $0x3c4] sm:$0xf0]  ;;  %v15779_v14 = vld [vmem:[#allocation45 + $0x30c] sm:$0xf] }
 0xecf   :  { %v3082_v41 = vsel %vm3079_vm8, %v3081_v17, %v3077_v44  ;;  %v3117_v6 = vsel %vm3116_vm11, %v16787_v2, %v3113_v56  ;;  %v15677_v2 = vld [vmem:[#allocation42 + $0x18] sm:$0xff]  ;;  %v15676_v17 = vld [vmem:[#allocation42 + $0x10] sm:$0xff]  ;;  %v15674_v44 = vld [vmem:[#allocation42] sm:$0xff]  ;;  %4256 = vmatpush.bf16.msrb.mxu0 %v12161_v36 }
 0xed0   :  { %v3083_v29 = vmul.f32 %v3082_v41, %v3058_v13  ;;  %v3122_v9 = vsel %vm3119_vm12, %v3121_v51, %v3117_v6  ;;  %v12156_v41 = vld [vmem:[#allocation45 + $0x380] sm:$0xf]  ;;  %v12094_v6 = vld [vmem:[#allocation45 + $0x340] sm:$0xf0]  ;;  %v11910_v36 = vld [vmem:[#allocation45 + $0x1c8] sm:$0xf0] }
 0xed1   :  { %v3123_v8 = vmul.f32 %v3122_v9, %v3098_v59  ;;  %v15786_v59 = vld [vmem:[#allocation45 + $0x33c] sm:$0xf0]  ;;  %v12100_v9 = vld [vmem:[#allocation45 + $0x308] sm:$0xf] }
 0xed2   :  { %v11608_v54 = vclamps-f32 %v3083_v29, 1.0  ;;  %v15802_v29 = vld [vmem:[#allocation45 + $0x3bc] sm:$0xf0] }
 0xed3   :  { %v11609_v60 = vclamps-f32 %v3123_v8, 1.0  ;;  %v12157_v48 = vor.u32 %v15802_v29, %v12156_v41  ;;  %v11902_v41 = vld [vmem:[#allocation45 + $0x1c0] sm:$0xf0]  ;;  %v11908_v29 = vld [vmem:[#allocation45 + $0x188] sm:$0xf] }
 0xed4   :  { %v3128_v58 = vadd.f32 1.0, %v11608_v54 }
 0xed5   :  { %v3129_v15 = vadd.f32 1.0, %v11609_v60  ;;  %4243 = vmatpush.bf16.msra.mxu3 %v12157_v48  ;;  %v12102_v60 = vld [vmem:[#allocation45 + $0x348] sm:$0xf0]  ;;  %v15739_v48 = vld [vmem:[#allocation45 + $0x1c4] sm:$0xf0] }
 0xed6   :  { %v3132_v7 = vmul.f32 %v3128_v58, %v2960_v55  ;;  %v15795_v55 = vld [vmem:[#allocation45 + $0x38c] sm:$0xf] }
 0xed7   :  { %v3133_v0 = vmul.f32 %v3129_v15, %v2961_v52  ;;  %v12166_v58 = vld [vmem:[#allocation45 + $0x3c8] sm:$0xf0]  ;;  %v12105_v15 = vor.u32 %v15779_v14, %v12102_v60 }
 0xed8   :  { %v3134_v10 = vpack.c.bf16 %v3132_v7, %v3130_v62  ;;  %v12169_v56 = vor.u32 %v15795_v55, %v12166_v58  ;;  %v12093_v62 = vor.u32 %v15786_v59, %v12092_v3  ;;  %v15778_v7 = vld [vmem:[#allocation45 + $0x304] sm:$0xf]  ;;  %v11836_v58 = vld [vmem:[#allocation45 + $0x100] sm:$0xf]  ;;  %v11913_v3 = vor.u32 %v15731_v16, %v11910_v36 }
 0xed9   :  { %v3135_v37 = vpack.c.bf16 %v3133_v0, %v3131_v32  ;;  %v12097_v8 = vor.u32 %v15778_v7, %v12094_v6  ;;  %v12028_v32 = vld [vmem:[#allocation45 + $0x280] sm:$0xf]  ;;  %v15714_v59 = vld [vmem:[#allocation45 + $0x104] sm:$0xf]  ;;  %v15723_v6 = vld [vmem:[#allocation45 + $0x144] sm:$0xf0] }
 0xeda   :  { %3276 = vmatmul.bf16.vlgmr.msra.gmra.mxu0 %v3134_v10  ;;  %v15787_v10 = vld [vmem:[#allocation45 + $0x344] sm:$0xf0]  ;;  %v15770_v0 = vld [vmem:[#allocation45 + $0x2bc] sm:$0xf0]  ;;  %4244 = vmatpush.bf16.msra.mxu3 %v12093_v62 }
 0xedb   :  { %3290 = vmatmul.bf16.vlgmr.msra.gmra.mxu1 %v3135_v37  ;;  %v12101_v52 = vor.u32 %v15787_v10, %v12100_v9  ;;  %v12029_v37 = vor.u32 %v15770_v0, %v12028_v32  ;;  %4257 = vmatpush.bf16.msrb.mxu0 %v12097_v8  ;;  %v11844_v62 = vld [vmem:[#allocation45 + $0x108] sm:$0xf]  ;;  %v11846_v9 = vld [vmem:[#allocation45 + $0x148] sm:$0xf0]  ;;  %v16718_v8 = vld [vmem:[#allocation39] ss:$0 sm:$0xff] }
 0xedc   :  { %v11845_v0 = vor.u32 %v15723_v6, %v11844_v62  ;;  %v12118_v62 = vld [vmem:[#allocation45 + $0x358] sm:$0xf0] }
 0xede   :  { %4245 = vmatpush.bf16.msra.mxu3 %v12029_v37 }
 0xf57   :  { %v3277_v19 = vpop.f32.mrf.mxu0 }
 0xf58   :  { %v3278_v21 = vadd.f32 %v16717_v11, %v3277_v19  ;;  %v3291_v57 = vpop.f32.mrf.mxu1  ;;  %v15762_v19 = vld [vmem:[#allocation45 + $0x284] sm:$0xf] }
 0xf5a   :  { %v3292_v22 = vadd.f32 %v3291_v57, %v3278_v21  ;;  %v12036_v21 = vld [vmem:[#allocation45 + $0x288] sm:$0xf] }
 0xf5c   :  { %v3296_v24 = vadd.f32 %v3292_v22, %v18350_v53 }
 0xf5e   :  { %3300 = vadd.xlane.f32.xlu0 %v3296_v24 }
 0xf5f   :  { %v3279_v30 = vpop.f32.mrf.mxu0 }
 0xf60   :  { %v3280_v26 = vadd.f32 %v16717_v11, %v3279_v30  ;;  %v3293_v28 = vpop.f32.mrf.mxu1  ;;  %v12030_v11 = vld [vmem:[#allocation45 + $0x2c0] sm:$0xf0]  ;;  %v15771_v30 = vld [vmem:[#allocation45 + $0x2c4] sm:$0xf0] }
 0xf61   :  { %v12033_v22 = vor.u32 %v15762_v19, %v12030_v11  ;;  %v15698_v19 = vld [vmem:[#allocation45 + $0x84] sm:$0xf]  ;;  %v11780_v11 = vld [vmem:[#allocation45 + $0x88] sm:$0xf] }
 0xf62   :  { %v3294_v61 = vadd.f32 %v3293_v28, %v3280_v26  ;;  %v12037_v28 = vor.u32 %v15771_v30, %v12036_v21  ;;  %v15707_v21 = vld [vmem:[#allocation45 + $0xc4] sm:$0xf0] }
 0xf63   :  { %4258 = vmatpush.bf16.msrb.mxu0 %v12033_v22  ;;  %v11782_v22 = vld [vmem:[#allocation45 + $0xc8] sm:$0xf0] }
 0xf64   :  { %v3297_v33 = vadd.f32 %v3294_v61, %v18352_v50  ;;  %v15681_v50 = vld [vmem:[#allocation42 + $0x38] sm:$0xff]  ;;  %v12038_v61 = vld [vmem:[#allocation45 + $0x2c8] sm:$0xf0] }
 0xf65   :  { %3424 = vmatpush.bf16.msra.mxu2 %v15681_v50 }
 0xf66   :  { %3302 = vadd.xlane.f32.xlu2 %v3297_v33 }
 0xf69   :  { %3425 = vmatpush.bf16.msra.mxu2 %v15680_v35  ;;  %v15755_v35 = vld [vmem:[#allocation45 + $0x244] sm:$0xf0] }
 0xf6d   :  { %3426 = vmatpush.bf16.msra.mxu2 %v15679_v38  ;;  %v15747_v38 = vld [vmem:[#allocation45 + $0x20c] sm:$0xf] }
 0xf71   :  { %3427 = vmatpush.bf16.msra.mxu2 %v15678_v39 }
 0xf75   :  { %3428 = vmatpush.bf16.msra.mxu2 %v15677_v2 }
 0xf79   :  { %3429 = vmatpush.bf16.msra.mxu2 %v15676_v17  ;;  %v11974_v17 = vld [vmem:[#allocation45 + $0x248] sm:$0xf0] }
 0xf7d   :  { %3430 = vmatpush.bf16.msra.mxu2 %v15675_v43  ;;  %v15738_v43 = vld [vmem:[#allocation45 + $0x1bc] sm:$0xf0] }
 0xf81   :  { %3431 = vmatpush.bf16.msra.mxu2 %v15674_v44 }
 0xf85   :  { %4282 = vmatpush.bf16.msrb.mxu2 %v12169_v56  ;;  %v11909_v56 = vor.u32 %v15739_v48, %v11908_v29  ;;  %v12182_v29 = vld [vmem:[#allocation45 + $0x3d8] sm:$0xf0] }
 0xf89   :  { %4283 = vmatpush.bf16.msrb.mxu2 %v12105_v15  ;;  %v15706_v15 = vld [vmem:[#allocation45 + $0xbc] sm:$0xf0] }
 0xfd1   :  { %v3301_v12 = vpop.xlane.xlu0 %3300 }
 0xfd2   :  { %v3304_v31 = vmul.f32 %v3301_v12, %v18097_v20  ;;  %v15754_v12 = vld [vmem:[#allocation45 + $0x23c] sm:$0xf0] }
 0xfd4   :  { %v18477_v23 = vsub.f32 %v3296_v24, %v3304_v31  ;;  %v15763_v24 = vld [vmem:[#allocation45 + $0x28c] sm:$0xf] }
 0xfd6   :  { %v3308_v4 = vmul.f32 %v18477_v23, %v18477_v23 }
 0xfd8   :  { %3310 = vadd.xlane.f32.xlu2 %v3308_v4  ;;  %v12041_v4 = vor.u32 %v15763_v24, %v12038_v61  ;;  %v15690_v61 = vld [vmem:[#allocation45 + $0x3c] sm:$0xf0] }
 0xfd9   :  { %v3303_v18 = vpop.xlane.xlu2 %3302 }
 0xfda   :  { %v3305_v1 = vmul.f32 %v3303_v18, %v18097_v20  ;;  %v15746_v18 = vld [vmem:[#allocation45 + $0x204] sm:$0xf]  ;;  %4284 = vmatpush.bf16.msrb.mxu2 %v12041_v4 }
 0xfdc   :  { %v18482_v53 = vsub.f32 %v3297_v33, %v3305_v1  ;;  %v11964_v33 = vld [vmem:[#allocation45 + $0x200] sm:$0xf]  ;;  %v11966_v1 = vld [vmem:[#allocation45 + $0x240] sm:$0xf0] }
 0xfdd   :  { %v11965_v50 = vor.u32 %v15754_v12, %v11964_v33  ;;  %v15682_v33 = vld [vmem:[#allocation45 + $0x4] sm:$0xf] }
 0xfde   :  { %v3309_v34 = vmul.f32 %v18482_v53, %v18482_v53  ;;  %v11710_v12 = vld [vmem:[#allocation45 + $0x40] sm:$0xf0] }
 0xfdf   :  { %4246 = vmatpush.bf16.msra.mxu3 %v11965_v50  ;;  %v15683_v50 = vld [vmem:[#allocation45 + $0xc] sm:$0xf] }
 0xfe0   :  { %3312 = vadd.xlane.f32.xlu1 %v3309_v34  ;;  %v11972_v34 = vld [vmem:[#allocation45 + $0x208] sm:$0xf] }
 0xfe1   :  { %v11973_v44 = vor.u32 %v15755_v35, %v11972_v34  ;;  %v15691_v34 = vld [vmem:[#allocation45 + $0x44] sm:$0xf0]  ;;  %v11718_v35 = vld [vmem:[#allocation45 + $0x48] sm:$0xf0] }
 0xfe2   :  { %v11721_v16 = vor.u32 %v15683_v50, %v11718_v35  ;;  %v15733_v50 = vld [vmem:[#allocation45 + $0x19c] sm:$0xf] }
 0xfe3   :  { %v11926_v35 = vld [vmem:[#allocation45 + $0x1d8] sm:$0xf0] }
0x104b   :  { %v3311_v13 = vpop.xlane.xlu2 %3310 }
0x104c   :  { %v3314_v42 = vmul.f32 %v3311_v13, %v18097_v20  ;;  %v11969_v13 = vor.u32 %v15746_v18, %v11966_v1  ;;  %v11781_v18 = vor.u32 %v15707_v21, %v11780_v11  ;;  %v15748_v21 = vld [vmem:[#allocation45 + $0x214] sm:$0xf] }
0x104e   :  { %v18487_v40 = vadd.f32 1e-12, %v3314_v42  ;;  %v11900_v42 = vld [vmem:[#allocation45 + $0x180] sm:$0xf]  ;;  %4259 = vmatpush.bf16.msrb.mxu0 %v11969_v13 }
0x1050   :  { %16788 = vrsqrt.f32 %v18487_v40  ;;  %vm3324_vm14 = vweird.f32 %v18487_v40 }
0x1053   :  { %v3313_v27 = vpop.xlane.xlu1 %3312 }
0x1054   :  { %v3315_v5 = vmul.f32 %v3313_v27, %v18097_v20  ;;  %v12165_v20 = vor.u32 %v15803_v45, %v12164_v49  ;;  %v11977_v27 = vor.u32 %v15747_v38, %v11974_v17  ;;  %v12172_v38 = vld [vmem:[#allocation45 + $0x390] sm:$0xf] }
0x1056   :  { %v18491_v47 = vpop.eup %16788  ;;  %v18493_v46 = vadd.f32 1e-12, %v3315_v5  ;;  %4269 = vmatpush.bf16.msrb.mxu1 %v12165_v20  ;;  %v15730_v5 = vld [vmem:[#allocation45 + $0x184] sm:$0xf]  ;;  %v15722_v20 = vld [vmem:[#allocation45 + $0x13c] sm:$0xf0]  ;;  %4285 = vmatpush.bf16.msrb.mxu2 %v11977_v27  ;;  %v11713_v27 = vor.u32 %v15682_v33, %v11710_v12 }
0x1057   :  { %v3319_v54 = vmul.f32 %v18491_v47, %v18487_v40  ;;  %vm3325_vm13 = vweird.f32 %v18491_v47  ;;  %v11905_v40 = vor.u32 %v15730_v5, %v11902_v41  ;;  %v11837_v14 = vor.u32 %v15722_v20, %v11836_v58  ;;  %v15805_v5 = vld [vmem:[#allocation45 + $0x3d4] sm:$0xf0]  ;;  %v15797_v41 = vld [vmem:[#allocation45 + $0x39c] sm:$0xf]  ;;  %v15780_v20 = vld [vmem:[#allocation45 + $0x314] sm:$0xf] }
0x1058   :  { %16790 = vrsqrt.f32 %v18493_v46  ;;  %vm18509_vm15 = vmor %vm3324_vm14, %vm3325_vm13  ;;  %vm3334_vm1 = vweird.f32 %v18493_v46  ;;  %v12185_v58 = vor.u32 %v15797_v41, %v12182_v29  ;;  %v15740_v33 = vld [vmem:[#allocation45 + $0x1cc] sm:$0xf0]  ;;  %v15725_v41 = vld [vmem:[#allocation45 + $0x154] sm:$0xf0] }
0x1059   :  { %v3320_v51 = vmul.f32 %v18491_v47, %v3319_v54  ;;  %v11901_v54 = vor.u32 %v15738_v43, %v11900_v42  ;;  %4260 = vmatpush.bf16.msrb.mxu0 %v11905_v40  ;;  %v12174_v43 = vld [vmem:[#allocation45 + $0x3d0] sm:$0xf0] }
0x105a   :  { %4270 = vmatpush.bf16.msrb.mxu1 %v12101_v52  ;;  %v11772_v52 = vld [vmem:[#allocation45 + $0x80] sm:$0xf]  ;;  %4286 = vmatpush.bf16.msrb.mxu2 %v11913_v3  ;;  %v12116_v3 = vld [vmem:[#allocation45 + $0x318] sm:$0xf] }
0x105b   :  { %v3321_v63 = vmul.f32 0.5, %v3320_v51  ;;  %v11838_v51 = vld [vmem:[#allocation45 + $0x140] sm:$0xf0]  ;;  %4247 = vmatpush.bf16.msra.mxu3 %v11901_v54 }
0x105d   :  { %v3322_v57 = vsub.f32 1.5, %v3321_v63  ;;  %v11841_v63 = vor.u32 %v15714_v59, %v11838_v51  ;;  %v15789_v59 = vld [vmem:[#allocation45 + $0x354] sm:$0xf0]  ;;  %v15781_v51 = vld [vmem:[#allocation45 + $0x31c] sm:$0xf] }
0x105e   :  { %v18499_v26 = vpop.eup %16790  ;;  %4271 = vmatpush.bf16.msrb.mxu1 %v12037_v28  ;;  %v11708_v28 = vld [vmem:[#allocation45] sm:$0xf] }
0x105f   :  { %v3329_v31 = vmul.f32 %v18499_v26, %v18493_v46  ;;  %v3323_v39 = vmul.f32 %v18491_v47, %v3322_v57  ;;  %vm3335_vm0 = vweird.f32 %v18499_v26  ;;  %v16719_v46 = vld [vmem:[#allocation40] ss:$0 sm:$0xff]  ;;  %v15699_v57 = vld [vmem:[#allocation45 + $0x8c] sm:$0xf]  ;;  %4248 = vmatpush.bf16.msra.mxu3 %v11837_v14  ;;  %4261 = vmatpush.bf16.msrb.mxu0 %v11841_v63  ;;  %v11709_v42 = vor.u32 %v15690_v61, %v11708_v28  ;;  %v15764_v14 = vld [vmem:[#allocation45 + $0x294] sm:$0xf] }
0x1060   :  { %vm3336_vm2 = vmor %vm3334_vm1, %vm3335_vm0  ;;  %v11785_v1 = vor.u32 %v15699_v57, %v11782_v22  ;;  %v12052_v63 = vld [vmem:[#allocation45 + $0x298] sm:$0xf]  ;;  %v11982_v57 = vld [vmem:[#allocation45 + $0x250] sm:$0xf0] }
0x1061   :  { %v3330_v2 = vmul.f32 %v18499_v26, %v3329_v31  ;;  %v3327_v45 = vsel %vm18509_vm15, %v18491_v47, %v3323_v39  ;;  %v15715_v47 = vld [vmem:[#allocation45 + $0x10c] sm:$0xf]  ;;  %v11716_v31 = vld [vmem:[#allocation45 + $0x8] sm:$0xf]  ;;  %v15804_v39 = vld [vmem:[#allocation45 + $0x3cc] sm:$0xf0]  ;;  %v11985_v61 = vor.u32 %v15748_v21, %v11982_v57 }
0x1062   :  { %4272 = vmatpush.bf16.msrb.mxu1 %v11973_v44  ;;  %v3338_v10 = vmul.f32 %v3327_v45, %v18477_v23  ;;  %v11849_v37 = vor.u32 %v15715_v47, %v11846_v9  ;;  %v11774_v23 = vld [vmem:[#allocation45 + $0xc0] sm:$0xf0]  ;;  %v12180_v44 = vld [vmem:[#allocation45 + $0x398] sm:$0xf]  ;;  %v11717_v48 = vor.u32 %v15691_v34, %v11716_v31  ;;  %v12173_v54 = vor.u32 %v15804_v39, %v12172_v38  ;;  %v12108_v45 = vld [vmem:[#allocation45 + $0x310] sm:$0xf] }
0x1063   :  { %v3331_v25 = vmul.f32 0.5, %v3330_v2  ;;  %v15796_v2 = vld [vmem:[#allocation45 + $0x394] sm:$0xf]  ;;  %v12181_v40 = vor.u32 %v15805_v5, %v12180_v44  ;;  %v12044_v47 = vld [vmem:[#allocation45 + $0x290] sm:$0xf] }
0x1064   :  { %v3343_v30 = vmul.f32 %v16718_v8, %v3338_v10  ;;  %4287 = vmatpush.bf16.msrb.mxu2 %v11849_v37  ;;  %v12177_v36 = vor.u32 %v15796_v2, %v12174_v43  ;;  %v15772_v9 = vld [vmem:[#allocation45 + $0x2cc] sm:$0xf0]  ;;  %v12121_v10 = vor.u32 %v15781_v51, %v12118_v62  ;;  %v11988_v22 = vld [vmem:[#allocation45 + $0x218] sm:$0xf]  ;;  %v15716_v43 = vld [vmem:[#allocation45 + $0x114] sm:$0xf] }
0x1065   :  { %v3332_v55 = vsub.f32 1.5, %v3331_v25  ;;  %v11980_v37 = vld [vmem:[#allocation45 + $0x210] sm:$0xf]  ;;  %v15741_v34 = vld [vmem:[#allocation45 + $0x1d4] sm:$0xf0] }
0x1066   :  { %4273 = vmatpush.bf16.msrb.mxu1 %v11909_v56  ;;  %v3348_v13 = vadd.f32 %v16719_v46, %v3343_v30  ;;  %v12110_v56 = vld [vmem:[#allocation45 + $0x350] sm:$0xf0]  ;;  %v15757_v30 = vld [vmem:[#allocation45 + $0x254] sm:$0xf0]  ;;  %v11798_v51 = vld [vmem:[#allocation45 + $0xd8] sm:$0xf0] }
0x1067   :  { %v3333_v7 = vmul.f32 %v18499_v26, %v3332_v55  ;;  %v15788_v55 = vld [vmem:[#allocation45 + $0x34c] sm:$0xf0]  ;;  %v12113_v6 = vor.u32 %v15780_v20, %v12110_v56  ;;  %v11989_v12 = vor.u32 %v15757_v30, %v11988_v22  ;;  %v11860_v5 = vld [vmem:[#allocation45 + $0x118] sm:$0xf]  ;;  %v12190_v21 = vld [vmem:[#allocation45 + $0x3e0] sm:$0xf0] }
0x1068   :  { %4288 = vmatpush.bf16.msrb.mxu2 %v11785_v1  ;;  %v11924_v1 = vld [vmem:[#allocation45 + $0x198] sm:$0xf]  ;;  %v12196_v57 = vld [vmem:[#allocation45 + $0x3a8] sm:$0xf] }
0x1069   :  { %v3337_v60 = vsel %vm3336_vm2, %v18499_v26, %v3333_v7  ;;  %v11773_v26 = vor.u32 %v15706_v15, %v11772_v52  ;;  %v12109_v7 = vor.u32 %v15788_v55, %v12108_v45  ;;  %v15773_v52 = vld [vmem:[#allocation45 + $0x2d4] sm:$0xf0]  ;;  %v15765_v15 = vld [vmem:[#allocation45 + $0x29c] sm:$0xf]  ;;  %v11925_v2 = vor.u32 %v15741_v34, %v11924_v1  ;;  %v15700_v45 = vld [vmem:[#allocation45 + $0x94] sm:$0xf] }
0x106a   :  { %v3339_v32 = vmul.f32 %v3337_v60, %v18482_v53  ;;  %v11777_v53 = vor.u32 %v15698_v19, %v11774_v23  ;;  %4274 = vmatpush.bf16.msrb.mxu1 %v11845_v0  ;;  %v12046_v60 = vld [vmem:[#allocation45 + $0x2d0] sm:$0xf0]  ;;  %v15756_v19 = vld [vmem:[#allocation45 + $0x24c] sm:$0xf0]  ;;  %v12053_v23 = vor.u32 %v15773_v52, %v12052_v63  ;;  %v15709_v20 = vld [vmem:[#allocation45 + $0xd4] sm:$0xf0] }
0x106b   :  { %4249 = vmatpush.bf16.msra.mxu3 %v11773_v26  ;;  %v12049_v0 = vor.u32 %v15764_v14, %v12046_v60  ;;  %v11990_v26 = vld [vmem:[#allocation45 + $0x258] sm:$0xf0]  ;;  %v11981_v28 = vor.u32 %v15756_v19, %v11980_v37  ;;  %v15693_v14 = vld [vmem:[#allocation45 + $0x54] sm:$0xf0]  ;;  %v12188_v19 = vld [vmem:[#allocation45 + $0x3a0] sm:$0xf] }
0x106c   :  { %v3344_v24 = vmul.f32 %v16718_v8, %v3339_v32  ;;  %4262 = vmatpush.bf16.msrb.mxu0 %v11777_v53  ;;  %4289 = vmatpush.bf16.msrb.mxu2 %v11721_v16  ;;  %v12117_v8 = vor.u32 %v15789_v59, %v12116_v3  ;;  %v12054_v32 = vld [vmem:[#allocation45 + $0x2d8] sm:$0xf0]  ;;  %v11916_v53 = vld [vmem:[#allocation45 + $0x190] sm:$0xf]  ;;  %v15807_v30 = vld [vmem:[#allocation45 + $0x3e4] sm:$0xf0] }
0x106d   :  { %v12057_v11 = vor.u32 %v15765_v15, %v12054_v32  ;;  %v11917_v38 = vor.u32 %v15740_v33, %v11916_v53  ;;  %v11862_v16 = vld [vmem:[#allocation45 + $0x158] sm:$0xf0]  ;;  %v15782_v1 = vld [vmem:[#allocation45 + $0x324] sm:$0xf] }
0x106e   :  { %v3349_v4 = vadd.f32 %v16719_v46, %v3344_v24  ;;  %4275 = vmatpush.bf16.msrb.mxu1 %v11781_v18  ;;  %v12045_v46 = vor.u32 %v15772_v9, %v12044_v47  ;;  %v15749_v24 = vld [vmem:[#allocation45 + $0x21c] sm:$0xf]  ;;  %v11918_v18 = vld [vmem:[#allocation45 + $0x1d0] sm:$0xf0]  ;;  %v12126_v34 = vld [vmem:[#allocation45 + $0x360] sm:$0xf0] }
0x106f   :  { %4250 = vmatpush.bf16.msra.mxu3 %v11709_v42  ;;  %v11993_v31 = vor.u32 %v15749_v24, %v11990_v26  ;;  %v15724_v42 = vld [vmem:[#allocation45 + $0x14c] sm:$0xf0]  ;;  %v15701_v59 = vld [vmem:[#allocation45 + $0x9c] sm:$0xf]  ;;  %v15684_v47 = vld [vmem:[#allocation45 + $0x14] sm:$0xf] }
0x1070   :  { %v3351_v17 = vrot.slane %v3349_v4, 7  ;;  %4263 = vmatpush.bf16.msrb.mxu0 %v11713_v27  ;;  %v15732_v4 = vld [vmem:[#allocation45 + $0x194] sm:$0xf]  ;;  %v11801_v62 = vor.u32 %v15701_v59, %v11798_v51  ;;  %v15685_v52 = vld [vmem:[#allocation45 + $0x1c] sm:$0xf] }
0x1071   :  { %v11921_v39 = vor.u32 %v15732_v4, %v11918_v18  ;;  %v11854_v27 = vld [vmem:[#allocation45 + $0x150] sm:$0xf0]  ;;  %v11734_v15 = vld [vmem:[#allocation45 + $0x58] sm:$0xf0]  ;;  %v15799_v24 = vld [vmem:[#allocation45 + $0x3ac] sm:$0xf]  ;;  %v12197_v4 = vor.u32 %v15807_v30, %v12196_v57 }
0x1072   :  { %v3354_v25 = vsel %vm3353_vm3, %v3348_v13, %v3351_v17  ;;  %4276 = vmatpush.bf16.msrb.mxu1 %v11717_v48  ;;  %v11929_v13 = vor.u32 %v15733_v50, %v11926_v35  ;;  %v11852_v17 = vld [vmem:[#allocation45 + $0x110] sm:$0xf]  ;;  %v11857_v29 = vor.u32 %v15716_v43, %v11854_v27  ;;  %v15717_v48 = vld [vmem:[#allocation45 + $0x11c] sm:$0xf]  ;;  %v11737_v32 = vor.u32 %v15685_v52, %v11734_v15  ;;  %v12198_v26 = vld [vmem:[#allocation45 + $0x3e8] sm:$0xf0] }
0x1073   :  { %v3355_v49 = vpack.c.bf16 %v3354_v25, %v3354_v25  ;;  %4295 = vmatpush.bf16.msrb.mxu3 %v12173_v54  ;;  %v11853_v44 = vor.u32 %v15724_v42, %v11852_v17  ;;  %v11861_v25 = vor.u32 %v15725_v41, %v11860_v5  ;;  %v11788_v54 = vld [vmem:[#allocation45 + $0x90] sm:$0xf]  ;;  %v12201_v18 = vor.u32 %v15799_v24, %v12198_v26  ;;  %v12132_v50 = vld [vmem:[#allocation45 + $0x328] sm:$0xf]  ;;  %v12060_v17 = vld [vmem:[#allocation45 + $0x2a0] sm:$0xf] }
0x1074   :  { %4308 = vmatpush.bf16.msra.mxu0 %v12177_v36  ;;  %v15708_v36 = vld [vmem:[#allocation45 + $0xcc] sm:$0xf0]  ;;  %v15791_v35 = vld [vmem:[#allocation45 + $0x364] sm:$0xf0]  ;;  %v15774_v42 = vld [vmem:[#allocation45 + $0x2dc] sm:$0xf0] }
0x1075   :  { %3432 = vmatmul.bf16.vlgmr.msra.gmra.mxu2 %v3355_v49  ;;  %v11865_v49 = vor.u32 %v15717_v48, %v11862_v16  ;;  %v11789_v55 = vor.u32 %v15708_v36, %v11788_v54  ;;  %v12133_v43 = vor.u32 %v15791_v35, %v12132_v50  ;;  %v15766_v27 = vld [vmem:[#allocation45 + $0x2a4] sm:$0xf]  ;;  %v12068_v41 = vld [vmem:[#allocation45 + $0x2a8] sm:$0xf]  ;;  %v12070_v48 = vld [vmem:[#allocation45 + $0x2e8] sm:$0xf0]  ;;  %v12061_v16 = vor.u32 %v15774_v42, %v12060_v17 }
0x1076   :  { %4321 = vmatpush.bf16.msra.mxu1 %v12181_v40  ;;  %4334 = vmatpush.bf16.msra.mxu2 %v12185_v58  ;;  %v11790_v40 = vld [vmem:[#allocation45 + $0xd0] sm:$0xf0]  ;;  %v11796_v58 = vld [vmem:[#allocation45 + $0x98] sm:$0xf]  ;;  %v12062_v5 = vld [vmem:[#allocation45 + $0x2e0] sm:$0xf0] }
0x1077   :  { %4296 = vmatpush.bf16.msrb.mxu3 %v12109_v7  ;;  %v11793_v56 = vor.u32 %v15700_v45, %v11790_v40  ;;  %v11797_v3 = vor.u32 %v15709_v20, %v11796_v58  ;;  %v11724_v7 = vld [vmem:[#allocation45 + $0x10] sm:$0xf]  ;;  %v11996_v54 = vld [vmem:[#allocation45 + $0x220] sm:$0xf]  ;;  %v15750_v40 = vld [vmem:[#allocation45 + $0x224] sm:$0xf] }
0x1078   :  { %4309 = vmatpush.bf16.msra.mxu0 %v12113_v6  ;;  %v15692_v6 = vld [vmem:[#allocation45 + $0x4c] sm:$0xf0]  ;;  %v15758_v36 = vld [vmem:[#allocation45 + $0x25c] sm:$0xf0]  ;;  %v11998_v58 = vld [vmem:[#allocation45 + $0x260] sm:$0xf0] }
0x1079   :  { %v11725_v9 = vor.u32 %v15692_v6, %v11724_v7  ;;  %v12004_v20 = vld [vmem:[#allocation45 + $0x228] sm:$0xf]  ;;  %v12006_v59 = vld [vmem:[#allocation45 + $0x268] sm:$0xf0]  ;;  %v11997_v51 = vor.u32 %v15758_v36, %v11996_v54  ;;  %v11932_v7 = vld [vmem:[#allocation45 + $0x1a0] sm:$0xf] }
0x107a   :  { %4322 = vmatpush.bf16.msra.mxu1 %v12117_v8  ;;  %4335 = vmatpush.bf16.msra.mxu2 %v12121_v10  ;;  %v11726_v8 = vld [vmem:[#allocation45 + $0x50] sm:$0xf0]  ;;  %v11732_v10 = vld [vmem:[#allocation45 + $0x18] sm:$0xf]  ;;  %v15742_v6 = vld [vmem:[#allocation45 + $0x1dc] sm:$0xf0] }
0x107b   :  { %4297 = vmatpush.bf16.msrb.mxu3 %v12045_v46  ;;  %v11729_v60 = vor.u32 %v15684_v47, %v11726_v8  ;;  %v11733_v63 = vor.u32 %v15693_v14, %v11732_v10  ;;  %v16720_v46 = vld [vmem:[#allocation43] ss:$0 sm:$0xff]  ;;  %v15734_v8 = vld [vmem:[#allocation45 + $0x1a4] sm:$0xf]  ;;  %v11940_v14 = vld [vmem:[#allocation45 + $0x1a8] sm:$0xf]  ;;  %v11933_v15 = vor.u32 %v15742_v6, %v11932_v7 }
0x107c   :  { %4310 = vmatpush.bf16.msra.mxu0 %v12049_v0  ;;  %v11934_v10 = vld [vmem:[#allocation45 + $0x1e0] sm:$0xf0]  ;;  %v11942_v52 = vld [vmem:[#allocation45 + $0x1e8] sm:$0xf0]  ;;  %v15727_v57 = vld [vmem:[#allocation45 + $0x164] sm:$0xf0] }
0x107d   :  { %v11878_v30 = vld [vmem:[#allocation45 + $0x168] sm:$0xf0]  ;;  %v11740_v35 = vld [vmem:[#allocation45 + $0x20] sm:$0xf]  ;;  %v11742_v17 = vld [vmem:[#allocation45 + $0x60] sm:$0xf0] }
0x107e   :  { %4323 = vmatpush.bf16.msra.mxu1 %v12053_v23  ;;  %4336 = vmatpush.bf16.msra.mxu2 %v12057_v11  ;;  %v15806_v23 = vld [vmem:[#allocation45 + $0x3dc] sm:$0xf0]  ;;  %v15798_v11 = vld [vmem:[#allocation45 + $0x3a4] sm:$0xf]  ;;  %v11814_v50 = vld [vmem:[#allocation45 + $0xe8] sm:$0xf0] }
0x107f   :  { %4298 = vmatpush.bf16.msrb.mxu3 %v11981_v28  ;;  %v12189_v53 = vor.u32 %v15806_v23, %v12188_v19  ;;  %v12193_v33 = vor.u32 %v15798_v11, %v12190_v21  ;;  %v15718_v23 = vld [vmem:[#allocation45 + $0x124] sm:$0xf]  ;;  %v11876_v21 = vld [vmem:[#allocation45 + $0x128] sm:$0xf]  ;;  %v15784_v6 = vld [vmem:[#allocation45 + $0x334] sm:$0xf] }
0x1080   :  { %4311 = vmatpush.bf16.msra.mxu0 %v11985_v61  ;;  %v11870_v11 = vld [vmem:[#allocation45 + $0x160] sm:$0xf0] }
0x1081   :  { %v11873_v26 = vor.u32 %v15718_v23, %v11870_v11  ;;  %v15777_v23 = vld [vmem:[#allocation45 + $0x2f4] sm:$0xf0]  ;;  %v15769_v11 = vld [vmem:[#allocation45 + $0x2bc] sm:$0xf] }
0x1082   :  { %4324 = vmatpush.bf16.msra.mxu1 %v11989_v12  ;;  %4337 = vmatpush.bf16.msra.mxu2 %v11993_v31  ;;  %v12124_v12 = vld [vmem:[#allocation45 + $0x320] sm:$0xf] }
0x1083   :  { %4299 = vmatpush.bf16.msrb.mxu3 %v11917_v38  ;;  %v15790_v31 = vld [vmem:[#allocation45 + $0x35c] sm:$0xf0]  ;;  %v15783_v38 = vld [vmem:[#allocation45 + $0x32c] sm:$0xf] }
0x1084   :  { %4312 = vmatpush.bf16.msra.mxu0 %v11921_v39  ;;  %v12134_v39 = vld [vmem:[#allocation45 + $0x368] sm:$0xf0] }
0x1086   :  { %4325 = vmatpush.bf16.msra.mxu1 %v11925_v2  ;;  %4338 = vmatpush.bf16.msra.mxu2 %v11929_v13  ;;  %v12125_v2 = vor.u32 %v15790_v31, %v12124_v12  ;;  %v12129_v13 = vor.u32 %v15782_v1, %v12126_v34  ;;  %v15702_v31 = vld [vmem:[#allocation45 + $0xa4] sm:$0xf]  ;;  %v15711_v1 = vld [vmem:[#allocation45 + $0xe4] sm:$0xf0]  ;;  %v15703_v34 = vld [vmem:[#allocation45 + $0xac] sm:$0xf] }
0x1087   :  { %4300 = vmatpush.bf16.msrb.mxu3 %v11853_v44  ;;  %v12137_v44 = vor.u32 %v15783_v38, %v12134_v39 }
0x1088   :  { %4313 = vmatpush.bf16.msra.mxu0 %v11857_v29  ;;  %v15775_v29 = vld [vmem:[#allocation45 + $0x2e4] sm:$0xf0] }
0x1089   :  { %v12069_v45 = vor.u32 %v15775_v29, %v12068_v41  ;;  %v11750_v41 = vld [vmem:[#allocation45 + $0x68] sm:$0xf0]  ;;  %v12204_v29 = vld [vmem:[#allocation45 + $0x3b0] sm:$0xf] }
0x108a   :  { %4326 = vmatpush.bf16.msra.mxu1 %v11861_v25  ;;  %4339 = vmatpush.bf16.msra.mxu2 %v11865_v49  ;;  %v15767_v25 = vld [vmem:[#allocation45 + $0x2ac] sm:$0xf]  ;;  %v12065_v49 = vor.u32 %v15766_v27, %v12062_v5  ;;  %v15695_v27 = vld [vmem:[#allocation45 + $0x64] sm:$0xf0] }
0x108b   :  { %4301 = vmatpush.bf16.msrb.mxu3 %v11789_v55  ;;  %v12073_v55 = vor.u32 %v15767_v25, %v12070_v48  ;;  %v15687_v5 = vld [vmem:[#allocation45 + $0x2c] sm:$0xf]  ;;  %v15808_v25 = vld [vmem:[#allocation45 + $0x3ec] sm:$0xf0]  ;;  %v15800_v48 = vld [vmem:[#allocation45 + $0x3b4] sm:$0xf] }
0x108c   :  { %4314 = vmatpush.bf16.msra.mxu0 %v11793_v56  ;;  %v15759_v56 = vld [vmem:[#allocation45 + $0x264] sm:$0xf0] }
0x108d   :  { %v12005_v47 = vor.u32 %v15759_v56, %v12004_v20  ;;  %v11753_v20 = vor.u32 %v15687_v5, %v11750_v41  ;;  %v12205_v56 = vor.u32 %v15808_v25, %v12204_v29  ;;  %v11884_v41 = vld [vmem:[#allocation45 + $0x130] sm:$0xf] }
0x108e   :  { %4327 = vmatpush.bf16.msra.mxu1 %v11797_v3  ;;  %4340 = vmatpush.bf16.msra.mxu2 %v11801_v62  ;;  %v15751_v3 = vld [vmem:[#allocation45 + $0x22c] sm:$0xf]  ;;  %v12001_v62 = vor.u32 %v15750_v40, %v11998_v58  ;;  %v12214_v40 = vld [vmem:[#allocation45 + $0x3f8] sm:$0xf0]  ;;  %v15728_v29 = vld [vmem:[#allocation45 + $0x16c] sm:$0xf0] }
0x108f   :  { %4302 = vmatpush.bf16.msrb.mxu3 %v11725_v9  ;;  %v12009_v9 = vor.u32 %v15751_v3, %v12006_v59  ;;  %v12140_v59 = vld [vmem:[#allocation45 + $0x330] sm:$0xf] }
0x1090   :  { %4315 = vmatpush.bf16.msra.mxu0 %v11729_v60  ;;  %v15743_v60 = vld [vmem:[#allocation45 + $0x1e4] sm:$0xf0] }
0x1092   :  { %4328 = vmatpush.bf16.msra.mxu1 %v11733_v63  ;;  %4341 = vmatpush.bf16.msra.mxu2 %v11737_v32  ;;  %v15735_v63 = vld [vmem:[#allocation45 + $0x1ac] sm:$0xf]  ;;  %v11937_v32 = vor.u32 %v15734_v8, %v11934_v10  ;;  %v15793_v8 = vld [vmem:[#allocation45 + $0x374] sm:$0xf0]  ;;  %v15785_v10 = vld [vmem:[#allocation45 + $0x33c] sm:$0xf] }
0x1093   :  { %v11945_v19 = vor.u32 %v15735_v63, %v11942_v52  ;;  %v12076_v52 = vld [vmem:[#allocation45 + $0x2b0] sm:$0xf] }
0x10f8   :  { %v3433_v0 = vpop.f32.mrf.mxu2 }
0x10f9   :  { %v3434_v37 = vadd.f32 %v16720_v46, %v3433_v0  ;;  %v11868_v46 = vld [vmem:[#allocation45 + $0x120] sm:$0xf] }
0x10fa   :  { %v15726_v0 = vld [vmem:[#allocation45 + $0x15c] sm:$0xf0] }
0x10fb   :  { %16792 = vtanh.f32 %v3434_v37  ;;  %v11941_v37 = vor.u32 %v15743_v60, %v11940_v14  ;;  %v11869_v24 = vor.u32 %v15726_v0, %v11868_v46  ;;  %v12150_v14 = vld [vmem:[#allocation45 + $0x378] sm:$0xf0]  ;;  %v15768_v0 = vld [vmem:[#allocation45 + $0x2b4] sm:$0xf] }
0x10fc   :  { %v12153_v46 = vor.u32 %v15785_v10, %v12150_v14  ;;  %v11756_v14 = vld [vmem:[#allocation45 + $0x30] sm:$0xf] }
0x1100   :  { %v3435_v22 = vpop.f32.mrf.mxu2 }
0x1101   :  { %v16793_v28 = vpop.eup %16792  ;;  %v15719_v22 = vld [vmem:[#allocation45 + $0x12c] sm:$0xf] }
0x1102   :  { %v18525_v61 = vpack.c.bf16 %v16793_v28, %v16793_v28  ;;  %v11804_v28 = vld [vmem:[#allocation45 + $0xa0] sm:$0xf]  ;;  %v11881_v12 = vor.u32 %v15719_v22, %v11878_v30  ;;  %v12012_v30 = vld [vmem:[#allocation45 + $0x230] sm:$0xf] }
0x1104   :  { %4251 = vmatmul.bf16.vlgmr.msra.gmra.mxu3 %v18525_v61  ;;  %4264 = vmatmul.bf16.vlgmr.msrb.gmra.mxu0 %v18525_v61 }
0x1105   :  { %4277 = vmatmul.bf16.vlgmr.msrb.gmra.mxu1 %v18525_v61  ;;  %4290 = vmatmul.bf16.vlgmr.msrb.gmra.mxu2 %v18525_v61 }
0x1106   :  { %4347 = vmatpush.bf16.msra.mxu3 %v12189_v53  ;;  %4360 = vmatpush.bf16.msrb.mxu0 %v12193_v33  ;;  %v15710_v53 = vld [vmem:[#allocation45 + $0xdc] sm:$0xf0]  ;;  %v11877_v33 = vor.u32 %v15727_v57, %v11876_v21  ;;  %v12086_v21 = vld [vmem:[#allocation45 + $0x2f8] sm:$0xf0] }
0x1107   :  { %4373 = vmatpush.bf16.msrb.mxu1 %v12197_v4  ;;  %4386 = vmatpush.bf16.msrb.mxu2 %v12201_v18  ;;  %v11806_v4 = vld [vmem:[#allocation45 + $0xe0] sm:$0xf0]  ;;  %v11812_v18 = vld [vmem:[#allocation45 + $0xa8] sm:$0xf]  ;;  %v11805_v38 = vor.u32 %v15710_v53, %v11804_v28  ;;  %v12089_v28 = vor.u32 %v15769_v11, %v12086_v21  ;;  %v15752_v53 = vld [vmem:[#allocation45 + $0x234] sm:$0xf] }
0x1108   :  { %v11809_v39 = vor.u32 %v15702_v31, %v11806_v4  ;;  %v11813_v42 = vor.u32 %v15711_v1, %v11812_v18  ;;  %v15761_v31 = vld [vmem:[#allocation45 + $0x274] sm:$0xf0]  ;;  %v15753_v4 = vld [vmem:[#allocation45 + $0x23c] sm:$0xf]  ;;  %v12772_v21 = vld [vmem:[#allocation48 + $0x450] sm:$0xf] }
0x1109   :  { %v12022_v18 = vld [vmem:[#allocation45 + $0x278] sm:$0xf0]  ;;  %v15903_v11 = vld [vmem:[#allocation48 + $0x2e4] sm:$0xf0] }
0x110a   :  { %4348 = vmatpush.bf16.msra.mxu3 %v12125_v2  ;;  %4361 = vmatpush.bf16.msrb.mxu0 %v12129_v13  ;;  %v15694_v2 = vld [vmem:[#allocation45 + $0x5c] sm:$0xf0]  ;;  %v15686_v13 = vld [vmem:[#allocation45 + $0x24] sm:$0xf] }
0x110b   :  { %4374 = vmatpush.bf16.msrb.mxu1 %v12133_v43  ;;  %4387 = vmatpush.bf16.msrb.mxu2 %v12137_v44  ;;  %v11817_v43 = vor.u32 %v15703_v34, %v11814_v50  ;;  %v11748_v44 = vld [vmem:[#allocation45 + $0x28] sm:$0xf]  ;;  %v11741_v54 = vor.u32 %v15694_v2, %v11740_v35  ;;  %v11745_v36 = vor.u32 %v15686_v13, %v11742_v17  ;;  %v11948_v50 = vld [vmem:[#allocation45 + $0x1b0] sm:$0xf]  ;;  %v15736_v2 = vld [vmem:[#allocation45 + $0x1b4] sm:$0xf] }
0x110c   :  { %v11749_v58 = vor.u32 %v15695_v27, %v11748_v44  ;;  %v15744_v35 = vld [vmem:[#allocation45 + $0x1ec] sm:$0xf0]  ;;  %v11950_v13 = vld [vmem:[#allocation45 + $0x1f0] sm:$0xf0]  ;;  %v11956_v17 = vld [vmem:[#allocation45 + $0x1b8] sm:$0xf] }
0x110d   :  { %v11958_v44 = vld [vmem:[#allocation45 + $0x1f8] sm:$0xf0]  ;;  %v11949_v27 = vor.u32 %v15744_v35, %v11948_v50  ;;  %v11953_v5 = vor.u32 %v15736_v2, %v11950_v13  ;;  %v15945_v50 = vld [vmem:[#allocation48 + $0x434] sm:$0xf0]  ;;  %v12364_v2 = vld [vmem:[#allocation48 + $0x120] sm:$0xf] }
0x110e   :  { %4349 = vmatpush.bf16.msra.mxu3 %v12061_v16  ;;  %4362 = vmatpush.bf16.msrb.mxu0 %v12065_v49  ;;  %v12206_v16 = vld [vmem:[#allocation45 + $0x3f0] sm:$0xf0]  ;;  %v12212_v49 = vld [vmem:[#allocation45 + $0x3b8] sm:$0xf] }
0x110f   :  { %4375 = vmatpush.bf16.msrb.mxu1 %v12069_v45  ;;  %4388 = vmatpush.bf16.msrb.mxu2 %v12073_v55  ;;  %v15809_v45 = vld [vmem:[#allocation45 + $0x3f4] sm:$0xf0]  ;;  %v15801_v55 = vld [vmem:[#allocation45 + $0x3bc] sm:$0xf]  ;;  %v12209_v3 = vor.u32 %v15800_v48, %v12206_v16  ;;  %v15720_v16 = vld [vmem:[#allocation45 + $0x134] sm:$0xf] }
0x1110   :  { %v12217_v7 = vor.u32 %v15801_v55, %v12214_v40  ;;  %v11894_v55 = vld [vmem:[#allocation45 + $0x178] sm:$0xf0]  ;;  %v11885_v40 = vor.u32 %v15728_v29, %v11884_v41  ;;  %v15939_v41 = vld [vmem:[#allocation48 + $0x404] sm:$0xf0] }
0x1112   :  { %4350 = vmatpush.bf16.msra.mxu3 %v11997_v51  ;;  %4363 = vmatpush.bf16.msrb.mxu0 %v12001_v62  ;;  %v15792_v51 = vld [vmem:[#allocation45 + $0x36c] sm:$0xf0]  ;;  %v12213_v62 = vor.u32 %v15809_v45, %v12212_v49  ;;  %v11886_v49 = vld [vmem:[#allocation45 + $0x170] sm:$0xf0]  ;;  %v15721_v45 = vld [vmem:[#allocation45 + $0x13c] sm:$0xf] }
0x1113   :  { %4376 = vmatpush.bf16.msrb.mxu1 %v12005_v47  ;;  %4389 = vmatpush.bf16.msrb.mxu2 %v12009_v9  ;;  %v12142_v47 = vld [vmem:[#allocation45 + $0x370] sm:$0xf0]  ;;  %v12148_v9 = vld [vmem:[#allocation45 + $0x338] sm:$0xf]  ;;  %v12141_v60 = vor.u32 %v15792_v51, %v12140_v59  ;;  %v11897_v59 = vor.u32 %v15721_v45, %v11894_v55  ;;  %v12916_v45 = vld [vmem:[#allocation48 + $0x570] sm:$0xf] }
0x1114   :  { %4303 = vmatmul.bf16.vlgmr.msrb.gmra.mxu3 %v18525_v61  ;;  %4316 = vmatmul.bf16.vlgmr.msra.gmra.mxu0 %v18525_v61  ;;  %v12145_v63 = vor.u32 %v15784_v6, %v12142_v47  ;;  %v15704_v51 = vld [vmem:[#allocation45 + $0xb4] sm:$0xf]  ;;  %v15713_v6 = vld [vmem:[#allocation45 + $0xf4] sm:$0xf0]  ;;  %v15705_v47 = vld [vmem:[#allocation45 + $0xbc] sm:$0xf] }
0x1115   :  { %4329 = vmatmul.bf16.vlgmr.msra.gmra.mxu1 %v18525_v61  ;;  %4342 = vmatmul.bf16.vlgmr.msra.gmra.mxu2 %v18525_v61  ;;  %v15987_v55 = vld [vmem:[#allocation48 + $0x584] sm:$0xf0] }
0x1116   :  { %4351 = vmatpush.bf16.msra.mxu3 %v11933_v15  ;;  %4364 = vmatpush.bf16.msrb.mxu0 %v11937_v32  ;;  %v15776_v15 = vld [vmem:[#allocation45 + $0x2ec] sm:$0xf0]  ;;  %v12149_v32 = vor.u32 %v15793_v8, %v12148_v9  ;;  %v11830_v9 = vld [vmem:[#allocation45 + $0xf8] sm:$0xf0] }
0x1117   :  { %4377 = vmatpush.bf16.msrb.mxu1 %v11941_v37  ;;  %4390 = vmatpush.bf16.msrb.mxu2 %v11945_v19  ;;  %v12078_v37 = vld [vmem:[#allocation45 + $0x2f0] sm:$0xf0]  ;;  %v12084_v19 = vld [vmem:[#allocation45 + $0x2b8] sm:$0xf]  ;;  %v12077_v57 = vor.u32 %v15776_v15, %v12076_v52  ;;  %v11833_v15 = vor.u32 %v15705_v47, %v11830_v9  ;;  %v15981_v47 = vld [vmem:[#allocation48 + $0x554] sm:$0xf0] }
0x1118   :  { %v12081_v22 = vor.u32 %v15768_v0, %v12078_v37  ;;  %v15697_v0 = vld [vmem:[#allocation45 + $0x74] sm:$0xf0]  ;;  %v15689_v37 = vld [vmem:[#allocation45 + $0x3c] sm:$0xf] }
0x1119   :  { %v15879_v9 = vld [vmem:[#allocation48 + $0x224] sm:$0xf0] }
0x111a   :  { %4352 = vmatpush.bf16.msra.mxu3 %v11869_v24  ;;  %4365 = vmatpush.bf16.msrb.mxu0 %v11873_v26  ;;  %v15760_v24 = vld [vmem:[#allocation45 + $0x26c] sm:$0xf0]  ;;  %v12085_v26 = vor.u32 %v15777_v23, %v12084_v19  ;;  %v11766_v19 = vld [vmem:[#allocation45 + $0x78] sm:$0xf0]  ;;  %v12580_v23 = vld [vmem:[#allocation48 + $0x2d0] sm:$0xf] }
0x111b   :  { %4378 = vmatpush.bf16.msrb.mxu1 %v11877_v33  ;;  %4391 = vmatpush.bf16.msrb.mxu2 %v11881_v12  ;;  %v12014_v33 = vld [vmem:[#allocation45 + $0x270] sm:$0xf0]  ;;  %v12020_v12 = vld [vmem:[#allocation45 + $0x238] sm:$0xf]  ;;  %v12013_v1 = vor.u32 %v15760_v24, %v12012_v30 }
0x111c   :  { %v12017_v34 = vor.u32 %v15752_v53, %v12014_v33  ;;  %v12388_v53 = vld [vmem:[#allocation48 + $0x150] sm:$0xf]  ;;  %v12581_v33 = vor.u32 %v15903_v11, %v12580_v23  ;;  %v12652_v23 = vld [vmem:[#allocation48 + $0x360] sm:$0xf]  ;;  %v15921_v11 = vld [vmem:[#allocation48 + $0x374] sm:$0xf0] }
0x111e   :  { %4353 = vmatpush.bf16.msra.mxu3 %v11805_v38  ;;  %4366 = vmatpush.bf16.msrb.mxu0 %v11809_v39  ;;  %v12021_v38 = vor.u32 %v15761_v31, %v12020_v12  ;;  %v12025_v39 = vor.u32 %v15753_v4, %v12022_v18  ;;  %v15855_v31 = vld [vmem:[#allocation48 + $0x164] sm:$0xf0]  ;;  %v12964_v4 = vld [vmem:[#allocation48 + $0x5d0] sm:$0xf] }
0x111f   :  { %4379 = vmatpush.bf16.msrb.mxu1 %v11813_v42  ;;  %4392 = vmatpush.bf16.msrb.mxu2 %v11817_v43  ;;  %v15745_v42 = vld [vmem:[#allocation45 + $0x1f4] sm:$0xf0]  ;;  %v15737_v43 = vld [vmem:[#allocation45 + $0x1bc] sm:$0xf]  ;;  %v12389_v35 = vor.u32 %v15855_v31, %v12388_v53  ;;  %v12844_v53 = vld [vmem:[#allocation48 + $0x4e0] sm:$0xf] }
0x1120   :  { %v11957_v25 = vor.u32 %v15745_v42, %v11956_v17  ;;  %v11961_v48 = vor.u32 %v15737_v43, %v11958_v44  ;;  %v15999_v18 = vld [vmem:[#allocation48 + $0x5e4] sm:$0xf0]  ;;  %v15849_v42 = vld [vmem:[#allocation48 + $0x134] sm:$0xf0]  ;;  %v12940_v43 = vld [vmem:[#allocation48 + $0x5a0] sm:$0xf] }
0x1121   :  { %v15993_v44 = vld [vmem:[#allocation48 + $0x5b4] sm:$0xf0]  ;;  %v12365_v29 = vor.u32 %v15849_v42, %v12364_v2  ;;  %v12628_v31 = vld [vmem:[#allocation48 + $0x330] sm:$0xf]  ;;  %v15819_v2 = vld [vmem:[#allocation48 + $0x44] sm:$0xf0] }
0x1122   :  { %4354 = vmatpush.bf16.msra.mxu3 %v11741_v54  ;;  %4367 = vmatpush.bf16.msrb.mxu0 %v11745_v36  ;;  %v11892_v54 = vld [vmem:[#allocation45 + $0x138] sm:$0xf]  ;;  %v12604_v42 = vld [vmem:[#allocation48 + $0x300] sm:$0xf] }
0x1123   :  { %4380 = vmatpush.bf16.msrb.mxu1 %v11749_v58  ;;  %4393 = vmatpush.bf16.msrb.mxu2 %v11753_v20  ;;  %v15729_v36 = vld [vmem:[#allocation45 + $0x174] sm:$0xf0]  ;;  %v11889_v58 = vor.u32 %v15720_v16, %v11886_v49  ;;  %v11820_v20 = vld [vmem:[#allocation45 + $0xb0] sm:$0xf]  ;;  %v12340_v16 = vld [vmem:[#allocation48 + $0xf0] sm:$0xf] }
0x1125   :  { %4355 = vmatmul.bf16.vlgmr.msra.gmra.mxu3 %v18525_v61  ;;  %4368 = vmatmul.bf16.vlgmr.msrb.gmra.mxu0 %v18525_v61 }
0x1126   :  { %4399 = vmatpush.bf16.msrb.mxu3 %v12205_v56  ;;  %4412 = vmatpush.bf16.msra.mxu0 %v12209_v3  ;;  %v15712_v56 = vld [vmem:[#allocation45 + $0xec] sm:$0xf0]  ;;  %v11893_v3 = vor.u32 %v15729_v36, %v11892_v54  ;;  %v15843_v36 = vld [vmem:[#allocation48 + $0x104] sm:$0xf0] }
0x1127   :  { %4425 = vmatpush.bf16.msra.mxu1 %v12213_v62  ;;  %4438 = vmatpush.bf16.msra.mxu2 %v12217_v7  ;;  %v11822_v62 = vld [vmem:[#allocation45 + $0xf0] sm:$0xf0]  ;;  %v11828_v7 = vld [vmem:[#allocation45 + $0xb8] sm:$0xf]  ;;  %v11821_v8 = vor.u32 %v15712_v56, %v11820_v20  ;;  %v15933_v20 = vld [vmem:[#allocation48 + $0x3d4] sm:$0xf0]  ;;  %v12341_v56 = vor.u32 %v15843_v36, %v12340_v16 }
0x1128   :  { %4381 = vmatmul.bf16.vlgmr.msrb.gmra.mxu1 %v18525_v61  ;;  %4394 = vmatmul.bf16.vlgmr.msrb.gmra.mxu2 %v18525_v61  ;;  %v11825_v10 = vor.u32 %v15704_v51, %v11822_v62  ;;  %v11829_v52 = vor.u32 %v15713_v6, %v11828_v7  ;;  %v15837_v7 = vld [vmem:[#allocation48 + $0xd4] sm:$0xf0]  ;;  %v12892_v6 = vld [vmem:[#allocation48 + $0x540] sm:$0xf] }
0x1129   :  { %v15813_v16 = vld [vmem:[#allocation48 + $0x14] sm:$0xf0]  ;;  %v13324_v36 = vld [vmem:[#allocation48 + $0x8a0] sm:$0xf] }
0x112a   :  { %4400 = vmatpush.bf16.msrb.mxu3 %v12141_v60  ;;  %4413 = vmatpush.bf16.msra.mxu0 %v12145_v63  ;;  %v15696_v60 = vld [vmem:[#allocation45 + $0x6c] sm:$0xf0]  ;;  %v15688_v63 = vld [vmem:[#allocation45 + $0x34] sm:$0xf] }
0x112b   :  { %4426 = vmatpush.bf16.msra.mxu1 %v12149_v32  ;;  %4439 = vmatpush.bf16.msra.mxu2 %v12153_v46  ;;  %v11758_v32 = vld [vmem:[#allocation45 + $0x70] sm:$0xf0]  ;;  %v11764_v46 = vld [vmem:[#allocation45 + $0x38] sm:$0xf] }
0x112c   :  { %v11761_v30 = vor.u32 %v15688_v63, %v11758_v32  ;;  %v11765_v24 = vor.u32 %v15697_v0, %v11764_v46  ;;  %v12460_v63 = vld [vmem:[#allocation48 + $0x1e0] sm:$0xf]  ;;  %v15831_v46 = vld [vmem:[#allocation48 + $0xa4] sm:$0xf0]  ;;  %v12868_v0 = vld [vmem:[#allocation48 + $0x510] sm:$0xf] }
0x112e   :  { %4401 = vmatpush.bf16.msrb.mxu3 %v12077_v57  ;;  %4414 = vmatpush.bf16.msra.mxu0 %v12081_v22  ;;  %v15951_v57 = vld [vmem:[#allocation48 + $0x464] sm:$0xf0]  ;;  %v11757_v22 = vor.u32 %v15696_v60, %v11756_v14  ;;  %v12893_v60 = vor.u32 %v15981_v47, %v12892_v6 }
0x112f   :  { %4427 = vmatpush.bf16.msra.mxu1 %v12085_v26  ;;  %4440 = vmatpush.bf16.msra.mxu2 %v12089_v28  ;;  %v11769_v26 = vor.u32 %v15689_v37, %v11766_v19  ;;  %v12556_v28 = vld [vmem:[#allocation48 + $0x2a0] sm:$0xf]  ;;  %v12773_v12 = vor.u32 %v15951_v57, %v12772_v21  ;;  %v15975_v37 = vld [vmem:[#allocation48 + $0x524] sm:$0xf0]  ;;  %v15873_v19 = vld [vmem:[#allocation48 + $0x1f4] sm:$0xf0] }
0x1130   :  { %v12869_v57 = vor.u32 %v15975_v37, %v12868_v0  ;;  %v16131_v0 = vld [vmem:[#allocation48 + $0xa04] sm:$0xf0] }
0x1132   :  { %4402 = vmatpush.bf16.msrb.mxu3 %v12013_v1  ;;  %4415 = vmatpush.bf16.msra.mxu0 %v12017_v34  ;;  %v15897_v1 = vld [vmem:[#allocation48 + $0x2b4] sm:$0xf0]  ;;  %v12748_v34 = vld [vmem:[#allocation48 + $0x420] sm:$0xf] }
0x1133   :  { %4428 = vmatpush.bf16.msra.mxu1 %v12021_v38  ;;  %4441 = vmatpush.bf16.msra.mxu2 %v12025_v39  ;;  %v12965_v38 = vor.u32 %v15999_v18, %v12964_v4  ;;  %v12532_v39 = vld [vmem:[#allocation48 + $0x270] sm:$0xf]  ;;  %v12557_v13 = vor.u32 %v15897_v1, %v12556_v28  ;;  %v12749_v17 = vor.u32 %v15945_v50, %v12748_v34  ;;  %v15825_v28 = vld [vmem:[#allocation48 + $0x74] sm:$0xf0]  ;;  %v15915_v4 = vld [vmem:[#allocation48 + $0x344] sm:$0xf0] }
0x1134   :  { %v12412_v34 = vld [vmem:[#allocation48 + $0x180] sm:$0xf]  ;;  %v15861_v50 = vld [vmem:[#allocation48 + $0x194] sm:$0xf0] }
0x1136   :  { %4403 = vmatpush.bf16.msrb.mxu3 %v11949_v27  ;;  %4416 = vmatpush.bf16.msra.mxu0 %v11953_v5  ;;  %v15891_v27 = vld [vmem:[#allocation48 + $0x284] sm:$0xf0]  ;;  %v12724_v5 = vld [vmem:[#allocation48 + $0x3f0] sm:$0xf] }
0x1137   :  { %4429 = vmatpush.bf16.msra.mxu1 %v11957_v25  ;;  %4442 = vmatpush.bf16.msra.mxu2 %v11961_v48  ;;  %v12941_v25 = vor.u32 %v15993_v44, %v12940_v43  ;;  %v12508_v48 = vld [vmem:[#allocation48 + $0x240] sm:$0xf]  ;;  %v12533_v49 = vor.u32 %v15891_v27, %v12532_v39  ;;  %v12725_v54 = vor.u32 %v15939_v41, %v12724_v5  ;;  %v15909_v43 = vld [vmem:[#allocation48 + $0x314] sm:$0xf0]  ;;  %v13348_v44 = vld [vmem:[#allocation48 + $0x8d0] sm:$0xf] }
0x1138   :  { %v12629_v39 = vor.u32 %v15915_v4, %v12628_v31  ;;  %v16095_v27 = vld [vmem:[#allocation48 + $0x8e4] sm:$0xf0]  ;;  %v13540_v5 = vld [vmem:[#allocation48 + $0xa50] sm:$0xf]  ;;  %v13084_v4 = vld [vmem:[#allocation48 + $0x6c0] sm:$0xf] }
0x1139   :  { %v16143_v41 = vld [vmem:[#allocation48 + $0xa64] sm:$0xf0]  ;;  %v13252_v31 = vld [vmem:[#allocation48 + $0x810] sm:$0xf] }
0x113a   :  { %4404 = vmatpush.bf16.msrb.mxu3 %v11885_v40  ;;  %4417 = vmatpush.bf16.msra.mxu0 %v11889_v58  ;;  %v15885_v40 = vld [vmem:[#allocation48 + $0x254] sm:$0xf0]  ;;  %v12700_v58 = vld [vmem:[#allocation48 + $0x3c0] sm:$0xf] }
0x113b   :  { %4430 = vmatpush.bf16.msra.mxu1 %v11893_v3  ;;  %4443 = vmatpush.bf16.msra.mxu2 %v11897_v59  ;;  %v12484_v3 = vld [vmem:[#allocation48 + $0x210] sm:$0xf]  ;;  %v12316_v59 = vld [vmem:[#allocation48 + $0xc0] sm:$0xf]  ;;  %v12509_v51 = vor.u32 %v15885_v40, %v12508_v48  ;;  %v12701_v62 = vor.u32 %v15933_v20, %v12700_v58  ;;  %v13349_v58 = vor.u32 %v16095_v27, %v13348_v44 }
0x113c   :  { %v12317_v14 = vor.u32 %v15837_v7, %v12316_v59  ;;  %v12220_v48 = vld [vmem:[#allocation48] sm:$0xf]  ;;  %v13156_v40 = vld [vmem:[#allocation48 + $0x750] sm:$0xf]  ;;  %v13541_v20 = vor.u32 %v16143_v41, %v13540_v5  ;;  %v16089_v59 = vld [vmem:[#allocation48 + $0x8b4] sm:$0xf0] }
0x113d   :  { %v12221_v7 = vor.u32 %v15813_v16, %v12220_v48  ;;  %v16023_v5 = vld [vmem:[#allocation48 + $0x6a4] sm:$0xf0]  ;;  %v13636_v41 = vld [vmem:[#allocation48 + $0xb10] sm:$0xf]  ;;  %v13420_v48 = vld [vmem:[#allocation48 + $0x960] sm:$0xf] }
0x113e   :  { %4405 = vmatpush.bf16.msrb.mxu3 %v11821_v8  ;;  %4418 = vmatpush.bf16.msra.mxu0 %v11825_v10  ;;  %v12676_v8 = vld [vmem:[#allocation48 + $0x390] sm:$0xf]  ;;  %v15927_v10 = vld [vmem:[#allocation48 + $0x3a4] sm:$0xf0]  ;;  %v16113_v16 = vld [vmem:[#allocation48 + $0x974] sm:$0xf0] }
0x113f   :  { %4431 = vmatpush.bf16.msra.mxu1 %v11829_v52  ;;  %4444 = vmatpush.bf16.msra.mxu2 %v11833_v15  ;;  %v12292_v52 = vld [vmem:[#allocation48 + $0x90] sm:$0xf]  ;;  %v12485_v15 = vor.u32 %v15879_v9, %v12484_v3  ;;  %v12677_v32 = vor.u32 %v15927_v10, %v12676_v8  ;;  %v16191_v3 = vld [vmem:[#allocation48 + $0xbe4] sm:$0xf0]  ;;  %v13132_v10 = vld [vmem:[#allocation48 + $0x720] sm:$0xf] }
0x1140   :  { %v12293_v21 = vor.u32 %v15831_v46, %v12292_v52  ;;  %v13300_v8 = vld [vmem:[#allocation48 + $0x870] sm:$0xf]  ;;  %v13708_v52 = vld [vmem:[#allocation48 + $0xba0] sm:$0xf] }
0x1141   :  { %v13492_v46 = vld [vmem:[#allocation48 + $0x9f0] sm:$0xf] }
0x1142   :  { %4406 = vmatpush.bf16.msrb.mxu3 %v11757_v22  ;;  %4419 = vmatpush.bf16.msra.mxu0 %v11761_v30  ;;  %v12436_v22 = vld [vmem:[#allocation48 + $0x1b0] sm:$0xf]  ;;  %v12268_v30 = vld [vmem:[#allocation48 + $0x60] sm:$0xf] }
0x1143   :  { %4432 = vmatpush.bf16.msra.mxu1 %v11765_v24  ;;  %4445 = vmatpush.bf16.msra.mxu2 %v11769_v26  ;;  %v12461_v24 = vor.u32 %v15873_v19, %v12460_v63  ;;  %v12653_v26 = vor.u32 %v15921_v11, %v12652_v23  ;;  %v12269_v18 = vor.u32 %v15825_v28, %v12268_v30  ;;  %v16041_v63 = vld [vmem:[#allocation48 + $0x734] sm:$0xf0]  ;;  %v13276_v23 = vld [vmem:[#allocation48 + $0x840] sm:$0xf]  ;;  %v13108_v11 = vld [vmem:[#allocation48 + $0x6f0] sm:$0xf] }
0x1144   :  { %v13133_v37 = vor.u32 %v16041_v63, %v13132_v10  ;;  %v13684_v30 = vld [vmem:[#allocation48 + $0xb70] sm:$0xf]  ;;  %v13468_v28 = vld [vmem:[#allocation48 + $0x9c0] sm:$0xf] }
0x1145   :  { %4407 = vmatmul.bf16.vlgmr.msrb.gmra.mxu3 %v18525_v61  ;;  %4420 = vmatmul.bf16.vlgmr.msra.gmra.mxu0 %v18525_v61  ;;  %v13588_v10 = vld [vmem:[#allocation48 + $0xab0] sm:$0xf]  ;;  %v13372_v63 = vld [vmem:[#allocation48 + $0x900] sm:$0xf] }
0x1146   :  { %9118 = vmatpush.bf16.msrb.mxu0 %v12581_v33  ;;  %4433 = vmatmul.bf16.vlgmr.msra.gmra.mxu1 %v18525_v61  ;;  %v15969_v33 = vld [vmem:[#allocation48 + $0x4f4] sm:$0xf0] }
0x1147   :  { %9131 = vmatpush.bf16.msrb.mxu1 %v12773_v12  ;;  %4446 = vmatmul.bf16.vlgmr.msra.gmra.mxu2 %v18525_v61  ;;  %v12917_v61 = vor.u32 %v15987_v55, %v12916_v45  ;;  %v15867_v12 = vld [vmem:[#allocation48 + $0x1c4] sm:$0xf0]  ;;  %v12845_v1 = vor.u32 %v15969_v33, %v12844_v53  ;;  %v12796_v45 = vld [vmem:[#allocation48 + $0x480] sm:$0xf]  ;;  %v15957_v55 = vld [vmem:[#allocation48 + $0x494] sm:$0xf0] }
0x1148   :  { %9105 = vmatpush.bf16.msra.mxu3 %v12389_v35  ;;  %9144 = vmatpush.bf16.msrb.mxu2 %v12965_v38  ;;  %v12244_v35 = vld [vmem:[#allocation48 + $0x30] sm:$0xf]  ;;  %v12437_v38 = vor.u32 %v15867_v12, %v12436_v22  ;;  %v12797_v6 = vor.u32 %v15957_v55, %v12796_v45  ;;  %v16035_v22 = vld [vmem:[#allocation48 + $0x704] sm:$0xf0]  ;;  %v16125_v53 = vld [vmem:[#allocation48 + $0x9d4] sm:$0xf0] }
0x1149   :  { %v13109_v33 = vor.u32 %v16035_v22, %v13108_v11  ;;  %v13036_v45 = vld [vmem:[#allocation48 + $0x660] sm:$0xf]  ;;  %v16149_v11 = vld [vmem:[#allocation48 + $0xa94] sm:$0xf0]  ;;  %v18543_v22 = vld [vmem:[#allocation46] sm:$0xff] }
0x114a   :  { %9119 = vmatpush.bf16.msrb.mxu0 %v12557_v13  ;;  %v12820_v13 = vld [vmem:[#allocation48 + $0x4b0] sm:$0xf] }
0x114b   :  { %9132 = vmatpush.bf16.msrb.mxu1 %v12749_v17  ;;  %v15963_v17 = vld [vmem:[#allocation48 + $0x4c4] sm:$0xf0] }
0x114c   :  { %9106 = vmatpush.bf16.msra.mxu3 %v12365_v29  ;;  %9145 = vmatpush.bf16.msrb.mxu2 %v12941_v25  ;;  %v12245_v29 = vor.u32 %v15819_v2, %v12244_v35  ;;  %v12821_v25 = vor.u32 %v15963_v17, %v12820_v13  ;;  %v16173_v35 = vld [vmem:[#allocation48 + $0xb54] sm:$0xf0]  ;;  %v16119_v2 = vld [vmem:[#allocation48 + $0x9a4] sm:$0xf0] }
0x114e   :  { %9120 = vmatpush.bf16.msrb.mxu0 %v12533_v49  ;;  %v12413_v49 = vor.u32 %v15861_v50, %v12412_v34  ;;  %v16029_v34 = vld [vmem:[#allocation48 + $0x6d4] sm:$0xf0]  ;;  %v13660_v50 = vld [vmem:[#allocation48 + $0xb40] sm:$0xf] }
0x114f   :  { %9133 = vmatpush.bf16.msrb.mxu1 %v12725_v54  ;;  %v12605_v54 = vor.u32 %v15909_v43, %v12604_v42  ;;  %v13085_v13 = vor.u32 %v16029_v34, %v13084_v4  ;;  %v13661_v17 = vor.u32 %v16173_v35, %v13660_v50  ;;  %v13228_v42 = vld [vmem:[#allocation48 + $0x7e0] sm:$0xf]  ;;  %v13060_v43 = vld [vmem:[#allocation48 + $0x690] sm:$0xf]  ;;  %v3571_v34 = vperm.slane %v18543_v22, 0 }
0x1150   :  { %9107 = vmatpush.bf16.msra.mxu3 %v12341_v56  ;;  %9146 = vmatpush.bf16.msrb.mxu2 %v12917_v61  ;;  %v16047_v56 = vld [vmem:[#allocation48 + $0x764] sm:$0xf0]  ;;  %v13732_v61 = vld [vmem:[#allocation48 + $0xbd0] sm:$0xf]  ;;  %v3574_v35 = vperm.slane %v18543_v22, 3 }
0x1151   :  { %v13157_v47 = vor.u32 %v16047_v56, %v13156_v40  ;;  %v13733_v9 = vor.u32 %v16191_v3, %v13732_v61  ;;  %v13421_v40 = vor.u32 %v16113_v16, %v13420_v48  ;;  %v16161_v56 = vld [vmem:[#allocation48 + $0xaf4] sm:$0xf0]  ;;  %v16059_v61 = vld [vmem:[#allocation48 + $0x7c4] sm:$0xf0]  ;;  %v13396_v3 = vld [vmem:[#allocation48 + $0x930] sm:$0xf] }
0x1152   :  { %9121 = vmatpush.bf16.msrb.mxu0 %v12509_v51  ;;  %v13516_v51 = vld [vmem:[#allocation48 + $0xa20] sm:$0xf]  ;;  %v14308_v4 = vld [vmem:[#allocation48 + $0x1050] sm:$0xf] }
0x1153   :  { %9134 = vmatpush.bf16.msrb.mxu1 %v12701_v62  ;;  %v16137_v62 = vld [vmem:[#allocation48 + $0xa34] sm:$0xf0] }
0x1154   :  { %9108 = vmatpush.bf16.msra.mxu3 %v12317_v14  ;;  %9147 = vmatpush.bf16.msrb.mxu2 %v12893_v60  ;;  %v13325_v14 = vor.u32 %v16089_v59, %v13324_v36  ;;  %v13517_v60 = vor.u32 %v16137_v62, %v13516_v51  ;;  %v13204_v36 = vld [vmem:[#allocation48 + $0x7b0] sm:$0xf]  ;;  %v16107_v59 = vld [vmem:[#allocation48 + $0x944] sm:$0xf0] }
0x1156   :  { %9122 = vmatpush.bf16.msrb.mxu0 %v12485_v15  ;;  %v16185_v15 = vld [vmem:[#allocation48 + $0xbb4] sm:$0xf0] }
0x1157   :  { %9135 = vmatpush.bf16.msrb.mxu1 %v12677_v32  ;;  %v16083_v32 = vld [vmem:[#allocation48 + $0x884] sm:$0xf0]  ;;  %v13709_v19 = vor.u32 %v16185_v15, %v13708_v52  ;;  %v16101_v52 = vld [vmem:[#allocation48 + $0x914] sm:$0xf0] }
0x1158   :  { %9109 = vmatpush.bf16.msra.mxu3 %v12293_v21  ;;  %9148 = vmatpush.bf16.msrb.mxu2 %v12869_v57  ;;  %v13301_v21 = vor.u32 %v16083_v32, %v13300_v8  ;;  %v13493_v57 = vor.u32 %v16131_v0, %v13492_v46  ;;  %v16011_v8 = vld [vmem:[#allocation48 + $0x644] sm:$0xf0]  ;;  %v12988_v46 = vld [vmem:[#allocation48 + $0x600] sm:$0xf] }
0x115a   :  { %9123 = vmatpush.bf16.msrb.mxu0 %v12461_v24  ;;  %v16179_v24 = vld [vmem:[#allocation48 + $0xb84] sm:$0xf0] }
0x115b   :  { %9136 = vmatpush.bf16.msrb.mxu1 %v12653_v26  ;;  %v16077_v26 = vld [vmem:[#allocation48 + $0x854] sm:$0xf0]  ;;  %v13685_v12 = vor.u32 %v16179_v24, %v13684_v30  ;;  %v3572_v30 = vperm.slane %v18543_v22, 1  ;;  %v3573_v24 = vperm.slane %v18543_v22, 2 }
0x115c   :  { %9110 = vmatpush.bf16.msra.mxu3 %v12269_v18  ;;  %9149 = vmatpush.bf16.msrb.mxu2 %v12845_v1  ;;  %v13277_v18 = vor.u32 %v16077_v26, %v13276_v23  ;;  %v13469_v1 = vor.u32 %v16125_v53, %v13468_v28  ;;  %v13564_v23 = vld [vmem:[#allocation48 + $0xa80] sm:$0xf] }
0x115e   :  { %9124 = vmatpush.bf16.msrb.mxu0 %v12437_v38  ;;  %v16071_v38 = vld [vmem:[#allocation48 + $0x824] sm:$0xf0] }
0x115f   :  { %9137 = vmatpush.bf16.msrb.mxu1 %v12629_v39  ;;  %v13444_v39 = vld [vmem:[#allocation48 + $0x990] sm:$0xf]  ;;  %v13253_v44 = vor.u32 %v16071_v38, %v13252_v31 }
0x1160   :  { %9111 = vmatpush.bf16.msra.mxu3 %v12245_v29  ;;  %9150 = vmatpush.bf16.msrb.mxu2 %v12821_v25  ;;  %v13445_v27 = vor.u32 %v16119_v2, %v13444_v39  ;;  %v16167_v29 = vld [vmem:[#allocation48 + $0xb24] sm:$0xf0]  ;;  %v16065_v25 = vld [vmem:[#allocation48 + $0x7f4] sm:$0xf0] }
0x1161   :  { %v13229_v55 = vor.u32 %v16065_v25, %v13228_v42  ;;  %v16239_v25 = vld [vmem:[#allocation48 + $0xd64] sm:$0xf0] }
0x1162   :  { %9125 = vmatpush.bf16.msrb.mxu0 %v12413_v49  ;;  %v13061_v49 = vor.u32 %v16023_v5, %v13060_v43 }
0x1163   :  { %9138 = vmatpush.bf16.msrb.mxu1 %v12605_v54  ;;  %v13637_v54 = vor.u32 %v16167_v29, %v13636_v41  ;;  %v13924_v29 = vld [vmem:[#allocation48 + $0xd50] sm:$0xf] }
0x1164   :  { %9112 = vmatpush.bf16.msra.mxu3 %v12221_v7  ;;  %9151 = vmatpush.bf16.msrb.mxu2 %v12797_v6  ;;  %v13180_v7 = vld [vmem:[#allocation48 + $0x780] sm:$0xf]  ;;  %v13012_v6 = vld [vmem:[#allocation48 + $0x630] sm:$0xf] }
0x1165   :  { %v13013_v15 = vor.u32 %v16011_v8, %v13012_v6  ;;  %v16233_v6 = vld [vmem:[#allocation48 + $0xd34] sm:$0xf0]  ;;  %v14476_v8 = vld [vmem:[#allocation48 + $0x11a0] sm:$0xf] }
0x1166   :  { %9170 = vmatpush.bf16.msra.mxu0 %v13349_v58  ;;  %v16017_v58 = vld [vmem:[#allocation48 + $0x674] sm:$0xf0] }
0x1167   :  { %9183 = vmatpush.bf16.msra.mxu1 %v13541_v20  ;;  %v13612_v20 = vld [vmem:[#allocation48 + $0xae0] sm:$0xf]  ;;  %v13037_v51 = vor.u32 %v16017_v58, %v13036_v45  ;;  %v14068_v58 = vld [vmem:[#allocation48 + $0xe70] sm:$0xf] }
0x1168   :  { %9157 = vmatpush.bf16.msrb.mxu3 %v13157_v47  ;;  %9196 = vmatpush.bf16.msra.mxu2 %v13733_v9  ;;  %v13613_v62 = vor.u32 %v16161_v56, %v13612_v20  ;;  %v13205_v47 = vor.u32 %v16059_v61, %v13204_v36  ;;  %v13397_v9 = vor.u32 %v16107_v59, %v13396_v3  ;;  %v16383_v36 = vld [vmem:[#allocation48 + $0x11e4] sm:$0xf0]  ;;  %v14260_v3 = vld [vmem:[#allocation48 + $0xff0] sm:$0xf] }
0x1169   :  { %v16275_v20 = vld [vmem:[#allocation48 + $0xe84] sm:$0xf0]  ;;  %v13925_v61 = vor.u32 %v16239_v25, %v13924_v29  ;;  %v13996_v25 = vld [vmem:[#allocation48 + $0xde0] sm:$0xf] }
0x116a   :  { %9171 = vmatpush.bf16.msra.mxu0 %v13325_v14  ;;  %v16155_v14 = vld [vmem:[#allocation48 + $0xac4] sm:$0xf0] }
0x116b   :  { %9184 = vmatpush.bf16.msra.mxu1 %v13517_v60  ;;  %v16053_v60 = vld [vmem:[#allocation48 + $0x794] sm:$0xf0]  ;;  %v13589_v32 = vor.u32 %v16155_v14, %v13588_v10  ;;  %v16323_v59 = vld [vmem:[#allocation48 + $0x1004] sm:$0xf0] }
0x116c   :  { %9158 = vmatpush.bf16.msrb.mxu3 %v13133_v37  ;;  %9197 = vmatpush.bf16.msra.mxu2 %v13709_v19  ;;  %v13181_v0 = vor.u32 %v16053_v60, %v13180_v7  ;;  %v13373_v37 = vor.u32 %v16101_v52, %v13372_v63  ;;  %v16005_v19 = vld [vmem:[#allocation48 + $0x614] sm:$0xf0]  ;;  %v13900_v7 = vld [vmem:[#allocation48 + $0xd20] sm:$0xf]  ;;  %v14261_v14 = vor.u32 %v16323_v59, %v14260_v3  ;;  %v3576_v60 = vperm.slane %v18543_v22, 5 }
0x116d   :  { %v16377_v10 = vld [vmem:[#allocation48 + $0x11b4] sm:$0xf0]  ;;  %v14044_v63 = vld [vmem:[#allocation48 + $0xe40] sm:$0xf]  ;;  %v14404_v59 = vld [vmem:[#allocation48 + $0x1110] sm:$0xf] }
0x116e   :  { %9172 = vmatpush.bf16.msra.mxu0 %v13301_v21  ;;  %v12989_v21 = vor.u32 %v16005_v19, %v12988_v46  ;;  %v16269_v52 = vld [vmem:[#allocation48 + $0xe54] sm:$0xf0]  ;;  %v13901_v46 = vor.u32 %v16233_v6, %v13900_v7 }
0x116f   :  { %9185 = vmatpush.bf16.msra.mxu1 %v13493_v57  ;;  %v13565_v57 = vor.u32 %v16149_v11, %v13564_v23  ;;  %v14477_v23 = vor.u32 %v16377_v10, %v14476_v8  ;;  %v13876_v11 = vld [vmem:[#allocation48 + $0xcf0] sm:$0xf]  ;;  %v18571_v7 = vld [vmem:[#allocation46 + $0x8] sm:$0xff] }
0x1170   :  { %9159 = vmatpush.bf16.msrb.mxu3 %v13109_v33  ;;  %9198 = vmatpush.bf16.msra.mxu2 %v13685_v12  ;;  %v14116_v33 = vld [vmem:[#allocation48 + $0xed0] sm:$0xf]  ;;  %v16287_v12 = vld [vmem:[#allocation48 + $0xee4] sm:$0xf0] }
0x1171   :  { %v14117_v38 = vor.u32 %v16287_v12, %v14116_v33  ;;  %v14020_v12 = vld [vmem:[#allocation48 + $0xe10] sm:$0xf] }
0x1172   :  { %9173 = vmatpush.bf16.msra.mxu0 %v13277_v18  ;;  %v16335_v18 = vld [vmem:[#allocation48 + $0x1064] sm:$0xf0]  ;;  %v13972_v10 = vld [vmem:[#allocation48 + $0xdb0] sm:$0xf] }
0x1173   :  { %9186 = vmatpush.bf16.msra.mxu1 %v13469_v1  ;;  %v14309_v2 = vor.u32 %v16335_v18, %v14308_v4 }
0x1174   :  { %9160 = vmatpush.bf16.msrb.mxu3 %v13085_v13  ;;  %9199 = vmatpush.bf16.msra.mxu2 %v13661_v17  ;;  %v14092_v13 = vld [vmem:[#allocation48 + $0xea0] sm:$0xf]  ;;  %v16281_v17 = vld [vmem:[#allocation48 + $0xeb4] sm:$0xf0] }
0x1176   :  { %9174 = vmatpush.bf16.msra.mxu0 %v13253_v44  ;;  %v14284_v44 = vld [vmem:[#allocation48 + $0x1020] sm:$0xf] }
0x1177   :  { %9187 = vmatpush.bf16.msra.mxu1 %v13445_v27  ;;  %v16329_v27 = vld [vmem:[#allocation48 + $0x1034] sm:$0xf0] }
0x1178   :  { %9161 = vmatpush.bf16.msrb.mxu3 %v13061_v49  ;;  %9200 = vmatpush.bf16.msra.mxu2 %v13637_v54  ;;  %v14093_v49 = vor.u32 %v16281_v17, %v14092_v13  ;;  %v14500_v54 = vld [vmem:[#allocation48 + $0x11d0] sm:$0xf]  ;;  %v16221_v13 = vld [vmem:[#allocation48 + $0xcd4] sm:$0xf0] }
0x117a   :  { %9175 = vmatpush.bf16.msra.mxu0 %v13229_v55 }
0x117b   :  { %9188 = vmatpush.bf16.msra.mxu1 %v13421_v40  ;;  %v14285_v40 = vor.u32 %v16329_v27, %v14284_v44  ;;  %v14428_v27 = vld [vmem:[#allocation48 + $0x1140] sm:$0xf] }
0x117c   :  { %9162 = vmatpush.bf16.msrb.mxu3 %v13037_v51  ;;  %9201 = vmatpush.bf16.msra.mxu2 %v13613_v62  ;;  %v14501_v62 = vor.u32 %v16383_v36, %v14500_v54  ;;  %v14188_v36 = vld [vmem:[#allocation48 + $0xf60] sm:$0xf] }
0x117e   :  { %9176 = vmatpush.bf16.msra.mxu0 %v13205_v47 }
0x117f   :  { %9189 = vmatpush.bf16.msra.mxu1 %v13397_v9  ;;  %v14069_v9 = vor.u32 %v16275_v20, %v14068_v58  ;;  %v13828_v58 = vld [vmem:[#allocation48 + $0xc90] sm:$0xf]  ;;  %v16215_v20 = vld [vmem:[#allocation48 + $0xca4] sm:$0xf0] }
0x1180   :  { %9163 = vmatpush.bf16.msrb.mxu3 %v13013_v15  ;;  %9202 = vmatpush.bf16.msra.mxu2 %v13589_v32  ;;  %v3577_v32 = vperm.slane %v18543_v22, 6 }
0x1181   :  { %v4265_v26 = vpop.f32.mrf.mxu0 }
0x1182   :  { %9177 = vmatpush.bf16.msra.mxu0 %v13181_v0  ;;  %v4266_v28 = vadd.f32 %v4265_v26, %v3572_v30  ;;  %v4278_v53 = vpop.f32.mrf.mxu1  ;;  %v14236_v0 = vld [vmem:[#allocation48 + $0xfc0] sm:$0xf]  ;;  %v14045_v30 = vor.u32 %v16269_v52, %v14044_v63  ;;  %v16371_v26 = vld [vmem:[#allocation48 + $0x1184] sm:$0xf0]  ;;  %v13829_v63 = vor.u32 %v16215_v20, %v13828_v58  ;;  %v14164_v52 = vld [vmem:[#allocation48 + $0xf30] sm:$0xf] }
0x1183   :  { %9190 = vmatpush.bf16.msra.mxu1 %v13373_v37  ;;  %v4279_v31 = vadd.f32 %v4278_v53, %v3573_v24  ;;  %v16317_v37 = vld [vmem:[#allocation48 + $0xfd4] sm:$0xf0]  ;;  %v14452_v24 = vld [vmem:[#allocation48 + $0x1170] sm:$0xf] }
0x1184   :  { %9164 = vmatpush.bf16.msrb.mxu3 %v12989_v21  ;;  %9203 = vmatpush.bf16.msra.mxu2 %v13565_v57  ;;  %v4452_v1 = vmax.f32 %v4266_v28, 0.0  ;;  %v16227_v21 = vld [vmem:[#allocation48 + $0xd04] sm:$0xf0]  ;;  %v14237_v33 = vor.u32 %v16317_v37, %v14236_v0  ;;  %v3580_v0 = vperm.slane %v18571_v7, 1  ;;  %v13804_v37 = vld [vmem:[#allocation48 + $0xc60] sm:$0xf] }
0x1185   :  { %v4453_v50 = vmax.f32 %v4279_v31, 0.0  ;;  %v16263_v31 = vld [vmem:[#allocation48 + $0xe24] sm:$0xf0]  ;;  %v13877_v18 = vor.u32 %v16227_v21, %v13876_v11  ;;  %v14380_v21 = vld [vmem:[#allocation48 + $0x10e0] sm:$0xf] }
0x1186   :  { %v18549_v39 = vpack.c.bf16 %v4452_v1, %v4452_v1  ;;  %v14212_v1 = vld [vmem:[#allocation48 + $0xf90] sm:$0xf]  ;;  %v14021_v44 = vor.u32 %v16263_v31, %v14020_v12  ;;  %v16197_v20 = vld [vmem:[#allocation48 + $0xc14] sm:$0xf0] }
0x1187   :  { %v18551_v42 = vpack.c.bf16 %v4453_v50, %v4453_v50  ;;  %v4252_v43 = vpop.f32.mrf.mxu3  ;;  %v14884_v31 = vld [vmem:[#allocation48 + $0x14d0] sm:$0xf] }
0x1188   :  { %v4253_v5 = vadd.f32 %v4252_v43, %v3571_v34  ;;  %v4291_v41 = vpop.f32.mrf.mxu2  ;;  %9126 = vmatmul.bf16.vlgmr.msrb.gmra.mxu0 %v18549_v39  ;;  %v16311_v34 = vld [vmem:[#allocation48 + $0xfa4] sm:$0xf0]  ;;  %v3578_v43 = vperm.slane %v18543_v22, 7 }
0x1189   :  { %v4292_v48 = vadd.f32 %v4291_v41, %v3574_v35  ;;  %9139 = vmatmul.bf16.vlgmr.msrb.gmra.mxu1 %v18551_v42  ;;  %9222 = vmatpush.bf16.msrb.mxu0 %v14117_v38  ;;  %v4267_v16 = vpop.f32.mrf.mxu0  ;;  %v14453_v35 = vor.u32 %v16371_v26, %v14452_v24  ;;  %v3575_v38 = vperm.slane %v18543_v22, 4  ;;  %v14213_v29 = vor.u32 %v16311_v34, %v14212_v1  ;;  %v16245_v26 = vld [vmem:[#allocation48 + $0xd94] sm:$0xf0] }
0x118a   :  { %v4451_v45 = vmax.f32 %v4253_v5, 0.0  ;;  %9235 = vmatpush.bf16.msrb.mxu1 %v14309_v2  ;;  %v4280_v55 = vpop.f32.mrf.mxu1  ;;  %v13852_v2 = vld [vmem:[#allocation48 + $0xcc0] sm:$0xf]  ;;  %v16365_v5 = vld [vmem:[#allocation48 + $0x1154] sm:$0xf0] }
0x118b   :  { %v4454_v56 = vmax.f32 %v4292_v48, 0.0  ;;  %v16257_v48 = vld [vmem:[#allocation48 + $0xdf4] sm:$0xf0]  ;;  %v13853_v54 = vor.u32 %v16221_v13, %v13852_v2  ;;  %v14429_v22 = vor.u32 %v16365_v5, %v14428_v27  ;;  %v3581_v2 = vperm.slane %v18571_v7, 2 }
0x118c   :  { %v18555_v51 = vpack.c.bf16 %v4451_v45, %v4451_v45  ;;  %v16305_v45 = vld [vmem:[#allocation48 + $0xf74] sm:$0xf0]  ;;  %v13997_v3 = vor.u32 %v16257_v48, %v13996_v25  ;;  %v14860_v48 = vld [vmem:[#allocation48 + $0x14a0] sm:$0xf] }
0x118d   :  { %v18557_v47 = vpack.c.bf16 %v4454_v56, %v4454_v56  ;;  %9223 = vmatpush.bf16.msrb.mxu0 %v14093_v49  ;;  %v14189_v8 = vor.u32 %v16305_v45, %v14188_v36 }
0x118e   :  { %9236 = vmatpush.bf16.msrb.mxu1 %v14285_v40  ;;  %9113 = vmatmul.bf16.vlgmr.msra.gmra.mxu3 %v18555_v51 }
0x118f   :  { %9152 = vmatmul.bf16.vlgmr.msrb.gmra.mxu2 %v18557_v47  ;;  %9209 = vmatpush.bf16.msra.mxu3 %v13925_v61  ;;  %v4254_v15 = vpop.f32.mrf.mxu3 }
0x1190   :  { %9248 = vmatpush.bf16.msrb.mxu2 %v14501_v62  ;;  %v4293_v19 = vpop.f32.mrf.mxu2  ;;  %v16359_v62 = vld [vmem:[#allocation48 + $0x1124] sm:$0xf0] }
0x1191   :  { %9224 = vmatpush.bf16.msrb.mxu0 %v14069_v9  ;;  %v4317_v57 = vpop.f32.mrf.mxu0  ;;  %v16299_v15 = vld [vmem:[#allocation48 + $0xf44] sm:$0xf0]  ;;  %v16209_v19 = vld [vmem:[#allocation48 + $0xc74] sm:$0xf0] }
0x1192   :  { %9237 = vmatpush.bf16.msrb.mxu1 %v14261_v14  ;;  %v4318_v28 = vadd.f32 %v4317_v57, %v3576_v60  ;;  %v4330_v53 = vpop.f32.mrf.mxu1  ;;  %v16251_v14 = vld [vmem:[#allocation48 + $0xdc4] sm:$0xf0]  ;;  %v16353_v57 = vld [vmem:[#allocation48 + $0x10f4] sm:$0xf0]  ;;  %v14165_v24 = vor.u32 %v16299_v15, %v14164_v52  ;;  %v13805_v12 = vor.u32 %v16209_v19, %v13804_v37 }
0x1193   :  { %v4331_v4 = vadd.f32 %v4330_v53, %v3577_v32  ;;  %9210 = vmatpush.bf16.msra.mxu3 %v13901_v46  ;;  %v14405_v46 = vor.u32 %v16359_v62, %v14404_v59  ;;  %v13973_v11 = vor.u32 %v16251_v14, %v13972_v10  ;;  %v16293_v53 = vld [vmem:[#allocation48 + $0xf14] sm:$0xf0]  ;;  %v14381_v34 = vor.u32 %v16353_v57, %v14380_v21  ;;  %v14692_v62 = vld [vmem:[#allocation48 + $0x1350] sm:$0xf] }
0x1194   :  { %v4456_v50 = vmax.f32 %v4318_v28, 0.0  ;;  %9249 = vmatpush.bf16.msrb.mxu2 %v14477_v23  ;;  %v14140_v28 = vld [vmem:[#allocation48 + $0xf00] sm:$0xf]  ;;  %v3579_v59 = vperm.slane %v18571_v7, 0  ;;  %v15268_v14 = vld [vmem:[#allocation48 + $0x17d0] sm:$0xf] }
0x1195   :  { %v4457_v17 = vmax.f32 %v4331_v4, 0.0  ;;  %9225 = vmatpush.bf16.msrb.mxu0 %v14045_v30  ;;  %v13948_v30 = vld [vmem:[#allocation48 + $0xd80] sm:$0xf]  ;;  %v16479_v4 = vld [vmem:[#allocation48 + $0x14e4] sm:$0xf0] }
0x1196   :  { %v18565_v41 = vpack.c.bf16 %v4456_v50, %v4456_v50  ;;  %9238 = vmatpush.bf16.msrb.mxu1 %v14237_v33  ;;  %v16527_v50 = vld [vmem:[#allocation48 + $0x1664] sm:$0xf0]  ;;  %v13949_v13 = vor.u32 %v16245_v26, %v13948_v30  ;;  %v14885_v27 = vor.u32 %v16479_v4, %v14884_v31  ;;  %v15028_v57 = vld [vmem:[#allocation48 + $0x15f0] sm:$0xf] }
0x1197   :  { %v18567_v16 = vpack.c.bf16 %v4457_v17, %v4457_v17  ;;  %9211 = vmatpush.bf16.msra.mxu3 %v13877_v18  ;;  %v4304_v49 = vpop.f32.mrf.mxu3  ;;  %v15076_v18 = vld [vmem:[#allocation48 + $0x1650] sm:$0xf]  ;;  %v16515_v30 = vld [vmem:[#allocation48 + $0x1604] sm:$0xf0] }
0x1198   :  { %9250 = vmatpush.bf16.msrb.mxu2 %v14453_v35  ;;  %v4305_v55 = vadd.f32 %v4304_v49, %v3575_v38  ;;  %v4343_v40 = vpop.f32.mrf.mxu2  ;;  %9178 = vmatmul.bf16.vlgmr.msra.gmra.mxu0 %v18565_v41  ;;  %v13780_v35 = vld [vmem:[#allocation48 + $0xc30] sm:$0xf]  ;;  %v16203_v38 = vld [vmem:[#allocation48 + $0xc44] sm:$0xf0]  ;;  %v16473_v49 = vld [vmem:[#allocation48 + $0x14b4] sm:$0xf0] }
0x1199   :  { %v4344_v56 = vadd.f32 %v4343_v40, %v3578_v43  ;;  %9191 = vmatmul.bf16.vlgmr.msra.gmra.mxu1 %v18567_v16  ;;  %9226 = vmatpush.bf16.msrb.mxu0 %v14021_v44  ;;  %v4319_v61 = vpop.f32.mrf.mxu0  ;;  %v14356_v17 = vld [vmem:[#allocation48 + $0x10b0] sm:$0xf]  ;;  %v16347_v43 = vld [vmem:[#allocation48 + $0x10c4] sm:$0xf0]  ;;  %v14141_v44 = vor.u32 %v16293_v53, %v14140_v28  ;;  %v13781_v25 = vor.u32 %v16203_v38, %v13780_v35  ;;  %v16521_v40 = vld [vmem:[#allocation48 + $0x1634] sm:$0xf0] }
0x119a   :  { %v4455_v6 = vmax.f32 %v4305_v55, 0.0  ;;  %9239 = vmatpush.bf16.msrb.mxu1 %v14213_v29  ;;  %v4332_v9 = vpop.f32.mrf.mxu1  ;;  %v15077_v29 = vor.u32 %v16527_v50, %v15076_v18  ;;  %v14357_v45 = vor.u32 %v16347_v43, %v14356_v17  ;;  %v15052_v55 = vld [vmem:[#allocation48 + $0x1620] sm:$0xf]  ;;  %v16341_v61 = vld [vmem:[#allocation48 + $0x1094] sm:$0xf0]  ;;  %v14861_v10 = vor.u32 %v16473_v49, %v14860_v48 }
0x119b   :  { %v4458_v60 = vmax.f32 %v4344_v56, 0.0  ;;  %9212 = vmatpush.bf16.msra.mxu3 %v13853_v54  ;;  %v14332_v56 = vld [vmem:[#allocation48 + $0x1080] sm:$0xf]  ;;  %v15053_v52 = vor.u32 %v16521_v40, %v15052_v55  ;;  %v15029_v35 = vor.u32 %v16515_v30, %v15028_v57  ;;  %v14788_v55 = vld [vmem:[#allocation48 + $0x1410] sm:$0xf] }
0x119c   :  { %v18573_v32 = vpack.c.bf16 %v4455_v6, %v4455_v6  ;;  %9251 = vmatpush.bf16.msrb.mxu2 %v14429_v22  ;;  %v13756_v22 = vld [vmem:[#allocation48 + $0xc00] sm:$0xf]  ;;  %v16431_v6 = vld [vmem:[#allocation48 + $0x1364] sm:$0xf0]  ;;  %v15172_v57 = vld [vmem:[#allocation48 + $0x1710] sm:$0xf] }
0x119d   :  { %v18576_v23 = vpack.c.bf16 %v4458_v60, %v4458_v60  ;;  %9227 = vmatpush.bf16.msrb.mxu0 %v13997_v3  ;;  %v16575_v60 = vld [vmem:[#allocation48 + $0x17e4] sm:$0xf0]  ;;  %v13757_v15 = vor.u32 %v16197_v20, %v13756_v22  ;;  %v14693_v21 = vor.u32 %v16431_v6, %v14692_v62  ;;  %v14668_v53 = vld [vmem:[#allocation48 + $0x1320] sm:$0xf]  ;;  %v14980_v20 = vld [vmem:[#allocation48 + $0x1590] sm:$0xf] }
0x119e   :  { %9240 = vmatpush.bf16.msrb.mxu1 %v14189_v8  ;;  %9165 = vmatmul.bf16.vlgmr.msrb.gmra.mxu3 %v18573_v32  ;;  %v3582_v8 = vperm.slane %v18571_v7, 3  ;;  %v15269_v28 = vor.u32 %v16575_v60, %v15268_v14  ;;  %v15244_v18 = vld [vmem:[#allocation48 + $0x17a0] sm:$0xf]  ;;  %v16455_v40 = vld [vmem:[#allocation48 + $0x1424] sm:$0xf0] }
0x119f   :  { %9204 = vmatmul.bf16.vlgmr.msra.gmra.mxu2 %v18576_v23  ;;  %9213 = vmatpush.bf16.msra.mxu3 %v13829_v63  ;;  %v4306_v33 = vpop.f32.mrf.mxu3  ;;  %v14812_v38 = vld [vmem:[#allocation48 + $0x1440] sm:$0xf]  ;;  %v16413_v62 = vld [vmem:[#allocation48 + $0x12d4] sm:$0xf0]  ;;  %v14789_v6 = vor.u32 %v16455_v40, %v14788_v55  ;;  %v16551_v30 = vld [vmem:[#allocation48 + $0x1724] sm:$0xf0] }
0x11a0   :  { %9252 = vmatpush.bf16.msrb.mxu2 %v14405_v46  ;;  %v4345_v1 = vpop.f32.mrf.mxu2  ;;  %v14836_v46 = vld [vmem:[#allocation48 + $0x1470] sm:$0xf]  ;;  %v16425_v33 = vld [vmem:[#allocation48 + $0x1334] sm:$0xf0]  ;;  %v15004_v43 = vld [vmem:[#allocation48 + $0x15c0] sm:$0xf] }
0x11a1   :  { %9228 = vmatpush.bf16.msrb.mxu0 %v13973_v11  ;;  %v14333_v11 = vor.u32 %v16341_v61, %v14332_v56  ;;  %v16569_v1 = vld [vmem:[#allocation48 + $0x17b4] sm:$0xf0]  ;;  %v14669_v17 = vor.u32 %v16425_v33, %v14668_v53  ;;  %v16503_v56 = vld [vmem:[#allocation48 + $0x15a4] sm:$0xf0]  ;;  %v14764_v14 = vld [vmem:[#allocation48 + $0x13e0] sm:$0xf] }
0x11a2   :  { %9241 = vmatpush.bf16.msrb.mxu1 %v14165_v24  ;;  %v4369_v5 = vpop.f32.mrf.mxu0  ;;  %v16449_v60 = vld [vmem:[#allocation48 + $0x13f4] sm:$0xf0]  ;;  %v14932_v33 = vld [vmem:[#allocation48 + $0x1530] sm:$0xf]  ;;  %v16395_v55 = vld [vmem:[#allocation48 + $0x1244] sm:$0xf0] }
0x11a3   :  { %9214 = vmatpush.bf16.msra.mxu3 %v13805_v12  ;;  %v4370_v54 = vadd.f32 %v4369_v5, %v3580_v0  ;;  %v16467_v0 = vld [vmem:[#allocation48 + $0x1484] sm:$0xf0]  ;;  %v15245_v5 = vor.u32 %v16569_v1, %v15244_v18  ;;  %v3585_v18 = vperm.slane %v18571_v7, 6  ;;  %v14572_v1 = vld [vmem:[#allocation48 + $0x1260] sm:$0xf] }
0x11a4   :  { %9253 = vmatpush.bf16.msrb.mxu2 %v14381_v34  ;;  %v14837_v4 = vor.u32 %v16467_v0, %v14836_v46  ;;  %v16497_v46 = vld [vmem:[#allocation48 + $0x1574] sm:$0xf0] }
0x11a5   :  { %v4382_v36 = vpop.f32.mrf.mxu1  ;;  %9229 = vmatpush.bf16.msrb.mxu0 %v13949_v13  ;;  %v4460_v3 = vmax.f32 %v4370_v54, 0.0  ;;  %v15220_v54 = vld [vmem:[#allocation48 + $0x1770] sm:$0xf] }
0x11a6   :  { %v4383_v58 = vadd.f32 %v4382_v36, %v3581_v2  ;;  %9242 = vmatpush.bf16.msrb.mxu1 %v14141_v44  ;;  %v16461_v2 = vld [vmem:[#allocation48 + $0x1454] sm:$0xf0]  ;;  %v16563_v36 = vld [vmem:[#allocation48 + $0x1784] sm:$0xf0] }
0x11a7   :  { %9215 = vmatpush.bf16.msra.mxu3 %v13781_v25  ;;  %v18583_v63 = vpack.c.bf16 %v4460_v3, %v4460_v3  ;;  %v16509_v44 = vld [vmem:[#allocation48 + $0x15d4] sm:$0xf0]  ;;  %v16419_v25 = vld [vmem:[#allocation48 + $0x1304] sm:$0xf0]  ;;  %v14813_v49 = vor.u32 %v16461_v2, %v14812_v38  ;;  %v15221_v3 = vor.u32 %v16563_v36, %v15220_v54  ;;  %v14716_v2 = vld [vmem:[#allocation48 + $0x1380] sm:$0xf] }
0x11a8   :  { %v4461_v9 = vmax.f32 %v4383_v58, 0.0  ;;  %9254 = vmatpush.bf16.msrb.mxu2 %v14357_v45  ;;  %v4356_v19 = vpop.f32.mrf.mxu3  ;;  %v15005_v45 = vor.u32 %v16509_v44, %v15004_v43  ;;  %v16545_v38 = vld [vmem:[#allocation48 + $0x16f4] sm:$0xf0]  ;;  %v14908_v43 = vld [vmem:[#allocation48 + $0x1500] sm:$0xf] }
0x11a9   :  { %9274 = vmatpush.bf16.msra.mxu0 %v14885_v27  ;;  %v4357_v24 = vadd.f32 %v4356_v19, %v3579_v59  ;;  %v14620_v59 = vld [vmem:[#allocation48 + $0x12c0] sm:$0xf]  ;;  %v14596_v19 = vld [vmem:[#allocation48 + $0x1290] sm:$0xf]  ;;  %v16485_v44 = vld [vmem:[#allocation48 + $0x1514] sm:$0xf0] }
0x11aa   :  { %9287 = vmatpush.bf16.msra.mxu1 %v15077_v29  ;;  %v18585_v37 = vpack.c.bf16 %v4461_v9, %v4461_v9  ;;  %9230 = vmatmul.bf16.vlgmr.msrb.gmra.mxu0 %v18583_v63  ;;  %v4371_v31 = vpop.f32.mrf.mxu0  ;;  %v14644_v29 = vld [vmem:[#allocation48 + $0x12f0] sm:$0xf]  ;;  %v15196_v9 = vld [vmem:[#allocation48 + $0x1740] sm:$0xf]  ;;  %v12774_v36 = vld [vmem:[#allocation48 + $0x468] sm:$0xf0] }
0x11ab   :  { %v4395_v26 = vpop.f32.mrf.mxu2  ;;  %v4459_v34 = vmax.f32 %v4357_v24, 0.0  ;;  %9216 = vmatpush.bf16.msra.mxu3 %v13757_v15  ;;  %v14645_v58 = vor.u32 %v16419_v25, %v14644_v29  ;;  %v14956_v15 = vld [vmem:[#allocation48 + $0x1560] sm:$0xf]  ;;  %v15173_v31 = vor.u32 %v16551_v30, %v15172_v57  ;;  %v15900_v29 = vld [vmem:[#allocation48 + $0x2d4] sm:$0xf] }
0x11ac   :  { %v4396_v12 = vadd.f32 %v4395_v26, %v3582_v8  ;;  %9243 = vmatmul.bf16.vlgmr.msrb.gmra.mxu1 %v18585_v37  ;;  %9255 = vmatpush.bf16.msrb.mxu2 %v14333_v11  ;;  %v16557_v8 = vld [vmem:[#allocation48 + $0x1754] sm:$0xf0]  ;;  %v16407_v11 = vld [vmem:[#allocation48 + $0x12a4] sm:$0xf0]  ;;  %v14957_v24 = vor.u32 %v16497_v46, %v14956_v15  ;;  %v14740_v26 = vld [vmem:[#allocation48 + $0x13b0] sm:$0xf] }
0x11ad   :  { %9275 = vmatpush.bf16.msra.mxu0 %v14861_v10  ;;  %v4384_v50 = vpop.f32.mrf.mxu1  ;;  %v18589_v27 = vpack.c.bf16 %v4459_v34, %v4459_v34  ;;  %v14981_v10 = vor.u32 %v16503_v56, %v14980_v20  ;;  %v15197_v0 = vor.u32 %v16557_v8, %v15196_v9  ;;  %v14597_v53 = vor.u32 %v16407_v11, %v14596_v19  ;;  %v16401_v34 = vld [vmem:[#allocation48 + $0x1274] sm:$0xf0]  ;;  %v12582_v25 = vld [vmem:[#allocation48 + $0x2e8] sm:$0xf0]  ;;  %v15852_v57 = vld [vmem:[#allocation48 + $0x154] sm:$0xf] }
0x11ae   :  { %9288 = vmatpush.bf16.msra.mxu1 %v15053_v52  ;;  %v4462_v13 = vmax.f32 %v4396_v12, 0.0  ;;  %v14621_v52 = vor.u32 %v16413_v62, %v14620_v59  ;;  %v16491_v12 = vld [vmem:[#allocation48 + $0x1544] sm:$0xf0]  ;;  %v14909_v56 = vor.u32 %v16485_v44, %v14908_v43  ;;  %v12558_v59 = vld [vmem:[#allocation48 + $0x2b8] sm:$0xf0] }
0x11af   :  { %9261 = vmatpush.bf16.msrb.mxu3 %v14693_v21  ;;  %v14765_v21 = vor.u32 %v16449_v60, %v14764_v14  ;;  %v12750_v14 = vld [vmem:[#allocation48 + $0x438] sm:$0xf0]  ;;  %v14524_v60 = vld [vmem:[#allocation48 + $0x1200] sm:$0xf]  ;;  %v16389_v46 = vld [vmem:[#allocation48 + $0x1214] sm:$0xf0] }
0x11b0   :  { %9300 = vmatpush.bf16.msra.mxu2 %v15269_v28  ;;  %v18591_v48 = vpack.c.bf16 %v4462_v13, %v4462_v13  ;;  %9217 = vmatmul.bf16.vlgmr.msra.gmra.mxu3 %v18589_v27  ;;  %v4358_v22 = vpop.f32.mrf.mxu3  ;;  %v16443_v28 = vld [vmem:[#allocation48 + $0x13c4] sm:$0xf0]  ;;  %v14933_v13 = vor.u32 %v16491_v12, %v14932_v33  ;;  %v16533_v19 = vld [vmem:[#allocation48 + $0x1694] sm:$0xf0]  ;;  %v12390_v30 = vld [vmem:[#allocation48 + $0x168] sm:$0xf0] }
0x11b1   :  { %9276 = vmatpush.bf16.msra.mxu0 %v14837_v4  ;;  %v3584_v4 = vperm.slane %v18571_v7, 5  ;;  %v14741_v50 = vor.u32 %v16443_v28, %v14740_v26  ;;  %v15124_v22 = vld [vmem:[#allocation48 + $0x16b0] sm:$0xf]  ;;  %v3586_v26 = vperm.slane %v18571_v7, 7  ;;  %v12966_v33 = vld [vmem:[#allocation48 + $0x5e8] sm:$0xf0] }
0x11b2   :  { %9289 = vmatpush.bf16.msra.mxu1 %v15029_v35  ;;  %9256 = vmatmul.bf16.vlgmr.msrb.gmra.mxu2 %v18591_v48  ;;  %v15148_v35 = vld [vmem:[#allocation48 + $0x16e0] sm:$0xf]  ;;  %v15846_v44 = vld [vmem:[#allocation48 + $0x124] sm:$0xf] }
0x11b3   :  { %9262 = vmatpush.bf16.msrb.mxu3 %v14669_v17  ;;  %v4397_v61 = vpop.f32.mrf.mxu2  ;;  %v16437_v17 = vld [vmem:[#allocation48 + $0x1394] sm:$0xf0]  ;;  %v15149_v54 = vor.u32 %v16545_v38, %v15148_v35  ;;  %v12393_v38 = vor.u32 %v15852_v57, %v12390_v30 }
0x11b4   :  { %9301 = vmatpush.bf16.msra.mxu2 %v15245_v5  ;;  %v14573_v5 = vor.u32 %v16401_v34, %v14572_v1  ;;  %v14717_v40 = vor.u32 %v16437_v17, %v14716_v2  ;;  %v12585_v61 = vor.u32 %v15900_v29, %v12582_v25  ;;  %v12534_v1 = vld [vmem:[#allocation48 + $0x288] sm:$0xf0]  ;;  %v15936_v2 = vld [vmem:[#allocation48 + $0x3f4] sm:$0xf] }
0x11b5   :  { %9277 = vmatpush.bf16.msra.mxu0 %v14813_v49  ;;  %v15948_v49 = vld [vmem:[#allocation48 + $0x454] sm:$0xf] }
0x11b6   :  { %9290 = vmatpush.bf16.msra.mxu1 %v15005_v45  ;;  %v14548_v45 = vld [vmem:[#allocation48 + $0x1230] sm:$0xf]  ;;  %v12777_v9 = vor.u32 %v15948_v49, %v12774_v36  ;;  %v12942_v36 = vld [vmem:[#allocation48 + $0x5b8] sm:$0xf0] }
0x11b7   :  { %9263 = vmatpush.bf16.msrb.mxu3 %v14645_v58  ;;  %v16539_v58 = vld [vmem:[#allocation48 + $0x16c4] sm:$0xf0]  ;;  %v14549_v8 = vor.u32 %v16395_v55, %v14548_v45 }
0x11b8   :  { %9302 = vmatpush.bf16.msra.mxu2 %v15221_v3  ;;  %v15894_v3 = vld [vmem:[#allocation48 + $0x2a4] sm:$0xf]  ;;  %v15125_v15 = vor.u32 %v16539_v58, %v15124_v22  ;;  %v12510_v58 = vld [vmem:[#allocation48 + $0x258] sm:$0xf0] }
0x11b9   :  { %9278 = vmatpush.bf16.msra.mxu0 %v14789_v6  ;;  %v12561_v28 = vor.u32 %v15894_v3, %v12558_v59  ;;  %v15882_v22 = vld [vmem:[#allocation48 + $0x244] sm:$0xf]  ;;  %v12702_v3 = vld [vmem:[#allocation48 + $0x3d8] sm:$0xf0] }
0x11ba   :  { %9291 = vmatpush.bf16.msra.mxu1 %v14981_v10  ;;  %v15942_v10 = vld [vmem:[#allocation48 + $0x424] sm:$0xf] }
0x11bb   :  { %9264 = vmatpush.bf16.msrb.mxu3 %v14621_v52 }
0x11bc   :  { %9303 = vmatpush.bf16.msra.mxu2 %v15197_v0  ;;  %v15100_v0 = vld [vmem:[#allocation48 + $0x1680] sm:$0xf] }
0x11bd   :  { %9279 = vmatpush.bf16.msra.mxu0 %v14765_v21  ;;  %v3583_v21 = vperm.slane %v18571_v7, 4  ;;  %v15101_v35 = vor.u32 %v16533_v19, %v15100_v0 }
0x11be   :  { %9292 = vmatpush.bf16.msra.mxu1 %v14957_v24 }
0x11bf   :  { %9265 = vmatpush.bf16.msrb.mxu3 %v14597_v53  ;;  %v15996_v53 = vld [vmem:[#allocation48 + $0x5d4] sm:$0xf] }
0x11c0   :  { %9304 = vmatpush.bf16.msra.mxu2 %v15173_v31  ;;  %v12753_v31 = vor.u32 %v15942_v10, %v12750_v14  ;;  %v12969_v43 = vor.u32 %v15996_v53, %v12966_v33  ;;  %v12513_v10 = vor.u32 %v15882_v22, %v12510_v58  ;;  %v15984_v14 = vld [vmem:[#allocation48 + $0x574] sm:$0xf]  ;;  %v15978_v53 = vld [vmem:[#allocation48 + $0x544] sm:$0xf]  ;;  %v12894_v33 = vld [vmem:[#allocation48 + $0x558] sm:$0xf0] }
0x11c1   :  { %9280 = vmatpush.bf16.msra.mxu0 %v14741_v50  ;;  %v15966_v22 = vld [vmem:[#allocation48 + $0x4e4] sm:$0xf]  ;;  %v12846_v58 = vld [vmem:[#allocation48 + $0x4f8] sm:$0xf0] }
0x11c2   :  { %v4421_v20 = vpop.f32.mrf.mxu0  ;;  %9293 = vmatpush.bf16.msra.mxu1 %v14933_v13  ;;  %v12726_v13 = vld [vmem:[#allocation48 + $0x408] sm:$0xf0] }
0x11c3   :  { %v4422_v62 = vadd.f32 %v4421_v20, %v3584_v4  ;;  %v4434_v6 = vpop.f32.mrf.mxu1  ;;  %9266 = vmatpush.bf16.msrb.mxu3 %v14573_v5  ;;  %v14525_v4 = vor.u32 %v16389_v46, %v14524_v60  ;;  %v12366_v5 = vld [vmem:[#allocation48 + $0x138] sm:$0xf0]  ;;  %v12918_v60 = vld [vmem:[#allocation48 + $0x588] sm:$0xf0] }
0x11c4   :  { %v4435_v52 = vadd.f32 %v4434_v6, %v3585_v18  ;;  %9305 = vmatpush.bf16.msra.mxu2 %v15149_v54  ;;  %v15888_v18 = vld [vmem:[#allocation48 + $0x274] sm:$0xf]  ;;  %v15990_v54 = vld [vmem:[#allocation48 + $0x5a4] sm:$0xf]  ;;  %v12486_v46 = vld [vmem:[#allocation48 + $0x228] sm:$0xf0]  ;;  %v12921_v30 = vor.u32 %v15984_v14, %v12918_v60  ;;  %v12849_v60 = vor.u32 %v15966_v22, %v12846_v58 }
0x11c5   :  { %v4464_v11 = vmax.f32 %v4422_v62, 0.0  ;;  %9281 = vmatpush.bf16.msra.mxu0 %v14717_v40  ;;  %v12537_v49 = vor.u32 %v15888_v18, %v12534_v1  ;;  %v12729_v40 = vor.u32 %v15936_v2, %v12726_v13  ;;  %v12945_v62 = vor.u32 %v15990_v54, %v12942_v36  ;;  %v15840_v6 = vld [vmem:[#allocation48 + $0xf4] sm:$0xf]  ;;  %v12462_v18 = vld [vmem:[#allocation48 + $0x1f8] sm:$0xf0] }
0x11c6   :  { %v4465_v24 = vmax.f32 %v4435_v52, 0.0  ;;  %9294 = vmatpush.bf16.msra.mxu1 %v14909_v56  ;;  %v12369_v56 = vor.u32 %v15846_v44, %v12366_v5  ;;  %v15828_v2 = vld [vmem:[#allocation48 + $0x94] sm:$0xf]  ;;  %v12294_v13 = vld [vmem:[#allocation48 + $0xa8] sm:$0xf0] }
0x11c7   :  { %v18599_v12 = vpack.c.bf16 %v4464_v11, %v4464_v11  ;;  %9267 = vmatpush.bf16.msrb.mxu3 %v14549_v8  ;;  %v15924_v11 = vld [vmem:[#allocation48 + $0x394] sm:$0xf]  ;;  %v12630_v54 = vld [vmem:[#allocation48 + $0x348] sm:$0xf0]  ;;  %v16182_v22 = vld [vmem:[#allocation48 + $0xba4] sm:$0xf] }
0x11c8   :  { %v18601_v34 = vpack.c.bf16 %v4465_v24, %v4465_v24  ;;  %v4408_v50 = vpop.f32.mrf.mxu3  ;;  %9306 = vmatpush.bf16.msra.mxu2 %v15125_v15  ;;  %v15876_v15 = vld [vmem:[#allocation48 + $0x214] sm:$0xf]  ;;  %v15834_v24 = vld [vmem:[#allocation48 + $0xc4] sm:$0xf]  ;;  %v13710_v58 = vld [vmem:[#allocation48 + $0xbb8] sm:$0xf0] }
0x11c9   :  { %9326 = vmatpush.bf16.msrb.mxu0 %v12585_v61  ;;  %v4409_v7 = vadd.f32 %v4408_v50, %v3583_v21  ;;  %v15930_v61 = vld [vmem:[#allocation48 + $0x3c4] sm:$0xf]  ;;  %v12678_v21 = vld [vmem:[#allocation48 + $0x3a8] sm:$0xf0]  ;;  %v15864_v5 = vld [vmem:[#allocation48 + $0x1b4] sm:$0xf] }
0x11ca   :  { %9339 = vmatpush.bf16.msrb.mxu1 %v12777_v9  ;;  %v4447_v17 = vpop.f32.mrf.mxu2  ;;  %9282 = vmatmul.bf16.vlgmr.msra.gmra.mxu0 %v18599_v12  ;;  %v4423_v25 = vpop.f32.mrf.mxu0  ;;  %v12342_v9 = vld [vmem:[#allocation48 + $0x108] sm:$0xf0]  ;;  %v12705_v52 = vor.u32 %v15930_v61, %v12702_v3  ;;  %v15918_v50 = vld [vmem:[#allocation48 + $0x364] sm:$0xf]  ;;  %v12414_v61 = vld [vmem:[#allocation48 + $0x198] sm:$0xf0] }
0x11cb   :  { %v4448_v29 = vadd.f32 %v4447_v17, %v3586_v26  ;;  %9295 = vmatmul.bf16.vlgmr.msra.gmra.mxu1 %v18601_v34  ;;  %v4463_v45 = vmax.f32 %v4409_v7, 0.0  ;;  %v4436_v55 = vpop.f32.mrf.mxu1  ;;  %9268 = vmatpush.bf16.msrb.mxu3 %v14525_v4  ;;  %v12345_v19 = vor.u32 %v15840_v6, %v12342_v9  ;;  %v12318_v26 = vld [vmem:[#allocation48 + $0xd8] sm:$0xf0]  ;;  %v15870_v4 = vld [vmem:[#allocation48 + $0x1e4] sm:$0xf]  ;;  %v12297_v25 = vor.u32 %v15828_v2, %v12294_v13 }
0x11cc   :  { %9307 = vmatpush.bf16.msra.mxu2 %v15101_v35  ;;  %v12321_v1 = vor.u32 %v15834_v24, %v12318_v26  ;;  %v12654_v35 = vld [vmem:[#allocation48 + $0x378] sm:$0xf0]  ;;  %v12465_v7 = vor.u32 %v15870_v4, %v12462_v18  ;;  %v15972_v17 = vld [vmem:[#allocation48 + $0x514] sm:$0xf]  ;;  %v15906_v3 = vld [vmem:[#allocation48 + $0x304] sm:$0xf] }
0x11cd   :  { %9327 = vmatpush.bf16.msrb.mxu0 %v12561_v28  ;;  %v4466_v20 = vmax.f32 %v4448_v29, 0.0  ;;  %v18605_v59 = vpack.c.bf16 %v4463_v45, %v4463_v45  ;;  %v12489_v28 = vor.u32 %v15876_v15, %v12486_v46  ;;  %v12657_v44 = vor.u32 %v15918_v50, %v12654_v35  ;;  %v12438_v29 = vld [vmem:[#allocation48 + $0x1c8] sm:$0xf0]  ;;  %v15822_v45 = vld [vmem:[#allocation48 + $0x64] sm:$0xf] }
0x11ce   :  { %9340 = vmatpush.bf16.msrb.mxu1 %v12753_v31  ;;  %v12681_v31 = vor.u32 %v15924_v11, %v12678_v21  ;;  %v12270_v55 = vld [vmem:[#allocation48 + $0x78] sm:$0xf0]  ;;  %v16092_v9 = vld [vmem:[#allocation48 + $0x8d4] sm:$0xf]  ;;  %v12246_v46 = vld [vmem:[#allocation48 + $0x48] sm:$0xf0] }
0x11cf   :  { %9313 = vmatpush.bf16.msra.mxu3 %v12393_v38  ;;  %v18607_v8 = vpack.c.bf16 %v4466_v20, %v4466_v20  ;;  %v12897_v38 = vor.u32 %v15978_v53, %v12894_v33  ;;  %v15858_v20 = vld [vmem:[#allocation48 + $0x184] sm:$0xf]  ;;  %v12273_v6 = vor.u32 %v15822_v45, %v12270_v55  ;;  %v16140_v14 = vld [vmem:[#allocation48 + $0xa54] sm:$0xf]  ;;  %v12822_v11 = vld [vmem:[#allocation48 + $0x4c8] sm:$0xf0] }
0x11d0   :  { %9352 = vmatpush.bf16.msrb.mxu2 %v12969_v43  ;;  %9269 = vmatmul.bf16.vlgmr.msrb.gmra.mxu3 %v18605_v59  ;;  %v4410_v0 = vpop.f32.mrf.mxu3  ;;  %v12870_v43 = vld [vmem:[#allocation48 + $0x528] sm:$0xf0]  ;;  %v15816_v15 = vld [vmem:[#allocation48 + $0x34] sm:$0xf]  ;;  %v16134_v53 = vld [vmem:[#allocation48 + $0xa24] sm:$0xf] }
0x11d1   :  { %9328 = vmatpush.bf16.msrb.mxu0 %v12537_v49  ;;  %9308 = vmatmul.bf16.vlgmr.msra.gmra.mxu2 %v18607_v8  ;;  %v15912_v49 = vld [vmem:[#allocation48 + $0x334] sm:$0xf]  ;;  %v12873_v36 = vor.u32 %v15972_v17, %v12870_v43  ;;  %v12417_v0 = vor.u32 %v15858_v20, %v12414_v61  ;;  %v12249_v26 = vor.u32 %v15816_v15, %v12246_v46  ;;  %v13518_v33 = vld [vmem:[#allocation48 + $0xa38] sm:$0xf0]  ;;  %v15810_v4 = vld [vmem:[#allocation48 + $0x4] sm:$0xf] }
0x11d2   :  { %9341 = vmatpush.bf16.msrb.mxu1 %v12729_v40  ;;  %v4449_v57 = vpop.f32.mrf.mxu2  ;;  %v12441_v40 = vor.u32 %v15864_v5, %v12438_v29  ;;  %v12222_v18 = vld [vmem:[#allocation48 + $0x18] sm:$0xf0]  ;;  %v16044_v35 = vld [vmem:[#allocation48 + $0x754] sm:$0xf]  ;;  %v13521_v17 = vor.u32 %v16134_v53, %v13518_v33  ;;  %v13302_v5 = vld [vmem:[#allocation48 + $0x888] sm:$0xf0] }
0x11d3   :  { %9314 = vmatpush.bf16.msra.mxu3 %v12369_v56  ;;  %v12633_v56 = vor.u32 %v15912_v49, %v12630_v54  ;;  %v12798_v50 = vld [vmem:[#allocation48 + $0x498] sm:$0xf0]  ;;  %v16188_v13 = vld [vmem:[#allocation48 + $0xbd4] sm:$0xf]  ;;  %v12225_v43 = vor.u32 %v15810_v4, %v12222_v18  ;;  %v13494_v54 = vld [vmem:[#allocation48 + $0xa08] sm:$0xf0] }
0x11d4   :  { %9353 = vmatpush.bf16.msrb.mxu2 %v12945_v62  ;;  %v12606_v62 = vld [vmem:[#allocation48 + $0x318] sm:$0xf0]  ;;  %v16128_v49 = vld [vmem:[#allocation48 + $0x9f4] sm:$0xf]  ;;  %v16038_v45 = vld [vmem:[#allocation48 + $0x724] sm:$0xf] }
0x11d5   :  { %9329 = vmatpush.bf16.msrb.mxu0 %v12513_v10  ;;  %v13350_v10 = vld [vmem:[#allocation48 + $0x8e8] sm:$0xf0]  ;;  %v12609_v21 = vor.u32 %v15906_v3, %v12606_v62  ;;  %v13134_v55 = vld [vmem:[#allocation48 + $0x738] sm:$0xf0]  ;;  %v13497_v20 = vor.u32 %v16128_v49, %v13494_v54  ;;  %v16122_v62 = vld [vmem:[#allocation48 + $0x9c4] sm:$0xf] }
0x11d6   :  { %9342 = vmatpush.bf16.msrb.mxu1 %v12705_v52  ;;  %v13542_v52 = vld [vmem:[#allocation48 + $0xa68] sm:$0xf0]  ;;  %v13353_v57 = vor.u32 %v16092_v9, %v13350_v10  ;;  %v13278_v61 = vld [vmem:[#allocation48 + $0x858] sm:$0xf0]  ;;  %v13137_v3 = vor.u32 %v16038_v45, %v13134_v55  ;;  %v13713_v9 = vor.u32 %v16182_v22, %v13710_v58  ;;  %v16032_v10 = vld [vmem:[#allocation48 + $0x6f4] sm:$0xf] }
0x11d7   :  { %9315 = vmatpush.bf16.msra.mxu3 %v12345_v19  ;;  %v15960_v19 = vld [vmem:[#allocation48 + $0x4b4] sm:$0xf]  ;;  %v13545_v24 = vor.u32 %v16140_v14, %v13542_v52  ;;  %v13110_v14 = vld [vmem:[#allocation48 + $0x708] sm:$0xf0]  ;;  %v16170_v53 = vld [vmem:[#allocation48 + $0xb44] sm:$0xf] }
0x11d8   :  { %9354 = vmatpush.bf16.msrb.mxu2 %v12921_v30  ;;  %v16086_v30 = vld [vmem:[#allocation48 + $0x8a4] sm:$0xf]  ;;  %v16176_v52 = vld [vmem:[#allocation48 + $0xb74] sm:$0xf]  ;;  %v13686_v15 = vld [vmem:[#allocation48 + $0xb88] sm:$0xf0] }
0x11d9   :  { %9330 = vmatpush.bf16.msrb.mxu0 %v12489_v28  ;;  %v13326_v28 = vld [vmem:[#allocation48 + $0x8b8] sm:$0xf0]  ;;  %v16062_v4 = vld [vmem:[#allocation48 + $0x7e4] sm:$0xf]  ;;  %v16104_v49 = vld [vmem:[#allocation48 + $0x934] sm:$0xf] }
0x11da   :  { %9343 = vmatpush.bf16.msrb.mxu1 %v12681_v31  ;;  %v12825_v31 = vor.u32 %v15960_v19, %v12822_v11  ;;  %v13329_v2 = vor.u32 %v16086_v30, %v13326_v28  ;;  %v13254_v19 = vld [vmem:[#allocation48 + $0x828] sm:$0xf0]  ;;  %v13113_v11 = vor.u32 %v16032_v10, %v13110_v14  ;;  %v13689_v30 = vor.u32 %v16176_v52, %v13686_v15  ;;  %v13662_v33 = vld [vmem:[#allocation48 + $0xb58] sm:$0xf0]  ;;  %v16014_v45 = vld [vmem:[#allocation48 + $0x664] sm:$0xf] }
0x11db   :  { %9316 = vmatpush.bf16.msra.mxu3 %v12321_v1  ;;  %v15954_v1 = vld [vmem:[#allocation48 + $0x484] sm:$0xf]  ;;  %v13230_v18 = vld [vmem:[#allocation48 + $0x7f8] sm:$0xf0]  ;;  %v13398_v54 = vld [vmem:[#allocation48 + $0x948] sm:$0xf0] }
0x11dc   :  { %9355 = vmatpush.bf16.msrb.mxu2 %v12897_v38  ;;  %v13158_v38 = vld [vmem:[#allocation48 + $0x768] sm:$0xf0]  ;;  %v12801_v29 = vor.u32 %v15954_v1, %v12798_v50  ;;  %v16110_v50 = vld [vmem:[#allocation48 + $0x964] sm:$0xf]  ;;  %v13038_v55 = vld [vmem:[#allocation48 + $0x678] sm:$0xf0] }
0x11dd   :  { %9331 = vmatpush.bf16.msrb.mxu0 %v12465_v7  ;;  %v13734_v7 = vld [vmem:[#allocation48 + $0xbe8] sm:$0xf0]  ;;  %v16158_v22 = vld [vmem:[#allocation48 + $0xae4] sm:$0xf]  ;;  %v13614_v58 = vld [vmem:[#allocation48 + $0xaf8] sm:$0xf0] }
0x11de   :  { %9344 = vmatpush.bf16.msrb.mxu1 %v12657_v44  ;;  %v16080_v44 = vld [vmem:[#allocation48 + $0x874] sm:$0xf]  ;;  %v14118_v10 = vld [vmem:[#allocation48 + $0xee8] sm:$0xf0] }
0x11df   :  { %9317 = vmatpush.bf16.msra.mxu3 %v12297_v25  ;;  %v13161_v25 = vor.u32 %v16044_v35, %v13158_v38  ;;  %v13422_v35 = vld [vmem:[#allocation48 + $0x978] sm:$0xf0]  ;;  %v13665_v38 = vor.u32 %v16170_v53, %v13662_v33  ;;  %v16332_v14 = vld [vmem:[#allocation48 + $0x1054] sm:$0xf]  ;;  %v14310_v52 = vld [vmem:[#allocation48 + $0x1068] sm:$0xf0] }
0x11e0   :  { %9356 = vmatpush.bf16.msrb.mxu2 %v12873_v36  ;;  %v13737_v36 = vor.u32 %v16188_v13, %v13734_v7  ;;  %v13062_v13 = vld [vmem:[#allocation48 + $0x6a8] sm:$0xf0]  ;;  %v13233_v7 = vor.u32 %v16062_v4, %v13230_v18  ;;  %v16008_v15 = vld [vmem:[#allocation48 + $0x634] sm:$0xf]  ;;  %v16326_v53 = vld [vmem:[#allocation48 + $0x1024] sm:$0xf] }
0x11e1   :  { %9332 = vmatpush.bf16.msrb.mxu0 %v12441_v40  ;;  %v13305_v40 = vor.u32 %v16080_v44, %v13302_v5  ;;  %v13425_v44 = vor.u32 %v16110_v50, %v13422_v35  ;;  %v16056_v5 = vld [vmem:[#allocation48 + $0x7b4] sm:$0xf]  ;;  %v14286_v33 = vld [vmem:[#allocation48 + $0x1038] sm:$0xf0]  ;;  %v16002_v4 = vld [vmem:[#allocation48 + $0x604] sm:$0xf] }
0x11e2   :  { %9345 = vmatpush.bf16.msrb.mxu1 %v12633_v56  ;;  %v16074_v56 = vld [vmem:[#allocation48 + $0x844] sm:$0xf]  ;;  %v12990_v18 = vld [vmem:[#allocation48 + $0x618] sm:$0xf0]  ;;  %v16236_v35 = vld [vmem:[#allocation48 + $0xd54] sm:$0xf] }
0x11e3   :  { %9318 = vmatpush.bf16.msra.mxu3 %v12273_v6  ;;  %v13470_v6 = vld [vmem:[#allocation48 + $0x9d8] sm:$0xf0] }
0x11e4   :  { %9357 = vmatpush.bf16.msrb.mxu2 %v12849_v60  ;;  %v13281_v60 = vor.u32 %v16074_v56, %v13278_v61  ;;  %v13473_v46 = vor.u32 %v16122_v62, %v13470_v6  ;;  %v13401_v56 = vor.u32 %v16104_v49, %v13398_v54  ;;  %v13182_v61 = vld [vmem:[#allocation48 + $0x798] sm:$0xf0]  ;;  %v13041_v6 = vor.u32 %v16014_v45, %v13038_v55  ;;  %v16320_v49 = vld [vmem:[#allocation48 + $0xff4] sm:$0xf]  ;;  %v14262_v54 = vld [vmem:[#allocation48 + $0x1008] sm:$0xf0] }
0x11e5   :  { %9333 = vmatpush.bf16.msrb.mxu0 %v12417_v0  ;;  %v16068_v0 = vld [vmem:[#allocation48 + $0x814] sm:$0xf]  ;;  %v13374_v62 = vld [vmem:[#allocation48 + $0x918] sm:$0xf0]  ;;  %v16230_v45 = vld [vmem:[#allocation48 + $0xd24] sm:$0xf] }
0x11e6   :  { %9346 = vmatpush.bf16.msrb.mxu1 %v12609_v21  ;;  %v16116_v21 = vld [vmem:[#allocation48 + $0x994] sm:$0xf]  ;;  %v13257_v28 = vor.u32 %v16068_v0, %v13254_v19  ;;  %v13566_v50 = vld [vmem:[#allocation48 + $0xa98] sm:$0xf0] }
0x11e7   :  { %9319 = vmatpush.bf16.msra.mxu3 %v12249_v26  ;;  %v13086_v26 = vld [vmem:[#allocation48 + $0x6d8] sm:$0xf0]  ;;  %v16152_v19 = vld [vmem:[#allocation48 + $0xab4] sm:$0xf] }
0x11e8   :  { %9358 = vmatpush.bf16.msrb.mxu2 %v12825_v31  ;;  %9334 = vmatmul.bf16.vlgmr.msrb.gmra.mxu0 %v18549_v39  ;;  %v13902_v55 = vld [vmem:[#allocation48 + $0xd38] sm:$0xf0] }
0x11e9   :  { %9378 = vmatpush.bf16.msra.mxu0 %v13353_v57  ;;  %9347 = vmatmul.bf16.vlgmr.msrb.gmra.mxu1 %v18551_v42  ;;  %v13446_v57 = vld [vmem:[#allocation48 + $0x9a8] sm:$0xf0] }
0x11ea   :  { %9391 = vmatpush.bf16.msra.mxu1 %v13545_v24  ;;  %v16026_v24 = vld [vmem:[#allocation48 + $0x6c4] sm:$0xf]  ;;  %v13449_v31 = vor.u32 %v16116_v21, %v13446_v57 }
0x11eb   :  { %9320 = vmatpush.bf16.msra.mxu3 %v12225_v43  ;;  %v13089_v1 = vor.u32 %v16026_v24, %v13086_v26  ;;  %v13638_v43 = vld [vmem:[#allocation48 + $0xb28] sm:$0xf0]  ;;  %v14313_v24 = vor.u32 %v16332_v14, %v14310_v52  ;;  %v16224_v14 = vld [vmem:[#allocation48 + $0xcf4] sm:$0xf] }
0x11ec   :  { %9359 = vmatpush.bf16.msrb.mxu2 %v12801_v29  ;;  %v13206_v29 = vld [vmem:[#allocation48 + $0x7c8] sm:$0xf0] }
0x11ed   :  { %9379 = vmatpush.bf16.msra.mxu0 %v13329_v2  ;;  %v16020_v2 = vld [vmem:[#allocation48 + $0x694] sm:$0xf] }
0x11ee   :  { %9392 = vmatpush.bf16.msra.mxu1 %v13521_v17  ;;  %9321 = vmatmul.bf16.vlgmr.msra.gmra.mxu3 %v18555_v51  ;;  %v16164_v17 = vld [vmem:[#allocation48 + $0xb14] sm:$0xf] }
0x11ef   :  { %9365 = vmatpush.bf16.msrb.mxu3 %v13161_v25  ;;  %9360 = vmatmul.bf16.vlgmr.msrb.gmra.mxu2 %v18557_v47  ;;  %v13065_v25 = vor.u32 %v16020_v2, %v13062_v13  ;;  %v16380_v13 = vld [vmem:[#allocation48 + $0x11d4] sm:$0xf] }
0x11f0   :  { %9404 = vmatpush.bf16.msra.mxu2 %v13737_v36  ;;  %v13641_v36 = vor.u32 %v16164_v17, %v13638_v43  ;;  %v14289_v17 = vor.u32 %v16326_v53, %v14286_v33  ;;  %v12993_v43 = vor.u32 %v16002_v4, %v12990_v18  ;;  %v13854_v53 = vld [vmem:[#allocation48 + $0xcd8] sm:$0xf0] }
0x11f1   :  { %9380 = vmatpush.bf16.msra.mxu0 %v13305_v40  ;;  %v13209_v40 = vor.u32 %v16056_v5, %v13206_v29  ;;  %v14070_v5 = vld [vmem:[#allocation48 + $0xe88] sm:$0xf0]  ;;  %v14430_v4 = vld [vmem:[#allocation48 + $0x1158] sm:$0xf0] }
0x11f2   :  { %9393 = vmatpush.bf16.msra.mxu1 %v13497_v20  ;;  %v16050_v20 = vld [vmem:[#allocation48 + $0x784] sm:$0xf] }
0x11f3   :  { %9366 = vmatpush.bf16.msrb.mxu3 %v13137_v3  ;;  %v16098_v3 = vld [vmem:[#allocation48 + $0x904] sm:$0xf]  ;;  %v13185_v0 = vor.u32 %v16050_v20, %v13182_v61  ;;  %v14265_v20 = vor.u32 %v16320_v49, %v14262_v54  ;;  %v14046_v61 = vld [vmem:[#allocation48 + $0xe58] sm:$0xf0]  ;;  %v16356_v49 = vld [vmem:[#allocation48 + $0x1114] sm:$0xf] }
0x11f4   :  { %9405 = vmatpush.bf16.msra.mxu2 %v13713_v9  ;;  %v16284_v9 = vld [vmem:[#allocation48 + $0xed4] sm:$0xf]  ;;  %v13377_v21 = vor.u32 %v16098_v3, %v13374_v62  ;;  %v13905_v3 = vor.u32 %v16230_v45, %v13902_v55  ;;  %v16314_v62 = vld [vmem:[#allocation48 + $0xfc4] sm:$0xf]  ;;  %v14406_v54 = vld [vmem:[#allocation48 + $0x1128] sm:$0xf0] }
0x11f5   :  { %9381 = vmatpush.bf16.msra.mxu0 %v13281_v60  ;;  %v13617_v60 = vor.u32 %v16158_v22, %v13614_v58  ;;  %v14121_v57 = vor.u32 %v16284_v9, %v14118_v10  ;;  %v16374_v22 = vld [vmem:[#allocation48 + $0x11a4] sm:$0xf]  ;;  %v14478_v58 = vld [vmem:[#allocation48 + $0x11b8] sm:$0xf0]  ;;  %v16248_v45 = vld [vmem:[#allocation48 + $0xdb4] sm:$0xf] }
0x11f6   :  { %9394 = vmatpush.bf16.msra.mxu1 %v13473_v46  ;;  %v13014_v46 = vld [vmem:[#allocation48 + $0x648] sm:$0xf0]  ;;  %v14481_v10 = vor.u32 %v16374_v22, %v14478_v58  ;;  %v16296_v22 = vld [vmem:[#allocation48 + $0xf34] sm:$0xf] }
0x11f7   :  { %9367 = vmatpush.bf16.msrb.mxu3 %v13113_v11  ;;  %v13590_v11 = vld [vmem:[#allocation48 + $0xac8] sm:$0xf0]  ;;  %v13017_v26 = vor.u32 %v16008_v15, %v13014_v46  ;;  %v16368_v46 = vld [vmem:[#allocation48 + $0x1174] sm:$0xf] }
0x11f8   :  { %9406 = vmatpush.bf16.msra.mxu2 %v13689_v30  ;;  %v16278_v30 = vld [vmem:[#allocation48 + $0xea4] sm:$0xf]  ;;  %v13974_v55 = vld [vmem:[#allocation48 + $0xdc8] sm:$0xf0] }
0x11f9   :  { %9382 = vmatpush.bf16.msra.mxu0 %v13257_v28  ;;  %v14094_v28 = vld [vmem:[#allocation48 + $0xeb8] sm:$0xf0]  ;;  %v14166_v58 = vld [vmem:[#allocation48 + $0xf48] sm:$0xf0] }
0x11fa   :  { %9395 = vmatpush.bf16.msra.mxu1 %v13449_v31  ;;  %v13593_v31 = vor.u32 %v16152_v19, %v13590_v11  ;;  %v14097_v2 = vor.u32 %v16278_v30, %v14094_v28  ;;  %v16260_v11 = vld [vmem:[#allocation48 + $0xe14] sm:$0xf]  ;;  %v16218_v28 = vld [vmem:[#allocation48 + $0xcc4] sm:$0xf] }
0x11fb   :  { %9368 = vmatpush.bf16.msrb.mxu3 %v13089_v1  ;;  %v16146_v1 = vld [vmem:[#allocation48 + $0xa84] sm:$0xf]  ;;  %v16308_v30 = vld [vmem:[#allocation48 + $0xf94] sm:$0xf] }
0x11fc   :  { %9407 = vmatpush.bf16.msra.mxu2 %v13665_v38  ;;  %v13926_v38 = vld [vmem:[#allocation48 + $0xd68] sm:$0xf0]  ;;  %v13569_v29 = vor.u32 %v16146_v1, %v13566_v50  ;;  %v16254_v1 = vld [vmem:[#allocation48 + $0xde4] sm:$0xf]  ;;  %v13998_v50 = vld [vmem:[#allocation48 + $0xdf8] sm:$0xf0] }
0x11fd   :  { %9383 = vmatpush.bf16.msra.mxu0 %v13233_v7  ;;  %v14502_v7 = vld [vmem:[#allocation48 + $0x11e8] sm:$0xf0] }
0x11fe   :  { %9396 = vmatpush.bf16.msra.mxu1 %v13425_v44  ;;  %v16272_v44 = vld [vmem:[#allocation48 + $0xe74] sm:$0xf] }
0x11ff   :  { %9369 = vmatpush.bf16.msrb.mxu3 %v13065_v25  ;;  %v13929_v25 = vor.u32 %v16236_v35, %v13926_v38  ;;  %v18623_v35 = vld [vmem:[#allocation49] sm:$0x3f]  ;;  %v13857_v38 = vor.u32 %v16218_v28, %v13854_v53 }
0x1200   :  { %9408 = vmatpush.bf16.msra.mxu2 %v13641_v36  ;;  %v14505_v36 = vor.u32 %v16380_v13, %v14502_v7  ;;  %v14190_v13 = vld [vmem:[#allocation48 + $0xf78] sm:$0xf0] }
0x1201   :  { %9384 = vmatpush.bf16.msra.mxu0 %v13209_v40  ;;  %v14073_v40 = vor.u32 %v16272_v44, %v14070_v5  ;;  %v13830_v44 = vld [vmem:[#allocation48 + $0xca8] sm:$0xf0] }
0x1202   :  { %9397 = vmatpush.bf16.msra.mxu1 %v13401_v56  ;;  %v16266_v56 = vld [vmem:[#allocation48 + $0xe44] sm:$0xf] }
0x1203   :  { %9370 = vmatpush.bf16.msrb.mxu3 %v13041_v6  ;;  %v14238_v6 = vld [vmem:[#allocation48 + $0xfd8] sm:$0xf0]  ;;  %v14049_v15 = vor.u32 %v16266_v56, %v14046_v61  ;;  %v14409_v56 = vor.u32 %v16356_v49, %v14406_v54  ;;  %v16206_v61 = vld [vmem:[#allocation48 + $0xc64] sm:$0xf] }
0x1204   :  { %9409 = vmatpush.bf16.msra.mxu2 %v13617_v60  ;;  %v13878_v60 = vld [vmem:[#allocation48 + $0xd08] sm:$0xf0]  ;;  %v14241_v19 = vor.u32 %v16314_v62, %v14238_v6  ;;  %v16194_v54 = vld [vmem:[#allocation48 + $0xc04] sm:$0xf] }
0x1205   :  { %9385 = vmatpush.bf16.msra.mxu0 %v13185_v0  ;;  %v18617_v9 = vpop.f32.mrf.mxu0  ;;  %v14454_v0 = vld [vmem:[#allocation48 + $0x1188] sm:$0xf0] }
0x1206   :  { %9398 = vmatpush.bf16.msra.mxu1 %v13377_v21  ;;  %v18620_v52 = vpop.f32.mrf.mxu1  ;;  %v14022_v21 = vld [vmem:[#allocation48 + $0xe28] sm:$0xf0] }
0x1207   :  { %9371 = vmatpush.bf16.msrb.mxu3 %v13017_v26  ;;  %v14457_v26 = vor.u32 %v16368_v46, %v14454_v0  ;;  %v14025_v33 = vor.u32 %v16260_v11, %v14022_v21  ;;  %v14169_v46 = vor.u32 %v16296_v22, %v14166_v58  ;;  %v13950_v0 = vld [vmem:[#allocation48 + $0xd98] sm:$0xf0]  ;;  %v16428_v22 = vld [vmem:[#allocation48 + $0x1354] sm:$0xf]  ;;  %v14694_v58 = vld [vmem:[#allocation48 + $0x1368] sm:$0xf0] }
0x1208   :  { %9410 = vmatpush.bf16.msra.mxu2 %v13593_v31  ;;  %9386 = vmatmul.bf16.vlgmr.msra.gmra.mxu0 %v18565_v41  ;;  %v16362_v31 = vld [vmem:[#allocation48 + $0x1144] sm:$0xf]  ;;  %v14142_v11 = vld [vmem:[#allocation48 + $0xf18] sm:$0xf0] }
0x1209   :  { %9430 = vmatpush.bf16.msrb.mxu0 %v14121_v57  ;;  %9399 = vmatmul.bf16.vlgmr.msra.gmra.mxu1 %v18567_v16  ;;  %v13881_v57 = vor.u32 %v16224_v14, %v13878_v60  ;;  %v16350_v14 = vld [vmem:[#allocation48 + $0x10e4] sm:$0xf]  ;;  %v14382_v60 = vld [vmem:[#allocation48 + $0x10f8] sm:$0xf0] }
0x120a   :  { %9443 = vmatpush.bf16.msrb.mxu1 %v14313_v24  ;;  %v14214_v24 = vld [vmem:[#allocation48 + $0xfa8] sm:$0xf0]  ;;  %v14385_v53 = vor.u32 %v16350_v14, %v14382_v60 }
0x120b   :  { %9372 = vmatpush.bf16.msrb.mxu3 %v12993_v43  ;;  %v14217_v18 = vor.u32 %v16308_v30, %v14214_v24  ;;  %v16212_v43 = vld [vmem:[#allocation48 + $0xc94] sm:$0xf]  ;;  %v14886_v24 = vld [vmem:[#allocation48 + $0x14e8] sm:$0xf0] }
0x120c   :  { %9411 = vmatpush.bf16.msra.mxu2 %v13569_v29  ;;  %v14001_v29 = vor.u32 %v16254_v1, %v13998_v50  ;;  %v16476_v30 = vld [vmem:[#allocation48 + $0x14d4] sm:$0xf] }
0x120d   :  { %9431 = vmatpush.bf16.msrb.mxu0 %v14097_v2  ;;  %v16302_v2 = vld [vmem:[#allocation48 + $0xf64] sm:$0xf]  ;;  %v9129_v7 = vpop.f32.mrf.mxu0 }
0x120e   :  { %9444 = vmatpush.bf16.msrb.mxu1 %v14289_v17  ;;  %9373 = vmatmul.bf16.vlgmr.msrb.gmra.mxu3 %v18573_v32  ;;  %v14433_v17 = vor.u32 %v16362_v31, %v14430_v4  ;;  %v9142_v5 = vpop.f32.mrf.mxu1  ;;  %v16200_v31 = vld [vmem:[#allocation48 + $0xc34] sm:$0xf]  ;;  %v13782_v4 = vld [vmem:[#allocation48 + $0xc48] sm:$0xf0]  ;;  %v16470_v7 = vld [vmem:[#allocation48 + $0x14a4] sm:$0xf] }
0x120f   :  { %9417 = vmatpush.bf16.msra.mxu3 %v13929_v25  ;;  %9412 = vmatmul.bf16.vlgmr.msra.gmra.mxu2 %v18576_v23  ;;  %v5253_v25 = vperm.slane %v18623_v35, 0  ;;  %v14862_v5 = vld [vmem:[#allocation48 + $0x14b8] sm:$0xf0] }
0x1210   :  { %9456 = vmatpush.bf16.msrb.mxu2 %v14505_v36  ;;  %v14193_v36 = vor.u32 %v16302_v2, %v14190_v13  ;;  %v14889_v13 = vor.u32 %v16476_v30, %v14886_v24  ;;  %v16566_v24 = vld [vmem:[#allocation48 + $0x17a4] sm:$0xf] }
0x1211   :  { %9432 = vmatpush.bf16.msrb.mxu0 %v14073_v40  ;;  %v13833_v40 = vor.u32 %v16212_v43, %v13830_v44  ;;  %v13785_v44 = vor.u32 %v16200_v31, %v13782_v4  ;;  %v14814_v31 = vld [vmem:[#allocation48 + $0x1458] sm:$0xf0] }
0x1212   :  { %9445 = vmatpush.bf16.msrb.mxu1 %v14265_v20  ;;  %v9114_v20 = vpop.f32.mrf.mxu3  ;;  %v9153_v6 = vpop.f32.mrf.mxu2 }
0x1213   :  { %9418 = vmatpush.bf16.msra.mxu3 %v13905_v3  ;;  %v13806_v3 = vld [vmem:[#allocation48 + $0xc78] sm:$0xf0]  ;;  %v9115_v62 = vadd.f32 %v9114_v20, %v5253_v25  ;;  %v14865_v20 = vor.u32 %v16470_v7, %v14862_v5  ;;  %v16416_v7 = vld [vmem:[#allocation48 + $0x12f4] sm:$0xf] }
0x1214   :  { %9457 = vmatpush.bf16.msrb.mxu2 %v14481_v10  ;;  %v13977_v10 = vor.u32 %v16248_v45, %v13974_v55  ;;  %v15054_v25 = vld [vmem:[#allocation48 + $0x1638] sm:$0xf0]  ;;  %v16338_v45 = vld [vmem:[#allocation48 + $0x1084] sm:$0xf]  ;;  %v16560_v5 = vld [vmem:[#allocation48 + $0x1774] sm:$0xf] }
0x1215   :  { %9433 = vmatpush.bf16.msrb.mxu0 %v14049_v15  ;;  %v16242_v15 = vld [vmem:[#allocation48 + $0xd84] sm:$0xf]  ;;  %v9128_v21 = vadd.f32 %v18617_v9, %v9115_v62  ;;  %v18627_v28 = vpop.f32.mrf.mxu0  ;;  %v14358_v9 = vld [vmem:[#allocation48 + $0x10c8] sm:$0xf0] }
0x1216   :  { %9446 = vmatpush.bf16.msrb.mxu1 %v14241_v19  ;;  %v16290_v19 = vld [vmem:[#allocation48 + $0xf04] sm:$0xf]  ;;  %v18630_v1 = vpop.f32.mrf.mxu1  ;;  %v13953_v50 = vor.u32 %v16242_v15, %v13950_v0  ;;  %v14697_v15 = vor.u32 %v16428_v22, %v14694_v58  ;;  %v15030_v0 = vld [vmem:[#allocation48 + $0x1608] sm:$0xf0]  ;;  %v14622_v58 = vld [vmem:[#allocation48 + $0x12d8] sm:$0xf0] }
0x1217   :  { %9419 = vmatpush.bf16.msra.mxu3 %v13881_v57  ;;  %v13809_v57 = vor.u32 %v16206_v61, %v13806_v3  ;;  %v14145_v2 = vor.u32 %v16290_v19, %v14142_v11  ;;  %v15270_v61 = vld [vmem:[#allocation48 + $0x17e8] sm:$0xf0]  ;;  %v16410_v22 = vld [vmem:[#allocation48 + $0x12c4] sm:$0xf] }
0x1218   :  { %9458 = vmatpush.bf16.msrb.mxu2 %v14457_v26  ;;  %v16524_v26 = vld [vmem:[#allocation48 + $0x1654] sm:$0xf] }
0x1219   :  { %9434 = vmatpush.bf16.msrb.mxu0 %v14025_v33  ;;  %v15078_v33 = vld [vmem:[#allocation48 + $0x1668] sm:$0xf0] }
0x121a   :  { %9447 = vmatpush.bf16.msrb.mxu1 %v14217_v18  ;;  %v9141_v18 = vadd.f32 %v18620_v52, %v9128_v21  ;;  %v15081_v43 = vor.u32 %v16524_v26, %v15078_v33  ;;  %v9116_v49 = vpop.f32.mrf.mxu3  ;;  %v9155_v55 = vpop.f32.mrf.mxu2  ;;  %v16422_v21 = vld [vmem:[#allocation48 + $0x1324] sm:$0xf]  ;;  %v15246_v26 = vld [vmem:[#allocation48 + $0x17b8] sm:$0xf0] }
0x121b   :  { %9420 = vmatpush.bf16.msra.mxu3 %v13857_v38  ;;  %v16344_v38 = vld [vmem:[#allocation48 + $0x10b4] sm:$0xf]  ;;  %v16458_v33 = vld [vmem:[#allocation48 + $0x1444] sm:$0xf] }
0x121c   :  { %9459 = vmatpush.bf16.msrb.mxu2 %v14433_v17  ;;  %v9154_v17 = vadd.f32 %v9153_v6, %v9141_v18  ;;  %v14361_v52 = vor.u32 %v16344_v38, %v14358_v9  ;;  %v16464_v6 = vld [vmem:[#allocation48 + $0x1474] sm:$0xf]  ;;  %v15006_v38 = vld [vmem:[#allocation48 + $0x15d8] sm:$0xf0] }
0x121d   :  { %9435 = vmatpush.bf16.msrb.mxu0 %v14001_v29  ;;  %v16518_v29 = vld [vmem:[#allocation48 + $0x1624] sm:$0xf]  ;;  %v9181_v14 = vpop.f32.mrf.mxu0 }
0x121e   :  { %9448 = vmatpush.bf16.msrb.mxu1 %v14193_v36  ;;  %v13758_v36 = vld [vmem:[#allocation48 + $0xc18] sm:$0xf0]  ;;  %v15057_v3 = vor.u32 %v16518_v29, %v15054_v25  ;;  %v9194_v19 = vpop.f32.mrf.mxu1  ;;  %v15222_v29 = vld [vmem:[#allocation48 + $0x1788] sm:$0xf0] }
0x121f   :  { %9421 = vmatpush.bf16.msra.mxu3 %v13833_v40  ;;  %v14334_v40 = vld [vmem:[#allocation48 + $0x1098] sm:$0xf0]  ;;  %v13761_v62 = vor.u32 %v16194_v54, %v13758_v36  ;;  %v14790_v54 = vld [vmem:[#allocation48 + $0x1428] sm:$0xf0]  ;;  %v16500_v36 = vld [vmem:[#allocation48 + $0x1594] sm:$0xf] }
0x1220   :  { %9460 = vmatpush.bf16.msrb.mxu2 %v14409_v56  ;;  %v16572_v56 = vld [vmem:[#allocation48 + $0x17d4] sm:$0xf]  ;;  %v14337_v60 = vor.u32 %v16338_v45, %v14334_v40  ;;  %v14982_v45 = vld [vmem:[#allocation48 + $0x15a8] sm:$0xf0]  ;;  %v15225_v40 = vor.u32 %v16560_v5, %v15222_v29  ;;  %v14766_v14 = vld [vmem:[#allocation48 + $0x13f8] sm:$0xf0] }
0x1221   :  { %9436 = vmatpush.bf16.msrb.mxu0 %v13977_v10  ;;  %v14838_v10 = vld [vmem:[#allocation48 + $0x1488] sm:$0xf0]  ;;  %v15273_v11 = vor.u32 %v16572_v56, %v15270_v61  ;;  %v16554_v56 = vld [vmem:[#allocation48 + $0x1744] sm:$0xf]  ;;  %v15198_v61 = vld [vmem:[#allocation48 + $0x1758] sm:$0xf0] }
0x1222   :  { %9449 = vmatpush.bf16.msrb.mxu1 %v14169_v46  ;;  %v16512_v46 = vld [vmem:[#allocation48 + $0x15f4] sm:$0xf]  ;;  %v14841_v30 = vor.u32 %v16464_v6, %v14838_v10  ;;  %v9166_v4 = vpop.f32.mrf.mxu3  ;;  %v14985_v6 = vor.u32 %v16500_v36, %v14982_v45  ;;  %v16446_v10 = vld [vmem:[#allocation48 + $0x13e4] sm:$0xf]  ;;  %v15201_v19 = vor.u32 %v16554_v56, %v15198_v61  ;;  %v15904_v36 = vld [vmem:[#allocation48 + $0x2ec] sm:$0xf0] }
0x1223   :  { %9422 = vmatpush.bf16.msra.mxu3 %v13809_v57  ;;  %v14670_v57 = vld [vmem:[#allocation48 + $0x1338] sm:$0xf0]  ;;  %v9167_v9 = vadd.f32 %v9166_v4, %v9154_v17  ;;  %v16488_v4 = vld [vmem:[#allocation48 + $0x1534] sm:$0xf]  ;;  %v12780_v45 = vld [vmem:[#allocation48 + $0x458] sm:$0xf] }
0x1224   :  { %9461 = vmatpush.bf16.msrb.mxu2 %v14385_v53  ;;  %v15033_v53 = vor.u32 %v16512_v46, %v15030_v0  ;;  %v14673_v18 = vor.u32 %v16422_v21, %v14670_v57  ;;  %v14958_v46 = vld [vmem:[#allocation48 + $0x1578] sm:$0xf0]  ;;  %v14598_v21 = vld [vmem:[#allocation48 + $0x12a8] sm:$0xf0]  ;;  %v14769_v57 = vor.u32 %v16446_v10, %v14766_v14  ;;  %v16536_v61 = vld [vmem:[#allocation48 + $0x16b4] sm:$0xf] }
0x1225   :  { %9437 = vmatpush.bf16.msrb.mxu0 %v13953_v50  ;;  %v16506_v50 = vld [vmem:[#allocation48 + $0x15c4] sm:$0xf]  ;;  %v9180_v25 = vadd.f32 %v18627_v28, %v9167_v9  ;;  %v14574_v9 = vld [vmem:[#allocation48 + $0x1278] sm:$0xf0] }
0x1226   :  { %9450 = vmatpush.bf16.msrb.mxu1 %v14145_v2  ;;  %v9205_v2 = vpop.f32.mrf.mxu2  ;;  %v15009_v49 = vor.u32 %v16506_v50, %v15006_v38  ;;  %v16398_v38 = vld [vmem:[#allocation48 + $0x1264] sm:$0xf] }
0x1227   :  { %9423 = vmatpush.bf16.msra.mxu3 %v13785_v44  ;;  %v14817_v44 = vor.u32 %v16458_v33, %v14814_v31  ;;  %v9193_v55 = vadd.f32 %v18630_v1, %v9180_v25  ;;  %v14625_v1 = vor.u32 %v16410_v22, %v14622_v58  ;;  %v14742_v33 = vld [vmem:[#allocation48 + $0x13c8] sm:$0xf0]  ;;  %v14718_v25 = vld [vmem:[#allocation48 + $0x1398] sm:$0xf0]  ;;  %v16392_v22 = vld [vmem:[#allocation48 + $0x1234] sm:$0xf] }
0x1228   :  { %9462 = vmatpush.bf16.msrb.mxu2 %v14361_v52  ;;  %9438 = vmatmul.bf16.vlgmr.msrb.gmra.mxu0 %v18583_v63  ;;  %v16452_v52 = vld [vmem:[#allocation48 + $0x1414] sm:$0xf]  ;;  %v14550_v58 = vld [vmem:[#allocation48 + $0x1248] sm:$0xf0] }
0x1229   :  { %9482 = vmatpush.bf16.msra.mxu0 %v14889_v13  ;;  %9451 = vmatmul.bf16.vlgmr.msrb.gmra.mxu1 %v18585_v37  ;;  %v15249_v13 = vor.u32 %v16566_v24, %v15246_v26  ;;  %v14793_v28 = vor.u32 %v16452_v52, %v14790_v54  ;;  %v15174_v24 = vld [vmem:[#allocation48 + $0x1728] sm:$0xf0]  ;;  %v14910_v52 = vld [vmem:[#allocation48 + $0x1518] sm:$0xf0]  ;;  %v14577_v54 = vor.u32 %v16398_v38, %v14574_v9  ;;  %v16000_v38 = vld [vmem:[#allocation48 + $0x5ec] sm:$0xf0] }
0x122a   :  { %9495 = vmatpush.bf16.msra.mxu1 %v15081_v43  ;;  %v14646_v43 = vld [vmem:[#allocation48 + $0x1308] sm:$0xf0] }
0x122b   :  { %9424 = vmatpush.bf16.msra.mxu3 %v13761_v62  ;;  %v14649_v17 = vor.u32 %v16416_v7, %v14646_v43  ;;  %v18640_v62 = vpop.f32.mrf.mxu1  ;;  %v16542_v7 = vld [vmem:[#allocation48 + $0x16e4] sm:$0xf]  ;;  %v15150_v43 = vld [vmem:[#allocation48 + $0x16f8] sm:$0xf0] }
0x122c   :  { %9463 = vmatpush.bf16.msrb.mxu2 %v14337_v60  ;;  %v9168_v60 = vpop.f32.mrf.mxu3 }
0x122d   :  { %9483 = vmatpush.bf16.msra.mxu0 %v14865_v20  ;;  %v18638_v20 = vpop.f32.mrf.mxu0 }
0x122e   :  { %9496 = vmatpush.bf16.msra.mxu1 %v15057_v3  ;;  %9425 = vmatmul.bf16.vlgmr.msra.gmra.mxu3 %v18589_v27  ;;  %v9206_v3 = vadd.f32 %v9205_v2, %v9193_v55  ;;  %v9207_v0 = vpop.f32.mrf.mxu2  ;;  %v15153_v55 = vor.u32 %v16542_v7, %v15150_v43 }
0x122f   :  { %9469 = vmatpush.bf16.msrb.mxu3 %v14697_v15  ;;  %9464 = vmatmul.bf16.vlgmr.msrb.gmra.mxu2 %v18591_v48  ;;  %v16494_v15 = vld [vmem:[#allocation48 + $0x1564] sm:$0xf]  ;;  %v14553_v0 = vor.u32 %v16392_v22, %v14550_v58  ;;  %v15886_v22 = vld [vmem:[#allocation48 + $0x25c] sm:$0xf0] }
0x1230   :  { %9508 = vmatpush.bf16.msra.mxu2 %v15273_v11  ;;  %v16404_v11 = vld [vmem:[#allocation48 + $0x1294] sm:$0xf]  ;;  %v14961_v26 = vor.u32 %v16494_v15, %v14958_v46  ;;  %v12564_v15 = vld [vmem:[#allocation48 + $0x2a8] sm:$0xf] }
0x1231   :  { %9484 = vmatpush.bf16.msra.mxu0 %v14841_v30  ;;  %v16548_v30 = vld [vmem:[#allocation48 + $0x1714] sm:$0xf]  ;;  %v14601_v31 = vor.u32 %v16404_v11, %v14598_v21  ;;  %v12756_v11 = vld [vmem:[#allocation48 + $0x428] sm:$0xf]  ;;  %v15946_v21 = vld [vmem:[#allocation48 + $0x43c] sm:$0xf0] }
0x1232   :  { %9497 = vmatpush.bf16.msra.mxu1 %v15033_v53  ;;  %v16440_v53 = vld [vmem:[#allocation48 + $0x13b4] sm:$0xf]  ;;  %v15177_v50 = vor.u32 %v16548_v30, %v15174_v24  ;;  %v16386_v24 = vld [vmem:[#allocation48 + $0x1204] sm:$0xf]  ;;  %v12757_v9 = vor.u32 %v15946_v21, %v12756_v11  ;;  %v12684_v11 = vld [vmem:[#allocation48 + $0x398] sm:$0xf] }
0x1233   :  { %9470 = vmatpush.bf16.msrb.mxu3 %v14673_v18  ;;  %v14934_v18 = vld [vmem:[#allocation48 + $0x1548] sm:$0xf0]  ;;  %v9246_v5 = vpop.f32.mrf.mxu1  ;;  %v15928_v21 = vld [vmem:[#allocation48 + $0x3ac] sm:$0xf0] }
0x1234   :  { %9509 = vmatpush.bf16.msra.mxu2 %v15249_v13  ;;  %v14745_v13 = vor.u32 %v16440_v53, %v14742_v33  ;;  %v14937_v29 = vor.u32 %v16488_v4, %v14934_v18  ;;  %v16530_v53 = vld [vmem:[#allocation48 + $0x1684] sm:$0xf]  ;;  %v12396_v33 = vld [vmem:[#allocation48 + $0x158] sm:$0xf] }
0x1235   :  { %9485 = vmatpush.bf16.msra.mxu0 %v14817_v44  ;;  %v9233_v2 = vpop.f32.mrf.mxu0  ;;  %v16434_v44 = vld [vmem:[#allocation48 + $0x1384] sm:$0xf]  ;;  %v12732_v5 = vld [vmem:[#allocation48 + $0x3f8] sm:$0xf] }
0x1236   :  { %9498 = vmatpush.bf16.msra.mxu1 %v15009_v49  ;;  %v16482_v49 = vld [vmem:[#allocation48 + $0x1504] sm:$0xf]  ;;  %v14721_v56 = vor.u32 %v16434_v44, %v14718_v25  ;;  %v9257_v14 = vpop.f32.mrf.mxu2  ;;  %v12540_v2 = vld [vmem:[#allocation48 + $0x278] sm:$0xf] }
0x1237   :  { %9471 = vmatpush.bf16.msrb.mxu3 %v14649_v17  ;;  %v12588_v17 = vld [vmem:[#allocation48 + $0x2d8] sm:$0xf]  ;;  %v14913_v60 = vor.u32 %v16482_v49, %v14910_v52  ;;  %v12372_v49 = vld [vmem:[#allocation48 + $0x128] sm:$0xf]  ;;  %v15850_v52 = vld [vmem:[#allocation48 + $0x13c] sm:$0xf0] }
0x1238   :  { %9510 = vmatpush.bf16.msra.mxu2 %v15225_v40  ;;  %v15952_v40 = vld [vmem:[#allocation48 + $0x46c] sm:$0xf0]  ;;  %v12373_v58 = vor.u32 %v15850_v52, %v12372_v49 }
0x1239   :  { %9486 = vmatpush.bf16.msra.mxu0 %v14793_v28  ;;  %v9218_v28 = vpop.f32.mrf.mxu3  ;;  %v12781_v46 = vor.u32 %v15952_v40, %v12780_v45  ;;  %v15994_v45 = vld [vmem:[#allocation48 + $0x5bc] sm:$0xf0]  ;;  %v12516_v40 = vld [vmem:[#allocation48 + $0x248] sm:$0xf]  ;;  %v15868_v49 = vld [vmem:[#allocation48 + $0x1cc] sm:$0xf0] }
0x123a   :  { %9499 = vmatpush.bf16.msra.mxu1 %v14985_v6  ;;  %v15126_v6 = vld [vmem:[#allocation48 + $0x16c8] sm:$0xf0]  ;;  %v9219_v10 = vadd.f32 %v9218_v28, %v9206_v3  ;;  %v15102_v3 = vld [vmem:[#allocation48 + $0x1698] sm:$0xf0]  ;;  %v12708_v28 = vld [vmem:[#allocation48 + $0x3c8] sm:$0xf] }
0x123b   :  { %9472 = vmatpush.bf16.msrb.mxu3 %v14625_v1  ;;  %v12589_v1 = vor.u32 %v15904_v36, %v12588_v17  ;;  %v15129_v30 = vor.u32 %v16536_v61, %v15126_v6  ;;  %v15105_v43 = vor.u32 %v16530_v53, %v15102_v3  ;;  %v12948_v36 = vld [vmem:[#allocation48 + $0x5a8] sm:$0xf]  ;;  %v12348_v6 = vld [vmem:[#allocation48 + $0xf8] sm:$0xf] }
0x123c   :  { %9511 = vmatpush.bf16.msra.mxu2 %v15201_v19  ;;  %v15898_v19 = vld [vmem:[#allocation48 + $0x2bc] sm:$0xf0]  ;;  %v12949_v61 = vor.u32 %v15994_v45, %v12948_v36  ;;  %v12900_v3 = vld [vmem:[#allocation48 + $0x548] sm:$0xf] }
0x123d   :  { %9487 = vmatpush.bf16.msra.mxu0 %v14769_v57  ;;  %v9232_v57 = vadd.f32 %v18638_v20, %v9219_v10  ;;  %v12565_v18 = vor.u32 %v15898_v19, %v12564_v15  ;;  %v15844_v10 = vld [vmem:[#allocation48 + $0x10c] sm:$0xf0]  ;;  %v12276_v45 = vld [vmem:[#allocation48 + $0x68] sm:$0xf] }
0x123e   :  { %9500 = vmatpush.bf16.msra.mxu1 %v14961_v26  ;;  %v14526_v26 = vld [vmem:[#allocation48 + $0x1218] sm:$0xf0]  ;;  %v12349_v19 = vor.u32 %v15844_v10, %v12348_v6  ;;  %v15862_v10 = vld [vmem:[#allocation48 + $0x19c] sm:$0xf0] }
0x123f   :  { %9473 = vmatpush.bf16.msrb.mxu3 %v14601_v31  ;;  %v15856_v31 = vld [vmem:[#allocation48 + $0x16c] sm:$0xf0]  ;;  %v9245_v4 = vadd.f32 %v18640_v62, %v9232_v57  ;;  %v14529_v20 = vor.u32 %v16386_v24, %v14526_v26  ;;  %v15838_v24 = vld [vmem:[#allocation48 + $0xdc] sm:$0xf0] }
0x1240   :  { %9512 = vmatpush.bf16.msra.mxu2 %v15177_v50  ;;  %v12972_v50 = vld [vmem:[#allocation48 + $0x5d8] sm:$0xf]  ;;  %v12397_v44 = vor.u32 %v15856_v31, %v12396_v33  ;;  %v15940_v62 = vld [vmem:[#allocation48 + $0x40c] sm:$0xf0]  ;;  %v15982_v33 = vld [vmem:[#allocation48 + $0x55c] sm:$0xf0] }
0x1241   :  { %9488 = vmatpush.bf16.msra.mxu0 %v14745_v13  ;;  %v15892_v13 = vld [vmem:[#allocation48 + $0x28c] sm:$0xf0]  ;;  %v18644_v7 = vadd.f32 %v9257_v14, %v9245_v4  ;;  %v12973_v25 = vor.u32 %v16000_v38, %v12972_v50  ;;  %v12517_v14 = vor.u32 %v15886_v22, %v12516_v40  ;;  %v12685_v4 = vor.u32 %v15928_v21, %v12684_v11  ;;  %v15874_v50 = vld [vmem:[#allocation48 + $0x1fc] sm:$0xf0]  ;;  %v12252_v21 = vld [vmem:[#allocation48 + $0x38] sm:$0xf] }
0x1242   :  { %9501 = vmatpush.bf16.msra.mxu1 %v14937_v29  ;;  %v9220_v29 = vpop.f32.mrf.mxu3  ;;  %v12541_v17 = vor.u32 %v15892_v13, %v12540_v2  ;;  %v12901_v2 = vor.u32 %v15982_v33, %v12900_v3  ;;  %v12300_v13 = vld [vmem:[#allocation48 + $0x98] sm:$0xf]  ;;  %v16144_v11 = vld [vmem:[#allocation48 + $0xa6c] sm:$0xf0] }
0x1243   :  { %9474 = vmatpush.bf16.msrb.mxu3 %v14577_v54  ;;  %v9259_v54 = vpop.f32.mrf.mxu2  ;;  %v15964_v3 = vld [vmem:[#allocation48 + $0x4cc] sm:$0xf0] }
0x1244   :  { %9513 = vmatpush.bf16.msra.mxu2 %v15153_v55  ;;  %v12733_v55 = vor.u32 %v15940_v62, %v12732_v5  ;;  %v12876_v5 = vld [vmem:[#allocation48 + $0x518] sm:$0xf]  ;;  %v15976_v62 = vld [vmem:[#allocation48 + $0x52c] sm:$0xf0] }
0x1245   :  { %9489 = vmatpush.bf16.msra.mxu0 %v14721_v56  ;;  %v15934_v56 = vld [vmem:[#allocation48 + $0x3dc] sm:$0xf0]  ;;  %v12636_v54 = vld [vmem:[#allocation48 + $0x338] sm:$0xf]  ;;  %v12877_v36 = vor.u32 %v15976_v62, %v12876_v5  ;;  %v12228_v62 = vld [vmem:[#allocation48 + $0x8] sm:$0xf] }
0x1246   :  { %9502 = vmatpush.bf16.msra.mxu1 %v14913_v60  ;;  %v12924_v60 = vld [vmem:[#allocation48 + $0x578] sm:$0xf]  ;;  %v12709_v15 = vor.u32 %v15934_v56, %v12708_v28  ;;  %v15970_v28 = vld [vmem:[#allocation48 + $0x4fc] sm:$0xf0]  ;;  %v12420_v56 = vld [vmem:[#allocation48 + $0x188] sm:$0xf] }
0x1247   :  { %9475 = vmatpush.bf16.msrb.mxu3 %v14553_v0  ;;  %v15880_v0 = vld [vmem:[#allocation48 + $0x22c] sm:$0xf0]  ;;  %v18650_v26 = vpop.f32.mrf.mxu0 }
0x1248   :  { %9514 = vmatpush.bf16.msra.mxu2 %v15129_v30  ;;  %9490 = vmatmul.bf16.vlgmr.msra.gmra.mxu0 %v18599_v12  ;;  %v12324_v30 = vld [vmem:[#allocation48 + $0xc8] sm:$0xf]  ;;  %v18652_v31 = vpop.f32.mrf.mxu1 }
0x1249   :  { %9534 = vmatpush.bf16.msrb.mxu0 %v12589_v1  ;;  %9503 = vmatmul.bf16.vlgmr.msra.gmra.mxu1 %v18601_v34  ;;  %v15988_v1 = vld [vmem:[#allocation48 + $0x58c] sm:$0xf0]  ;;  %v12325_v38 = vor.u32 %v15838_v24, %v12324_v30  ;;  %v12421_v24 = vor.u32 %v15862_v10, %v12420_v56 }
0x124a   :  { %9547 = vmatpush.bf16.msrb.mxu1 %v12781_v46  ;;  %v12492_v46 = vld [vmem:[#allocation48 + $0x218] sm:$0xf]  ;;  %v12925_v57 = vor.u32 %v15988_v1, %v12924_v60  ;;  %v15910_v60 = vld [vmem:[#allocation48 + $0x31c] sm:$0xf0] }
0x124b   :  { %9476 = vmatpush.bf16.msrb.mxu3 %v14529_v20  ;;  %v12493_v53 = vor.u32 %v15880_v0, %v12492_v46  ;;  %v15922_v20 = vld [vmem:[#allocation48 + $0x37c] sm:$0xf0]  ;;  %v16096_v46 = vld [vmem:[#allocation48 + $0x8ec] sm:$0xf0]  ;;  %v13548_v0 = vld [vmem:[#allocation48 + $0xa58] sm:$0xf] }
0x124c   :  { %9515 = vmatpush.bf16.msra.mxu2 %v15105_v43  ;;  %v15832_v43 = vld [vmem:[#allocation48 + $0xac] sm:$0xf0] }
0x124d   :  { %9535 = vmatpush.bf16.msrb.mxu0 %v12565_v18  ;;  %v12468_v18 = vld [vmem:[#allocation48 + $0x1e8] sm:$0xf]  ;;  %v12301_v52 = vor.u32 %v15832_v43, %v12300_v13  ;;  %v16138_v43 = vld [vmem:[#allocation48 + $0xa3c] sm:$0xf0] }
0x124e   :  { %9548 = vmatpush.bf16.msrb.mxu1 %v12757_v9  ;;  %9477 = vmatmul.bf16.vlgmr.msrb.gmra.mxu3 %v18605_v59  ;;  %v12660_v9 = vld [vmem:[#allocation48 + $0x368] sm:$0xf] }
0x124f   :  { %9521 = vmatpush.bf16.msra.mxu3 %v12397_v44  ;;  %9516 = vmatmul.bf16.vlgmr.msra.gmra.mxu2 %v18607_v8  ;;  %v12469_v44 = vor.u32 %v15874_v50, %v12468_v18  ;;  %v12661_v29 = vor.u32 %v15922_v20, %v12660_v9  ;;  %v9285_v40 = vpop.f32.mrf.mxu0  ;;  %v13549_v9 = vor.u32 %v16144_v11, %v13548_v0  ;;  %v13524_v13 = vld [vmem:[#allocation48 + $0xa28] sm:$0xf]  ;;  %v16186_v0 = vld [vmem:[#allocation48 + $0xbbc] sm:$0xf0] }
0x1250   :  { %9560 = vmatpush.bf16.msrb.mxu2 %v12973_v25  ;;  %v12444_v25 = vld [vmem:[#allocation48 + $0x1b8] sm:$0xf]  ;;  %v13284_v11 = vld [vmem:[#allocation48 + $0x848] sm:$0xf] }
0x1251   :  { %9536 = vmatpush.bf16.msrb.mxu0 %v12541_v17  ;;  %v15916_v17 = vld [vmem:[#allocation48 + $0x34c] sm:$0xf0]  ;;  %v12445_v22 = vor.u32 %v15868_v49, %v12444_v25  ;;  %v12804_v25 = vld [vmem:[#allocation48 + $0x488] sm:$0xf]  ;;  %v13164_v49 = vld [vmem:[#allocation48 + $0x758] sm:$0xf] }
0x1252   :  { %9549 = vmatpush.bf16.msrb.mxu1 %v12733_v55  ;;  %v15826_v55 = vld [vmem:[#allocation48 + $0x7c] sm:$0xf0]  ;;  %v12637_v6 = vor.u32 %v15916_v17, %v12636_v54  ;;  %v13308_v40 = vld [vmem:[#allocation48 + $0x878] sm:$0xf] }
0x1253   :  { %9522 = vmatpush.bf16.msra.mxu3 %v12373_v58  ;;  %v12852_v58 = vld [vmem:[#allocation48 + $0x4e8] sm:$0xf]  ;;  %v12277_v1 = vor.u32 %v15826_v55, %v12276_v45  ;;  %v9270_v30 = vpop.f32.mrf.mxu3  ;;  %v16192_v45 = vld [vmem:[#allocation48 + $0xbec] sm:$0xf0]  ;;  %v13525_v55 = vor.u32 %v16138_v43, %v13524_v13  ;;  %v13452_v13 = vld [vmem:[#allocation48 + $0x998] sm:$0xf] }
0x1254   :  { %9561 = vmatpush.bf16.msrb.mxu2 %v12949_v61  ;;  %v9298_v61 = vpop.f32.mrf.mxu1  ;;  %v9271_v33 = vadd.f32 %v9270_v30, %v18644_v7  ;;  %v15958_v7 = vld [vmem:[#allocation48 + $0x49c] sm:$0xf0]  ;;  %v13476_v30 = vld [vmem:[#allocation48 + $0x9c8] sm:$0xf]  ;;  %v16120_v43 = vld [vmem:[#allocation48 + $0x9ac] sm:$0xf0] }
0x1255   :  { %9537 = vmatpush.bf16.msrb.mxu0 %v12517_v14  ;;  %v12612_v14 = vld [vmem:[#allocation48 + $0x308] sm:$0xf]  ;;  %v13500_v61 = vld [vmem:[#allocation48 + $0x9f8] sm:$0xf] }
0x1256   :  { %9550 = vmatpush.bf16.msrb.mxu1 %v12709_v15  ;;  %v13356_v15 = vld [vmem:[#allocation48 + $0x8d8] sm:$0xf]  ;;  %v12613_v18 = vor.u32 %v15910_v60, %v12612_v14  ;;  %v13140_v14 = vld [vmem:[#allocation48 + $0x728] sm:$0xf]  ;;  %v16042_v60 = vld [vmem:[#allocation48 + $0x73c] sm:$0xf0] }
0x1257   :  { %9523 = vmatpush.bf16.msra.mxu3 %v12349_v19  ;;  %v12853_v19 = vor.u32 %v15970_v28, %v12852_v58  ;;  %v13357_v50 = vor.u32 %v16096_v46, %v13356_v15  ;;  %v12805_v28 = vor.u32 %v15958_v7, %v12804_v25  ;;  %v13716_v46 = vld [vmem:[#allocation48 + $0xba8] sm:$0xf] }
0x1258   :  { %9562 = vmatpush.bf16.msrb.mxu2 %v12925_v57  ;;  %v15820_v57 = vld [vmem:[#allocation48 + $0x4c] sm:$0xf0] }
0x1259   :  { %9538 = vmatpush.bf16.msrb.mxu0 %v12493_v53  ;;  %v12828_v53 = vld [vmem:[#allocation48 + $0x4b8] sm:$0xf]  ;;  %v12253_v20 = vor.u32 %v15820_v57, %v12252_v21  ;;  %v16078_v21 = vld [vmem:[#allocation48 + $0x85c] sm:$0xf0]  ;;  %v13141_v57 = vor.u32 %v16042_v60, %v13140_v14  ;;  %v16060_v14 = vld [vmem:[#allocation48 + $0x7cc] sm:$0xf0] }
0x125a   :  { %9551 = vmatpush.bf16.msrb.mxu1 %v12685_v4  ;;  %v9309_v4 = vpop.f32.mrf.mxu2  ;;  %v12829_v5 = vor.u32 %v15964_v3, %v12828_v53  ;;  %v13717_v53 = vor.u32 %v16186_v0, %v13716_v46  ;;  %v13116_v3 = vld [vmem:[#allocation48 + $0x6f8] sm:$0xf] }
0x125b   :  { %9524 = vmatpush.bf16.msra.mxu3 %v12325_v38  ;;  %v13332_v38 = vld [vmem:[#allocation48 + $0x8a8] sm:$0xf] }
0x125c   :  { %9563 = vmatpush.bf16.msrb.mxu2 %v12901_v2  ;;  %v16090_v2 = vld [vmem:[#allocation48 + $0x8bc] sm:$0xf0] }
0x125d   :  { %9539 = vmatpush.bf16.msrb.mxu0 %v12469_v44  ;;  %v9284_v44 = vadd.f32 %v18650_v26, %v9271_v33  ;;  %v13333_v17 = vor.u32 %v16090_v2, %v13332_v38  ;;  %v16036_v33 = vld [vmem:[#allocation48 + $0x70c] sm:$0xf0] }
0x125e   :  { %9552 = vmatpush.bf16.msrb.mxu1 %v12661_v29  ;;  %v15814_v29 = vld [vmem:[#allocation48 + $0x1c] sm:$0xf0]  ;;  %v13117_v2 = vor.u32 %v16036_v33, %v13116_v3  ;;  %v13188_v3 = vld [vmem:[#allocation48 + $0x788] sm:$0xf] }
0x125f   :  { %9525 = vmatpush.bf16.msra.mxu3 %v12301_v52  ;;  %v16048_v52 = vld [vmem:[#allocation48 + $0x76c] sm:$0xf0]  ;;  %v9297_v54 = vadd.f32 %v18652_v31, %v9284_v44  ;;  %v12229_v26 = vor.u32 %v15814_v29, %v12228_v62  ;;  %v13092_v62 = vld [vmem:[#allocation48 + $0x6c8] sm:$0xf]  ;;  %v16030_v29 = vld [vmem:[#allocation48 + $0x6dc] sm:$0xf0] }
0x1260   :  { %9564 = vmatpush.bf16.msrb.mxu2 %v12877_v36  ;;  %v13740_v36 = vld [vmem:[#allocation48 + $0xbd8] sm:$0xf]  ;;  %v13165_v56 = vor.u32 %v16048_v52, %v13164_v49  ;;  %v16132_v31 = vld [vmem:[#allocation48 + $0xa0c] sm:$0xf0]  ;;  %v13668_v49 = vld [vmem:[#allocation48 + $0xb48] sm:$0xf] }
0x1261   :  { %9540 = vmatpush.bf16.msrb.mxu0 %v12445_v22  ;;  %v16084_v22 = vld [vmem:[#allocation48 + $0x88c] sm:$0xf0]  ;;  %v18657_v58 = vadd.f32 %v9309_v4, %v9297_v54  ;;  %v13741_v10 = vor.u32 %v16192_v45, %v13740_v36  ;;  %v13285_v4 = vor.u32 %v16078_v21, %v13284_v11  ;;  %v16174_v52 = vld [vmem:[#allocation48 + $0xb5c] sm:$0xf0]  ;;  %v13453_v54 = vor.u32 %v16120_v43, %v13452_v13  ;;  %v13044_v11 = vld [vmem:[#allocation48 + $0x668] sm:$0xf] }
0x1262   :  { %9553 = vmatpush.bf16.msrb.mxu1 %v12637_v6  ;;  %v9272_v6 = vpop.f32.mrf.mxu3  ;;  %v13309_v15 = vor.u32 %v16084_v22, %v13308_v40  ;;  %v16066_v36 = vld [vmem:[#allocation48 + $0x7fc] sm:$0xf0]  ;;  %v13093_v45 = vor.u32 %v16030_v29, %v13092_v62  ;;  %v13669_v40 = vor.u32 %v16174_v52, %v13668_v49  ;;  %v13068_v22 = vld [vmem:[#allocation48 + $0x698] sm:$0xf]  ;;  %v16336_v43 = vld [vmem:[#allocation48 + $0x106c] sm:$0xf0] }
0x1263   :  { %9526 = vmatpush.bf16.msra.mxu3 %v12277_v1  ;;  %v9311_v1 = vpop.f32.mrf.mxu2  ;;  %v16018_v21 = vld [vmem:[#allocation48 + $0x67c] sm:$0xf0]  ;;  %v16012_v62 = vld [vmem:[#allocation48 + $0x64c] sm:$0xf0]  ;;  %v13596_v52 = vld [vmem:[#allocation48 + $0xab8] sm:$0xf] }
0x1264   :  { %9565 = vmatpush.bf16.msrb.mxu2 %v12853_v19  ;;  %v13501_v19 = vor.u32 %v16132_v31, %v13500_v61  ;;  %v13644_v61 = vld [vmem:[#allocation48 + $0xb18] sm:$0xf]  ;;  %v16168_v31 = vld [vmem:[#allocation48 + $0xb2c] sm:$0xf0] }
0x1265   :  { %9541 = vmatpush.bf16.msrb.mxu0 %v12421_v24  ;;  %v16126_v24 = vld [vmem:[#allocation48 + $0x9dc] sm:$0xf0]  ;;  %v18663_v44 = vpop.f32.mrf.mxu0  ;;  %v13404_v1 = vld [vmem:[#allocation48 + $0x938] sm:$0xf]  ;;  %v13645_v0 = vor.u32 %v16168_v31, %v13644_v61  ;;  %v12996_v31 = vld [vmem:[#allocation48 + $0x608] sm:$0xf] }
0x1266   :  { %9554 = vmatpush.bf16.msrb.mxu1 %v12613_v18  ;;  %v13692_v18 = vld [vmem:[#allocation48 + $0xb78] sm:$0xf]  ;;  %v13477_v38 = vor.u32 %v16126_v24, %v13476_v30  ;;  %v18665_v25 = vpop.f32.mrf.mxu1  ;;  %v13620_v24 = vld [vmem:[#allocation48 + $0xae8] sm:$0xf] }
0x1267   :  { %9527 = vmatpush.bf16.msra.mxu3 %v12253_v20  ;;  %v16072_v20 = vld [vmem:[#allocation48 + $0x82c] sm:$0xf0] }
0x1268   :  { %9566 = vmatpush.bf16.msrb.mxu2 %v12829_v5  ;;  %9542 = vmatmul.bf16.vlgmr.msrb.gmra.mxu0 %v18549_v39 }
0x1269   :  { %9586 = vmatpush.bf16.msra.mxu0 %v13357_v50  ;;  %9555 = vmatmul.bf16.vlgmr.msrb.gmra.mxu1 %v18551_v42  ;;  %v16180_v50 = vld [vmem:[#allocation48 + $0xb8c] sm:$0xf0] }
0x126a   :  { %9599 = vmatpush.bf16.msra.mxu1 %v13549_v9  ;;  %v13260_v9 = vld [vmem:[#allocation48 + $0x818] sm:$0xf]  ;;  %v13693_v5 = vor.u32 %v16180_v50, %v13692_v18  ;;  %v13380_v18 = vld [vmem:[#allocation48 + $0x908] sm:$0xf]  ;;  %v16102_v50 = vld [vmem:[#allocation48 + $0x91c] sm:$0xf0] }
0x126b   :  { %9528 = vmatpush.bf16.msra.mxu3 %v12229_v26  ;;  %v13261_v7 = vor.u32 %v16072_v20, %v13260_v9  ;;  %v16114_v26 = vld [vmem:[#allocation48 + $0x97c] sm:$0xf0]  ;;  %v14124_v9 = vld [vmem:[#allocation48 + $0xed8] sm:$0xf]  ;;  %v16288_v20 = vld [vmem:[#allocation48 + $0xeec] sm:$0xf0] }
0x126c   :  { %9567 = vmatpush.bf16.msrb.mxu2 %v12805_v28  ;;  %v16024_v28 = vld [vmem:[#allocation48 + $0x6ac] sm:$0xf0] }
0x126d   :  { %9587 = vmatpush.bf16.msra.mxu0 %v13333_v17  ;;  %v13236_v17 = vld [vmem:[#allocation48 + $0x7e8] sm:$0xf]  ;;  %v13069_v60 = vor.u32 %v16024_v28, %v13068_v22  ;;  %v9337_v46 = vpop.f32.mrf.mxu0  ;;  %v16282_v22 = vld [vmem:[#allocation48 + $0xebc] sm:$0xf0] }
0x126e   :  { %9600 = vmatpush.bf16.msra.mxu1 %v13525_v55  ;;  %9529 = vmatmul.bf16.vlgmr.msra.gmra.mxu3 %v18555_v51  ;;  %v13428_v55 = vld [vmem:[#allocation48 + $0x968] sm:$0xf]  ;;  %v14508_v46 = vld [vmem:[#allocation48 + $0x11d8] sm:$0xf] }
0x126f   :  { %9573 = vmatpush.bf16.msrb.mxu3 %v13165_v56  ;;  %9568 = vmatmul.bf16.vlgmr.msrb.gmra.mxu2 %v18557_v47  ;;  %v13237_v56 = vor.u32 %v16066_v36, %v13236_v17  ;;  %v13429_v6 = vor.u32 %v16114_v26, %v13428_v55  ;;  %v13381_v17 = vor.u32 %v16102_v50, %v13380_v18  ;;  %v14292_v28 = vld [vmem:[#allocation48 + $0x1028] sm:$0xf] }
0x1270   :  { %9612 = vmatpush.bf16.msra.mxu2 %v13741_v10  ;;  %v13212_v10 = vld [vmem:[#allocation48 + $0x7b8] sm:$0xf]  ;;  %v14125_v36 = vor.u32 %v16288_v20, %v14124_v9  ;;  %v13908_v50 = vld [vmem:[#allocation48 + $0xd28] sm:$0xf] }
0x1271   :  { %9588 = vmatpush.bf16.msra.mxu0 %v13309_v15  ;;  %v16108_v15 = vld [vmem:[#allocation48 + $0x94c] sm:$0xf0]  ;;  %v13213_v30 = vor.u32 %v16060_v14, %v13212_v10  ;;  %v13572_v10 = vld [vmem:[#allocation48 + $0xa88] sm:$0xf] }
0x1272   :  { %9601 = vmatpush.bf16.msra.mxu1 %v13501_v19  ;;  %v5254_v19 = vperm.slane %v18623_v35, 1  ;;  %v13405_v33 = vor.u32 %v16108_v15, %v13404_v1  ;;  %v9322_v35 = vpop.f32.mrf.mxu3  ;;  %v13932_v1 = vld [vmem:[#allocation48 + $0xd58] sm:$0xf]  ;;  %v16240_v15 = vld [vmem:[#allocation48 + $0xd6c] sm:$0xf0] }
0x1273   :  { %9574 = vmatpush.bf16.msrb.mxu3 %v13141_v57  ;;  %v9350_v57 = vpop.f32.mrf.mxu1  ;;  %v14484_v20 = vld [vmem:[#allocation48 + $0x11a8] sm:$0xf] }
0x1274   :  { %9613 = vmatpush.bf16.msra.mxu2 %v13717_v53  ;;  %v16162_v53 = vld [vmem:[#allocation48 + $0xafc] sm:$0xf0]  ;;  %v9323_v29 = vadd.f32 %v9322_v35, %v5254_v19  ;;  %v14076_v57 = vld [vmem:[#allocation48 + $0xe78] sm:$0xf] }
0x1275   :  { %9589 = vmatpush.bf16.msra.mxu0 %v13285_v4  ;;  %v16054_v4 = vld [vmem:[#allocation48 + $0x79c] sm:$0xf0]  ;;  %v13621_v13 = vor.u32 %v16162_v53, %v13620_v24  ;;  %v13933_v53 = vor.u32 %v16240_v15, %v13932_v1 }
0x1276   :  { %9602 = vmatpush.bf16.msra.mxu1 %v13477_v38  ;;  %v13045_v38 = vor.u32 %v16018_v21, %v13044_v11  ;;  %v13189_v49 = vor.u32 %v16054_v4, %v13188_v3  ;;  %v9336_v55 = vadd.f32 %v18663_v44, %v9323_v29  ;;  %v14268_v3 = vld [vmem:[#allocation48 + $0xff8] sm:$0xf]  ;;  %v16318_v29 = vld [vmem:[#allocation48 + $0xfdc] sm:$0xf0] }
0x1277   :  { %9575 = vmatpush.bf16.msrb.mxu3 %v13117_v2  ;;  %v14316_v2 = vld [vmem:[#allocation48 + $0x1058] sm:$0xf]  ;;  %v16366_v1 = vld [vmem:[#allocation48 + $0x115c] sm:$0xf0] }
0x1278   :  { %9614 = vmatpush.bf16.msra.mxu2 %v13693_v5  ;;  %v13020_v5 = vld [vmem:[#allocation48 + $0x638] sm:$0xf]  ;;  %v14317_v26 = vor.u32 %v16336_v43, %v14316_v2  ;;  %v9349_v14 = vadd.f32 %v18665_v25, %v9336_v55  ;;  %v16378_v2 = vld [vmem:[#allocation48 + $0x11bc] sm:$0xf0] }
0x1279   :  { %9590 = vmatpush.bf16.msra.mxu0 %v13261_v7  ;;  %v9361_v7 = vpop.f32.mrf.mxu2  ;;  %v16270_v43 = vld [vmem:[#allocation48 + $0xe5c] sm:$0xf0]  ;;  %v14028_v55 = vld [vmem:[#allocation48 + $0xe18] sm:$0xf] }
0x127a   :  { %9603 = vmatpush.bf16.msra.mxu1 %v13453_v54  ;;  %v16156_v54 = vld [vmem:[#allocation48 + $0xacc] sm:$0xf0]  ;;  %v18670_v19 = vadd.f32 %v9361_v7, %v9349_v14  ;;  %v9324_v24 = vpop.f32.mrf.mxu3  ;;  %v14485_v7 = vor.u32 %v16378_v2, %v14484_v20 }
0x127b   :  { %9576 = vmatpush.bf16.msrb.mxu3 %v13093_v45  ;;  %v14100_v45 = vld [vmem:[#allocation48 + $0xea8] sm:$0xf]  ;;  %v13597_v61 = vor.u32 %v16156_v54, %v13596_v52  ;;  %v16228_v52 = vld [vmem:[#allocation48 + $0xd0c] sm:$0xf0] }
0x127c   :  { %9615 = vmatpush.bf16.msra.mxu2 %v13669_v40  ;;  %v13021_v40 = vor.u32 %v16012_v62, %v13020_v5  ;;  %v14101_v44 = vor.u32 %v16282_v22, %v14100_v45  ;;  %v14244_v62 = vld [vmem:[#allocation48 + $0xfc8] sm:$0xf]  ;;  %v14220_v22 = vld [vmem:[#allocation48 + $0xf98] sm:$0xf]  ;;  %v16216_v24 = vld [vmem:[#allocation48 + $0xcac] sm:$0xf0] }
0x127d   :  { %9591 = vmatpush.bf16.msra.mxu0 %v13237_v56  ;;  %v16330_v56 = vld [vmem:[#allocation48 + $0x103c] sm:$0xf0]  ;;  %v14245_v45 = vor.u32 %v16318_v29, %v14244_v62  ;;  %v14388_v62 = vld [vmem:[#allocation48 + $0x10e8] sm:$0xf] }
0x127e   :  { %9604 = vmatpush.bf16.msra.mxu1 %v13429_v6  ;;  %v16006_v6 = vld [vmem:[#allocation48 + $0x61c] sm:$0xf0]  ;;  %v14293_v11 = vor.u32 %v16330_v56, %v14292_v28  ;;  %v16312_v28 = vld [vmem:[#allocation48 + $0xfac] sm:$0xf0] }
0x127f   :  { %9577 = vmatpush.bf16.msrb.mxu3 %v13069_v60  ;;  %v16150_v60 = vld [vmem:[#allocation48 + $0xa9c] sm:$0xf0]  ;;  %v12997_v21 = vor.u32 %v16006_v6, %v12996_v31  ;;  %v13860_v31 = vld [vmem:[#allocation48 + $0xcc8] sm:$0xf]  ;;  %v14221_v15 = vor.u32 %v16312_v28, %v14220_v22  ;;  %v16528_v28 = vld [vmem:[#allocation48 + $0x166c] sm:$0xf0] }
0x1280   :  { %9616 = vmatpush.bf16.msra.mxu2 %v13645_v0  ;;  %v16384_v0 = vld [vmem:[#allocation48 + $0x11ec] sm:$0xf0]  ;;  %v13573_v25 = vor.u32 %v16150_v60, %v13572_v10  ;;  %v16222_v6 = vld [vmem:[#allocation48 + $0xcdc] sm:$0xf0]  ;;  %v14436_v60 = vld [vmem:[#allocation48 + $0x1148] sm:$0xf] }
0x1281   :  { %9592 = vmatpush.bf16.msra.mxu0 %v13213_v30  ;;  %v16276_v30 = vld [vmem:[#allocation48 + $0xe8c] sm:$0xf0]  ;;  %v9363_v4 = vpop.f32.mrf.mxu2  ;;  %v14509_v18 = vor.u32 %v16384_v0, %v14508_v46  ;;  %v16258_v46 = vld [vmem:[#allocation48 + $0xdfc] sm:$0xf0]  ;;  %v13861_v0 = vor.u32 %v16222_v6, %v13860_v31 }
0x1282   :  { %9605 = vmatpush.bf16.msra.mxu1 %v13405_v33  ;;  %v16324_v33 = vld [vmem:[#allocation48 + $0x100c] sm:$0xf0]  ;;  %v14077_v9 = vor.u32 %v16276_v30, %v14076_v57  ;;  %v14437_v57 = vor.u32 %v16366_v1, %v14436_v60  ;;  %v13836_v30 = vld [vmem:[#allocation48 + $0xc98] sm:$0xf]  ;;  %v16354_v29 = vld [vmem:[#allocation48 + $0x10fc] sm:$0xf0] }
0x1283   :  { %9578 = vmatpush.bf16.msrb.mxu3 %v13045_v38  ;;  %v16234_v38 = vld [vmem:[#allocation48 + $0xd3c] sm:$0xf0]  ;;  %v14269_v35 = vor.u32 %v16324_v33, %v14268_v3  ;;  %v16360_v3 = vld [vmem:[#allocation48 + $0x112c] sm:$0xf0]  ;;  %v13980_v4 = vld [vmem:[#allocation48 + $0xdb8] sm:$0xf]  ;;  %v14389_v22 = vor.u32 %v16354_v29, %v14388_v62 }
0x1284   :  { %9617 = vmatpush.bf16.msra.mxu2 %v13621_v13  ;;  %v14052_v13 = vld [vmem:[#allocation48 + $0xe48] sm:$0xf]  ;;  %v13909_v5 = vor.u32 %v16234_v38, %v13908_v50  ;;  %v13837_v50 = vor.u32 %v16216_v24, %v13836_v30  ;;  %v14172_v38 = vld [vmem:[#allocation48 + $0xf38] sm:$0xf]  ;;  %v16204_v31 = vld [vmem:[#allocation48 + $0xc4c] sm:$0xf0] }
0x1285   :  { %9593 = vmatpush.bf16.msra.mxu0 %v13189_v49  ;;  %v13884_v49 = vld [vmem:[#allocation48 + $0xcf8] sm:$0xf]  ;;  %v14053_v54 = vor.u32 %v16270_v43, %v14052_v13  ;;  %v18676_v56 = vpop.f32.mrf.mxu0  ;;  %v16210_v13 = vld [vmem:[#allocation48 + $0xc7c] sm:$0xf0]  ;;  %v15060_v24 = vld [vmem:[#allocation48 + $0x1628] sm:$0xf] }
0x1286   :  { %9606 = vmatpush.bf16.msra.mxu1 %v13381_v17  ;;  %v14460_v17 = vld [vmem:[#allocation48 + $0x1178] sm:$0xf]  ;;  %v18678_v10 = vpop.f32.mrf.mxu1  ;;  %v16474_v30 = vld [vmem:[#allocation48 + $0x14bc] sm:$0xf0] }
0x1287   :  { %9579 = vmatpush.bf16.msrb.mxu3 %v13021_v40  ;;  %v13885_v40 = vor.u32 %v16228_v52, %v13884_v49  ;;  %v16246_v52 = vld [vmem:[#allocation48 + $0xd9c] sm:$0xf0]  ;;  %v14364_v1 = vld [vmem:[#allocation48 + $0x10b8] sm:$0xf] }
0x1288   :  { %9618 = vmatpush.bf16.msra.mxu2 %v13597_v61  ;;  %9594 = vmatmul.bf16.vlgmr.msra.gmra.mxu0 %v18565_v41 }
0x1289   :  { %9638 = vmatpush.bf16.msrb.mxu0 %v14125_v36  ;;  %9607 = vmatmul.bf16.vlgmr.msra.gmra.mxu1 %v18567_v16  ;;  %v16372_v36 = vld [vmem:[#allocation48 + $0x118c] sm:$0xf0] }
0x128a   :  { %9651 = vmatpush.bf16.msrb.mxu1 %v14317_v26  ;;  %v16264_v26 = vld [vmem:[#allocation48 + $0xe2c] sm:$0xf0]  ;;  %v14461_v61 = vor.u32 %v16372_v36, %v14460_v17  ;;  %v16294_v17 = vld [vmem:[#allocation48 + $0xf1c] sm:$0xf0] }
0x128b   :  { %9580 = vmatpush.bf16.msrb.mxu3 %v12997_v21  ;;  %v14029_v14 = vor.u32 %v16264_v26, %v14028_v55  ;;  %v16306_v21 = vld [vmem:[#allocation48 + $0xf7c] sm:$0xf0]  ;;  %v16480_v55 = vld [vmem:[#allocation48 + $0x14ec] sm:$0xf0]  ;;  %v15084_v26 = vld [vmem:[#allocation48 + $0x1658] sm:$0xf] }
0x128c   :  { %9619 = vmatpush.bf16.msra.mxu2 %v13573_v25 }
0x128d   :  { %9639 = vmatpush.bf16.msrb.mxu0 %v14101_v44  ;;  %v14004_v44 = vld [vmem:[#allocation48 + $0xde8] sm:$0xf]  ;;  %v9389_v20 = vpop.f32.mrf.mxu0 }
0x128e   :  { %9652 = vmatpush.bf16.msrb.mxu1 %v14293_v11  ;;  %9581 = vmatmul.bf16.vlgmr.msrb.gmra.mxu3 %v18573_v32  ;;  %v14196_v11 = vld [vmem:[#allocation48 + $0xf68] sm:$0xf]  ;;  %v14005_v25 = vor.u32 %v16258_v46, %v14004_v44  ;;  %v9402_v43 = vpop.f32.mrf.mxu1  ;;  %v16576_v20 = vld [vmem:[#allocation48 + $0x17ec] sm:$0xf0] }
0x128f   :  { %9625 = vmatpush.bf16.msra.mxu3 %v13933_v53  ;;  %9620 = vmatmul.bf16.vlgmr.msra.gmra.mxu2 %v18576_v23  ;;  %v14412_v53 = vld [vmem:[#allocation48 + $0x1118] sm:$0xf]  ;;  %v14197_v33 = vor.u32 %v16306_v21, %v14196_v11  ;;  %v15085_v21 = vor.u32 %v16528_v28, %v15084_v26  ;;  %v16570_v26 = vld [vmem:[#allocation48 + $0x17bc] sm:$0xf0] }
0x1290   :  { %9664 = vmatpush.bf16.msrb.mxu2 %v14509_v18  ;;  %v16252_v18 = vld [vmem:[#allocation48 + $0xdcc] sm:$0xf0]  ;;  %v14413_v2 = vor.u32 %v16360_v3, %v14412_v53  ;;  %v16198_v3 = vld [vmem:[#allocation48 + $0xc1c] sm:$0xf0]  ;;  %v14844_v43 = vld [vmem:[#allocation48 + $0x1478] sm:$0xf] }
0x1291   :  { %9640 = vmatpush.bf16.msrb.mxu0 %v14077_v9  ;;  %v16300_v9 = vld [vmem:[#allocation48 + $0xf4c] sm:$0xf0]  ;;  %v16462_v28 = vld [vmem:[#allocation48 + $0x145c] sm:$0xf0] }
0x1292   :  { %9653 = vmatpush.bf16.msrb.mxu1 %v14269_v35  ;;  %v13812_v35 = vld [vmem:[#allocation48 + $0xc68] sm:$0xf]  ;;  %v14173_v49 = vor.u32 %v16300_v9, %v14172_v38  ;;  %v16432_v38 = vld [vmem:[#allocation48 + $0x136c] sm:$0xf0]  ;;  %v15276_v9 = vld [vmem:[#allocation48 + $0x17d8] sm:$0xf] }
0x1293   :  { %9626 = vmatpush.bf16.msra.mxu3 %v13909_v5  ;;  %v13981_v5 = vor.u32 %v16252_v18, %v13980_v4  ;;  %v13813_v36 = vor.u32 %v16210_v13, %v13812_v35  ;;  %v16342_v18 = vld [vmem:[#allocation48 + $0x109c] sm:$0xf0] }
0x1294   :  { %9665 = vmatpush.bf16.msrb.mxu2 %v14485_v7  ;;  %v13956_v7 = vld [vmem:[#allocation48 + $0xd88] sm:$0xf] }
0x1295   :  { %9641 = vmatpush.bf16.msrb.mxu0 %v14053_v54  ;;  %v14148_v54 = vld [vmem:[#allocation48 + $0xf08] sm:$0xf]  ;;  %v13957_v60 = vor.u32 %v16246_v52, %v13956_v7  ;;  %v15036_v7 = vld [vmem:[#allocation48 + $0x15f8] sm:$0xf] }
0x1296   :  { %9654 = vmatpush.bf16.msrb.mxu1 %v14245_v45  ;;  %v14892_v45 = vld [vmem:[#allocation48 + $0x14d8] sm:$0xf]  ;;  %v14149_v44 = vor.u32 %v16294_v17, %v14148_v54  ;;  %v15277_v54 = vor.u32 %v16576_v20, %v15276_v9  ;;  %v14676_v17 = vld [vmem:[#allocation48 + $0x1328] sm:$0xf]  ;;  %v16450_v9 = vld [vmem:[#allocation48 + $0x13fc] sm:$0xf0] }
0x1297   :  { %9627 = vmatpush.bf16.msra.mxu3 %v13885_v40  ;;  %v9374_v40 = vpop.f32.mrf.mxu3  ;;  %v14893_v46 = vor.u32 %v16480_v55, %v14892_v45  ;;  %v15252_v55 = vld [vmem:[#allocation48 + $0x17a8] sm:$0xf] }
0x1298   :  { %9666 = vmatpush.bf16.msrb.mxu2 %v14461_v61  ;;  %v13788_v61 = vld [vmem:[#allocation48 + $0xc38] sm:$0xf]  ;;  %v9375_v6 = vadd.f32 %v9374_v40, %v18670_v19  ;;  %v13764_v19 = vld [vmem:[#allocation48 + $0xc08] sm:$0xf] }
0x1299   :  { %9642 = vmatpush.bf16.msrb.mxu0 %v14029_v14  ;;  %v9413_v14 = vpop.f32.mrf.mxu2  ;;  %v13765_v13 = vor.u32 %v16198_v3, %v13764_v19  ;;  %v14628_v19 = vld [vmem:[#allocation48 + $0x12c8] sm:$0xf]  ;;  %v16414_v3 = vld [vmem:[#allocation48 + $0x12dc] sm:$0xf0] }
0x129a   :  { %9655 = vmatpush.bf16.msrb.mxu1 %v14221_v15  ;;  %v16348_v15 = vld [vmem:[#allocation48 + $0x10cc] sm:$0xf0]  ;;  %v9388_v11 = vadd.f32 %v18676_v56, %v9375_v6  ;;  %v16510_v6 = vld [vmem:[#allocation48 + $0x15dc] sm:$0xf0]  ;;  %v14629_v20 = vor.u32 %v16414_v3, %v14628_v19 }
0x129b   :  { %9628 = vmatpush.bf16.msra.mxu3 %v13861_v0  ;;  %v14868_v0 = vld [vmem:[#allocation48 + $0x14a8] sm:$0xf]  ;;  %v14365_v53 = vor.u32 %v16348_v15, %v14364_v1  ;;  %v16420_v1 = vld [vmem:[#allocation48 + $0x130c] sm:$0xf0] }
0x129c   :  { %9667 = vmatpush.bf16.msrb.mxu2 %v14437_v57  ;;  %v13789_v57 = vor.u32 %v16204_v31, %v13788_v61  ;;  %v9401_v4 = vadd.f32 %v18678_v10, %v9388_v11  ;;  %v14869_v56 = vor.u32 %v16474_v30, %v14868_v0  ;;  %v15012_v31 = vld [vmem:[#allocation48 + $0x15c8] sm:$0xf]  ;;  %v14796_v11 = vld [vmem:[#allocation48 + $0x1418] sm:$0xf]  ;;  %v16396_v19 = vld [vmem:[#allocation48 + $0x124c] sm:$0xf0] }
0x129d   :  { %9643 = vmatpush.bf16.msrb.mxu0 %v14005_v25  ;;  %v16522_v25 = vld [vmem:[#allocation48 + $0x163c] sm:$0xf0]  ;;  %v15013_v0 = vor.u32 %v16510_v6, %v15012_v31  ;;  %v14988_v30 = vld [vmem:[#allocation48 + $0x1598] sm:$0xf]  ;;  %v15156_v31 = vld [vmem:[#allocation48 + $0x16e8] sm:$0xf] }
0x129e   :  { %9656 = vmatpush.bf16.msrb.mxu1 %v14197_v33  ;;  %v14340_v33 = vld [vmem:[#allocation48 + $0x1088] sm:$0xf]  ;;  %v15061_v35 = vor.u32 %v16522_v25, %v15060_v24  ;;  %v16504_v24 = vld [vmem:[#allocation48 + $0x15ac] sm:$0xf0]  ;;  %v16546_v6 = vld [vmem:[#allocation48 + $0x16fc] sm:$0xf0] }
0x129f   :  { %9629 = vmatpush.bf16.msra.mxu3 %v13837_v50  ;;  %v14700_v50 = vld [vmem:[#allocation48 + $0x1358] sm:$0xf]  ;;  %v9376_v62 = vpop.f32.mrf.mxu3  ;;  %v14341_v10 = vor.u32 %v16342_v18, %v14340_v33  ;;  %v15204_v18 = vld [vmem:[#allocation48 + $0x1748] sm:$0xf] }
0x12a0   :  { %9668 = vmatpush.bf16.msrb.mxu2 %v14413_v2  ;;  %v18683_v2 = vadd.f32 %v9413_v14, %v9401_v4  ;;  %v14701_v29 = vor.u32 %v16432_v38, %v14700_v50  ;;  %v15253_v14 = vor.u32 %v16570_v26, %v15252_v55  ;;  %v16558_v50 = vld [vmem:[#allocation48 + $0x175c] sm:$0xf0]  ;;  %v14989_v38 = vor.u32 %v16504_v24, %v14988_v30  ;;  %v16408_v62 = vld [vmem:[#allocation48 + $0x12ac] sm:$0xf0]  ;;  %v12782_v24 = vld [vmem:[#allocation48 + $0x470] sm:$0xf0] }
0x12a1   :  { %9644 = vmatpush.bf16.msrb.mxu0 %v13981_v5  ;;  %v16468_v5 = vld [vmem:[#allocation48 + $0x148c] sm:$0xf0]  ;;  %v9415_v52 = vpop.f32.mrf.mxu2  ;;  %v15157_v30 = vor.u32 %v16546_v6, %v15156_v31 }
0x12a2   :  { %9657 = vmatpush.bf16.msrb.mxu1 %v14173_v49  ;;  %v16516_v49 = vld [vmem:[#allocation48 + $0x160c] sm:$0xf0]  ;;  %v14845_v45 = vor.u32 %v16468_v5, %v14844_v43  ;;  %v15205_v43 = vor.u32 %v16558_v50, %v15204_v18  ;;  %v14604_v5 = vld [vmem:[#allocation48 + $0x1298] sm:$0xf] }
0x12a3   :  { %9630 = vmatpush.bf16.msra.mxu3 %v13813_v36  ;;  %v16426_v36 = vld [vmem:[#allocation48 + $0x133c] sm:$0xf0]  ;;  %v15037_v40 = vor.u32 %v16516_v49, %v15036_v7  ;;  %v16552_v7 = vld [vmem:[#allocation48 + $0x172c] sm:$0xf0]  ;;  %v14748_v52 = vld [vmem:[#allocation48 + $0x13b8] sm:$0xf] }
0x12a4   :  { %9669 = vmatpush.bf16.msrb.mxu2 %v14389_v22  ;;  %v14820_v22 = vld [vmem:[#allocation48 + $0x1448] sm:$0xf]  ;;  %v14677_v61 = vor.u32 %v16426_v36, %v14676_v17  ;;  %v14605_v17 = vor.u32 %v16408_v62, %v14604_v5  ;;  %v14940_v36 = vld [vmem:[#allocation48 + $0x1538] sm:$0xf]  ;;  %v12566_v5 = vld [vmem:[#allocation48 + $0x2c0] sm:$0xf0] }
0x12a5   :  { %9645 = vmatpush.bf16.msrb.mxu0 %v13957_v60  ;;  %v14652_v60 = vld [vmem:[#allocation48 + $0x12f8] sm:$0xf]  ;;  %v14821_v15 = vor.u32 %v16462_v28, %v14820_v22  ;;  %v18689_v25 = vpop.f32.mrf.mxu0  ;;  %v16402_v22 = vld [vmem:[#allocation48 + $0x127c] sm:$0xf0]  ;;  %v15943_v62 = vld [vmem:[#allocation48 + $0x42c] sm:$0xf] }
0x12a6   :  { %9658 = vmatpush.bf16.msrb.mxu1 %v14149_v44  ;;  %v15228_v44 = vld [vmem:[#allocation48 + $0x1778] sm:$0xf]  ;;  %v18691_v33 = vpop.f32.mrf.mxu1 }
0x12a7   :  { %9631 = vmatpush.bf16.msra.mxu3 %v13789_v57  ;;  %v14653_v57 = vor.u32 %v16420_v1, %v14652_v60  ;;  %v16438_v1 = vld [vmem:[#allocation48 + $0x139c] sm:$0xf0]  ;;  %v15132_v50 = vld [vmem:[#allocation48 + $0x16b8] sm:$0xf] }
0x12a8   :  { %9670 = vmatpush.bf16.msrb.mxu2 %v14365_v53  ;;  %9646 = vmatmul.bf16.vlgmr.msrb.gmra.mxu0 %v18583_v63 }
0x12a9   :  { %9690 = vmatpush.bf16.msra.mxu0 %v14893_v46  ;;  %9659 = vmatmul.bf16.vlgmr.msrb.gmra.mxu1 %v18585_v37  ;;  %v16564_v46 = vld [vmem:[#allocation48 + $0x178c] sm:$0xf0] }
0x12aa   :  { %9703 = vmatpush.bf16.msra.mxu1 %v15085_v21  ;;  %v16456_v21 = vld [vmem:[#allocation48 + $0x142c] sm:$0xf0]  ;;  %v15229_v53 = vor.u32 %v16564_v46, %v15228_v44  ;;  %v16486_v44 = vld [vmem:[#allocation48 + $0x151c] sm:$0xf0] }
0x12ab   :  { %9632 = vmatpush.bf16.msra.mxu3 %v13765_v13  ;;  %v14797_v4 = vor.u32 %v16456_v21, %v14796_v11  ;;  %v16498_v13 = vld [vmem:[#allocation48 + $0x157c] sm:$0xf0]  ;;  %v12590_v11 = vld [vmem:[#allocation48 + $0x2f0] sm:$0xf0]  ;;  %v15949_v21 = vld [vmem:[#allocation48 + $0x45c] sm:$0xf] }
0x12ac   :  { %9671 = vmatpush.bf16.msrb.mxu2 %v14341_v10 }
0x12ad   :  { %9691 = vmatpush.bf16.msra.mxu0 %v14869_v56  ;;  %v14772_v56 = vld [vmem:[#allocation48 + $0x13e8] sm:$0xf]  ;;  %v9441_v55 = vpop.f32.mrf.mxu0 }
0x12ae   :  { %9704 = vmatpush.bf16.msra.mxu1 %v15061_v35  ;;  %9633 = vmatmul.bf16.vlgmr.msra.gmra.mxu3 %v18589_v27  ;;  %v14964_v35 = vld [vmem:[#allocation48 + $0x1568] sm:$0xf]  ;;  %v14773_v10 = vor.u32 %v16450_v9, %v14772_v56  ;;  %v9454_v28 = vpop.f32.mrf.mxu1  ;;  %v12974_v55 = vld [vmem:[#allocation48 + $0x5f0] sm:$0xf0] }
0x12af   :  { %9677 = vmatpush.bf16.msrb.mxu3 %v14701_v29  ;;  %9672 = vmatmul.bf16.vlgmr.msrb.gmra.mxu2 %v18591_v48  ;;  %v15180_v29 = vld [vmem:[#allocation48 + $0x1718] sm:$0xf]  ;;  %v14965_v49 = vor.u32 %v16498_v13, %v14964_v35  ;;  %v12785_v13 = vor.u32 %v15949_v21, %v12782_v24  ;;  %v15889_v28 = vld [vmem:[#allocation48 + $0x27c] sm:$0xf]  ;;  %v12950_v21 = vld [vmem:[#allocation48 + $0x5c0] sm:$0xf0] }
0x12b0   :  { %9716 = vmatpush.bf16.msra.mxu2 %v15277_v54  ;;  %v16444_v54 = vld [vmem:[#allocation48 + $0x13cc] sm:$0xf0]  ;;  %v15181_v26 = vor.u32 %v16552_v7, %v15180_v29  ;;  %v16390_v7 = vld [vmem:[#allocation48 + $0x121c] sm:$0xf0]  ;;  %v12518_v24 = vld [vmem:[#allocation48 + $0x260] sm:$0xf0] }
0x12b1   :  { %9692 = vmatpush.bf16.msra.mxu0 %v14845_v45  ;;  %v16492_v45 = vld [vmem:[#allocation48 + $0x154c] sm:$0xf0] }
0x12b2   :  { %9705 = vmatpush.bf16.msra.mxu1 %v15037_v40  ;;  %v14580_v40 = vld [vmem:[#allocation48 + $0x1268] sm:$0xf]  ;;  %v14941_v60 = vor.u32 %v16492_v45, %v14940_v36  ;;  %v12398_v36 = vld [vmem:[#allocation48 + $0x170] sm:$0xf0]  ;;  %v15997_v45 = vld [vmem:[#allocation48 + $0x5dc] sm:$0xf] }
0x12b3   :  { %9678 = vmatpush.bf16.msrb.mxu3 %v14677_v61  ;;  %v14749_v61 = vor.u32 %v16444_v54, %v14748_v52  ;;  %v14581_v46 = vor.u32 %v16402_v22, %v14580_v40  ;;  %v16534_v54 = vld [vmem:[#allocation48 + $0x169c] sm:$0xf0] }
0x12b4   :  { %9717 = vmatpush.bf16.msra.mxu2 %v15253_v14  ;;  %v14724_v14 = vld [vmem:[#allocation48 + $0x1388] sm:$0xf] }
0x12b5   :  { %9693 = vmatpush.bf16.msra.mxu0 %v14821_v15  ;;  %v14916_v15 = vld [vmem:[#allocation48 + $0x1508] sm:$0xf]  ;;  %v14725_v18 = vor.u32 %v16438_v1, %v14724_v14  ;;  %v15937_v14 = vld [vmem:[#allocation48 + $0x3fc] sm:$0xf] }
0x12b6   :  { %9706 = vmatpush.bf16.msra.mxu1 %v15013_v0  ;;  %v15901_v0 = vld [vmem:[#allocation48 + $0x2dc] sm:$0xf]  ;;  %v14917_v56 = vor.u32 %v16486_v44, %v14916_v15  ;;  %v12977_v15 = vor.u32 %v15997_v45, %v12974_v55  ;;  %v15847_v44 = vld [vmem:[#allocation48 + $0x12c] sm:$0xf]  ;;  %v12470_v45 = vld [vmem:[#allocation48 + $0x200] sm:$0xf0] }
0x12b7   :  { %9679 = vmatpush.bf16.msrb.mxu3 %v14653_v57  ;;  %v9426_v57 = vpop.f32.mrf.mxu3  ;;  %v12593_v9 = vor.u32 %v15901_v0, %v12590_v11  ;;  %v15991_v11 = vld [vmem:[#allocation48 + $0x5ac] sm:$0xf] }
0x12b8   :  { %9718 = vmatpush.bf16.msra.mxu2 %v15229_v53  ;;  %v14556_v53 = vld [vmem:[#allocation48 + $0x1238] sm:$0xf]  ;;  %v9427_v3 = vadd.f32 %v9426_v57, %v18683_v2  ;;  %v14532_v2 = vld [vmem:[#allocation48 + $0x1208] sm:$0xf] }
0x12b9   :  { %9694 = vmatpush.bf16.msra.mxu0 %v14797_v4  ;;  %v9465_v4 = vpop.f32.mrf.mxu2  ;;  %v14533_v22 = vor.u32 %v16390_v7, %v14532_v2  ;;  %v15835_v2 = vld [vmem:[#allocation48 + $0xcc] sm:$0xf]  ;;  %v12326_v7 = vld [vmem:[#allocation48 + $0xe0] sm:$0xf0] }
0x12ba   :  { %9707 = vmatpush.bf16.msra.mxu1 %v14989_v38  ;;  %v16540_v38 = vld [vmem:[#allocation48 + $0x16cc] sm:$0xf0]  ;;  %v9440_v35 = vadd.f32 %v18689_v25, %v9427_v3  ;;  %v12710_v3 = vld [vmem:[#allocation48 + $0x3e0] sm:$0xf0]  ;;  %v12329_v55 = vor.u32 %v15835_v2, %v12326_v7  ;;  %v12254_v2 = vld [vmem:[#allocation48 + $0x50] sm:$0xf0] }
0x12bb   :  { %9680 = vmatpush.bf16.msrb.mxu3 %v14629_v20  ;;  %v15895_v20 = vld [vmem:[#allocation48 + $0x2ac] sm:$0xf]  ;;  %v15133_v29 = vor.u32 %v16540_v38, %v15132_v50  ;;  %v12350_v50 = vld [vmem:[#allocation48 + $0x110] sm:$0xf0] }
0x12bc   :  { %9719 = vmatpush.bf16.msra.mxu2 %v15205_v43  ;;  %v14557_v43 = vor.u32 %v16396_v19, %v14556_v53  ;;  %v9453_v52 = vadd.f32 %v18691_v33, %v9440_v35  ;;  %v12569_v25 = vor.u32 %v15895_v20, %v12566_v5  ;;  %v15931_v19 = vld [vmem:[#allocation48 + $0x3cc] sm:$0xf]  ;;  %v15877_v35 = vld [vmem:[#allocation48 + $0x21c] sm:$0xf] }
0x12bd   :  { %9695 = vmatpush.bf16.msra.mxu0 %v14773_v10  ;;  %v12758_v10 = vld [vmem:[#allocation48 + $0x440] sm:$0xf0]  ;;  %v12713_v20 = vor.u32 %v15931_v19, %v12710_v3  ;;  %v15925_v5 = vld [vmem:[#allocation48 + $0x39c] sm:$0xf]  ;;  %v15967_v19 = vld [vmem:[#allocation48 + $0x4ec] sm:$0xf] }
0x12be   :  { %9708 = vmatpush.bf16.msra.mxu1 %v14965_v49  ;;  %v15108_v49 = vld [vmem:[#allocation48 + $0x1688] sm:$0xf]  ;;  %v12761_v40 = vor.u32 %v15943_v62, %v12758_v10  ;;  %v12686_v62 = vld [vmem:[#allocation48 + $0x3b0] sm:$0xf0]  ;;  %v12854_v3 = vld [vmem:[#allocation48 + $0x500] sm:$0xf0] }
0x12bf   :  { %9681 = vmatpush.bf16.msrb.mxu3 %v14605_v17  ;;  %v15853_v17 = vld [vmem:[#allocation48 + $0x15c] sm:$0xf]  ;;  %v9428_v31 = vpop.f32.mrf.mxu3  ;;  %v15109_v33 = vor.u32 %v16534_v54, %v15108_v49  ;;  %v15979_v54 = vld [vmem:[#allocation48 + $0x54c] sm:$0xf] }
0x12c0   :  { %9720 = vmatpush.bf16.msra.mxu2 %v15181_v26  ;;  %v18696_v26 = vadd.f32 %v9465_v4, %v9453_v52  ;;  %v12401_v6 = vor.u32 %v15853_v17, %v12398_v36  ;;  %v12953_v4 = vor.u32 %v15991_v11, %v12950_v21  ;;  %v12902_v17 = vld [vmem:[#allocation48 + $0x560] sm:$0xf0]  ;;  %v12689_v36 = vor.u32 %v15925_v5, %v12686_v62  ;;  %v12302_v31 = vld [vmem:[#allocation48 + $0xb0] sm:$0xf0] }
0x12c1   :  { %9696 = vmatpush.bf16.msra.mxu0 %v14749_v61  ;;  %v12542_v61 = vld [vmem:[#allocation48 + $0x290] sm:$0xf0]  ;;  %v9467_v1 = vpop.f32.mrf.mxu2  ;;  %v12857_v5 = vor.u32 %v15967_v19, %v12854_v3 }
0x12c2   :  { %9709 = vmatpush.bf16.msra.mxu1 %v14941_v60  ;;  %v12734_v60 = vld [vmem:[#allocation48 + $0x410] sm:$0xf0]  ;;  %v12545_v0 = vor.u32 %v15889_v28, %v12542_v61  ;;  %v12905_v28 = vor.u32 %v15979_v54, %v12902_v17  ;;  %v15829_v61 = vld [vmem:[#allocation48 + $0x9c] sm:$0xf] }
0x12c3   :  { %9682 = vmatpush.bf16.msrb.mxu3 %v14581_v46  ;;  %v12374_v46 = vld [vmem:[#allocation48 + $0x140] sm:$0xf0]  ;;  %v12737_v57 = vor.u32 %v15937_v14, %v12734_v60  ;;  %v12878_v14 = vld [vmem:[#allocation48 + $0x530] sm:$0xf0]  ;;  %v15865_v1 = vld [vmem:[#allocation48 + $0x1bc] sm:$0xf] }
0x12c4   :  { %9721 = vmatpush.bf16.msra.mxu2 %v15157_v30  ;;  %v15883_v30 = vld [vmem:[#allocation48 + $0x24c] sm:$0xf]  ;;  %v12377_v53 = vor.u32 %v15847_v44, %v12374_v46  ;;  %v12305_v44 = vor.u32 %v15829_v61, %v12302_v31  ;;  %v15913_v46 = vld [vmem:[#allocation48 + $0x33c] sm:$0xf]  ;;  %v13550_v62 = vld [vmem:[#allocation48 + $0xa70] sm:$0xf0] }
0x12c5   :  { %9697 = vmatpush.bf16.msra.mxu0 %v14725_v18  ;;  %v15841_v18 = vld [vmem:[#allocation48 + $0xfc] sm:$0xf]  ;;  %v12521_v38 = vor.u32 %v15883_v30, %v12518_v24  ;;  %v18702_v10 = vpop.f32.mrf.mxu0  ;;  %v12278_v30 = vld [vmem:[#allocation48 + $0x80] sm:$0xf0]  ;;  %v16135_v31 = vld [vmem:[#allocation48 + $0xa2c] sm:$0xf] }
0x12c6   :  { %9710 = vmatpush.bf16.msra.mxu1 %v14917_v56  ;;  %v15985_v56 = vld [vmem:[#allocation48 + $0x57c] sm:$0xf]  ;;  %v18704_v49 = vpop.f32.mrf.mxu1  ;;  %v13334_v61 = vld [vmem:[#allocation48 + $0x8c0] sm:$0xf0] }
0x12c7   :  { %9683 = vmatpush.bf16.msrb.mxu3 %v14557_v43  ;;  %v12353_v43 = vor.u32 %v15841_v18, %v12350_v50  ;;  %v12422_v50 = vld [vmem:[#allocation48 + $0x1a0] sm:$0xf0]  ;;  %v15961_v17 = vld [vmem:[#allocation48 + $0x4bc] sm:$0xf] }
0x12c8   :  { %9722 = vmatpush.bf16.msra.mxu2 %v15133_v29  ;;  %9698 = vmatmul.bf16.vlgmr.msra.gmra.mxu0 %v18599_v12 }
0x12c9   :  { %9742 = vmatpush.bf16.msrb.mxu0 %v12593_v9  ;;  %9711 = vmatmul.bf16.vlgmr.msra.gmra.mxu1 %v18601_v34  ;;  %v12926_v9 = vld [vmem:[#allocation48 + $0x590] sm:$0xf0] }
0x12ca   :  { %9755 = vmatpush.bf16.msrb.mxu1 %v12785_v13  ;;  %v12494_v13 = vld [vmem:[#allocation48 + $0x230] sm:$0xf0]  ;;  %v12929_v29 = vor.u32 %v15985_v56, %v12926_v9  ;;  %v12614_v56 = vld [vmem:[#allocation48 + $0x320] sm:$0xf0] }
0x12cb   :  { %9684 = vmatpush.bf16.msrb.mxu3 %v14533_v22  ;;  %v12497_v52 = vor.u32 %v15877_v35, %v12494_v13  ;;  %v12662_v22 = vld [vmem:[#allocation48 + $0x380] sm:$0xf0]  ;;  %v13358_v35 = vld [vmem:[#allocation48 + $0x8f0] sm:$0xf0]  ;;  %v16141_v13 = vld [vmem:[#allocation48 + $0xa5c] sm:$0xf] }
0x12cc   :  { %9723 = vmatpush.bf16.msra.mxu2 %v15109_v33 }
0x12cd   :  { %9743 = vmatpush.bf16.msrb.mxu0 %v12569_v25  ;;  %v15871_v25 = vld [vmem:[#allocation48 + $0x1ec] sm:$0xf]  ;;  %v9493_v11 = vpop.f32.mrf.mxu0 }
0x12ce   :  { %9756 = vmatpush.bf16.msrb.mxu1 %v12761_v40  ;;  %9685 = vmatmul.bf16.vlgmr.msrb.gmra.mxu3 %v18605_v59  ;;  %v15919_v40 = vld [vmem:[#allocation48 + $0x36c] sm:$0xf]  ;;  %v12473_v33 = vor.u32 %v15871_v25, %v12470_v45  ;;  %v9506_v24 = vpop.f32.mrf.mxu1  ;;  %v13742_v11 = vld [vmem:[#allocation48 + $0xbf0] sm:$0xf0] }
0x12cf   :  { %9729 = vmatpush.bf16.msra.mxu3 %v12401_v6  ;;  %9724 = vmatmul.bf16.vlgmr.msra.gmra.mxu2 %v18607_v8  ;;  %v15973_v6 = vld [vmem:[#allocation48 + $0x51c] sm:$0xf]  ;;  %v12665_v60 = vor.u32 %v15919_v40, %v12662_v22  ;;  %v13553_v22 = vor.u32 %v16141_v13, %v13550_v62  ;;  %v13718_v13 = vld [vmem:[#allocation48 + $0xbc0] sm:$0xf0] }
0x12d0   :  { %9768 = vmatpush.bf16.msrb.mxu2 %v12977_v15  ;;  %v12446_v15 = vld [vmem:[#allocation48 + $0x1d0] sm:$0xf0]  ;;  %v12881_v21 = vor.u32 %v15973_v6, %v12878_v14  ;;  %v12230_v14 = vld [vmem:[#allocation48 + $0x20] sm:$0xf0]  ;;  %v16081_v24 = vld [vmem:[#allocation48 + $0x87c] sm:$0xf] }
0x12d1   :  { %9744 = vmatpush.bf16.msrb.mxu0 %v12545_v0  ;;  %v12638_v0 = vld [vmem:[#allocation48 + $0x350] sm:$0xf0]  ;;  %v13286_v62 = vld [vmem:[#allocation48 + $0x860] sm:$0xf0] }
0x12d2   :  { %9757 = vmatpush.bf16.msrb.mxu1 %v12737_v57  ;;  %v15823_v57 = vld [vmem:[#allocation48 + $0x6c] sm:$0xf]  ;;  %v12641_v18 = vor.u32 %v15913_v46, %v12638_v0  ;;  %v13166_v46 = vld [vmem:[#allocation48 + $0x770] sm:$0xf0]  ;;  %v16189_v0 = vld [vmem:[#allocation48 + $0xbdc] sm:$0xf] }
0x12d3   :  { %9730 = vmatpush.bf16.msra.mxu3 %v12377_v53  ;;  %v12449_v53 = vor.u32 %v15865_v1, %v12446_v15  ;;  %v12281_v9 = vor.u32 %v15823_v57, %v12278_v30  ;;  %v12806_v15 = vld [vmem:[#allocation48 + $0x4a0] sm:$0xf0] }
0x12d4   :  { %9769 = vmatpush.bf16.msrb.mxu2 %v12953_v4  ;;  %v15859_v4 = vld [vmem:[#allocation48 + $0x18c] sm:$0xf] }
0x12d5   :  { %9745 = vmatpush.bf16.msrb.mxu0 %v12521_v38  ;;  %v15907_v38 = vld [vmem:[#allocation48 + $0x30c] sm:$0xf]  ;;  %v12425_v54 = vor.u32 %v15859_v4, %v12422_v50  ;;  %v16129_v4 = vld [vmem:[#allocation48 + $0x9fc] sm:$0xf] }
0x12d6   :  { %9758 = vmatpush.bf16.msrb.mxu1 %v12713_v20  ;;  %v16093_v20 = vld [vmem:[#allocation48 + $0x8dc] sm:$0xf]  ;;  %v12617_v25 = vor.u32 %v15907_v38, %v12614_v56  ;;  %v13745_v38 = vor.u32 %v16189_v0, %v13742_v11  ;;  %v16039_v56 = vld [vmem:[#allocation48 + $0x72c] sm:$0xf]  ;;  %v13238_v0 = vld [vmem:[#allocation48 + $0x800] sm:$0xf0] }
0x12d7   :  { %9731 = vmatpush.bf16.msra.mxu3 %v12353_v43  ;;  %v9478_v43 = vpop.f32.mrf.mxu3  ;;  %v13361_v45 = vor.u32 %v16093_v20, %v13358_v35  ;;  %v16183_v35 = vld [vmem:[#allocation48 + $0xbac] sm:$0xf] }
0x12d8   :  { %9770 = vmatpush.bf16.msrb.mxu2 %v12929_v29  ;;  %v15817_v29 = vld [vmem:[#allocation48 + $0x3c] sm:$0xf]  ;;  %v9479_v7 = vadd.f32 %v9478_v43, %v18696_v26  ;;  %v15811_v26 = vld [vmem:[#allocation48 + $0xc] sm:$0xf] }
0x12d9   :  { %9746 = vmatpush.bf16.msrb.mxu0 %v12497_v52  ;;  %v9517_v52 = vpop.f32.mrf.mxu2  ;;  %v12233_v30 = vor.u32 %v15811_v26, %v12230_v14  ;;  %v16027_v26 = vld [vmem:[#allocation48 + $0x6cc] sm:$0xf]  ;;  %v13094_v14 = vld [vmem:[#allocation48 + $0x6e0] sm:$0xf0] }
0x12da   :  { %9759 = vmatpush.bf16.msrb.mxu1 %v12689_v36  ;;  %v12830_v36 = vld [vmem:[#allocation48 + $0x4d0] sm:$0xf0]  ;;  %v9492_v40 = vadd.f32 %v18702_v10, %v9479_v7  ;;  %v13478_v7 = vld [vmem:[#allocation48 + $0x9e0] sm:$0xf0]  ;;  %v13097_v11 = vor.u32 %v16027_v26, %v13094_v14  ;;  %v16009_v14 = vld [vmem:[#allocation48 + $0x63c] sm:$0xf] }
0x12db   :  { %9732 = vmatpush.bf16.msra.mxu3 %v12329_v55  ;;  %v16087_v55 = vld [vmem:[#allocation48 + $0x8ac] sm:$0xf]  ;;  %v12833_v6 = vor.u32 %v15961_v17, %v12830_v36  ;;  %v13118_v17 = vld [vmem:[#allocation48 + $0x710] sm:$0xf0] }
0x12dc   :  { %9771 = vmatpush.bf16.msrb.mxu2 %v12905_v28  ;;  %v12257_v28 = vor.u32 %v15817_v29, %v12254_v2  ;;  %v9505_v1 = vadd.f32 %v18704_v49, %v9492_v40  ;;  %v13337_v10 = vor.u32 %v16087_v55, %v13334_v61  ;;  %v16123_v2 = vld [vmem:[#allocation48 + $0x9cc] sm:$0xf]  ;;  %v16069_v40 = vld [vmem:[#allocation48 + $0x81c] sm:$0xf]  ;;  %v14318_v26 = vld [vmem:[#allocation48 + $0x1070] sm:$0xf0] }
0x12dd   :  { %9747 = vmatpush.bf16.msrb.mxu0 %v12473_v33  ;;  %v13526_v33 = vld [vmem:[#allocation48 + $0xa40] sm:$0xf0]  ;;  %v13481_v55 = vor.u32 %v16123_v2, %v13478_v7  ;;  %v16117_v61 = vld [vmem:[#allocation48 + $0x99c] sm:$0xf] }
0x12de   :  { %9760 = vmatpush.bf16.msrb.mxu1 %v12665_v60  ;;  %v15955_v60 = vld [vmem:[#allocation48 + $0x48c] sm:$0xf]  ;;  %v13529_v57 = vor.u32 %v16135_v31, %v13526_v33  ;;  %v13454_v31 = vld [vmem:[#allocation48 + $0x9b0] sm:$0xf0] }
0x12df   :  { %9733 = vmatpush.bf16.msra.mxu3 %v12305_v44  ;;  %v16045_v44 = vld [vmem:[#allocation48 + $0x75c] sm:$0xf]  ;;  %v9480_v19 = vpop.f32.mrf.mxu3  ;;  %v12809_v49 = vor.u32 %v15955_v60, %v12806_v15  ;;  %v16171_v15 = vld [vmem:[#allocation48 + $0xb4c] sm:$0xf] }
0x12e0   :  { %9772 = vmatpush.bf16.msrb.mxu2 %v12881_v21  ;;  %v18709_v21 = vadd.f32 %v9517_v52, %v9505_v1  ;;  %v13169_v3 = vor.u32 %v16045_v44, %v13166_v46  ;;  %v13721_v52 = vor.u32 %v16183_v35, %v13718_v13  ;;  %v13670_v44 = vld [vmem:[#allocation48 + $0xb60] sm:$0xf0]  ;;  %v13457_v46 = vor.u32 %v16117_v61, %v13454_v31  ;;  %v13070_v19 = vld [vmem:[#allocation48 + $0x6b0] sm:$0xf0]  ;;  %v16333_v61 = vld [vmem:[#allocation48 + $0x105c] sm:$0xf] }
0x12e1   :  { %9748 = vmatpush.bf16.msrb.mxu0 %v12449_v53  ;;  %v13310_v53 = vld [vmem:[#allocation48 + $0x890] sm:$0xf0]  ;;  %v9519_v50 = vpop.f32.mrf.mxu2 }
0x12e2   :  { %9761 = vmatpush.bf16.msrb.mxu1 %v12641_v18  ;;  %v13502_v18 = vld [vmem:[#allocation48 + $0xa10] sm:$0xf0]  ;;  %v13313_v20 = vor.u32 %v16081_v24, %v13310_v53  ;;  %v13673_v24 = vor.u32 %v16171_v15, %v13670_v44  ;;  %v16021_v53 = vld [vmem:[#allocation48 + $0x69c] sm:$0xf] }
0x12e3   :  { %9734 = vmatpush.bf16.msra.mxu3 %v12281_v9  ;;  %v13142_v9 = vld [vmem:[#allocation48 + $0x740] sm:$0xf0]  ;;  %v13505_v43 = vor.u32 %v16129_v4, %v13502_v18  ;;  %v13646_v4 = vld [vmem:[#allocation48 + $0xb30] sm:$0xf0]  ;;  %v16057_v50 = vld [vmem:[#allocation48 + $0x7bc] sm:$0xf] }
0x12e4   :  { %9773 = vmatpush.bf16.msrb.mxu2 %v12857_v5  ;;  %v16075_v5 = vld [vmem:[#allocation48 + $0x84c] sm:$0xf]  ;;  %v13145_v29 = vor.u32 %v16039_v56, %v13142_v9  ;;  %v13073_v56 = vor.u32 %v16021_v53, %v13070_v19  ;;  %v16105_v9 = vld [vmem:[#allocation48 + $0x93c] sm:$0xf]  ;;  %v14321_v53 = vor.u32 %v16333_v61, %v14318_v26 }
0x12e5   :  { %9749 = vmatpush.bf16.msrb.mxu0 %v12425_v54  ;;  %v16033_v54 = vld [vmem:[#allocation48 + $0x6fc] sm:$0xf]  ;;  %v13289_v36 = vor.u32 %v16075_v5, %v13286_v62  ;;  %v18715_v33 = vpop.f32.mrf.mxu0  ;;  %v16015_v62 = vld [vmem:[#allocation48 + $0x66c] sm:$0xf] }
0x12e6   :  { %9762 = vmatpush.bf16.msrb.mxu1 %v12617_v25  ;;  %v16177_v25 = vld [vmem:[#allocation48 + $0xb7c] sm:$0xf]  ;;  %v18717_v60 = vpop.f32.mrf.mxu1  ;;  %v16375_v61 = vld [vmem:[#allocation48 + $0x11ac] sm:$0xf] }
0x12e7   :  { %9735 = vmatpush.bf16.msra.mxu3 %v12257_v28  ;;  %v13121_v28 = vor.u32 %v16033_v54, %v13118_v17  ;;  %v13622_v54 = vld [vmem:[#allocation48 + $0xb00] sm:$0xf0]  ;;  %v16051_v17 = vld [vmem:[#allocation48 + $0x78c] sm:$0xf] }
0x12e8   :  { %9774 = vmatpush.bf16.msrb.mxu2 %v12833_v6  ;;  %9750 = vmatmul.bf16.vlgmr.msrb.gmra.mxu0 %v18549_v39  ;;  %v16267_v26 = vld [vmem:[#allocation48 + $0xe4c] sm:$0xf] }
0x12e9   :  { %9794 = vmatpush.bf16.msra.mxu0 %v13361_v45  ;;  %9763 = vmatmul.bf16.vlgmr.msrb.gmra.mxu1 %v18551_v42  ;;  %v13694_v45 = vld [vmem:[#allocation48 + $0xb90] sm:$0xf0] }
0x12ea   :  { %9807 = vmatpush.bf16.msra.mxu1 %v13553_v22  ;;  %v13262_v22 = vld [vmem:[#allocation48 + $0x830] sm:$0xf0]  ;;  %v13697_v6 = vor.u32 %v16177_v25, %v13694_v45  ;;  %v13190_v25 = vld [vmem:[#allocation48 + $0x7a0] sm:$0xf0]  ;;  %v16099_v45 = vld [vmem:[#allocation48 + $0x90c] sm:$0xf] }
0x12eb   :  { %9736 = vmatpush.bf16.msra.mxu3 %v12233_v30  ;;  %v13265_v1 = vor.u32 %v16069_v40, %v13262_v22  ;;  %v13430_v30 = vld [vmem:[#allocation48 + $0x980] sm:$0xf0]  ;;  %v16285_v22 = vld [vmem:[#allocation48 + $0xedc] sm:$0xf] }
0x12ec   :  { %9775 = vmatpush.bf16.msrb.mxu2 %v12809_v49 }
0x12ed   :  { %9795 = vmatpush.bf16.msra.mxu0 %v13337_v10  ;;  %v16063_v10 = vld [vmem:[#allocation48 + $0x7ec] sm:$0xf]  ;;  %v9545_v35 = vpop.f32.mrf.mxu0 }
0x12ee   :  { %9808 = vmatpush.bf16.msra.mxu1 %v13529_v57  ;;  %9737 = vmatmul.bf16.vlgmr.msra.gmra.mxu3 %v18555_v51  ;;  %v16111_v57 = vld [vmem:[#allocation48 + $0x96c] sm:$0xf]  ;;  %v13241_v49 = vor.u32 %v16063_v10, %v13238_v0  ;;  %v9558_v2 = vpop.f32.mrf.mxu1  ;;  %v16153_v10 = vld [vmem:[#allocation48 + $0xabc] sm:$0xf]  ;;  %v13598_v0 = vld [vmem:[#allocation48 + $0xad0] sm:$0xf0] }
0x12ef   :  { %9781 = vmatpush.bf16.msrb.mxu3 %v13169_v3  ;;  %9776 = vmatmul.bf16.vlgmr.msrb.gmra.mxu2 %v18557_v47  ;;  %v16165_v3 = vld [vmem:[#allocation48 + $0xb1c] sm:$0xf]  ;;  %v13433_v18 = vor.u32 %v16111_v57, %v13430_v30  ;;  %v16279_v30 = vld [vmem:[#allocation48 + $0xeac] sm:$0xf] }
0x12f0   :  { %9820 = vmatpush.bf16.msra.mxu2 %v13745_v38  ;;  %v13214_v38 = vld [vmem:[#allocation48 + $0x7d0] sm:$0xf0]  ;;  %v13649_v13 = vor.u32 %v16165_v3, %v13646_v4  ;;  %v16327_v3 = vld [vmem:[#allocation48 + $0x102c] sm:$0xf]  ;;  %v14294_v4 = vld [vmem:[#allocation48 + $0x1040] sm:$0xf0] }
0x12f1   :  { %9796 = vmatpush.bf16.msra.mxu0 %v13313_v20  ;;  %v13406_v20 = vld [vmem:[#allocation48 + $0x950] sm:$0xf0]  ;;  %v13217_v7 = vor.u32 %v16057_v50, %v13214_v38  ;;  %v9530_v31 = vpop.f32.mrf.mxu3  ;;  %v16003_v50 = vld [vmem:[#allocation48 + $0x60c] sm:$0xf]  ;;  %v12998_v38 = vld [vmem:[#allocation48 + $0x620] sm:$0xf0] }
0x12f2   :  { %9809 = vmatpush.bf16.msra.mxu1 %v13505_v43  ;;  %v16796_v43 = vld [vmem:[#allocation49] sm:$0x3f]  ;;  %v9569_v44 = vpop.f32.mrf.mxu2  ;;  %v16237_v35 = vld [vmem:[#allocation48 + $0xd5c] sm:$0xf]  ;;  %v13001_v2 = vor.u32 %v16003_v50, %v12998_v38  ;;  %v16219_v38 = vld [vmem:[#allocation48 + $0xccc] sm:$0xf] }
0x12f3   :  { %9782 = vmatpush.bf16.msrb.mxu3 %v13145_v29  ;;  %v5255_v5 = vperm.slane %v16796_v43, 2  ;;  %v13046_v29 = vld [vmem:[#allocation48 + $0x680] sm:$0xf0]  ;;  %v16381_v43 = vld [vmem:[#allocation48 + $0x11dc] sm:$0xf] }
0x12f4   :  { %9821 = vmatpush.bf16.msra.mxu2 %v13721_v52  ;;  %v16159_v52 = vld [vmem:[#allocation48 + $0xaec] sm:$0xf]  ;;  %v13049_v40 = vor.u32 %v16015_v62, %v13046_v29  ;;  %v14297_v29 = vor.u32 %v16327_v3, %v14294_v4  ;;  %v16309_v3 = vld [vmem:[#allocation48 + $0xf9c] sm:$0xf]  ;;  %v14222_v4 = vld [vmem:[#allocation48 + $0xfb0] sm:$0xf0] }
0x12f5   :  { %9797 = vmatpush.bf16.msra.mxu0 %v13289_v36  ;;  %v13409_v36 = vor.u32 %v16105_v9, %v13406_v20  ;;  %v9531_v15 = vadd.f32 %v9530_v31, %v5255_v5  ;;  %v13574_v20 = vld [vmem:[#allocation48 + $0xaa0] sm:$0xf0]  ;;  %v14510_v5 = vld [vmem:[#allocation48 + $0x11f0] sm:$0xf0] }
0x12f6   :  { %9810 = vmatpush.bf16.msra.mxu1 %v13481_v55  ;;  %v13382_v55 = vld [vmem:[#allocation48 + $0x920] sm:$0xf0] }
0x12f7   :  { %9783 = vmatpush.bf16.msrb.mxu3 %v13121_v28  ;;  %v14126_v28 = vld [vmem:[#allocation48 + $0xef0] sm:$0xf0]  ;;  %v14486_v31 = vld [vmem:[#allocation48 + $0x11c0] sm:$0xf0] }
0x12f8   :  { %9822 = vmatpush.bf16.msra.mxu2 %v13697_v6  ;;  %v13625_v6 = vor.u32 %v16159_v52, %v13622_v54  ;;  %v14129_v57 = vor.u32 %v16285_v22, %v14126_v28  ;;  %v14078_v52 = vld [vmem:[#allocation48 + $0xe90] sm:$0xf0]  ;;  %v13910_v22 = vld [vmem:[#allocation48 + $0xd40] sm:$0xf0] }
0x12f9   :  { %9798 = vmatpush.bf16.msra.mxu0 %v13265_v1  ;;  %v13022_v1 = vld [vmem:[#allocation48 + $0x650] sm:$0xf0]  ;;  %v9532_v54 = vpop.f32.mrf.mxu3 }
0x12fa   :  { %9811 = vmatpush.bf16.msra.mxu1 %v13457_v46  ;;  %v13193_v46 = vor.u32 %v16051_v17, %v13190_v25  ;;  %v13025_v19 = vor.u32 %v16009_v14, %v13022_v1  ;;  %v14270_v25 = vld [vmem:[#allocation48 + $0x1010] sm:$0xf0]  ;;  %v14054_v14 = vld [vmem:[#allocation48 + $0xe60] sm:$0xf0]  ;;  %v16213_v54 = vld [vmem:[#allocation48 + $0xc9c] sm:$0xf] }
0x12fb   :  { %9784 = vmatpush.bf16.msrb.mxu3 %v13097_v11  ;;  %v13385_v11 = vor.u32 %v16099_v45, %v13382_v55  ;;  %v9571_v45 = vpop.f32.mrf.mxu2  ;;  %v14513_v55 = vor.u32 %v16381_v43, %v14510_v5  ;;  %v16255_v43 = vld [vmem:[#allocation48 + $0xdec] sm:$0xf]  ;;  %v14006_v5 = vld [vmem:[#allocation48 + $0xe00] sm:$0xf0] }
0x12fc   :  { %9823 = vmatpush.bf16.msra.mxu2 %v13673_v24  ;;  %v9544_v24 = vadd.f32 %v18715_v33, %v9531_v15  ;;  %v16315_v15 = vld [vmem:[#allocation48 + $0xfcc] sm:$0xf] }
0x12fd   :  { %9799 = vmatpush.bf16.msra.mxu0 %v13241_v49  ;;  %v14102_v49 = vld [vmem:[#allocation48 + $0xec0] sm:$0xf0] }
0x12fe   :  { %9812 = vmatpush.bf16.msra.mxu1 %v13433_v18  ;;  %v13601_v18 = vor.u32 %v16153_v10, %v13598_v0  ;;  %v9557_v9 = vadd.f32 %v18717_v60, %v9544_v24  ;;  %v14105_v33 = vor.u32 %v16279_v30, %v14102_v49  ;;  %v16225_v10 = vld [vmem:[#allocation48 + $0xcfc] sm:$0xf]  ;;  %v13886_v0 = vld [vmem:[#allocation48 + $0xd10] sm:$0xf0] }
0x12ff   :  { %9785 = vmatpush.bf16.msrb.mxu3 %v13073_v56  ;;  %v16147_v56 = vld [vmem:[#allocation48 + $0xa8c] sm:$0xf]  ;;  %v14462_v30 = vld [vmem:[#allocation48 + $0x1190] sm:$0xf0]  ;;  %v13889_v49 = vor.u32 %v16225_v10, %v13886_v0 }
0x1300   :  { %9824 = vmatpush.bf16.msra.mxu2 %v13649_v13  ;;  %v13934_v13 = vld [vmem:[#allocation48 + $0xd70] sm:$0xf0]  ;;  %v18721_v62 = vadd.f32 %v9569_v44, %v9557_v9  ;;  %v13577_v60 = vor.u32 %v16147_v56, %v13574_v20  ;;  %v14246_v44 = vld [vmem:[#allocation48 + $0xfe0] sm:$0xf0]  ;;  %v16243_v10 = vld [vmem:[#allocation48 + $0xd8c] sm:$0xf] }
0x1301   :  { %9800 = vmatpush.bf16.msra.mxu0 %v13217_v7  ;;  %v16273_v7 = vld [vmem:[#allocation48 + $0xe7c] sm:$0xf]  ;;  %v13937_v17 = vor.u32 %v16237_v35, %v13934_v13  ;;  %v14249_v24 = vor.u32 %v16315_v15, %v14246_v44  ;;  %v13862_v56 = vld [vmem:[#allocation48 + $0xce0] sm:$0xf0]  ;;  %v16363_v35 = vld [vmem:[#allocation48 + $0x114c] sm:$0xf] }
0x1302   :  { %9813 = vmatpush.bf16.msra.mxu1 %v13409_v36  ;;  %v16321_v36 = vld [vmem:[#allocation48 + $0xffc] sm:$0xf]  ;;  %v14081_v28 = vor.u32 %v16273_v7, %v14078_v52  ;;  %v14438_v13 = vld [vmem:[#allocation48 + $0x1160] sm:$0xf0]  ;;  %v16351_v44 = vld [vmem:[#allocation48 + $0x10ec] sm:$0xf] }
0x1303   :  { %9786 = vmatpush.bf16.msrb.mxu3 %v13049_v40  ;;  %v16231_v40 = vld [vmem:[#allocation48 + $0xd2c] sm:$0xf]  ;;  %v14198_v7 = vld [vmem:[#allocation48 + $0xf80] sm:$0xf0]  ;;  %v14441_v52 = vor.u32 %v16363_v35, %v14438_v13 }
0x1304   :  { %9825 = vmatpush.bf16.msra.mxu2 %v13625_v6  ;;  %v14273_v6 = vor.u32 %v16321_v36, %v14270_v25  ;;  %v13913_v1 = vor.u32 %v16231_v40, %v13910_v22  ;;  %v16357_v36 = vld [vmem:[#allocation48 + $0x111c] sm:$0xf]  ;;  %v14414_v25 = vld [vmem:[#allocation48 + $0x1130] sm:$0xf0] }
0x1305   :  { %9801 = vmatpush.bf16.msra.mxu0 %v13193_v46  ;;  %v14489_v46 = vor.u32 %v16375_v61, %v14486_v31  ;;  %v13982_v40 = vld [vmem:[#allocation48 + $0xdd0] sm:$0xf0] }
0x1306   :  { %9814 = vmatpush.bf16.msra.mxu1 %v13385_v11  ;;  %v14057_v11 = vor.u32 %v16267_v26, %v14054_v14  ;;  %v18729_v9 = vpop.f32.mrf.mxu1  ;;  %v14174_v61 = vld [vmem:[#allocation48 + $0xf50] sm:$0xf0]  ;;  %v16207_v26 = vld [vmem:[#allocation48 + $0xc6c] sm:$0xf]  ;;  %v13814_v14 = vld [vmem:[#allocation48 + $0xc80] sm:$0xf0] }
0x1307   :  { %9787 = vmatpush.bf16.msrb.mxu3 %v13025_v19  ;;  %v14030_v19 = vld [vmem:[#allocation48 + $0xe30] sm:$0xf0] }
0x1308   :  { %9826 = vmatpush.bf16.msra.mxu2 %v13601_v18  ;;  %9802 = vmatmul.bf16.vlgmr.msra.gmra.mxu0 %v18565_v41  ;;  %v18727_v18 = vpop.f32.mrf.mxu0 }
0x1309   :  { %9846 = vmatpush.bf16.msrb.mxu0 %v14129_v57  ;;  %9815 = vmatmul.bf16.vlgmr.msra.gmra.mxu1 %v18567_v16  ;;  %v16369_v57 = vld [vmem:[#allocation48 + $0x117c] sm:$0xf] }
0x130a   :  { %9859 = vmatpush.bf16.msrb.mxu1 %v14321_v53  ;;  %v16261_v53 = vld [vmem:[#allocation48 + $0xe1c] sm:$0xf]  ;;  %v14465_v50 = vor.u32 %v16369_v57, %v14462_v30  ;;  %v16291_v57 = vld [vmem:[#allocation48 + $0xf0c] sm:$0xf]  ;;  %v14150_v30 = vld [vmem:[#allocation48 + $0xf20] sm:$0xf0] }
0x130b   :  { %9788 = vmatpush.bf16.msrb.mxu3 %v13001_v2  ;;  %v14033_v20 = vor.u32 %v16261_v53, %v14030_v19  ;;  %v16303_v2 = vld [vmem:[#allocation48 + $0xf6c] sm:$0xf]  ;;  %v16477_v53 = vld [vmem:[#allocation48 + $0x14dc] sm:$0xf]  ;;  %v14894_v19 = vld [vmem:[#allocation48 + $0x14f0] sm:$0xf0] }
0x130c   :  { %9827 = vmatpush.bf16.msra.mxu2 %v13577_v60  ;;  %v13838_v60 = vld [vmem:[#allocation48 + $0xcb0] sm:$0xf0]  ;;  %v14201_v45 = vor.u32 %v16303_v2, %v14198_v7  ;;  %v16471_v2 = vld [vmem:[#allocation48 + $0x14ac] sm:$0xf] }
0x130d   :  { %9847 = vmatpush.bf16.msrb.mxu0 %v14105_v33  ;;  %v14225_v33 = vor.u32 %v16309_v3, %v14222_v4  ;;  %v13841_v22 = vor.u32 %v16213_v54, %v13838_v60  ;;  %v14870_v60 = vld [vmem:[#allocation48 + $0x14c0] sm:$0xf0] }
0x130e   :  { %9860 = vmatpush.bf16.msrb.mxu1 %v14297_v29  ;;  %9789 = vmatmul.bf16.vlgmr.msrb.gmra.mxu3 %v18573_v32  ;;  %v13865_v29 = vor.u32 %v16219_v38, %v13862_v56  ;;  %v16201_v38 = vld [vmem:[#allocation48 + $0xc3c] sm:$0xf]  ;;  %v13790_v56 = vld [vmem:[#allocation48 + $0xc50] sm:$0xf0] }
0x130f   :  { %9833 = vmatpush.bf16.msra.mxu3 %v13937_v17  ;;  %9828 = vmatmul.bf16.vlgmr.msra.gmra.mxu2 %v18576_v23  ;;  %v14009_v17 = vor.u32 %v16255_v43, %v14006_v5  ;;  %v14366_v43 = vld [vmem:[#allocation48 + $0x10d0] sm:$0xf0]  ;;  %v14153_v5 = vor.u32 %v16291_v57, %v14150_v30  ;;  %v13793_v54 = vor.u32 %v16201_v38, %v13790_v56  ;;  %v14822_v38 = vld [vmem:[#allocation48 + $0x1460] sm:$0xf0] }
0x1310   :  { %9872 = vmatpush.bf16.msrb.mxu2 %v14513_v55  ;;  %v16249_v55 = vld [vmem:[#allocation48 + $0xdbc] sm:$0xf]  ;;  %v9597_v31 = vpop.f32.mrf.mxu0 }
0x1311   :  { %9848 = vmatpush.bf16.msrb.mxu0 %v14081_v28  ;;  %v16297_v28 = vld [vmem:[#allocation48 + $0xf3c] sm:$0xf]  ;;  %v13985_v15 = vor.u32 %v16249_v55, %v13982_v40  ;;  %v9582_v3 = vpop.f32.mrf.mxu3  ;;  %v16339_v55 = vld [vmem:[#allocation48 + $0x108c] sm:$0xf] }
0x1312   :  { %9861 = vmatpush.bf16.msrb.mxu1 %v14273_v6  ;;  %v14417_v6 = vor.u32 %v16357_v36, %v14414_v25  ;;  %v14177_v0 = vor.u32 %v16297_v28, %v14174_v61  ;;  %v9621_v35 = vpop.f32.mrf.mxu2  ;;  %v15062_v36 = vld [vmem:[#allocation48 + $0x1640] sm:$0xf0]  ;;  %v16429_v28 = vld [vmem:[#allocation48 + $0x135c] sm:$0xf]  ;;  %v14702_v61 = vld [vmem:[#allocation48 + $0x1370] sm:$0xf0] }
0x1313   :  { %9834 = vmatpush.bf16.msra.mxu3 %v13913_v1  ;;  %v9610_v1 = vpop.f32.mrf.mxu1  ;;  %v16573_v31 = vld [vmem:[#allocation48 + $0x17dc] sm:$0xf] }
0x1314   :  { %9873 = vmatpush.bf16.msrb.mxu2 %v14489_v46  ;;  %v14390_v46 = vld [vmem:[#allocation48 + $0x1100] sm:$0xf0] }
0x1315   :  { %9849 = vmatpush.bf16.msrb.mxu0 %v14057_v11  ;;  %v13958_v11 = vld [vmem:[#allocation48 + $0xda0] sm:$0xf0]  ;;  %v14393_v4 = vor.u32 %v16351_v44, %v14390_v46  ;;  %v14846_v44 = vld [vmem:[#allocation48 + $0x1490] sm:$0xf0] }
0x1316   :  { %9862 = vmatpush.bf16.msrb.mxu1 %v14249_v24  ;;  %v13817_v24 = vor.u32 %v16207_v26, %v13814_v14  ;;  %v13961_v13 = vor.u32 %v16243_v10, %v13958_v11  ;;  %v14705_v10 = vor.u32 %v16429_v28, %v14702_v61  ;;  %v15038_v11 = vld [vmem:[#allocation48 + $0x1610] sm:$0xf0]  ;;  %v16555_v28 = vld [vmem:[#allocation48 + $0x174c] sm:$0xf]  ;;  %v15206_v61 = vld [vmem:[#allocation48 + $0x1760] sm:$0xf0] }
0x1317   :  { %9835 = vmatpush.bf16.msra.mxu3 %v13889_v49  ;;  %v16525_v49 = vld [vmem:[#allocation48 + $0x165c] sm:$0xf] }
0x1318   :  { %9874 = vmatpush.bf16.msrb.mxu2 %v14465_v50  ;;  %v15086_v50 = vld [vmem:[#allocation48 + $0x1670] sm:$0xf0] }
0x1319   :  { %9850 = vmatpush.bf16.msrb.mxu0 %v14033_v20  ;;  %v9583_v20 = vadd.f32 %v9582_v3, %v18721_v62  ;;  %v16195_v62 = vld [vmem:[#allocation48 + $0xc0c] sm:$0xf]  ;;  %v9584_v46 = vpop.f32.mrf.mxu3  ;;  %v15254_v3 = vld [vmem:[#allocation48 + $0x17c0] sm:$0xf0] }
0x131a   :  { %9863 = vmatpush.bf16.msrb.mxu1 %v14225_v33  ;;  %v16345_v33 = vld [vmem:[#allocation48 + $0x10bc] sm:$0xf]  ;;  %v9623_v57 = vpop.f32.mrf.mxu2 }
0x131b   :  { %9836 = vmatpush.bf16.msra.mxu3 %v13865_v29  ;;  %v14897_v29 = vor.u32 %v16477_v53, %v14894_v19  ;;  %v9596_v7 = vadd.f32 %v18727_v18, %v9583_v20  ;;  %v14369_v25 = vor.u32 %v16345_v33, %v14366_v43  ;;  %v14873_v18 = vor.u32 %v16471_v2, %v14870_v60  ;;  %v14678_v53 = vld [vmem:[#allocation48 + $0x1340] sm:$0xf0]  ;;  %v16507_v20 = vld [vmem:[#allocation48 + $0x15cc] sm:$0xf]  ;;  %v16417_v33 = vld [vmem:[#allocation48 + $0x12fc] sm:$0xf] }
0x131c   :  { %9875 = vmatpush.bf16.msrb.mxu2 %v14441_v52  ;;  %v15089_v52 = vor.u32 %v16525_v49, %v15086_v50  ;;  %v16567_v49 = vld [vmem:[#allocation48 + $0x17ac] sm:$0xf]  ;;  %v14654_v43 = vld [vmem:[#allocation48 + $0x1310] sm:$0xf0]  ;;  %v16405_v46 = vld [vmem:[#allocation48 + $0x129c] sm:$0xf] }
0x131d   :  { %9851 = vmatpush.bf16.msrb.mxu0 %v14009_v17  ;;  %v16519_v17 = vld [vmem:[#allocation48 + $0x162c] sm:$0xf]  ;;  %v9609_v40 = vadd.f32 %v18729_v9, %v9596_v7  ;;  %v15230_v2 = vld [vmem:[#allocation48 + $0x1790] sm:$0xf0]  ;;  %v14657_v60 = vor.u32 %v16417_v33, %v14654_v43 }
0x131e   :  { %9864 = vmatpush.bf16.msrb.mxu1 %v14201_v45  ;;  %v13766_v45 = vld [vmem:[#allocation48 + $0xc20] sm:$0xf0]  ;;  %v15065_v14 = vor.u32 %v16519_v17, %v15062_v36  ;;  %v16459_v50 = vld [vmem:[#allocation48 + $0x144c] sm:$0xf]  ;;  %v16501_v17 = vld [vmem:[#allocation48 + $0x159c] sm:$0xf] }
0x131f   :  { %9837 = vmatpush.bf16.msra.mxu3 %v13841_v22  ;;  %v14342_v22 = vld [vmem:[#allocation48 + $0x10a0] sm:$0xf0]  ;;  %v18734_v26 = vadd.f32 %v9621_v35, %v9609_v40  ;;  %v13769_v1 = vor.u32 %v16195_v62, %v13766_v45  ;;  %v14990_v36 = vld [vmem:[#allocation48 + $0x15b0] sm:$0xf0]  ;;  %v16411_v45 = vld [vmem:[#allocation48 + $0x12cc] sm:$0xf] }
0x1320   :  { %9876 = vmatpush.bf16.msrb.mxu2 %v14417_v6  ;;  %v15278_v6 = vld [vmem:[#allocation48 + $0x17f0] sm:$0xf0]  ;;  %v14345_v9 = vor.u32 %v16339_v55, %v14342_v22  ;;  %v15014_v35 = vld [vmem:[#allocation48 + $0x15e0] sm:$0xf0]  ;;  %v16435_v33 = vld [vmem:[#allocation48 + $0x138c] sm:$0xf] }
0x1321   :  { %9852 = vmatpush.bf16.msrb.mxu0 %v13985_v15  ;;  %v16465_v15 = vld [vmem:[#allocation48 + $0x147c] sm:$0xf]  ;;  %v15281_v30 = vor.u32 %v16573_v31, %v15278_v6  ;;  %v15017_v7 = vor.u32 %v16507_v20, %v15014_v35  ;;  %v14630_v55 = vld [vmem:[#allocation48 + $0x12e0] sm:$0xf0]  ;;  %v16447_v31 = vld [vmem:[#allocation48 + $0x13ec] sm:$0xf] }
0x1322   :  { %9865 = vmatpush.bf16.msrb.mxu1 %v14177_v0  ;;  %v16513_v0 = vld [vmem:[#allocation48 + $0x15fc] sm:$0xf]  ;;  %v14849_v19 = vor.u32 %v16465_v15, %v14846_v44  ;;  %v14774_v6 = vld [vmem:[#allocation48 + $0x1400] sm:$0xf0]  ;;  %v15209_v44 = vor.u32 %v16555_v28, %v15206_v61  ;;  %v16543_v35 = vld [vmem:[#allocation48 + $0x16ec] sm:$0xf] }
0x1323   :  { %9838 = vmatpush.bf16.msra.mxu3 %v13817_v24  ;;  %v16423_v24 = vld [vmem:[#allocation48 + $0x132c] sm:$0xf]  ;;  %v14966_v15 = vld [vmem:[#allocation48 + $0x1580] sm:$0xf0] }
0x1324   :  { %9877 = vmatpush.bf16.msrb.mxu2 %v14393_v4  ;;  %v15041_v4 = vor.u32 %v16513_v0, %v15038_v11  ;;  %v14681_v56 = vor.u32 %v16423_v24, %v14678_v53  ;;  %v16549_v0 = vld [vmem:[#allocation48 + $0x171c] sm:$0xf]  ;;  %v15182_v11 = vld [vmem:[#allocation48 + $0x1730] sm:$0xf0] }
0x1325   :  { %9853 = vmatpush.bf16.msrb.mxu0 %v13961_v13  ;;  %v15257_v13 = vor.u32 %v16567_v49, %v15254_v3  ;;  %v14750_v24 = vld [vmem:[#allocation48 + $0x13d0] sm:$0xf0] }
0x1326   :  { %9866 = vmatpush.bf16.msrb.mxu1 %v14153_v5  ;;  %v14825_v5 = vor.u32 %v16459_v50, %v14822_v38  ;;  %v18742_v40 = vpop.f32.mrf.mxu1  ;;  %v14942_v49 = vld [vmem:[#allocation48 + $0x1550] sm:$0xf0]  ;;  %v16399_v50 = vld [vmem:[#allocation48 + $0x126c] sm:$0xf]  ;;  %v14582_v38 = vld [vmem:[#allocation48 + $0x1280] sm:$0xf0] }
0x1327   :  { %9839 = vmatpush.bf16.msra.mxu3 %v13793_v54  ;;  %v14798_v54 = vld [vmem:[#allocation48 + $0x1430] sm:$0xf0] }
0x1328   :  { %9878 = vmatpush.bf16.msrb.mxu2 %v14369_v25  ;;  %9854 = vmatmul.bf16.vlgmr.msrb.gmra.mxu0 %v18583_v63  ;;  %v18740_v25 = vpop.f32.mrf.mxu0 }
0x1329   :  { %9898 = vmatpush.bf16.msra.mxu0 %v14897_v29  ;;  %9867 = vmatmul.bf16.vlgmr.msrb.gmra.mxu1 %v18585_v37  ;;  %v16561_v29 = vld [vmem:[#allocation48 + $0x177c] sm:$0xf] }
0x132a   :  { %9911 = vmatpush.bf16.msra.mxu1 %v15089_v52  ;;  %v16453_v52 = vld [vmem:[#allocation48 + $0x141c] sm:$0xf]  ;;  %v15233_v62 = vor.u32 %v16561_v29, %v15230_v2  ;;  %v16483_v29 = vld [vmem:[#allocation48 + $0x150c] sm:$0xf]  ;;  %v14918_v2 = vld [vmem:[#allocation48 + $0x1520] sm:$0xf0] }
0x132b   :  { %9840 = vmatpush.bf16.msra.mxu3 %v13769_v1  ;;  %v14801_v22 = vor.u32 %v16453_v52, %v14798_v54  ;;  %v16495_v1 = vld [vmem:[#allocation48 + $0x156c] sm:$0xf]  ;;  %v12596_v52 = vld [vmem:[#allocation48 + $0x2e0] sm:$0xf]  ;;  %v15905_v54 = vld [vmem:[#allocation48 + $0x2f4] sm:$0xf0] }
0x132c   :  { %9879 = vmatpush.bf16.msrb.mxu2 %v14345_v9  ;;  %v14606_v9 = vld [vmem:[#allocation48 + $0x12b0] sm:$0xf0]  ;;  %v14969_v57 = vor.u32 %v16495_v1, %v14966_v15  ;;  %v12572_v1 = vld [vmem:[#allocation48 + $0x2b0] sm:$0xf] }
0x132d   :  { %9899 = vmatpush.bf16.msra.mxu0 %v14873_v18  ;;  %v14993_v18 = vor.u32 %v16501_v17, %v14990_v36  ;;  %v14609_v53 = vor.u32 %v16405_v46, %v14606_v9  ;;  %v15899_v9 = vld [vmem:[#allocation48 + $0x2c4] sm:$0xf0] }
0x132e   :  { %9912 = vmatpush.bf16.msra.mxu1 %v15065_v14  ;;  %9841 = vmatmul.bf16.vlgmr.msra.gmra.mxu3 %v18589_v27  ;;  %v14633_v14 = vor.u32 %v16411_v45, %v14630_v55  ;;  %v16393_v45 = vld [vmem:[#allocation48 + $0x123c] sm:$0xf]  ;;  %v14558_v55 = vld [vmem:[#allocation48 + $0x1250] sm:$0xf0] }
0x132f   :  { %9885 = vmatpush.bf16.msrb.mxu3 %v14705_v10  ;;  %9880 = vmatmul.bf16.vlgmr.msrb.gmra.mxu2 %v18591_v48  ;;  %v14777_v10 = vor.u32 %v16447_v31, %v14774_v6  ;;  %v15134_v31 = vld [vmem:[#allocation48 + $0x16d0] sm:$0xf0]  ;;  %v14921_v6 = vor.u32 %v16483_v29, %v14918_v2  ;;  %v14561_v46 = vor.u32 %v16393_v45, %v14558_v55  ;;  %v15887_v45 = vld [vmem:[#allocation48 + $0x264] sm:$0xf0] }
0x1330   :  { %9924 = vmatpush.bf16.msra.mxu2 %v15281_v30  ;;  %v16441_v30 = vld [vmem:[#allocation48 + $0x13bc] sm:$0xf]  ;;  %v9649_v3 = vpop.f32.mrf.mxu0 }
0x1331   :  { %9900 = vmatpush.bf16.msra.mxu0 %v14849_v19  ;;  %v16489_v19 = vld [vmem:[#allocation48 + $0x153c] sm:$0xf]  ;;  %v14753_v20 = vor.u32 %v16441_v30, %v14750_v24  ;;  %v9634_v17 = vpop.f32.mrf.mxu3  ;;  %v16531_v30 = vld [vmem:[#allocation48 + $0x168c] sm:$0xf]  ;;  %v12980_v3 = vld [vmem:[#allocation48 + $0x5e0] sm:$0xf] }
0x1332   :  { %9913 = vmatpush.bf16.msra.mxu1 %v15041_v4  ;;  %v15185_v4 = vor.u32 %v16549_v0, %v15182_v11  ;;  %v14945_v43 = vor.u32 %v16489_v19, %v14942_v49  ;;  %v9673_v28 = vpop.f32.mrf.mxu2  ;;  %v15947_v0 = vld [vmem:[#allocation48 + $0x444] sm:$0xf0]  ;;  %v12404_v19 = vld [vmem:[#allocation48 + $0x160] sm:$0xf]  ;;  %v15857_v49 = vld [vmem:[#allocation48 + $0x174] sm:$0xf0] }
0x1333   :  { %9886 = vmatpush.bf16.msrb.mxu3 %v14681_v56  ;;  %v9662_v56 = vpop.f32.mrf.mxu1 }
0x1334   :  { %9925 = vmatpush.bf16.msra.mxu2 %v15257_v13  ;;  %v15158_v13 = vld [vmem:[#allocation48 + $0x1700] sm:$0xf0] }
0x1335   :  { %9901 = vmatpush.bf16.msra.mxu0 %v14825_v5  ;;  %v14726_v5 = vld [vmem:[#allocation48 + $0x13a0] sm:$0xf0]  ;;  %v15161_v36 = vor.u32 %v16543_v35, %v15158_v13  ;;  %v15893_v35 = vld [vmem:[#allocation48 + $0x294] sm:$0xf0] }
0x1336   :  { %9914 = vmatpush.bf16.msra.mxu1 %v15017_v7  ;;  %v14585_v7 = vor.u32 %v16399_v50, %v14582_v38  ;;  %v14729_v61 = vor.u32 %v16435_v33, %v14726_v5  ;;  %v12405_v33 = vor.u32 %v15857_v49, %v12404_v19  ;;  %v15941_v5 = vld [vmem:[#allocation48 + $0x414] sm:$0xf0]  ;;  %v12908_v19 = vld [vmem:[#allocation48 + $0x550] sm:$0xf]  ;;  %v15983_v49 = vld [vmem:[#allocation48 + $0x564] sm:$0xf0] }
0x1337   :  { %9887 = vmatpush.bf16.msrb.mxu3 %v14657_v60  ;;  %v12788_v60 = vld [vmem:[#allocation48 + $0x460] sm:$0xf] }
0x1338   :  { %9926 = vmatpush.bf16.msra.mxu2 %v15233_v62  ;;  %v15953_v62 = vld [vmem:[#allocation48 + $0x474] sm:$0xf0] }
0x1339   :  { %9902 = vmatpush.bf16.msra.mxu0 %v14801_v22  ;;  %v9635_v22 = vadd.f32 %v9634_v17, %v18734_v26  ;;  %v16387_v26 = vld [vmem:[#allocation48 + $0x120c] sm:$0xf]  ;;  %v9636_v13 = vpop.f32.mrf.mxu3  ;;  %v15995_v17 = vld [vmem:[#allocation48 + $0x5c4] sm:$0xf0] }
0x133a   :  { %9915 = vmatpush.bf16.msra.mxu1 %v14993_v18  ;;  %v16537_v18 = vld [vmem:[#allocation48 + $0x16bc] sm:$0xf]  ;;  %v9675_v29 = vpop.f32.mrf.mxu2  ;;  %v12308_v13 = vld [vmem:[#allocation48 + $0xa0] sm:$0xf] }
0x133b   :  { %9888 = vmatpush.bf16.msrb.mxu3 %v14633_v14  ;;  %v12597_v14 = vor.u32 %v15905_v54, %v12596_v52  ;;  %v9648_v15 = vadd.f32 %v18740_v25, %v9635_v22  ;;  %v15137_v11 = vor.u32 %v16537_v18, %v15134_v31  ;;  %v12573_v25 = vor.u32 %v15899_v9, %v12572_v1  ;;  %v15851_v52 = vld [vmem:[#allocation48 + $0x144] sm:$0xf0]  ;;  %v12716_v22 = vld [vmem:[#allocation48 + $0x3d0] sm:$0xf]  ;;  %v12356_v18 = vld [vmem:[#allocation48 + $0x100] sm:$0xf] }
0x133c   :  { %9927 = vmatpush.bf16.msra.mxu2 %v15209_v44  ;;  %v12789_v44 = vor.u32 %v15953_v62, %v12788_v60  ;;  %v12956_v60 = vld [vmem:[#allocation48 + $0x5b0] sm:$0xf]  ;;  %v15845_v31 = vld [vmem:[#allocation48 + $0x114] sm:$0xf0] }
0x133d   :  { %9903 = vmatpush.bf16.msra.mxu0 %v14777_v10  ;;  %v12764_v10 = vld [vmem:[#allocation48 + $0x430] sm:$0xf]  ;;  %v9661_v24 = vadd.f32 %v18742_v40, %v9648_v15  ;;  %v15989_v1 = vld [vmem:[#allocation48 + $0x594] sm:$0xf0]  ;;  %v12357_v9 = vor.u32 %v15845_v31, %v12356_v18 }
0x133e   :  { %9916 = vmatpush.bf16.msra.mxu1 %v14969_v57  ;;  %v14534_v57 = vld [vmem:[#allocation48 + $0x1220] sm:$0xf0]  ;;  %v12765_v38 = vor.u32 %v15947_v0, %v12764_v10  ;;  %v12524_v62 = vld [vmem:[#allocation48 + $0x250] sm:$0xf]  ;;  %v12692_v10 = vld [vmem:[#allocation48 + $0x3a0] sm:$0xf] }
0x133f   :  { %9889 = vmatpush.bf16.msrb.mxu3 %v14609_v53  ;;  %v15110_v53 = vld [vmem:[#allocation48 + $0x16a0] sm:$0xf0]  ;;  %v18747_v50 = vadd.f32 %v9673_v28, %v9661_v24  ;;  %v14537_v56 = vor.u32 %v16387_v26, %v14534_v57  ;;  %v15935_v28 = vld [vmem:[#allocation48 + $0x3e4] sm:$0xf0]  ;;  %v15929_v0 = vld [vmem:[#allocation48 + $0x3b4] sm:$0xf0] }
0x1340   :  { %9928 = vmatpush.bf16.msra.mxu2 %v15185_v4  ;;  %v16001_v4 = vld [vmem:[#allocation48 + $0x5f4] sm:$0xf0]  ;;  %v15113_v40 = vor.u32 %v16531_v30, %v15110_v53  ;;  %v12717_v15 = vor.u32 %v15935_v28, %v12716_v22  ;;  %v12332_v57 = vld [vmem:[#allocation48 + $0xd0] sm:$0xf]  ;;  %v15839_v30 = vld [vmem:[#allocation48 + $0xe4] sm:$0xf0] }
0x1341   :  { %9904 = vmatpush.bf16.msra.mxu0 %v14753_v20  ;;  %v12548_v20 = vld [vmem:[#allocation48 + $0x280] sm:$0xf]  ;;  %v12981_v2 = vor.u32 %v16001_v4, %v12980_v3  ;;  %v12476_v3 = vld [vmem:[#allocation48 + $0x1f0] sm:$0xf]  ;;  %v15875_v4 = vld [vmem:[#allocation48 + $0x204] sm:$0xf0] }
0x1342   :  { %9917 = vmatpush.bf16.msra.mxu1 %v14945_v43  ;;  %v12740_v43 = vld [vmem:[#allocation48 + $0x400] sm:$0xf]  ;;  %v12549_v54 = vor.u32 %v15893_v35, %v12548_v20  ;;  %v15923_v20 = vld [vmem:[#allocation48 + $0x384] sm:$0xf0]  ;;  %v12909_v35 = vor.u32 %v15983_v49, %v12908_v19  ;;  %v12860_v28 = vld [vmem:[#allocation48 + $0x4f0] sm:$0xf] }
0x1343   :  { %9890 = vmatpush.bf16.msrb.mxu3 %v14585_v7  ;;  %v12380_v7 = vld [vmem:[#allocation48 + $0x130] sm:$0xf] }
0x1344   :  { %9929 = vmatpush.bf16.msra.mxu2 %v15161_v36  ;;  %v12741_v36 = vor.u32 %v15941_v5, %v12740_v43  ;;  %v12381_v55 = vor.u32 %v15851_v52, %v12380_v7  ;;  %v12884_v43 = vld [vmem:[#allocation48 + $0x520] sm:$0xf]  ;;  %v15977_v5 = vld [vmem:[#allocation48 + $0x534] sm:$0xf0]  ;;  %v12428_v18 = vld [vmem:[#allocation48 + $0x190] sm:$0xf] }
0x1345   :  { %9905 = vmatpush.bf16.msra.mxu0 %v14729_v61  ;;  %v12957_v61 = vor.u32 %v15995_v17, %v12956_v60  ;;  %v15869_v7 = vld [vmem:[#allocation48 + $0x1d4] sm:$0xf0] }
0x1346   :  { %9918 = vmatpush.bf16.msra.mxu1 %v14921_v6  ;;  %v12525_v6 = vor.u32 %v15887_v45, %v12524_v62  ;;  %v18755_v24 = vpop.f32.mrf.mxu1  ;;  %v15917_v60 = vld [vmem:[#allocation48 + $0x354] sm:$0xf0]  ;;  %v12284_v62 = vld [vmem:[#allocation48 + $0x70] sm:$0xf]  ;;  %v15827_v45 = vld [vmem:[#allocation48 + $0x84] sm:$0xf0] }
0x1347   :  { %9891 = vmatpush.bf16.msrb.mxu3 %v14561_v46  ;;  %v15881_v46 = vld [vmem:[#allocation48 + $0x234] sm:$0xf0] }
0x1348   :  { %9930 = vmatpush.bf16.msra.mxu2 %v15137_v11  ;;  %9906 = vmatmul.bf16.vlgmr.msra.gmra.mxu0 %v18599_v12  ;;  %v18753_v11 = vpop.f32.mrf.mxu0 }
0x1349   :  { %9950 = vmatpush.bf16.msrb.mxu0 %v12597_v14  ;;  %9919 = vmatmul.bf16.vlgmr.msra.gmra.mxu1 %v18601_v34  ;;  %v12932_v14 = vld [vmem:[#allocation48 + $0x580] sm:$0xf] }
0x134a   :  { %9963 = vmatpush.bf16.msrb.mxu1 %v12789_v44  ;;  %v12500_v44 = vld [vmem:[#allocation48 + $0x220] sm:$0xf]  ;;  %v12933_v26 = vor.u32 %v15989_v1, %v12932_v14  ;;  %v12620_v14 = vld [vmem:[#allocation48 + $0x310] sm:$0xf]  ;;  %v15911_v1 = vld [vmem:[#allocation48 + $0x324] sm:$0xf0] }
0x134b   :  { %9892 = vmatpush.bf16.msrb.mxu3 %v14537_v56  ;;  %v12501_v53 = vor.u32 %v15881_v46, %v12500_v44  ;;  %v12668_v56 = vld [vmem:[#allocation48 + $0x370] sm:$0xf]  ;;  %v13364_v44 = vld [vmem:[#allocation48 + $0x8e0] sm:$0xf]  ;;  %v16097_v46 = vld [vmem:[#allocation48 + $0x8f4] sm:$0xf0] }
0x134c   :  { %9931 = vmatpush.bf16.msra.mxu2 %v15113_v40  ;;  %v15833_v40 = vld [vmem:[#allocation48 + $0xb4] sm:$0xf0]  ;;  %v12669_v29 = vor.u32 %v15923_v20, %v12668_v56  ;;  %v13340_v56 = vld [vmem:[#allocation48 + $0x8b0] sm:$0xf] }
0x134d   :  { %9951 = vmatpush.bf16.msrb.mxu0 %v12573_v25  ;;  %v12693_v25 = vor.u32 %v15929_v0, %v12692_v10  ;;  %v12309_v52 = vor.u32 %v15833_v40, %v12308_v13  ;;  %v16091_v40 = vld [vmem:[#allocation48 + $0x8c4] sm:$0xf0] }
0x134e   :  { %9964 = vmatpush.bf16.msrb.mxu1 %v12765_v38  ;;  %9893 = vmatmul.bf16.vlgmr.msrb.gmra.mxu3 %v18605_v59  ;;  %v12333_v38 = vor.u32 %v15839_v30, %v12332_v57  ;;  %v12260_v57 = vld [vmem:[#allocation48 + $0x40] sm:$0xf]  ;;  %v15821_v30 = vld [vmem:[#allocation48 + $0x54] sm:$0xf0] }
0x134f   :  { %9937 = vmatpush.bf16.msra.mxu3 %v12405_v33  ;;  %9932 = vmatmul.bf16.vlgmr.msra.gmra.mxu2 %v18607_v8  ;;  %v12477_v33 = vor.u32 %v15875_v4, %v12476_v3  ;;  %v15965_v3 = vld [vmem:[#allocation48 + $0x4d4] sm:$0xf0]  ;;  %v12621_v4 = vor.u32 %v15911_v1, %v12620_v14  ;;  %v12261_v13 = vor.u32 %v15821_v30, %v12260_v57  ;;  %v16079_v57 = vld [vmem:[#allocation48 + $0x864] sm:$0xf0] }
0x1350   :  { %9976 = vmatpush.bf16.msrb.mxu2 %v12981_v2  ;;  %v12452_v2 = vld [vmem:[#allocation48 + $0x1c0] sm:$0xf]  ;;  %v9701_v17 = vpop.f32.mrf.mxu0 }
0x1351   :  { %9952 = vmatpush.bf16.msrb.mxu0 %v12549_v54  ;;  %v12644_v54 = vld [vmem:[#allocation48 + $0x340] sm:$0xf]  ;;  %v12453_v22 = vor.u32 %v15869_v7, %v12452_v2  ;;  %v9686_v10 = vpop.f32.mrf.mxu3  ;;  %v12812_v2 = vld [vmem:[#allocation48 + $0x490] sm:$0xf] }
0x1352   :  { %9965 = vmatpush.bf16.msrb.mxu1 %v12741_v36  ;;  %v12885_v36 = vor.u32 %v15977_v5, %v12884_v43  ;;  %v12645_v31 = vor.u32 %v15917_v60, %v12644_v54  ;;  %v9725_v19 = vpop.f32.mrf.mxu2  ;;  %v16139_v43 = vld [vmem:[#allocation48 + $0xa44] sm:$0xf0]  ;;  %v13172_v54 = vld [vmem:[#allocation48 + $0x760] sm:$0xf]  ;;  %v16049_v60 = vld [vmem:[#allocation48 + $0x774] sm:$0xf0] }
0x1353   :  { %9938 = vmatpush.bf16.msra.mxu3 %v12381_v55  ;;  %v9714_v55 = vpop.f32.mrf.mxu1  ;;  %v13748_v17 = vld [vmem:[#allocation48 + $0xbe0] sm:$0xf] }
0x1354   :  { %9977 = vmatpush.bf16.msrb.mxu2 %v12957_v61  ;;  %v15971_v61 = vld [vmem:[#allocation48 + $0x504] sm:$0xf0] }
0x1355   :  { %9953 = vmatpush.bf16.msrb.mxu0 %v12525_v6  ;;  %v15863_v6 = vld [vmem:[#allocation48 + $0x1a4] sm:$0xf0]  ;;  %v12861_v0 = vor.u32 %v15971_v61, %v12860_v28  ;;  %v16085_v28 = vld [vmem:[#allocation48 + $0x894] sm:$0xf0] }
0x1356   :  { %9966 = vmatpush.bf16.msrb.mxu1 %v12717_v15  ;;  %v12285_v15 = vor.u32 %v15827_v45, %v12284_v62  ;;  %v12429_v49 = vor.u32 %v15863_v6, %v12428_v18  ;;  %v13173_v18 = vor.u32 %v16049_v60, %v13172_v54  ;;  %v16133_v6 = vld [vmem:[#allocation48 + $0xa14] sm:$0xf0]  ;;  %v13676_v54 = vld [vmem:[#allocation48 + $0xb50] sm:$0xf]  ;;  %v16175_v60 = vld [vmem:[#allocation48 + $0xb64] sm:$0xf0] }
0x1357   :  { %9939 = vmatpush.bf16.msra.mxu3 %v12357_v9  ;;  %v13556_v9 = vld [vmem:[#allocation48 + $0xa60] sm:$0xf] }
0x1358   :  { %9978 = vmatpush.bf16.msrb.mxu2 %v12933_v26  ;;  %v16145_v26 = vld [vmem:[#allocation48 + $0xa74] sm:$0xf0] }
0x1359   :  { %9954 = vmatpush.bf16.msrb.mxu0 %v12501_v53  ;;  %v9687_v53 = vadd.f32 %v9686_v10, %v18747_v50  ;;  %v12236_v50 = vld [vmem:[#allocation48 + $0x10] sm:$0xf]  ;;  %v9688_v61 = vpop.f32.mrf.mxu3  ;;  %v16187_v10 = vld [vmem:[#allocation48 + $0xbc4] sm:$0xf0] }
0x135a   :  { %9967 = vmatpush.bf16.msrb.mxu1 %v12693_v25  ;;  %v12836_v25 = vld [vmem:[#allocation48 + $0x4c0] sm:$0xf]  ;;  %v9727_v14 = vpop.f32.mrf.mxu2 }
0x135b   :  { %9940 = vmatpush.bf16.msra.mxu3 %v12333_v38  ;;  %v13365_v38 = vor.u32 %v16097_v46, %v13364_v44  ;;  %v9700_v20 = vadd.f32 %v18753_v11, %v9687_v53  ;;  %v12837_v5 = vor.u32 %v15965_v3, %v12836_v25  ;;  %v13341_v11 = vor.u32 %v16091_v40, %v13340_v56  ;;  %v16043_v44 = vld [vmem:[#allocation48 + $0x744] sm:$0xf0]  ;;  %v13484_v53 = vld [vmem:[#allocation48 + $0x9d0] sm:$0xf]  ;;  %v13124_v25 = vld [vmem:[#allocation48 + $0x700] sm:$0xf] }
0x135c   :  { %9979 = vmatpush.bf16.msrb.mxu2 %v12909_v35  ;;  %v13557_v35 = vor.u32 %v16145_v26, %v13556_v9  ;;  %v13724_v9 = vld [vmem:[#allocation48 + $0xbb0] sm:$0xf]  ;;  %v16037_v3 = vld [vmem:[#allocation48 + $0x714] sm:$0xf0]  ;;  %v13076_v61 = vld [vmem:[#allocation48 + $0x6a0] sm:$0xf] }
0x135d   :  { %9955 = vmatpush.bf16.msrb.mxu0 %v12477_v33  ;;  %v13532_v33 = vld [vmem:[#allocation48 + $0xa30] sm:$0xf]  ;;  %v9713_v7 = vadd.f32 %v18755_v24, %v9700_v20  ;;  %v16181_v56 = vld [vmem:[#allocation48 + $0xb94] sm:$0xf0]  ;;  %v13125_v40 = vor.u32 %v16037_v3, %v13124_v25  ;;  %v16163_v3 = vld [vmem:[#allocation48 + $0xb04] sm:$0xf0] }
0x135e   :  { %9968 = vmatpush.bf16.msrb.mxu1 %v12669_v29  ;;  %v15815_v29 = vld [vmem:[#allocation48 + $0x24] sm:$0xf0]  ;;  %v13533_v45 = vor.u32 %v16139_v43, %v13532_v33  ;;  %v13292_v26 = vld [vmem:[#allocation48 + $0x850] sm:$0xf]  ;;  %v13460_v33 = vld [vmem:[#allocation48 + $0x9a0] sm:$0xf] }
0x135f   :  { %9941 = vmatpush.bf16.msra.mxu3 %v12309_v52  ;;  %v15959_v52 = vld [vmem:[#allocation48 + $0x4a4] sm:$0xf0]  ;;  %v18760_v62 = vadd.f32 %v9725_v19, %v9713_v7  ;;  %v12237_v55 = vor.u32 %v15815_v29, %v12236_v50  ;;  %v16121_v43 = vld [vmem:[#allocation48 + $0x9b4] sm:$0xf0]  ;;  %v13100_v29 = vld [vmem:[#allocation48 + $0x6d0] sm:$0xf] }
0x1360   :  { %9980 = vmatpush.bf16.msrb.mxu2 %v12885_v36  ;;  %v16193_v36 = vld [vmem:[#allocation48 + $0xbf4] sm:$0xf0]  ;;  %v12813_v24 = vor.u32 %v15959_v52, %v12812_v2  ;;  %v16127_v19 = vld [vmem:[#allocation48 + $0x9e4] sm:$0xf0]  ;;  %v13628_v25 = vld [vmem:[#allocation48 + $0xaf0] sm:$0xf] }
0x1361   :  { %9956 = vmatpush.bf16.msrb.mxu0 %v12453_v22  ;;  %v13316_v22 = vld [vmem:[#allocation48 + $0x880] sm:$0xf]  ;;  %v13749_v1 = vor.u32 %v16193_v36, %v13748_v17  ;;  %v13485_v20 = vor.u32 %v16127_v19, %v13484_v53  ;;  %v16031_v2 = vld [vmem:[#allocation48 + $0x6e4] sm:$0xf0]  ;;  %v13244_v17 = vld [vmem:[#allocation48 + $0x7f0] sm:$0xf] }
0x1362   :  { %9969 = vmatpush.bf16.msrb.mxu1 %v12645_v31  ;;  %v13508_v31 = vld [vmem:[#allocation48 + $0xa00] sm:$0xf]  ;;  %v13317_v46 = vor.u32 %v16085_v28, %v13316_v22  ;;  %v16067_v36 = vld [vmem:[#allocation48 + $0x804] sm:$0xf0]  ;;  %v13677_v28 = vor.u32 %v16175_v60, %v13676_v54  ;;  %v16013_v54 = vld [vmem:[#allocation48 + $0x654] sm:$0xf0] }
0x1363   :  { %9942 = vmatpush.bf16.msra.mxu3 %v12285_v15  ;;  %v13148_v15 = vld [vmem:[#allocation48 + $0x730] sm:$0xf]  ;;  %v16115_v22 = vld [vmem:[#allocation48 + $0x984] sm:$0xf0] }
0x1364   :  { %9981 = vmatpush.bf16.msrb.mxu2 %v12861_v0  ;;  %v13509_v0 = vor.u32 %v16133_v6, %v13508_v31  ;;  %v13149_v30 = vor.u32 %v16043_v44, %v13148_v15  ;;  %v13652_v31 = vld [vmem:[#allocation48 + $0xb20] sm:$0xf]  ;;  %v16169_v6 = vld [vmem:[#allocation48 + $0xb34] sm:$0xf0]  ;;  %v16019_v53 = vld [vmem:[#allocation48 + $0x684] sm:$0xf0] }
0x1365   :  { %9957 = vmatpush.bf16.msrb.mxu0 %v12429_v49  ;;  %v13725_v49 = vor.u32 %v16187_v10, %v13724_v9  ;;  %v16061_v15 = vld [vmem:[#allocation48 + $0x7d4] sm:$0xf0] }
0x1366   :  { %9970 = vmatpush.bf16.msrb.mxu1 %v12621_v4  ;;  %v13293_v4 = vor.u32 %v16079_v57, %v13292_v26  ;;  %v18768_v7 = vpop.f32.mrf.mxu1  ;;  %v16109_v9 = vld [vmem:[#allocation48 + $0x954] sm:$0xf0]  ;;  %v16797_v26 = vld [vmem:[#allocation49] sm:$0x3f] }
0x1367   :  { %9943 = vmatpush.bf16.msra.mxu3 %v12261_v13  ;;  %v16073_v13 = vld [vmem:[#allocation48 + $0x834] sm:$0xf0]  ;;  %v5256_v57 = vperm.slane %v16797_v26, 3 }
0x1368   :  { %9982 = vmatpush.bf16.msrb.mxu2 %v12837_v5  ;;  %9958 = vmatmul.bf16.vlgmr.msrb.gmra.mxu0 %v18549_v39  ;;  %v18766_v5 = vpop.f32.mrf.mxu0  ;;  %v16241_v26 = vld [vmem:[#allocation48 + $0xd74] sm:$0xf0] }
0x1369   :  { %10002 = vmatpush.bf16.msra.mxu0 %v13365_v38  ;;  %9971 = vmatmul.bf16.vlgmr.msrb.gmra.mxu1 %v18551_v42  ;;  %v13700_v38 = vld [vmem:[#allocation48 + $0xb80] sm:$0xf] }
0x136a   :  { %10015 = vmatpush.bf16.msra.mxu1 %v13557_v35  ;;  %v13268_v35 = vld [vmem:[#allocation48 + $0x820] sm:$0xf]  ;;  %v13701_v50 = vor.u32 %v16181_v56, %v13700_v38  ;;  %v16055_v56 = vld [vmem:[#allocation48 + $0x7a4] sm:$0xf0] }
0x136b   :  { %9944 = vmatpush.bf16.msra.mxu3 %v12237_v55  ;;  %v13269_v52 = vor.u32 %v16073_v13, %v13268_v35  ;;  %v13436_v55 = vld [vmem:[#allocation48 + $0x970] sm:$0xf]  ;;  %v16103_v35 = vld [vmem:[#allocation48 + $0x924] sm:$0xf0] }
0x136c   :  { %9983 = vmatpush.bf16.msrb.mxu2 %v12813_v24  ;;  %v16025_v24 = vld [vmem:[#allocation48 + $0x6b4] sm:$0xf0]  ;;  %v13437_v14 = vor.u32 %v16115_v22, %v13436_v55 }
0x136d   :  { %10003 = vmatpush.bf16.msra.mxu0 %v13341_v11  ;;  %v13461_v11 = vor.u32 %v16121_v43, %v13460_v33  ;;  %v13077_v44 = vor.u32 %v16025_v24, %v13076_v61  ;;  %v16289_v33 = vld [vmem:[#allocation48 + $0xef4] sm:$0xf0]  ;;  %v14324_v43 = vld [vmem:[#allocation48 + $0x1060] sm:$0xf] }
0x136e   :  { %10016 = vmatpush.bf16.msra.mxu1 %v13533_v45  ;;  %9945 = vmatmul.bf16.vlgmr.msra.gmra.mxu3 %v18555_v51  ;;  %v13101_v45 = vor.u32 %v16031_v2, %v13100_v29  ;;  %v9766_v19 = vpop.f32.mrf.mxu1  ;;  %v13629_v29 = vor.u32 %v16163_v3, %v13628_v25  ;;  %v16337_v2 = vld [vmem:[#allocation48 + $0x1074] sm:$0xf0]  ;;  %v14084_v25 = vld [vmem:[#allocation48 + $0xe80] sm:$0xf] }
0x136f   :  { %9989 = vmatpush.bf16.msrb.mxu3 %v13173_v18  ;;  %9984 = vmatmul.bf16.vlgmr.msrb.gmra.mxu2 %v18557_v47  ;;  %v13245_v18 = vor.u32 %v16067_v36, %v13244_v17  ;;  %v13604_v36 = vld [vmem:[#allocation48 + $0xac0] sm:$0xf]  ;;  %v14325_v24 = vor.u32 %v16337_v2, %v14324_v43  ;;  %v16277_v3 = vld [vmem:[#allocation48 + $0xe94] sm:$0xf0] }
0x1370   :  { %10028 = vmatpush.bf16.msra.mxu2 %v13749_v1  ;;  %v13220_v1 = vld [vmem:[#allocation48 + $0x7c0] sm:$0xf]  ;;  %v9753_v10 = vpop.f32.mrf.mxu0  ;;  %v14085_v43 = vor.u32 %v16277_v3, %v14084_v25  ;;  %v14204_v25 = vld [vmem:[#allocation48 + $0xf70] sm:$0xf]  ;;  %v16307_v3 = vld [vmem:[#allocation48 + $0xf84] sm:$0xf0] }
0x1371   :  { %10004 = vmatpush.bf16.msra.mxu0 %v13317_v46  ;;  %v13412_v46 = vld [vmem:[#allocation48 + $0x940] sm:$0xf]  ;;  %v16151_v10 = vld [vmem:[#allocation48 + $0xaa4] sm:$0xf0] }
0x1372   :  { %10017 = vmatpush.bf16.msra.mxu1 %v13509_v0  ;;  %v13653_v0 = vor.u32 %v16169_v6, %v13652_v31  ;;  %v13413_v38 = vor.u32 %v16109_v9, %v13412_v46  ;;  %v16283_v31 = vld [vmem:[#allocation48 + $0xec4] sm:$0xf0]  ;;  %v14300_v6 = vld [vmem:[#allocation48 + $0x1030] sm:$0xf] }
0x1373   :  { %9990 = vmatpush.bf16.msrb.mxu3 %v13149_v30  ;;  %v13052_v30 = vld [vmem:[#allocation48 + $0x670] sm:$0xf] }
0x1374   :  { %10029 = vmatpush.bf16.msra.mxu2 %v13725_v49  ;;  %v13221_v49 = vor.u32 %v16061_v15, %v13220_v1  ;;  %v13053_v13 = vor.u32 %v16019_v53, %v13052_v30  ;;  %v13004_v15 = vld [vmem:[#allocation48 + $0x610] sm:$0xf]  ;;  %v16385_v30 = vld [vmem:[#allocation48 + $0x11f4] sm:$0xf0] }
0x1375   :  { %10005 = vmatpush.bf16.msra.mxu0 %v13293_v4  ;;  %v13196_v4 = vld [vmem:[#allocation48 + $0x790] sm:$0xf] }
0x1376   :  { %10018 = vmatpush.bf16.msra.mxu1 %v13485_v20  ;;  %v13388_v20 = vld [vmem:[#allocation48 + $0x910] sm:$0xf]  ;;  %v13197_v17 = vor.u32 %v16055_v56, %v13196_v4  ;;  %v14276_v56 = vld [vmem:[#allocation48 + $0x1000] sm:$0xf] }
0x1377   :  { %9991 = vmatpush.bf16.msrb.mxu3 %v13125_v40  ;;  %v14132_v40 = vld [vmem:[#allocation48 + $0xee0] sm:$0xf]  ;;  %v13389_v55 = vor.u32 %v16103_v35, %v13388_v20  ;;  %v13580_v46 = vld [vmem:[#allocation48 + $0xa90] sm:$0xf]  ;;  %v16325_v20 = vld [vmem:[#allocation48 + $0x1014] sm:$0xf0] }
0x1378   :  { %10030 = vmatpush.bf16.msra.mxu2 %v13701_v50  ;;  %v9738_v50 = vpop.f32.mrf.mxu3  ;;  %v14133_v22 = vor.u32 %v16289_v33, %v14132_v40  ;;  %v13916_v40 = vld [vmem:[#allocation48 + $0xd30] sm:$0xf]  ;;  %v16235_v33 = vld [vmem:[#allocation48 + $0xd44] sm:$0xf0]  ;;  %v14277_v2 = vor.u32 %v16325_v20, %v14276_v56  ;;  %v14420_v20 = vld [vmem:[#allocation48 + $0x1120] sm:$0xf] }
0x1379   :  { %10006 = vmatpush.bf16.msra.mxu0 %v13269_v52  ;;  %v13028_v52 = vld [vmem:[#allocation48 + $0x640] sm:$0xf]  ;;  %v9739_v60 = vadd.f32 %v9738_v50, %v5256_v57  ;;  %v14492_v50 = vld [vmem:[#allocation48 + $0x11b0] sm:$0xf] }
0x137a   :  { %10019 = vmatpush.bf16.msra.mxu1 %v13461_v11  ;;  %v9777_v11 = vpop.f32.mrf.mxu2  ;;  %v14516_v57 = vld [vmem:[#allocation48 + $0x11e0] sm:$0xf] }
0x137b   :  { %9992 = vmatpush.bf16.msrb.mxu3 %v13101_v45  ;;  %v16157_v45 = vld [vmem:[#allocation48 + $0xad4] sm:$0xf0]  ;;  %v9752_v61 = vadd.f32 %v18766_v5, %v9739_v60  ;;  %v13917_v60 = vor.u32 %v16235_v33, %v13916_v40  ;;  %v13988_v40 = vld [vmem:[#allocation48 + $0xdc0] sm:$0xf] }
0x137c   :  { %10031 = vmatpush.bf16.msra.mxu2 %v13677_v28  ;;  %v14108_v28 = vld [vmem:[#allocation48 + $0xeb0] sm:$0xf]  ;;  %v13605_v1 = vor.u32 %v16157_v45, %v13604_v36  ;;  %v13892_v45 = vld [vmem:[#allocation48 + $0xd00] sm:$0xf]  ;;  %v16253_v33 = vld [vmem:[#allocation48 + $0xdd4] sm:$0xf0] }
0x137d   :  { %10007 = vmatpush.bf16.msra.mxu0 %v13245_v18  ;;  %v13029_v18 = vor.u32 %v16013_v54, %v13028_v52  ;;  %v9765_v9 = vadd.f32 %v18768_v7, %v9752_v61  ;;  %v14109_v5 = vor.u32 %v16283_v31, %v14108_v28  ;;  %v13581_v7 = vor.u32 %v16151_v10, %v13580_v46  ;;  %v14060_v52 = vld [vmem:[#allocation48 + $0xe50] sm:$0xf]  ;;  %v16271_v54 = vld [vmem:[#allocation48 + $0xe64] sm:$0xf0]  ;;  %v14468_v28 = vld [vmem:[#allocation48 + $0x1180] sm:$0xf] }
0x137e   :  { %10020 = vmatpush.bf16.msra.mxu1 %v13437_v14  ;;  %v16331_v14 = vld [vmem:[#allocation48 + $0x1044] sm:$0xf0]  ;;  %v16373_v61 = vld [vmem:[#allocation48 + $0x1194] sm:$0xf0]  ;;  %v13868_v46 = vld [vmem:[#allocation48 + $0xcd0] sm:$0xf] }
0x137f   :  { %9993 = vmatpush.bf16.msrb.mxu3 %v13077_v44  ;;  %v16007_v44 = vld [vmem:[#allocation48 + $0x624] sm:$0xf0]  ;;  %v18772_v53 = vadd.f32 %v9777_v11, %v9765_v9  ;;  %v14301_v19 = vor.u32 %v16331_v14, %v14300_v6  ;;  %v14252_v11 = vld [vmem:[#allocation48 + $0xfd0] sm:$0xf]  ;;  %v16265_v31 = vld [vmem:[#allocation48 + $0xe34] sm:$0xf0] }
0x1380   :  { %10032 = vmatpush.bf16.msra.mxu2 %v13653_v0  ;;  %v13940_v0 = vld [vmem:[#allocation48 + $0xd60] sm:$0xf]  ;;  %v9740_v4 = vpop.f32.mrf.mxu3  ;;  %v16223_v9 = vld [vmem:[#allocation48 + $0xce4] sm:$0xf0] }
0x1381   :  { %10008 = vmatpush.bf16.msra.mxu0 %v13221_v49  ;;  %v13005_v49 = vor.u32 %v16007_v44, %v13004_v15  ;;  %v14228_v14 = vld [vmem:[#allocation48 + $0xfa0] sm:$0xf]  ;;  %v14469_v44 = vor.u32 %v16373_v61, %v14468_v28  ;;  %v16247_v28 = vld [vmem:[#allocation48 + $0xda4] sm:$0xf0]  ;;  %v14156_v61 = vld [vmem:[#allocation48 + $0xf10] sm:$0xf] }
0x1382   :  { %10021 = vmatpush.bf16.msra.mxu1 %v13413_v38  ;;  %v13941_v38 = vor.u32 %v16241_v26, %v13940_v0  ;;  %v9779_v35 = vpop.f32.mrf.mxu2  ;;  %v14444_v26 = vld [vmem:[#allocation48 + $0x1150] sm:$0xf] }
0x1383   :  { %9994 = vmatpush.bf16.msrb.mxu3 %v13053_v13  ;;  %v14517_v13 = vor.u32 %v16385_v30, %v14516_v57  ;;  %v14012_v30 = vld [vmem:[#allocation48 + $0xdf0] sm:$0xf]  ;;  %v16361_v35 = vld [vmem:[#allocation48 + $0x1134] sm:$0xf0] }
0x1384   :  { %10033 = vmatpush.bf16.msra.mxu2 %v13629_v29  ;;  %v16379_v29 = vld [vmem:[#allocation48 + $0x11c4] sm:$0xf0] }
0x1385   :  { %10009 = vmatpush.bf16.msra.mxu0 %v13197_v17  ;;  %v16319_v17 = vld [vmem:[#allocation48 + $0xfe4] sm:$0xf0]  ;;  %v14493_v36 = vor.u32 %v16379_v29, %v14492_v50  ;;  %v18778_v15 = vpop.f32.mrf.mxu0  ;;  %v14180_v50 = vld [vmem:[#allocation48 + $0xf40] sm:$0xf]  ;;  %v16301_v29 = vld [vmem:[#allocation48 + $0xf54] sm:$0xf0] }
0x1386   :  { %10022 = vmatpush.bf16.msra.mxu1 %v13389_v55  ;;  %v16229_v55 = vld [vmem:[#allocation48 + $0xd14] sm:$0xf0]  ;;  %v18780_v10 = vpop.f32.mrf.mxu1 }
0x1387   :  { %9995 = vmatpush.bf16.msrb.mxu3 %v13029_v18  ;;  %v14036_v18 = vld [vmem:[#allocation48 + $0xe20] sm:$0xf]  ;;  %v13893_v6 = vor.u32 %v16229_v55, %v13892_v45  ;;  %v16355_v45 = vld [vmem:[#allocation48 + $0x1104] sm:$0xf0]  ;;  %v13964_v55 = vld [vmem:[#allocation48 + $0xd90] sm:$0xf] }
0x1388   :  { %10034 = vmatpush.bf16.msra.mxu2 %v13605_v1  ;;  %10010 = vmatmul.bf16.vlgmr.msra.gmra.mxu0 %v18565_v41  ;;  %v16313_v1 = vld [vmem:[#allocation48 + $0xfb4] sm:$0xf0]  ;;  %v14037_v0 = vor.u32 %v16265_v31, %v14036_v18  ;;  %v14900_v31 = vld [vmem:[#allocation48 + $0x14e0] sm:$0xf] }
0x1389   :  { %10054 = vmatpush.bf16.msrb.mxu0 %v14133_v22  ;;  %10023 = vmatmul.bf16.vlgmr.msra.gmra.mxu1 %v18567_v16  ;;  %v14061_v22 = vor.u32 %v16271_v54, %v14060_v52  ;;  %v14229_v57 = vor.u32 %v16313_v1, %v14228_v14  ;;  %v14421_v52 = vor.u32 %v16361_v35, %v14420_v20  ;;  %v13820_v54 = vld [vmem:[#allocation48 + $0xc70] sm:$0xf]  ;;  %v15092_v14 = vld [vmem:[#allocation48 + $0x1660] sm:$0xf]  ;;  %v16523_v35 = vld [vmem:[#allocation48 + $0x1644] sm:$0xf0] }
0x138a   :  { %10067 = vmatpush.bf16.msrb.mxu1 %v14325_v24  ;;  %v14253_v24 = vor.u32 %v16319_v17, %v14252_v11  ;;  %v13989_v17 = vor.u32 %v16253_v33, %v13988_v40  ;;  %v15068_v20 = vld [vmem:[#allocation48 + $0x1630] sm:$0xf]  ;;  %v16199_v40 = vld [vmem:[#allocation48 + $0xc24] sm:$0xf0] }
0x138b   :  { %9996 = vmatpush.bf16.msrb.mxu3 %v13005_v49  ;;  %v13869_v49 = vor.u32 %v16223_v9, %v13868_v46  ;;  %v16529_v46 = vld [vmem:[#allocation48 + $0x1674] sm:$0xf0]  ;;  %v13796_v9 = vld [vmem:[#allocation48 + $0xc40] sm:$0xf]  ;;  %v14348_v33 = vld [vmem:[#allocation48 + $0x1090] sm:$0xf] }
0x138c   :  { %10035 = vmatpush.bf16.msra.mxu2 %v13581_v7  ;;  %v13844_v7 = vld [vmem:[#allocation48 + $0xca0] sm:$0xf] }
0x138d   :  { %10055 = vmatpush.bf16.msrb.mxu0 %v14109_v5  ;;  %v16367_v5 = vld [vmem:[#allocation48 + $0x1164] sm:$0xf0] }
0x138e   :  { %10068 = vmatpush.bf16.msrb.mxu1 %v14301_v19  ;;  %9997 = vmatmul.bf16.vlgmr.msrb.gmra.mxu3 %v18573_v32  ;;  %v16259_v19 = vld [vmem:[#allocation48 + $0xe04] sm:$0xf0]  ;;  %v14445_v4 = vor.u32 %v16367_v5, %v14444_v26  ;;  %v9818_v11 = vpop.f32.mrf.mxu1 }
0x138f   :  { %10041 = vmatpush.bf16.msra.mxu3 %v13941_v38  ;;  %10036 = vmatmul.bf16.vlgmr.msra.gmra.mxu2 %v18576_v23  ;;  %v16217_v38 = vld [vmem:[#allocation48 + $0xcb4] sm:$0xf0]  ;;  %v14013_v56 = vor.u32 %v16259_v19, %v14012_v30  ;;  %v14372_v30 = vld [vmem:[#allocation48 + $0x10c0] sm:$0xf]  ;;  %v15069_v11 = vor.u32 %v16523_v35, %v15068_v20 }
0x1390   :  { %10080 = vmatpush.bf16.msrb.mxu2 %v14517_v13  ;;  %v14205_v13 = vor.u32 %v16307_v3, %v14204_v25  ;;  %v16349_v19 = vld [vmem:[#allocation48 + $0x10d4] sm:$0xf0]  ;;  %v14876_v3 = vld [vmem:[#allocation48 + $0x14b0] sm:$0xf]  ;;  %v14996_v35 = vld [vmem:[#allocation48 + $0x15a0] sm:$0xf] }
0x1391   :  { %10056 = vmatpush.bf16.msrb.mxu0 %v14085_v43  ;;  %v13845_v43 = vor.u32 %v16217_v38, %v13844_v7  ;;  %v9790_v1 = vpop.f32.mrf.mxu3  ;;  %v15093_v7 = vor.u32 %v16529_v46, %v15092_v14 }
0x1392   :  { %10069 = vmatpush.bf16.msrb.mxu1 %v14277_v2  ;;  %v9805_v2 = vpop.f32.mrf.mxu0  ;;  %v9791_v26 = vadd.f32 %v9790_v1, %v18772_v53  ;;  %v9829_v5 = vpop.f32.mrf.mxu2  ;;  %v13772_v53 = vld [vmem:[#allocation48 + $0xc10] sm:$0xf] }
0x1393   :  { %10042 = vmatpush.bf16.msra.mxu3 %v13917_v60  ;;  %v16211_v60 = vld [vmem:[#allocation48 + $0xc84] sm:$0xf0]  ;;  %v16433_v2 = vld [vmem:[#allocation48 + $0x1374] sm:$0xf0]  ;;  %v15260_v1 = vld [vmem:[#allocation48 + $0x17b0] sm:$0xf] }
0x1394   :  { %10081 = vmatpush.bf16.msrb.mxu2 %v14493_v36  ;;  %v14396_v36 = vld [vmem:[#allocation48 + $0x10f0] sm:$0xf]  ;;  %v13821_v18 = vor.u32 %v16211_v60, %v13820_v54  ;;  %v16577_v54 = vld [vmem:[#allocation48 + $0x17f4] sm:$0xf0] }
0x1395   :  { %10057 = vmatpush.bf16.msrb.mxu0 %v14061_v22  ;;  %v14181_v22 = vor.u32 %v16301_v29, %v14180_v50  ;;  %v16343_v50 = vld [vmem:[#allocation48 + $0x10a4] sm:$0xf0]  ;;  %v14708_v29 = vld [vmem:[#allocation48 + $0x1360] sm:$0xf] }
0x1396   :  { %10070 = vmatpush.bf16.msrb.mxu1 %v14253_v24  ;;  %v16295_v24 = vld [vmem:[#allocation48 + $0xf24] sm:$0xf0] }
0x1397   :  { %10043 = vmatpush.bf16.msra.mxu3 %v13893_v6  ;;  %v16481_v6 = vld [vmem:[#allocation48 + $0x14f4] sm:$0xf0] }
0x1398   :  { %10082 = vmatpush.bf16.msrb.mxu2 %v14469_v44  ;;  %v14397_v44 = vor.u32 %v16355_v45, %v14396_v36  ;;  %v14901_v25 = vor.u32 %v16481_v6, %v14900_v31  ;;  %v14852_v36 = vld [vmem:[#allocation48 + $0x1480] sm:$0xf]  ;;  %v16469_v45 = vld [vmem:[#allocation48 + $0x1494] sm:$0xf0]  ;;  %v14684_v31 = vld [vmem:[#allocation48 + $0x1330] sm:$0xf] }
0x1399   :  { %10058 = vmatpush.bf16.msrb.mxu0 %v14037_v0  ;;  %v16205_v0 = vld [vmem:[#allocation48 + $0xc54] sm:$0xf0]  ;;  %v16427_v6 = vld [vmem:[#allocation48 + $0x1344] sm:$0xf0]  ;;  %v14853_v14 = vor.u32 %v16469_v45, %v14852_v36  ;;  %v14972_v36 = vld [vmem:[#allocation48 + $0x1570] sm:$0xf] }
0x139a   :  { %10071 = vmatpush.bf16.msrb.mxu1 %v14229_v57  ;;  %v13965_v57 = vor.u32 %v16247_v28, %v13964_v55  ;;  %v13797_v38 = vor.u32 %v16205_v0, %v13796_v9  ;;  %v9792_v55 = vpop.f32.mrf.mxu3  ;;  %v15044_v28 = vld [vmem:[#allocation48 + $0x1600] sm:$0xf]  ;;  %v14828_v9 = vld [vmem:[#allocation48 + $0x1450] sm:$0xf]  ;;  %v16463_v0 = vld [vmem:[#allocation48 + $0x1464] sm:$0xf0] }
0x139b   :  { %10044 = vmatpush.bf16.msra.mxu3 %v13869_v49  ;;  %v14157_v49 = vor.u32 %v16295_v24, %v14156_v61  ;;  %v16517_v61 = vld [vmem:[#allocation48 + $0x1614] sm:$0xf0]  ;;  %v9831_v24 = vpop.f32.mrf.mxu2  ;;  %v16499_v45 = vld [vmem:[#allocation48 + $0x1584] sm:$0xf0] }
0x139c   :  { %10083 = vmatpush.bf16.msrb.mxu2 %v14445_v4  ;;  %v9804_v4 = vadd.f32 %v18778_v15, %v9791_v26  ;;  %v15045_v46 = vor.u32 %v16517_v61, %v15044_v28  ;;  %v14685_v26 = vor.u32 %v16427_v6, %v14684_v31  ;;  %v15188_v61 = vld [vmem:[#allocation48 + $0x1720] sm:$0xf]  ;;  %v16553_v24 = vld [vmem:[#allocation48 + $0x1734] sm:$0xf0] }
0x139d   :  { %10059 = vmatpush.bf16.msrb.mxu0 %v14013_v56  ;;  %v16475_v56 = vld [vmem:[#allocation48 + $0x14c4] sm:$0xf0]  ;;  %v14756_v31 = vld [vmem:[#allocation48 + $0x13c0] sm:$0xf]  ;;  %v16445_v6 = vld [vmem:[#allocation48 + $0x13d4] sm:$0xf0] }
0x139e   :  { %10072 = vmatpush.bf16.msrb.mxu1 %v14205_v13  ;;  %v14373_v13 = vor.u32 %v16349_v19, %v14372_v30  ;;  %v14877_v15 = vor.u32 %v16475_v56, %v14876_v3  ;;  %v14660_v19 = vld [vmem:[#allocation48 + $0x1300] sm:$0xf]  ;;  %v16457_v56 = vld [vmem:[#allocation48 + $0x1434] sm:$0xf0] }
0x139f   :  { %10045 = vmatpush.bf16.msra.mxu3 %v13845_v43  ;;  %v9817_v43 = vadd.f32 %v18780_v10, %v9804_v4  ;;  %v14349_v10 = vor.u32 %v16343_v50, %v14348_v33  ;;  %v15236_v3 = vld [vmem:[#allocation48 + $0x1780] sm:$0xf]  ;;  %v16565_v4 = vld [vmem:[#allocation48 + $0x1794] sm:$0xf0]  ;;  %v14636_v33 = vld [vmem:[#allocation48 + $0x12d0] sm:$0xf] }
0x13a0   :  { %10084 = vmatpush.bf16.msrb.mxu2 %v14421_v52  ;;  %v15284_v52 = vld [vmem:[#allocation48 + $0x17e0] sm:$0xf] }
0x13a1   :  { %10060 = vmatpush.bf16.msrb.mxu0 %v13989_v17  ;;  %v18785_v60 = vadd.f32 %v9829_v5, %v9817_v43  ;;  %v13773_v17 = vor.u32 %v16199_v40, %v13772_v53  ;;  %v15020_v5 = vld [vmem:[#allocation48 + $0x15d0] sm:$0xf]  ;;  %v15237_v40 = vor.u32 %v16565_v4, %v15236_v3  ;;  %v16415_v43 = vld [vmem:[#allocation48 + $0x12e4] sm:$0xf0] }
0x13a2   :  { %10073 = vmatpush.bf16.msrb.mxu1 %v14181_v22  ;;  %v14709_v22 = vor.u32 %v16433_v2, %v14708_v29  ;;  %v15212_v2 = vld [vmem:[#allocation48 + $0x1750] sm:$0xf]  ;;  %v16439_v3 = vld [vmem:[#allocation48 + $0x13a4] sm:$0xf0] }
0x13a3   :  { %10046 = vmatpush.bf16.msra.mxu3 %v13821_v18  ;;  %v15285_v18 = vor.u32 %v16577_v54, %v15284_v52  ;;  %v14780_v54 = vld [vmem:[#allocation48 + $0x13f0] sm:$0xf] }
0x13a4   :  { %10085 = vmatpush.bf16.msrb.mxu2 %v14397_v44  ;;  %v16571_v44 = vld [vmem:[#allocation48 + $0x17c4] sm:$0xf0]  ;;  %v14924_v4 = vld [vmem:[#allocation48 + $0x1510] sm:$0xf] }
0x13a5   :  { %10061 = vmatpush.bf16.msrb.mxu0 %v13965_v57  ;;  %v16511_v57 = vld [vmem:[#allocation48 + $0x15e4] sm:$0xf0]  ;;  %v15261_v30 = vor.u32 %v16571_v44, %v15260_v1  ;;  %v18791_v53 = vpop.f32.mrf.mxu0  ;;  %v14948_v1 = vld [vmem:[#allocation48 + $0x1540] sm:$0xf]  ;;  %v16493_v44 = vld [vmem:[#allocation48 + $0x1554] sm:$0xf0] }
0x13a6   :  { %10074 = vmatpush.bf16.msrb.mxu1 %v14157_v49  ;;  %v16421_v49 = vld [vmem:[#allocation48 + $0x1314] sm:$0xf0]  ;;  %v18793_v50 = vpop.f32.mrf.mxu1 }
0x13a7   :  { %10047 = vmatpush.bf16.msra.mxu3 %v13797_v38  ;;  %v14804_v38 = vld [vmem:[#allocation48 + $0x1420] sm:$0xf]  ;;  %v14661_v20 = vor.u32 %v16421_v49, %v14660_v19  ;;  %v16547_v19 = vld [vmem:[#allocation48 + $0x1704] sm:$0xf0]  ;;  %v14732_v49 = vld [vmem:[#allocation48 + $0x1390] sm:$0xf] }
0x13a8   :  { %10086 = vmatpush.bf16.msrb.mxu2 %v14373_v13  ;;  %10062 = vmatmul.bf16.vlgmr.msrb.gmra.mxu0 %v18583_v63  ;;  %v16505_v13 = vld [vmem:[#allocation48 + $0x15b4] sm:$0xf0]  ;;  %v14805_v29 = vor.u32 %v16457_v56, %v14804_v38  ;;  %v15902_v56 = vld [vmem:[#allocation48 + $0x2e4] sm:$0xf] }
0x13a9   :  { %10106 = vmatpush.bf16.msra.mxu0 %v14901_v25  ;;  %10075 = vmatmul.bf16.vlgmr.msrb.gmra.mxu1 %v18585_v37  ;;  %v14829_v25 = vor.u32 %v16463_v0, %v14828_v9  ;;  %v14997_v52 = vor.u32 %v16505_v13, %v14996_v35  ;;  %v15189_v9 = vor.u32 %v16553_v24, %v15188_v61  ;;  %v14588_v0 = vld [vmem:[#allocation48 + $0x1270] sm:$0xf]  ;;  %v15950_v35 = vld [vmem:[#allocation48 + $0x464] sm:$0xf]  ;;  %v15944_v61 = vld [vmem:[#allocation48 + $0x434] sm:$0xf] }
0x13aa   :  { %10119 = vmatpush.bf16.msra.mxu1 %v15093_v7  ;;  %v15021_v7 = vor.u32 %v16511_v57, %v15020_v5  ;;  %v14757_v57 = vor.u32 %v16445_v6, %v14756_v31  ;;  %v12766_v24 = vld [vmem:[#allocation48 + $0x448] sm:$0xf0]  ;;  %v16391_v31 = vld [vmem:[#allocation48 + $0x1224] sm:$0xf0]  ;;  %v15116_v6 = vld [vmem:[#allocation48 + $0x1690] sm:$0xf] }
0x13ab   :  { %10048 = vmatpush.bf16.msra.mxu3 %v13773_v17  ;;  %v14637_v17 = vor.u32 %v16415_v43, %v14636_v33  ;;  %v12790_v33 = vld [vmem:[#allocation48 + $0x478] sm:$0xf0]  ;;  %v14564_v43 = vld [vmem:[#allocation48 + $0x1240] sm:$0xf] }
0x13ac   :  { %10087 = vmatpush.bf16.msrb.mxu2 %v14349_v10  ;;  %v14612_v10 = vld [vmem:[#allocation48 + $0x12a0] sm:$0xf] }
0x13ad   :  { %10107 = vmatpush.bf16.msra.mxu0 %v14877_v15  ;;  %v16559_v15 = vld [vmem:[#allocation48 + $0x1764] sm:$0xf0] }
0x13ae   :  { %10120 = vmatpush.bf16.msra.mxu1 %v15069_v11  ;;  %10049 = vmatmul.bf16.vlgmr.msra.gmra.mxu3 %v18589_v27  ;;  %v16451_v11 = vld [vmem:[#allocation48 + $0x1404] sm:$0xf0]  ;;  %v15213_v55 = vor.u32 %v16559_v15, %v15212_v2  ;;  %v9870_v5 = vpop.f32.mrf.mxu1 }
0x13af   :  { %10093 = vmatpush.bf16.msrb.mxu3 %v14709_v22  ;;  %10088 = vmatmul.bf16.vlgmr.msrb.gmra.mxu2 %v18591_v48  ;;  %v16409_v22 = vld [vmem:[#allocation48 + $0x12b4] sm:$0xf0]  ;;  %v14781_v28 = vor.u32 %v16451_v11, %v14780_v54  ;;  %v15140_v54 = vld [vmem:[#allocation48 + $0x16c0] sm:$0xf]  ;;  %v12769_v5 = vor.u32 %v15944_v61, %v12766_v24  ;;  %v15926_v24 = vld [vmem:[#allocation48 + $0x3a4] sm:$0xf] }
0x13b0   :  { %10132 = vmatpush.bf16.msra.mxu2 %v15285_v18  ;;  %v14973_v18 = vor.u32 %v16499_v45, %v14972_v36  ;;  %v16541_v11 = vld [vmem:[#allocation48 + $0x16d4] sm:$0xf0]  ;;  %v15896_v45 = vld [vmem:[#allocation48 + $0x2b4] sm:$0xf] }
0x13b1   :  { %10108 = vmatpush.bf16.msra.mxu0 %v14853_v14  ;;  %v14613_v14 = vor.u32 %v16409_v22, %v14612_v10  ;;  %v9842_v13 = vpop.f32.mrf.mxu3  ;;  %v12793_v10 = vor.u32 %v15950_v35, %v12790_v33 }
0x13b2   :  { %10121 = vmatpush.bf16.msra.mxu1 %v15045_v46  ;;  %v9857_v46 = vpop.f32.mrf.mxu0  ;;  %v9843_v2 = vadd.f32 %v9842_v13, %v18785_v60  ;;  %v9881_v15 = vpop.f32.mrf.mxu2  ;;  %v14540_v60 = vld [vmem:[#allocation48 + $0x1210] sm:$0xf]  ;;  %v15992_v13 = vld [vmem:[#allocation48 + $0x5b4] sm:$0xf] }
0x13b3   :  { %10094 = vmatpush.bf16.msrb.mxu3 %v14685_v26  ;;  %v16403_v26 = vld [vmem:[#allocation48 + $0x1284] sm:$0xf0]  ;;  %v12406_v46 = vld [vmem:[#allocation48 + $0x178] sm:$0xf0] }
0x13b4   :  { %10133 = vmatpush.bf16.msra.mxu2 %v15261_v30  ;;  %v15164_v30 = vld [vmem:[#allocation48 + $0x16f0] sm:$0xf]  ;;  %v14589_v38 = vor.u32 %v16403_v26, %v14588_v0  ;;  %v12982_v0 = vld [vmem:[#allocation48 + $0x5f8] sm:$0xf0] }
0x13b5   :  { %10109 = vmatpush.bf16.msra.mxu0 %v14829_v25  ;;  %v14949_v25 = vor.u32 %v16493_v44, %v14948_v1  ;;  %v16535_v1 = vld [vmem:[#allocation48 + $0x16a4] sm:$0xf0]  ;;  %v15854_v44 = vld [vmem:[#allocation48 + $0x164] sm:$0xf] }
0x13b6   :  { %10122 = vmatpush.bf16.msra.mxu1 %v15021_v7  ;;  %v16487_v7 = vld [vmem:[#allocation48 + $0x1524] sm:$0xf0] }
0x13b7   :  { %10095 = vmatpush.bf16.msrb.mxu3 %v14661_v20  ;;  %v12598_v20 = vld [vmem:[#allocation48 + $0x2f8] sm:$0xf0] }
0x13b8   :  { %10134 = vmatpush.bf16.msra.mxu2 %v15237_v40  ;;  %v15165_v40 = vor.u32 %v16547_v19, %v15164_v30  ;;  %v12601_v36 = vor.u32 %v15902_v56, %v12598_v20  ;;  %v15890_v30 = vld [vmem:[#allocation48 + $0x284] sm:$0xf]  ;;  %v12550_v19 = vld [vmem:[#allocation48 + $0x298] sm:$0xf0]  ;;  %v15848_v56 = vld [vmem:[#allocation48 + $0x134] sm:$0xf] }
0x13b9   :  { %10110 = vmatpush.bf16.msra.mxu0 %v14805_v29  ;;  %v16397_v29 = vld [vmem:[#allocation48 + $0x1254] sm:$0xf0]  ;;  %v12382_v20 = vld [vmem:[#allocation48 + $0x148] sm:$0xf0]  ;;  %v12553_v35 = vor.u32 %v15890_v30, %v12550_v19  ;;  %v15920_v30 = vld [vmem:[#allocation48 + $0x374] sm:$0xf] }
0x13ba   :  { %10123 = vmatpush.bf16.msra.mxu1 %v14997_v52  ;;  %v14733_v52 = vor.u32 %v16439_v3, %v14732_v49  ;;  %v14565_v22 = vor.u32 %v16397_v29, %v14564_v43  ;;  %v9844_v49 = vpop.f32.mrf.mxu3  ;;  %v15938_v3 = vld [vmem:[#allocation48 + $0x404] sm:$0xf]  ;;  %v15884_v43 = vld [vmem:[#allocation48 + $0x254] sm:$0xf]  ;;  %v12526_v29 = vld [vmem:[#allocation48 + $0x268] sm:$0xf0] }
0x13bb   :  { %10096 = vmatpush.bf16.msrb.mxu3 %v14637_v17  ;;  %v14925_v17 = vor.u32 %v16487_v7, %v14924_v4  ;;  %v12742_v4 = vld [vmem:[#allocation48 + $0x418] sm:$0xf0]  ;;  %v9883_v7 = vpop.f32.mrf.mxu2  ;;  %v12670_v19 = vld [vmem:[#allocation48 + $0x388] sm:$0xf0] }
0x13bc   :  { %10135 = vmatpush.bf16.msra.mxu2 %v15213_v55  ;;  %v9856_v55 = vadd.f32 %v18791_v53, %v9843_v2  ;;  %v12745_v33 = vor.u32 %v15938_v3, %v12742_v4  ;;  %v12385_v2 = vor.u32 %v15848_v56, %v12382_v20  ;;  %v15974_v4 = vld [vmem:[#allocation48 + $0x524] sm:$0xf]  ;;  %v12886_v7 = vld [vmem:[#allocation48 + $0x538] sm:$0xf0] }
0x13bd   :  { %10111 = vmatpush.bf16.msra.mxu0 %v14781_v28  ;;  %v12574_v28 = vld [vmem:[#allocation48 + $0x2c8] sm:$0xf0]  ;;  %v15866_v56 = vld [vmem:[#allocation48 + $0x1c4] sm:$0xf]  ;;  %v12454_v20 = vld [vmem:[#allocation48 + $0x1d8] sm:$0xf0] }
0x13be   :  { %10124 = vmatpush.bf16.msra.mxu1 %v14973_v18  ;;  %v15141_v18 = vor.u32 %v16541_v11, %v15140_v54  ;;  %v12577_v53 = vor.u32 %v15896_v45, %v12574_v28  ;;  %v15842_v11 = vld [vmem:[#allocation48 + $0x104] sm:$0xf]  ;;  %v12502_v28 = vld [vmem:[#allocation48 + $0x238] sm:$0xf0] }
0x13bf   :  { %10097 = vmatpush.bf16.msrb.mxu3 %v14613_v14  ;;  %v9869_v14 = vadd.f32 %v18793_v50, %v9856_v55  ;;  %v15117_v50 = vor.u32 %v16535_v1, %v15116_v6  ;;  %v15986_v45 = vld [vmem:[#allocation48 + $0x584] sm:$0xf]  ;;  %v12934_v55 = vld [vmem:[#allocation48 + $0x598] sm:$0xf0]  ;;  %v15836_v6 = vld [vmem:[#allocation48 + $0xd4] sm:$0xf] }
0x13c0   :  { %10136 = vmatpush.bf16.msra.mxu2 %v15189_v9  ;;  %v15998_v9 = vld [vmem:[#allocation48 + $0x5e4] sm:$0xf] }
0x13c1   :  { %10112 = vmatpush.bf16.msra.mxu0 %v14757_v57  ;;  %v18798_v26 = vadd.f32 %v9881_v15, %v9869_v14  ;;  %v14541_v57 = vor.u32 %v16391_v31, %v14540_v60  ;;  %v15932_v15 = vld [vmem:[#allocation48 + $0x3d4] sm:$0xf]  ;;  %v12937_v31 = vor.u32 %v15986_v45, %v12934_v55  ;;  %v12334_v14 = vld [vmem:[#allocation48 + $0xe8] sm:$0xf0] }
0x13c2   :  { %10125 = vmatpush.bf16.msra.mxu1 %v14949_v25  ;;  %v12409_v25 = vor.u32 %v15854_v44, %v12406_v46  ;;  %v15980_v46 = vld [vmem:[#allocation48 + $0x554] sm:$0xf]  ;;  %v12430_v45 = vld [vmem:[#allocation48 + $0x1a8] sm:$0xf0] }
0x13c3   :  { %10098 = vmatpush.bf16.msrb.mxu3 %v14589_v38  ;;  %v12985_v38 = vor.u32 %v15998_v9, %v12982_v0  ;;  %v15872_v0 = vld [vmem:[#allocation48 + $0x1f4] sm:$0xf] }
0x13c4   :  { %10137 = vmatpush.bf16.msra.mxu2 %v15165_v40  ;;  %v12958_v40 = vld [vmem:[#allocation48 + $0x5c8] sm:$0xf0]  ;;  %v15908_v55 = vld [vmem:[#allocation48 + $0x314] sm:$0xf] }
0x13c5   :  { %10113 = vmatpush.bf16.msra.mxu0 %v14733_v52  ;;  %v12718_v52 = vld [vmem:[#allocation48 + $0x3e8] sm:$0xf0]  ;;  %v12961_v54 = vor.u32 %v15992_v13, %v12958_v40  ;;  %v18804_v60 = vpop.f32.mrf.mxu0  ;;  %v15914_v13 = vld [vmem:[#allocation48 + $0x344] sm:$0xf]  ;;  %v12646_v40 = vld [vmem:[#allocation48 + $0x358] sm:$0xf0] }
0x13c6   :  { %10126 = vmatpush.bf16.msra.mxu1 %v14925_v17  ;;  %v12358_v17 = vld [vmem:[#allocation48 + $0x118] sm:$0xf0]  ;;  %v18806_v1 = vpop.f32.mrf.mxu1 }
0x13c7   :  { %10099 = vmatpush.bf16.msrb.mxu3 %v14565_v22  ;;  %v15878_v22 = vld [vmem:[#allocation48 + $0x224] sm:$0xf]  ;;  %v12361_v61 = vor.u32 %v15842_v11, %v12358_v17  ;;  %v12862_v11 = vld [vmem:[#allocation48 + $0x508] sm:$0xf0]  ;;  %v15860_v17 = vld [vmem:[#allocation48 + $0x194] sm:$0xf] }
0x13c8   :  { %10138 = vmatpush.bf16.msra.mxu2 %v15141_v18  ;;  %10114 = vmatmul.bf16.vlgmr.msra.gmra.mxu0 %v18599_v12  ;;  %v12694_v18 = vld [vmem:[#allocation48 + $0x3b8] sm:$0xf0]  ;;  %v12505_v44 = vor.u32 %v15878_v22, %v12502_v28  ;;  %v16094_v28 = vld [vmem:[#allocation48 + $0x8e4] sm:$0xf] }
0x13c9   :  { %10158 = vmatpush.bf16.msrb.mxu0 %v12601_v36  ;;  %10127 = vmatmul.bf16.vlgmr.msra.gmra.mxu1 %v18601_v34  ;;  %v12529_v36 = vor.u32 %v15884_v43, %v12526_v29  ;;  %v12697_v9 = vor.u32 %v15926_v24, %v12694_v18  ;;  %v12889_v43 = vor.u32 %v15974_v4, %v12886_v7  ;;  %v15824_v29 = vld [vmem:[#allocation48 + $0x74] sm:$0xf]  ;;  %v16142_v24 = vld [vmem:[#allocation48 + $0xa64] sm:$0xf]  ;;  %v13534_v7 = vld [vmem:[#allocation48 + $0xa48] sm:$0xf0] }
0x13ca   :  { %10171 = vmatpush.bf16.msrb.mxu1 %v12793_v10  ;;  %v12721_v10 = vor.u32 %v15932_v15, %v12718_v52  ;;  %v12457_v52 = vor.u32 %v15866_v56, %v12454_v20  ;;  %v16136_v4 = vld [vmem:[#allocation48 + $0xa34] sm:$0xf]  ;;  %v12238_v56 = vld [vmem:[#allocation48 + $0x28] sm:$0xf0] }
0x13cb   :  { %10100 = vmatpush.bf16.msrb.mxu3 %v14541_v57  ;;  %v12337_v57 = vor.u32 %v15836_v6, %v12334_v14  ;;  %v13558_v6 = vld [vmem:[#allocation48 + $0xa78] sm:$0xf0]  ;;  %v15818_v14 = vld [vmem:[#allocation48 + $0x44] sm:$0xf]  ;;  %v15956_v20 = vld [vmem:[#allocation48 + $0x494] sm:$0xf] }
0x13cc   :  { %10139 = vmatpush.bf16.msra.mxu2 %v15117_v50  ;;  %v15830_v50 = vld [vmem:[#allocation48 + $0xa4] sm:$0xf] }
0x13cd   :  { %10159 = vmatpush.bf16.msrb.mxu0 %v12577_v53  ;;  %v12910_v53 = vld [vmem:[#allocation48 + $0x568] sm:$0xf0] }
0x13ce   :  { %10172 = vmatpush.bf16.msrb.mxu1 %v12769_v5  ;;  %10101 = vmatmul.bf16.vlgmr.msrb.gmra.mxu3 %v18605_v59  ;;  %v12478_v5 = vld [vmem:[#allocation48 + $0x208] sm:$0xf0]  ;;  %v12913_v49 = vor.u32 %v15980_v46, %v12910_v53  ;;  %v9922_v15 = vpop.f32.mrf.mxu1 }
0x13cf   :  { %10145 = vmatpush.bf16.msra.mxu3 %v12409_v25  ;;  %10140 = vmatmul.bf16.vlgmr.msra.gmra.mxu2 %v18607_v8  ;;  %v12310_v25 = vld [vmem:[#allocation48 + $0xb8] sm:$0xf0]  ;;  %v12481_v3 = vor.u32 %v15872_v0, %v12478_v5  ;;  %v15962_v0 = vld [vmem:[#allocation48 + $0x4c4] sm:$0xf]  ;;  %v13537_v15 = vor.u32 %v16136_v4, %v13534_v7 }
0x13d0   :  { %10184 = vmatpush.bf16.msrb.mxu2 %v12985_v38  ;;  %v12673_v38 = vor.u32 %v15920_v30, %v12670_v19  ;;  %v12838_v5 = vld [vmem:[#allocation48 + $0x4d8] sm:$0xf0]  ;;  %v16088_v19 = vld [vmem:[#allocation48 + $0x8b4] sm:$0xf] }
0x13d1   :  { %10160 = vmatpush.bf16.msrb.mxu0 %v12553_v35  ;;  %v12313_v35 = vor.u32 %v15830_v50, %v12310_v25  ;;  %v9894_v18 = vpop.f32.mrf.mxu3  ;;  %v13561_v50 = vor.u32 %v16142_v24, %v13558_v6  ;;  %v13462_v4 = vld [vmem:[#allocation48 + $0x9b8] sm:$0xf0] }
0x13d2   :  { %10173 = vmatpush.bf16.msrb.mxu1 %v12745_v33  ;;  %v9909_v33 = vpop.f32.mrf.mxu0  ;;  %v9895_v46 = vadd.f32 %v9894_v18, %v18798_v26  ;;  %v9933_v53 = vpop.f32.mrf.mxu2  ;;  %v15812_v26 = vld [vmem:[#allocation48 + $0x14] sm:$0xf] }
0x13d3   :  { %10146 = vmatpush.bf16.msra.mxu3 %v12385_v2  ;;  %v12286_v2 = vld [vmem:[#allocation48 + $0x88] sm:$0xf0]  ;;  %v13174_v33 = vld [vmem:[#allocation48 + $0x778] sm:$0xf0]  ;;  %v16184_v18 = vld [vmem:[#allocation48 + $0xbb4] sm:$0xf] }
0x13d4   :  { %10185 = vmatpush.bf16.msrb.mxu2 %v12961_v54  ;;  %v15968_v54 = vld [vmem:[#allocation48 + $0x4f4] sm:$0xf]  ;;  %v12289_v22 = vor.u32 %v15824_v29, %v12286_v2  ;;  %v13750_v29 = vld [vmem:[#allocation48 + $0xbf8] sm:$0xf0] }
0x13d5   :  { %10161 = vmatpush.bf16.msrb.mxu0 %v12529_v36  ;;  %v12649_v36 = vor.u32 %v15914_v13, %v12646_v40  ;;  %v12814_v13 = vld [vmem:[#allocation48 + $0x4a8] sm:$0xf0]  ;;  %v16046_v40 = vld [vmem:[#allocation48 + $0x764] sm:$0xf] }
0x13d6   :  { %10174 = vmatpush.bf16.msrb.mxu1 %v12721_v10  ;;  %v12622_v10 = vld [vmem:[#allocation48 + $0x328] sm:$0xf0] }
0x13d7   :  { %10147 = vmatpush.bf16.msra.mxu3 %v12361_v61  ;;  %v13366_v61 = vld [vmem:[#allocation48 + $0x8f8] sm:$0xf0] }
0x13d8   :  { %10186 = vmatpush.bf16.msrb.mxu2 %v12937_v31  ;;  %v12865_v31 = vor.u32 %v15968_v54, %v12862_v11  ;;  %v13369_v30 = vor.u32 %v16094_v28, %v13366_v61  ;;  %v16082_v54 = vld [vmem:[#allocation48 + $0x884] sm:$0xf]  ;;  %v13318_v11 = vld [vmem:[#allocation48 + $0x898] sm:$0xf0]  ;;  %v16040_v28 = vld [vmem:[#allocation48 + $0x734] sm:$0xf] }
0x13d9   :  { %10162 = vmatpush.bf16.msrb.mxu0 %v12505_v44  ;;  %v12262_v44 = vld [vmem:[#allocation48 + $0x58] sm:$0xf0]  ;;  %v13150_v61 = vld [vmem:[#allocation48 + $0x748] sm:$0xf0]  ;;  %v13321_v24 = vor.u32 %v16082_v54, %v13318_v11 }
0x13da   :  { %10175 = vmatpush.bf16.msrb.mxu1 %v12697_v9  ;;  %v12433_v9 = vor.u32 %v15860_v17, %v12430_v45  ;;  %v12265_v25 = vor.u32 %v15818_v14, %v12262_v44  ;;  %v9896_v17 = vpop.f32.mrf.mxu3  ;;  %v16130_v45 = vld [vmem:[#allocation48 + $0xa04] sm:$0xf]  ;;  %v16076_v14 = vld [vmem:[#allocation48 + $0x854] sm:$0xf]  ;;  %v13294_v44 = vld [vmem:[#allocation48 + $0x868] sm:$0xf0] }
0x13db   :  { %10148 = vmatpush.bf16.msra.mxu3 %v12337_v57  ;;  %v12625_v57 = vor.u32 %v15908_v55, %v12622_v10  ;;  %v13510_v55 = vld [vmem:[#allocation48 + $0xa18] sm:$0xf0]  ;;  %v9935_v10 = vpop.f32.mrf.mxu2  ;;  %v16166_v17 = vld [vmem:[#allocation48 + $0xb24] sm:$0xf] }
0x13dc   :  { %10187 = vmatpush.bf16.msrb.mxu2 %v12913_v49  ;;  %v9908_v49 = vadd.f32 %v18804_v60, %v9895_v46  ;;  %v13513_v6 = vor.u32 %v16130_v45, %v13510_v55  ;;  %v16124_v46 = vld [vmem:[#allocation48 + $0x9d4] sm:$0xf]  ;;  %v13078_v54 = vld [vmem:[#allocation48 + $0x6b8] sm:$0xf0]  ;;  %v16058_v45 = vld [vmem:[#allocation48 + $0x7c4] sm:$0xf] }
0x13dd   :  { %10163 = vmatpush.bf16.msrb.mxu0 %v12481_v3  ;;  %v13342_v3 = vld [vmem:[#allocation48 + $0x8c8] sm:$0xf0]  ;;  %v13222_v55 = vld [vmem:[#allocation48 + $0x7d8] sm:$0xf0] }
0x13de   :  { %10176 = vmatpush.bf16.msrb.mxu1 %v12673_v38  ;;  %v12841_v38 = vor.u32 %v15962_v0, %v12838_v5  ;;  %v13345_v60 = vor.u32 %v16088_v19, %v13342_v3  ;;  %v13126_v0 = vld [vmem:[#allocation48 + $0x718] sm:$0xf0]  ;;  %v13297_v5 = vor.u32 %v16076_v14, %v13294_v44  ;;  %v16118_v3 = vld [vmem:[#allocation48 + $0x9a4] sm:$0xf]  ;;  %v13054_v14 = vld [vmem:[#allocation48 + $0x688] sm:$0xf0] }
0x13df   :  { %10149 = vmatpush.bf16.msra.mxu3 %v12313_v35  ;;  %v9921_v35 = vadd.f32 %v18806_v1, %v9908_v49  ;;  %v12817_v1 = vor.u32 %v15956_v20, %v12814_v13  ;;  %v16070_v49 = vld [vmem:[#allocation48 + $0x824] sm:$0xf]  ;;  %v13465_v13 = vor.u32 %v16118_v3, %v13462_v4  ;;  %v14326_v4 = vld [vmem:[#allocation48 + $0x1078] sm:$0xf0] }
0x13e0   :  { %10188 = vmatpush.bf16.msrb.mxu2 %v12889_v43  ;;  %v16190_v43 = vld [vmem:[#allocation48 + $0xbe4] sm:$0xf] }
0x13e1   :  { %10164 = vmatpush.bf16.msrb.mxu0 %v12457_v52  ;;  %v18811_v2 = vadd.f32 %v9933_v53, %v9921_v35  ;;  %v12241_v52 = vor.u32 %v15812_v26, %v12238_v56  ;;  %v13486_v53 = vld [vmem:[#allocation48 + $0x9e8] sm:$0xf0]  ;;  %v16028_v26 = vld [vmem:[#allocation48 + $0x6d4] sm:$0xf] }
0x13e2   :  { %10177 = vmatpush.bf16.msrb.mxu1 %v12649_v36  ;;  %v13177_v36 = vor.u32 %v16046_v40, %v13174_v33  ;;  %v13489_v19 = vor.u32 %v16124_v46, %v13486_v53  ;;  %v16172_v35 = vld [vmem:[#allocation48 + $0xb54] sm:$0xf]  ;;  %v13246_v33 = vld [vmem:[#allocation48 + $0x808] sm:$0xf0] }
0x13e3   :  { %10150 = vmatpush.bf16.msra.mxu3 %v12289_v22  ;;  %v13753_v22 = vor.u32 %v16190_v43, %v13750_v29  ;;  %v16064_v40 = vld [vmem:[#allocation48 + $0x7f4] sm:$0xf]  ;;  %v13438_v29 = vld [vmem:[#allocation48 + $0x988] sm:$0xf0] }
0x13e4   :  { %10189 = vmatpush.bf16.msrb.mxu2 %v12865_v31  ;;  %v13726_v31 = vld [vmem:[#allocation48 + $0xbc8] sm:$0xf0]  ;;  %v16112_v43 = vld [vmem:[#allocation48 + $0x974] sm:$0xf]  ;;  %v13249_v11 = vor.u32 %v16064_v40, %v13246_v33 }
0x13e5   :  { %10165 = vmatpush.bf16.msrb.mxu0 %v12433_v9  ;;  %v13729_v9 = vor.u32 %v16184_v18, %v13726_v31  ;;  %v18817_v7 = vpop.f32.mrf.mxu0  ;;  %v18821_v18 = vld [vmem:[#allocation49] sm:$0x3f]  ;;  %v16160_v46 = vld [vmem:[#allocation48 + $0xaf4] sm:$0xf]  ;;  %v13630_v53 = vld [vmem:[#allocation48 + $0xb08] sm:$0xf0] }
0x13e6   :  { %10178 = vmatpush.bf16.msrb.mxu1 %v12625_v57  ;;  %v16178_v57 = vld [vmem:[#allocation48 + $0xb84] sm:$0xf]  ;;  %v18819_v56 = vpop.f32.mrf.mxu1  ;;  %v5257_v31 = vperm.slane %v18821_v18, 4  ;;  %v13633_v3 = vor.u32 %v16160_v46, %v13630_v53 }
0x13e7   :  { %10151 = vmatpush.bf16.msra.mxu3 %v12265_v25 }
0x13e8   :  { %10190 = vmatpush.bf16.msrb.mxu2 %v12841_v38  ;;  %10166 = vmatmul.bf16.vlgmr.msrb.gmra.mxu0 %v18549_v39  ;;  %v13153_v39 = vor.u32 %v16040_v28, %v13150_v61  ;;  %v13414_v28 = vld [vmem:[#allocation48 + $0x958] sm:$0xf0] }
0x13e9   :  { %10210 = vmatpush.bf16.msra.mxu0 %v13369_v30  ;;  %10179 = vmatmul.bf16.vlgmr.msrb.gmra.mxu1 %v18551_v42  ;;  %v16034_v42 = vld [vmem:[#allocation48 + $0x704] sm:$0xf]  ;;  %v13702_v30 = vld [vmem:[#allocation48 + $0xb98] sm:$0xf0] }
0x13ea   :  { %10223 = vmatpush.bf16.msra.mxu1 %v13561_v50  ;;  %v13270_v50 = vld [vmem:[#allocation48 + $0x838] sm:$0xf0]  ;;  %v13129_v25 = vor.u32 %v16034_v42, %v13126_v0  ;;  %v13705_v38 = vor.u32 %v16178_v57, %v13702_v30  ;;  %v13198_v0 = vld [vmem:[#allocation48 + $0x7a8] sm:$0xf0] }
0x13eb   :  { %10152 = vmatpush.bf16.msra.mxu3 %v12241_v52  ;;  %v13273_v20 = vor.u32 %v16070_v49, %v13270_v50  ;;  %v16022_v52 = vld [vmem:[#allocation48 + $0x6a4] sm:$0xf]  ;;  %v13390_v57 = vld [vmem:[#allocation48 + $0x928] sm:$0xf0]  ;;  %v14134_v49 = vld [vmem:[#allocation48 + $0xef8] sm:$0xf0] }
0x13ec   :  { %10191 = vmatpush.bf16.msrb.mxu2 %v12817_v1  ;;  %v13654_v1 = vld [vmem:[#allocation48 + $0xb38] sm:$0xf0]  ;;  %v13081_v10 = vor.u32 %v16022_v52, %v13078_v54  ;;  %v16334_v50 = vld [vmem:[#allocation48 + $0x1064] sm:$0xf]  ;;  %v14110_v52 = vld [vmem:[#allocation48 + $0xec8] sm:$0xf0] }
0x13ed   :  { %10211 = vmatpush.bf16.msra.mxu0 %v13345_v60  ;;  %v9961_v61 = vpop.f32.mrf.mxu0  ;;  %v16328_v54 = vld [vmem:[#allocation48 + $0x1034] sm:$0xf] }
0x13ee   :  { %10224 = vmatpush.bf16.msra.mxu1 %v13537_v15  ;;  %10153 = vmatmul.bf16.vlgmr.msra.gmra.mxu3 %v18555_v51  ;;  %v13102_v51 = vld [vmem:[#allocation48 + $0x6e8] sm:$0xf0]  ;;  %v9974_v44 = vpop.f32.mrf.mxu1  ;;  %v16382_v61 = vld [vmem:[#allocation48 + $0x11e4] sm:$0xf] }
0x13ef   :  { %10197 = vmatpush.bf16.msrb.mxu3 %v13177_v36  ;;  %10192 = vmatmul.bf16.vlgmr.msrb.gmra.mxu2 %v18557_v47  ;;  %v13678_v47 = vld [vmem:[#allocation48 + $0xb68] sm:$0xf0]  ;;  %v13105_v60 = vor.u32 %v16028_v26, %v13102_v51  ;;  %v13441_v36 = vor.u32 %v16112_v43, %v13438_v29  ;;  %v13030_v26 = vld [vmem:[#allocation48 + $0x658] sm:$0xf0]  ;;  %v14329_v29 = vor.u32 %v16334_v50, %v14326_v4  ;;  %v16274_v44 = vld [vmem:[#allocation48 + $0xe84] sm:$0xf] }
0x13f0   :  { %10236 = vmatpush.bf16.msra.mxu2 %v13753_v22  ;;  %v13681_v15 = vor.u32 %v16172_v35, %v13678_v47  ;;  %v16106_v22 = vld [vmem:[#allocation48 + $0x944] sm:$0xf]  ;;  %v14494_v50 = vld [vmem:[#allocation48 + $0x11c8] sm:$0xf0] }
0x13f1   :  { %10212 = vmatpush.bf16.msra.mxu0 %v13321_v24  ;;  %v13657_v24 = vor.u32 %v16166_v17, %v13654_v1  ;;  %v13417_v42 = vor.u32 %v16106_v22, %v13414_v28  ;;  %v16154_v47 = vld [vmem:[#allocation48 + $0xac4] sm:$0xf]  ;;  %v16004_v1 = vld [vmem:[#allocation48 + $0x614] sm:$0xf]  ;;  %v13942_v28 = vld [vmem:[#allocation48 + $0xd78] sm:$0xf0] }
0x13f2   :  { %10225 = vmatpush.bf16.msra.mxu1 %v13513_v6  ;;  %v16016_v6 = vld [vmem:[#allocation48 + $0x674] sm:$0xf]  ;;  %v16238_v22 = vld [vmem:[#allocation48 + $0xd64] sm:$0xf]  ;;  %v14062_v4 = vld [vmem:[#allocation48 + $0xe68] sm:$0xf0] }
0x13f3   :  { %10198 = vmatpush.bf16.msrb.mxu3 %v13153_v39  ;;  %v13225_v39 = vor.u32 %v16058_v45, %v13222_v55  ;;  %v13057_v30 = vor.u32 %v16016_v6, %v13054_v14  ;;  %v16148_v45 = vld [vmem:[#allocation48 + $0xa94] sm:$0xf]  ;;  %v13945_v53 = vor.u32 %v16238_v22, %v13942_v28 }
0x13f4   :  { %10237 = vmatpush.bf16.msra.mxu2 %v13729_v9  ;;  %v16052_v9 = vld [vmem:[#allocation48 + $0x794] sm:$0xf] }
0x13f5   :  { %10213 = vmatpush.bf16.msra.mxu0 %v13297_v5  ;;  %v16100_v5 = vld [vmem:[#allocation48 + $0x914] sm:$0xf]  ;;  %v13201_v35 = vor.u32 %v16052_v9, %v13198_v0  ;;  %v16322_v9 = vld [vmem:[#allocation48 + $0x1004] sm:$0xf] }
0x13f6   :  { %10226 = vmatpush.bf16.msra.mxu1 %v13489_v19  ;;  %v16286_v19 = vld [vmem:[#allocation48 + $0xee4] sm:$0xf]  ;;  %v13393_v40 = vor.u32 %v16100_v5, %v13390_v57  ;;  %v16232_v57 = vld [vmem:[#allocation48 + $0xd34] sm:$0xf] }
0x13f7   :  { %10199 = vmatpush.bf16.msrb.mxu3 %v13129_v25  ;;  %v9946_v25 = vpop.f32.mrf.mxu3  ;;  %v14137_v33 = vor.u32 %v16286_v19, %v14134_v49  ;;  %v16376_v49 = vld [vmem:[#allocation48 + $0x11b4] sm:$0xf] }
0x13f8   :  { %10238 = vmatpush.bf16.msra.mxu2 %v13705_v38  ;;  %v16010_v38 = vld [vmem:[#allocation48 + $0x644] sm:$0xf]  ;;  %v9947_v51 = vadd.f32 %v9946_v25, %v5257_v31  ;;  %v16304_v28 = vld [vmem:[#allocation48 + $0xf74] sm:$0xf] }
0x13f9   :  { %10214 = vmatpush.bf16.msra.mxu0 %v13273_v20  ;;  %v9985_v20 = vpop.f32.mrf.mxu2 }
0x13fa   :  { %10227 = vmatpush.bf16.msra.mxu1 %v13465_v13  ;;  %v13606_v13 = vld [vmem:[#allocation48 + $0xad8] sm:$0xf0]  ;;  %v9960_v43 = vadd.f32 %v18817_v7, %v9947_v51  ;;  %v14497_v51 = vor.u32 %v16376_v49, %v14494_v50 }
0x13fb   :  { %10200 = vmatpush.bf16.msrb.mxu3 %v13105_v60  ;;  %v16280_v60 = vld [vmem:[#allocation48 + $0xeb4] sm:$0xf]  ;;  %v13609_v17 = vor.u32 %v16154_v47, %v13606_v13  ;;  %v16370_v47 = vld [vmem:[#allocation48 + $0x1184] sm:$0xf]  ;;  %v14470_v13 = vld [vmem:[#allocation48 + $0x1198] sm:$0xf0] }
0x13fc   :  { %10239 = vmatpush.bf16.msra.mxu2 %v13681_v15  ;;  %v13033_v15 = vor.u32 %v16010_v38, %v13030_v26  ;;  %v9973_v55 = vadd.f32 %v18819_v56, %v9960_v43  ;;  %v14113_v7 = vor.u32 %v16280_v60, %v14110_v52  ;;  %v16316_v38 = vld [vmem:[#allocation48 + $0xfd4] sm:$0xf]  ;;  %v14254_v26 = vld [vmem:[#allocation48 + $0xfe8] sm:$0xf0]  ;;  %v14038_v60 = vld [vmem:[#allocation48 + $0xe38] sm:$0xf0] }
0x13fd   :  { %10215 = vmatpush.bf16.msra.mxu0 %v13249_v11  ;;  %v14302_v11 = vld [vmem:[#allocation48 + $0x1048] sm:$0xf0] }
0x13fe   :  { %10228 = vmatpush.bf16.msra.mxu1 %v13441_v36  ;;  %v13006_v36 = vld [vmem:[#allocation48 + $0x628] sm:$0xf0]  ;;  %v18826_v31 = vadd.f32 %v9985_v20, %v9973_v55  ;;  %v14305_v6 = vor.u32 %v16328_v54, %v14302_v11  ;;  %v13894_v20 = vld [vmem:[#allocation48 + $0xd18] sm:$0xf0]  ;;  %v14473_v54 = vor.u32 %v16370_v47, %v14470_v13  ;;  %v16220_v11 = vld [vmem:[#allocation48 + $0xcd4] sm:$0xf] }
0x13ff   :  { %10201 = vmatpush.bf16.msrb.mxu3 %v13081_v10  ;;  %v13582_v10 = vld [vmem:[#allocation48 + $0xaa8] sm:$0xf0]  ;;  %v13009_v14 = vor.u32 %v16004_v1, %v13006_v36  ;;  %v9948_v46 = vpop.f32.mrf.mxu3  ;;  %v16364_v36 = vld [vmem:[#allocation48 + $0x1154] sm:$0xf]  ;;  %v16526_v47 = vld [vmem:[#allocation48 + $0x1664] sm:$0xf] }
0x1400   :  { %10240 = vmatpush.bf16.msra.mxu2 %v13657_v24  ;;  %v14518_v24 = vld [vmem:[#allocation48 + $0x11f8] sm:$0xf0]  ;;  %v13585_v56 = vor.u32 %v16148_v45, %v13582_v10  ;;  %v16256_v55 = vld [vmem:[#allocation48 + $0xdf4] sm:$0xf]  ;;  %v14014_v10 = vld [vmem:[#allocation48 + $0xe08] sm:$0xf0] }
0x1401   :  { %10216 = vmatpush.bf16.msra.mxu0 %v13225_v39  ;;  %v14086_v39 = vld [vmem:[#allocation48 + $0xe98] sm:$0xf0]  ;;  %v9987_v0 = vpop.f32.mrf.mxu2  ;;  %v14521_v5 = vor.u32 %v16382_v61, %v14518_v24  ;;  %v16214_v24 = vld [vmem:[#allocation48 + $0xca4] sm:$0xf] }
0x1402   :  { %10229 = vmatpush.bf16.msra.mxu1 %v13417_v42  ;;  %v14278_v42 = vld [vmem:[#allocation48 + $0x1018] sm:$0xf0]  ;;  %v14089_v19 = vor.u32 %v16274_v44, %v14086_v39  ;;  %v16358_v44 = vld [vmem:[#allocation48 + $0x1124] sm:$0xf] }
0x1403   :  { %10202 = vmatpush.bf16.msrb.mxu3 %v13057_v30  ;;  %v13918_v30 = vld [vmem:[#allocation48 + $0xd48] sm:$0xf0]  ;;  %v14281_v25 = vor.u32 %v16322_v9, %v14278_v42  ;;  %v14422_v39 = vld [vmem:[#allocation48 + $0x1138] sm:$0xf0]  ;;  %v16298_v42 = vld [vmem:[#allocation48 + $0xf44] sm:$0xf] }
0x1404   :  { %10241 = vmatpush.bf16.msra.mxu2 %v13633_v3  ;;  %v16268_v3 = vld [vmem:[#allocation48 + $0xe54] sm:$0xf]  ;;  %v14182_v0 = vld [vmem:[#allocation48 + $0xf58] sm:$0xf0] }
0x1405   :  { %10217 = vmatpush.bf16.msra.mxu0 %v13201_v35  ;;  %v14065_v35 = vor.u32 %v16268_v3, %v14062_v4  ;;  %v18832_v52 = vpop.f32.mrf.mxu0  ;;  %v14398_v3 = vld [vmem:[#allocation48 + $0x1108] sm:$0xf0]  ;;  %v16244_v4 = vld [vmem:[#allocation48 + $0xd94] sm:$0xf] }
0x1406   :  { %10230 = vmatpush.bf16.msra.mxu1 %v13393_v40  ;;  %v14257_v40 = vor.u32 %v16316_v38, %v14254_v26  ;;  %v13966_v38 = vld [vmem:[#allocation48 + $0xda8] sm:$0xf0]  ;;  %v16292_v26 = vld [vmem:[#allocation48 + $0xf14] sm:$0xf] }
0x1407   :  { %10203 = vmatpush.bf16.msrb.mxu3 %v13033_v15  ;;  %v14230_v15 = vld [vmem:[#allocation48 + $0xfb8] sm:$0xf0] }
0x1408   :  { %10242 = vmatpush.bf16.msra.mxu2 %v13609_v17  ;;  %10218 = vmatmul.bf16.vlgmr.msra.gmra.mxu0 %v18565_v41  ;;  %v13921_v41 = vor.u32 %v16232_v57, %v13918_v30  ;;  %v18834_v17 = vpop.f32.mrf.mxu1  ;;  %v14425_v57 = vor.u32 %v16358_v44, %v14422_v39  ;;  %v16208_v30 = vld [vmem:[#allocation48 + $0xc74] sm:$0xf]  ;;  %v14350_v44 = vld [vmem:[#allocation48 + $0x10a8] sm:$0xf0]  ;;  %v16430_v39 = vld [vmem:[#allocation48 + $0x1364] sm:$0xf] }
0x1409   :  { %10262 = vmatpush.bf16.msrb.mxu0 %v14137_v33  ;;  %10231 = vmatmul.bf16.vlgmr.msra.gmra.mxu1 %v18567_v16  ;;  %v16226_v16 = vld [vmem:[#allocation48 + $0xd04] sm:$0xf] }
0x140a   :  { %10275 = vmatpush.bf16.msrb.mxu1 %v14329_v29  ;;  %v16262_v33 = vld [vmem:[#allocation48 + $0xe24] sm:$0xf]  ;;  %v13897_v43 = vor.u32 %v16226_v16, %v13894_v20 }
0x140b   :  { %10204 = vmatpush.bf16.msrb.mxu3 %v13009_v14  ;;  %v16310_v29 = vld [vmem:[#allocation48 + $0xfa4] sm:$0xf]  ;;  %v14041_v1 = vor.u32 %v16262_v33, %v14038_v60  ;;  %v14017_v14 = vor.u32 %v16256_v55, %v14014_v10  ;;  %v15094_v33 = vld [vmem:[#allocation48 + $0x1678] sm:$0xf0] }
0x140c   :  { %10243 = vmatpush.bf16.msra.mxu2 %v13585_v56  ;;  %v14233_v45 = vor.u32 %v16310_v29, %v14230_v15  ;;  %v16250_v56 = vld [vmem:[#allocation48 + $0xdc4] sm:$0xf]  ;;  %v15097_v55 = vor.u32 %v16526_v47, %v15094_v33  ;;  %v16508_v47 = vld [vmem:[#allocation48 + $0x15d4] sm:$0xf]  ;;  %v14662_v33 = vld [vmem:[#allocation48 + $0x1318] sm:$0xf0] }
0x140d   :  { %10263 = vmatpush.bf16.msrb.mxu0 %v14113_v7  ;;  %v14206_v7 = vld [vmem:[#allocation48 + $0xf88] sm:$0xf0]  ;;  %v16478_v20 = vld [vmem:[#allocation48 + $0x14e4] sm:$0xf] }
0x140e   :  { %10276 = vmatpush.bf16.msrb.mxu1 %v14305_v6  ;;  %10205 = vmatmul.bf16.vlgmr.msrb.gmra.mxu3 %v18573_v32  ;;  %v13870_v32 = vld [vmem:[#allocation48 + $0xce8] sm:$0xf0]  ;;  %v13846_v6 = vld [vmem:[#allocation48 + $0xcb8] sm:$0xf0]  ;;  %v14209_v46 = vor.u32 %v16304_v28, %v14206_v7  ;;  %v16202_v60 = vld [vmem:[#allocation48 + $0xc44] sm:$0xf] }
0x140f   :  { %10249 = vmatpush.bf16.msra.mxu3 %v13945_v53  ;;  %10244 = vmatmul.bf16.vlgmr.msra.gmra.mxu2 %v18576_v23  ;;  %v14446_v23 = vld [vmem:[#allocation48 + $0x1168] sm:$0xf0]  ;;  %v13873_v22 = vor.u32 %v16220_v11, %v13870_v32  ;;  %v13990_v53 = vld [vmem:[#allocation48 + $0xdd8] sm:$0xf0]  ;;  %v13849_v9 = vor.u32 %v16214_v24, %v13846_v6  ;;  %v16346_v11 = vld [vmem:[#allocation48 + $0x10c4] sm:$0xf] }
0x1410   :  { %10288 = vmatpush.bf16.msrb.mxu2 %v14521_v5  ;;  %v14449_v61 = vor.u32 %v16364_v36, %v14446_v23  ;;  %v10013_v5 = vpop.f32.mrf.mxu0  ;;  %v10026_v49 = vpop.f32.mrf.mxu1  ;;  %v13993_v50 = vor.u32 %v16250_v56, %v13990_v53  ;;  %v14374_v32 = vld [vmem:[#allocation48 + $0x10d8] sm:$0xf0]  ;;  %v16472_v23 = vld [vmem:[#allocation48 + $0x14b4] sm:$0xf]  ;;  %v15070_v7 = vld [vmem:[#allocation48 + $0x1648] sm:$0xf0] }
0x1411   :  { %10264 = vmatpush.bf16.msrb.mxu0 %v14089_v19  ;;  %v13822_v19 = vld [vmem:[#allocation48 + $0xc88] sm:$0xf0]  ;;  %v9998_v13 = vpop.f32.mrf.mxu3  ;;  %v16520_v28 = vld [vmem:[#allocation48 + $0x1634] sm:$0xf]  ;;  %v16574_v56 = vld [vmem:[#allocation48 + $0x17e4] sm:$0xf] }
0x1412   :  { %10277 = vmatpush.bf16.msrb.mxu1 %v14281_v25  ;;  %v16352_v25 = vld [vmem:[#allocation48 + $0x10f4] sm:$0xf]  ;;  %v13825_v16 = vor.u32 %v16208_v30, %v13822_v19  ;;  %v9999_v29 = vadd.f32 %v9998_v13, %v18826_v31  ;;  %v10037_v15 = vpop.f32.mrf.mxu2  ;;  %v13774_v24 = vld [vmem:[#allocation48 + $0xc28] sm:$0xf0]  ;;  %v15286_v53 = vld [vmem:[#allocation48 + $0x17f8] sm:$0xf0] }
0x1413   :  { %10250 = vmatpush.bf16.msra.mxu3 %v13921_v41  ;;  %v14185_v41 = vor.u32 %v16298_v42, %v14182_v0  ;;  %v16196_v31 = vld [vmem:[#allocation48 + $0xc14] sm:$0xf]  ;;  %v15073_v42 = vor.u32 %v16520_v28, %v15070_v7  ;;  %v16466_v5 = vld [vmem:[#allocation48 + $0x1484] sm:$0xf]  ;;  %v15022_v13 = vld [vmem:[#allocation48 + $0x15e8] sm:$0xf0] }
0x1414   :  { %10289 = vmatpush.bf16.msrb.mxu2 %v14497_v51  ;;  %v14158_v51 = vld [vmem:[#allocation48 + $0xf28] sm:$0xf0]  ;;  %v16340_v6 = vld [vmem:[#allocation48 + $0x1094] sm:$0xf]  ;;  %v13777_v0 = vor.u32 %v16196_v31, %v13774_v24  ;;  %v16514_v49 = vld [vmem:[#allocation48 + $0x1604] sm:$0xf] }
0x1415   :  { %10265 = vmatpush.bf16.msrb.mxu0 %v14065_v35  ;;  %v14902_v35 = vld [vmem:[#allocation48 + $0x14f8] sm:$0xf0]  ;;  %v16556_v28 = vld [vmem:[#allocation48 + $0x1754] sm:$0xf]  ;;  %v14782_v31 = vld [vmem:[#allocation48 + $0x1408] sm:$0xf0] }
0x1416   :  { %10278 = vmatpush.bf16.msrb.mxu1 %v14257_v40  ;;  %v14401_v40 = vor.u32 %v16352_v25, %v14398_v3  ;;  %v14905_v36 = vor.u32 %v16478_v20, %v14902_v35  ;;  %v15289_v3 = vor.u32 %v16574_v56, %v15286_v53  ;;  %v16460_v20 = vld [vmem:[#allocation48 + $0x1454] sm:$0xf]  ;;  %v14830_v35 = vld [vmem:[#allocation48 + $0x1468] sm:$0xf0]  ;;  %v16550_v56 = vld [vmem:[#allocation48 + $0x1724] sm:$0xf] }
0x1417   :  { %10251 = vmatpush.bf16.msra.mxu3 %v13897_v43  ;;  %v13798_v43 = vld [vmem:[#allocation48 + $0xc58] sm:$0xf0] }
0x1418   :  { %10290 = vmatpush.bf16.msrb.mxu2 %v14473_v54  ;;  %v13969_v54 = vor.u32 %v16244_v4, %v13966_v38  ;;  %v13801_v10 = vor.u32 %v16202_v60, %v13798_v43  ;;  %v16424_v4 = vld [vmem:[#allocation48 + $0x1334] sm:$0xf]  ;;  %v14833_v60 = vor.u32 %v16460_v20, %v14830_v35  ;;  %v16562_v43 = vld [vmem:[#allocation48 + $0x1784] sm:$0xf]  ;;  %v15190_v53 = vld [vmem:[#allocation48 + $0x1738] sm:$0xf0] }
0x1419   :  { %10266 = vmatpush.bf16.msrb.mxu0 %v14041_v1  ;;  %v14161_v1 = vor.u32 %v16292_v26, %v14158_v51  ;;  %v10000_v30 = vpop.f32.mrf.mxu3  ;;  %v16568_v26 = vld [vmem:[#allocation48 + $0x17b4] sm:$0xf]  ;;  %v15262_v51 = vld [vmem:[#allocation48 + $0x17c8] sm:$0xf0] }
0x141a   :  { %10279 = vmatpush.bf16.msrb.mxu1 %v14233_v45  ;;  %v10012_v45 = vadd.f32 %v18832_v52, %v9999_v29  ;;  %v10039_v25 = vpop.f32.mrf.mxu2  ;;  %v15238_v29 = vld [vmem:[#allocation48 + $0x1798] sm:$0xf0]  ;;  %v16490_v30 = vld [vmem:[#allocation48 + $0x1544] sm:$0xf]  ;;  %v16484_v35 = vld [vmem:[#allocation48 + $0x1514] sm:$0xf] }
0x141b   :  { %10252 = vmatpush.bf16.msra.mxu3 %v13873_v22  ;;  %v14878_v22 = vld [vmem:[#allocation48 + $0x14c8] sm:$0xf0] }
0x141c   :  { %10291 = vmatpush.bf16.msrb.mxu2 %v14449_v61  ;;  %v14377_v61 = vor.u32 %v16346_v11, %v14374_v32  ;;  %v14881_v52 = vor.u32 %v16472_v23, %v14878_v22  ;;  %v14806_v11 = vld [vmem:[#allocation48 + $0x1438] sm:$0xf0]  ;;  %v14590_v25 = vld [vmem:[#allocation48 + $0x1288] sm:$0xf0] }
0x141d   :  { %10267 = vmatpush.bf16.msrb.mxu0 %v14017_v14  ;;  %v10025_v14 = vadd.f32 %v18834_v17, %v10012_v45  ;;  %v14353_v17 = vor.u32 %v16340_v6, %v14350_v44  ;;  %v15241_v45 = vor.u32 %v16562_v43, %v15238_v29  ;;  %v16496_v6 = vld [vmem:[#allocation48 + $0x1574] sm:$0xf]  ;;  %v16538_v29 = vld [vmem:[#allocation48 + $0x16c4] sm:$0xf] }
0x141e   :  { %10280 = vmatpush.bf16.msrb.mxu1 %v14209_v46  ;;  %v14710_v46 = vld [vmem:[#allocation48 + $0x1378] sm:$0xf0] }
0x141f   :  { %10253 = vmatpush.bf16.msra.mxu3 %v13849_v9  ;;  %v18839_v9 = vadd.f32 %v10037_v15, %v10025_v14  ;;  %v14713_v19 = vor.u32 %v16430_v39, %v14710_v46  ;;  %v15025_v15 = vor.u32 %v16508_v47, %v15022_v13  ;;  %v14974_v14 = vld [vmem:[#allocation48 + $0x1588] sm:$0xf0]  ;;  %v16406_v39 = vld [vmem:[#allocation48 + $0x12a4] sm:$0xf]  ;;  %v14614_v46 = vld [vmem:[#allocation48 + $0x12b8] sm:$0xf0] }
0x1420   :  { %10292 = vmatpush.bf16.msrb.mxu2 %v14425_v57  ;;  %v14854_v57 = vld [vmem:[#allocation48 + $0x1498] sm:$0xf0] }
0x1421   :  { %10268 = vmatpush.bf16.msrb.mxu0 %v13993_v50  ;;  %v15046_v50 = vld [vmem:[#allocation48 + $0x1618] sm:$0xf0]  ;;  %v14857_v38 = vor.u32 %v16466_v5, %v14854_v57  ;;  %v14617_v57 = vor.u32 %v16406_v39, %v14614_v46 }
0x1422   :  { %10281 = vmatpush.bf16.msrb.mxu1 %v14185_v41  ;;  %v14686_v41 = vld [vmem:[#allocation48 + $0x1348] sm:$0xf0]  ;;  %v14758_v5 = vld [vmem:[#allocation48 + $0x13d8] sm:$0xf0] }
0x1423   :  { %10254 = vmatpush.bf16.msra.mxu3 %v13825_v16  ;;  %v15049_v16 = vor.u32 %v16514_v49, %v15046_v50  ;;  %v15193_v49 = vor.u32 %v16550_v56, %v15190_v53  ;;  %v16400_v50 = vld [vmem:[#allocation48 + $0x1274] sm:$0xf] }
0x1424   :  { %10293 = vmatpush.bf16.msrb.mxu2 %v14401_v40  ;;  %v15265_v40 = vor.u32 %v16568_v26, %v15262_v51  ;;  %v16436_v51 = vld [vmem:[#allocation48 + $0x1394] sm:$0xf]  ;;  %v14593_v20 = vor.u32 %v16400_v50, %v14590_v25 }
0x1425   :  { %10269 = vmatpush.bf16.msrb.mxu0 %v13969_v54  ;;  %v16454_v54 = vld [vmem:[#allocation48 + $0x1424] sm:$0xf]  ;;  %v18845_v23 = vpop.f32.mrf.mxu0  ;;  %v16584_v39 = vld [vmem:[#allocation51 + $0x30] sm:$0xff]  ;;  %v16607_v53 = vld [vmem:[#allocation51 + $0xe8] sm:$0xff] }
0x1426   :  { %10282 = vmatpush.bf16.msrb.mxu1 %v14161_v1  ;;  %v16502_v1 = vld [vmem:[#allocation48 + $0x15a4] sm:$0xf]  ;;  %v14809_v22 = vor.u32 %v16454_v54, %v14806_v11  ;;  %v16608_v46 = vld [vmem:[#allocation51 + $0xf0] sm:$0xff]  ;;  %v16587_v25 = vld [vmem:[#allocation51 + $0x48] sm:$0xff] }
0x1427   :  { %10255 = vmatpush.bf16.msra.mxu3 %v13801_v10  ;;  %v18847_v10 = vpop.f32.mrf.mxu1  ;;  %v16593_v11 = vld [vmem:[#allocation51 + $0x78] sm:$0xff] }
0x1428   :  { %10294 = vmatpush.bf16.msrb.mxu2 %v14377_v61  ;;  %10270 = vmatmul.bf16.vlgmr.msrb.gmra.mxu0 %v18583_v63  ;;  %v14689_v63 = vor.u32 %v16424_v4, %v14686_v41  ;;  %v16448_v61 = vld [vmem:[#allocation48 + $0x13f4] sm:$0xf] }
0x1429   :  { %10314 = vmatpush.bf16.msra.mxu0 %v14905_v36  ;;  %10283 = vmatmul.bf16.vlgmr.msrb.gmra.mxu1 %v18585_v37  ;;  %v16418_v37 = vld [vmem:[#allocation48 + $0x1304] sm:$0xf]  ;;  %v14998_v36 = vld [vmem:[#allocation48 + $0x15b8] sm:$0xf0]  ;;  %v16544_v41 = vld [vmem:[#allocation48 + $0x16f4] sm:$0xf] }
0x142a   :  { %10327 = vmatpush.bf16.msra.mxu1 %v15097_v55  ;;  %v14665_v32 = vor.u32 %v16418_v37, %v14662_v33  ;;  %v16412_v55 = vld [vmem:[#allocation48 + $0x12d4] sm:$0xf]  ;;  %v15001_v7 = vor.u32 %v16502_v1, %v14998_v36  ;;  %v14566_v37 = vld [vmem:[#allocation48 + $0x1258] sm:$0xf0] }
0x142b   :  { %10256 = vmatpush.bf16.msra.mxu3 %v13777_v0  ;;  %v16442_v0 = vld [vmem:[#allocation48 + $0x13c4] sm:$0xf] }
0x142c   :  { %10295 = vmatpush.bf16.msrb.mxu2 %v14353_v17  ;;  %v14950_v17 = vld [vmem:[#allocation48 + $0x1558] sm:$0xf0]  ;;  %v14761_v4 = vor.u32 %v16442_v0, %v14758_v5 }
0x142d   :  { %10315 = vmatpush.bf16.msra.mxu0 %v14881_v52  ;;  %v14785_v52 = vor.u32 %v16448_v61, %v14782_v31  ;;  %v14953_v26 = vor.u32 %v16490_v30, %v14950_v17  ;;  %v16601_v1 = vld [vmem:[#allocation51 + $0xb8] sm:$0xff]  ;;  %v16596_v30 = vld [vmem:[#allocation51 + $0x90] sm:$0xff] }
0x142e   :  { %10328 = vmatpush.bf16.msra.mxu1 %v15073_v42  ;;  %10257 = vmatmul.bf16.vlgmr.msra.gmra.mxu3 %v18589_v27  ;;  %v14638_v27 = vld [vmem:[#allocation48 + $0x12e8] sm:$0xf0]  ;;  %v14977_v42 = vor.u32 %v16496_v6, %v14974_v14  ;;  %v16589_v0 = vld [vmem:[#allocation51 + $0x58] sm:$0xff] }
0x142f   :  { %10301 = vmatpush.bf16.msrb.mxu3 %v14713_v19  ;;  %10296 = vmatmul.bf16.vlgmr.msrb.gmra.mxu2 %v18591_v48  ;;  %v15214_v48 = vld [vmem:[#allocation48 + $0x1768] sm:$0xf0]  ;;  %v14641_v24 = vor.u32 %v16412_v55, %v14638_v27  ;;  %v10065_v19 = vpop.f32.mrf.mxu0  ;;  %v16388_v55 = vld [vmem:[#allocation48 + $0x1214] sm:$0xf]  ;;  %v16597_v5 = vld [vmem:[#allocation51 + $0x98] sm:$0xff] }
0x1430   :  { %10340 = vmatpush.bf16.msra.mxu2 %v15289_v3  ;;  %v15217_v44 = vor.u32 %v16556_v28, %v15214_v48  ;;  %v10078_v3 = vpop.f32.mrf.mxu1  ;;  %v14542_v27 = vld [vmem:[#allocation48 + $0x1228] sm:$0xf0]  ;;  %v16592_v48 = vld [vmem:[#allocation51 + $0x70] sm:$0xff]  ;;  %v16581_v17 = vld [vmem:[#allocation51 + $0x18] sm:$0xff] }
0x1431   :  { %10316 = vmatpush.bf16.msra.mxu0 %v14857_v38  ;;  %v15166_v38 = vld [vmem:[#allocation48 + $0x1708] sm:$0xf0]  ;;  %v10050_v47 = vpop.f32.mrf.mxu3 }
0x1432   :  { %10329 = vmatpush.bf16.msra.mxu1 %v15049_v16  ;;  %v14734_v16 = vld [vmem:[#allocation48 + $0x13a8] sm:$0xf0]  ;;  %v15169_v13 = vor.u32 %v16544_v41, %v15166_v38  ;;  %v10051_v33 = vadd.f32 %v10050_v47, %v18839_v9  ;;  %v16604_v38 = vld [vmem:[#allocation51 + $0xd0] sm:$0xff] }
0x1433   :  { %10302 = vmatpush.bf16.msrb.mxu3 %v14689_v63  ;;  %v14926_v63 = vld [vmem:[#allocation48 + $0x1528] sm:$0xf0]  ;;  %v14737_v43 = vor.u32 %v16436_v51, %v14734_v16  ;;  %v10354_v16 = vmax.f32 %v18709_v21, 0.0 }
0x1434   :  { %10341 = vmatpush.bf16.msra.mxu2 %v15265_v40  ;;  %v16394_v40 = vld [vmem:[#allocation48 + $0x1244] sm:$0xf]  ;;  %v14929_v54 = vor.u32 %v16484_v35, %v14926_v63  ;;  %v15118_v28 = vld [vmem:[#allocation48 + $0x16a8] sm:$0xf0]  ;;  %v10355_v35 = vmax.f32 %v18760_v62, 0.0 }
0x1435   :  { %10317 = vmatpush.bf16.msra.mxu0 %v14833_v60  ;;  %v18850_v60 = vpop.f32.mrf.mxu2  ;;  %v14569_v36 = vor.u32 %v16394_v40, %v14566_v37  ;;  %v16591_v14 = vld [vmem:[#allocation51 + $0x68] sm:$0xff]  ;;  %v16586_v51 = vld [vmem:[#allocation51 + $0x40] sm:$0xff] }
0x1436   :  { %10330 = vmatpush.bf16.msra.mxu1 %v15025_v15  ;;  %v15142_v15 = vld [vmem:[#allocation48 + $0x16d8] sm:$0xf0]  ;;  %v16595_v3 = vld [vmem:[#allocation51 + $0x88] sm:$0xff]  ;;  %v10361_v40 = vpack.c.bf16 %v10355_v35, %v10355_v35  ;;  %v16578_v37 = vld [vmem:[#allocation51] sm:$0xff] }
0x1437   :  { %10303 = vmatpush.bf16.msrb.mxu3 %v14665_v32  ;;  %v10064_v32 = vadd.f32 %v18845_v23, %v10051_v33  ;;  %v14545_v23 = vor.u32 %v16388_v55, %v14542_v27  ;;  %v16579_v63 = vld [vmem:[#allocation51 + $0x8] sm:$0xff]  ;;  %v10353_v33 = vmax.f32 %v18657_v58, 0.0  ;;  %v16602_v21 = vld [vmem:[#allocation51 + $0xc0] sm:$0xff]  ;;  %v16613_v27 = vld [vmem:[#allocation51 + $0x118] sm:$0xff] }
0x1438   :  { %10342 = vmatpush.bf16.msra.mxu2 %v15241_v45  ;;  %v15145_v45 = vor.u32 %v16538_v29, %v15142_v15  ;;  %v16603_v47 = vld [vmem:[#allocation51 + $0xc8] sm:$0xff]  ;;  %v16617_v29 = vld [vmem:[#allocation51 + $0x138] sm:$0xff]  ;;  %v10356_v15 = vmax.f32 %v18811_v2, 0.0  ;;  %v16614_v55 = vld [vmem:[#allocation51 + $0x120] sm:$0xff] }
0x1439   :  { %10318 = vmatpush.bf16.msra.mxu0 %v14809_v22  ;;  %v18854_v9 = vadd.f32 %v18847_v10, %v10064_v32  ;;  %v16532_v22 = vld [vmem:[#allocation48 + $0x1694] sm:$0xf]  ;;  %v10052_v61 = vpop.f32.mrf.mxu3  ;;  %v16609_v10 = vld [vmem:[#allocation51 + $0xf8] sm:$0xff]  ;;  %v16618_v35 = vld [vmem:[#allocation51 + $0x140] sm:$0xff] }
0x143a   :  { %10331 = vmatpush.bf16.msra.mxu1 %v15001_v7  ;;  %v16600_v7 = vld [vmem:[#allocation51 + $0xb0] sm:$0xff]  ;;  %v15121_v31 = vor.u32 %v16532_v22, %v15118_v28  ;;  %v10362_v32 = vpack.c.bf16 %v10356_v15, %v10356_v15 }
0x143b   :  { %10304 = vmatpush.bf16.msrb.mxu3 %v14641_v24  ;;  %v16585_v24 = vld [vmem:[#allocation51 + $0x38] sm:$0xff] }
0x143c   :  { %10343 = vmatpush.bf16.msra.mxu2 %v15217_v44  ;;  %v16599_v44 = vld [vmem:[#allocation51 + $0xa8] sm:$0xff] }
0x143d   :  { %10319 = vmatpush.bf16.msra.mxu0 %v14785_v52  ;;  %v10091_v6 = vpop.f32.mrf.mxu2  ;;  %v16598_v52 = vld [vmem:[#allocation51 + $0xa0] sm:$0xff] }
0x143e   :  { %10332 = vmatpush.bf16.msra.mxu1 %v14977_v42 }
0x143f   :  { %10305 = vmatpush.bf16.msrb.mxu3 %v14617_v57  ;;  %v16606_v57 = vld [vmem:[#allocation51 + $0xe0] sm:$0xff] }
0x1440   :  { %10344 = vmatpush.bf16.msra.mxu2 %v15193_v49  ;;  %v16605_v49 = vld [vmem:[#allocation51 + $0xd8] sm:$0xff] }
0x1441   :  { %10320 = vmatpush.bf16.msra.mxu0 %v14761_v4  ;;  %v16580_v4 = vld [vmem:[#allocation51 + $0x10] sm:$0xff] }
0x1442   :  { %10333 = vmatpush.bf16.msra.mxu1 %v14953_v26 }
0x1443   :  { %10306 = vmatpush.bf16.msrb.mxu3 %v14593_v20  ;;  %v16594_v20 = vld [vmem:[#allocation51 + $0x80] sm:$0xff] }
0x1444   :  { %10345 = vmatpush.bf16.msra.mxu2 %v15169_v13  ;;  %v10360_v13 = vpack.c.bf16 %v10354_v16, %v10354_v16  ;;  %v16619_v16 = vld [vmem:[#allocation51 + $0x148] sm:$0xff] }
0x1445   :  { %10321 = vmatpush.bf16.msra.mxu0 %v14737_v43  ;;  %v18860_v56 = vpop.f32.mrf.mxu0 }
0x1446   :  { %10334 = vmatpush.bf16.msra.mxu1 %v14929_v54  ;;  %v18862_v42 = vpop.f32.mrf.mxu1  ;;  %v10359_v54 = vpack.c.bf16 %v10353_v33, %v10353_v33 }
0x1447   :  { %10307 = vmatpush.bf16.msrb.mxu3 %v14569_v36 }
0x1448   :  { %10346 = vmatpush.bf16.msra.mxu2 %v15145_v45  ;;  %10322 = vmatmul.bf16.vlgmr.msra.gmra.mxu0 %v18599_v12  ;;  %v16590_v12 = vld [vmem:[#allocation51 + $0x60] sm:$0xff]  ;;  %v10090_v45 = vadd.f32 %v18850_v60, %v18854_v9  ;;  %v16611_v60 = vld [vmem:[#allocation51 + $0x108] sm:$0xff] }
0x1449   :  { %10766 = vmatpush.bf16.msrb.mxu0 %v16593_v11  ;;  %10335 = vmatmul.bf16.vlgmr.msra.gmra.mxu1 %v18601_v34  ;;  %v16583_v34 = vld [vmem:[#allocation51 + $0x28] sm:$0xff]  ;;  %v16616_v11 = vld [vmem:[#allocation51 + $0x130] sm:$0xff] }
0x144a   :  { %10779 = vmatpush.bf16.msrb.mxu1 %v16601_v1  ;;  %v16615_v1 = vld [vmem:[#allocation51 + $0x128] sm:$0xff] }
0x144b   :  { %10308 = vmatpush.bf16.msrb.mxu3 %v14545_v23  ;;  %v16612_v23 = vld [vmem:[#allocation51 + $0x110] sm:$0xff] }
0x144c   :  { %10347 = vmatpush.bf16.msra.mxu2 %v15121_v31 }
0x144d   :  { %10767 = vmatpush.bf16.msrb.mxu0 %v16592_v48  ;;  %v10117_v19 = vpop.f32.mrf.mxu0 }
0x144e   :  { %10780 = vmatpush.bf16.msrb.mxu1 %v16600_v7  ;;  %10309 = vmatmul.bf16.vlgmr.msrb.gmra.mxu3 %v18605_v59  ;;  %v16582_v59 = vld [vmem:[#allocation51 + $0x20] sm:$0xff]  ;;  %v10130_v50 = vpop.f32.mrf.mxu1  ;;  %v5258_v7 = vperm.slane %v18821_v18, 5 }
0x144f   :  { %10753 = vmatpush.bf16.msra.mxu3 %v16585_v24  ;;  %10348 = vmatmul.bf16.vlgmr.msra.gmra.mxu2 %v18607_v8  ;;  %v16588_v8 = vld [vmem:[#allocation51 + $0x50] sm:$0xff] }
0x1450   :  { %10792 = vmatpush.bf16.msrb.mxu2 %v16609_v10 }
0x1451   :  { %10768 = vmatpush.bf16.msrb.mxu0 %v16591_v14  ;;  %v10102_v41 = vpop.f32.mrf.mxu3 }
0x1452   :  { %10781 = vmatpush.bf16.msrb.mxu1 %v16599_v44  ;;  %v10141_v26 = vpop.f32.mrf.mxu2  ;;  %v10103_v2 = vadd.f32 %v10102_v41, %v10090_v45  ;;  %v16620_v41 = vld [vmem:[#allocation51 + $0x150] sm:$0xff] }
0x1453   :  { %10754 = vmatpush.bf16.msra.mxu3 %v16584_v39  ;;  %v16610_v39 = vld [vmem:[#allocation51 + $0x100] sm:$0xff] }
0x1454   :  { %10793 = vmatpush.bf16.msrb.mxu2 %v16608_v46  ;;  %v10116_v22 = vadd.f32 %v18860_v56, %v10103_v2 }
0x1455   :  { %10769 = vmatpush.bf16.msrb.mxu0 %v16590_v12 }
0x1456   :  { %10782 = vmatpush.bf16.msrb.mxu1 %v16598_v52  ;;  %v10129_v61 = vadd.f32 %v18862_v42, %v10116_v22 }
0x1457   :  { %10755 = vmatpush.bf16.msra.mxu3 %v16583_v34 }
0x1458   :  { %10794 = vmatpush.bf16.msrb.mxu2 %v16607_v53  ;;  %v10142_v9 = vadd.f32 %v10141_v26, %v10129_v61  ;;  %v16721_v61 = vld [vmem:[#allocation52] ss:$0 sm:$0xff] }
0x1459   :  { %10770 = vmatpush.bf16.msrb.mxu0 %v16589_v0  ;;  %v10104_v43 = vpop.f32.mrf.mxu3 }
0x145a   :  { %10783 = vmatpush.bf16.msrb.mxu1 %v16597_v5  ;;  %v10143_v62 = vpop.f32.mrf.mxu2  ;;  %v10357_v46 = vmax.f32 %v10142_v9, 0.0 }
0x145b   :  { %10756 = vmatpush.bf16.msra.mxu3 %v16582_v59  ;;  %v16625_v59 = vld [vmem:[#allocation51 + $0x178] sm:$0xff] }
0x145c   :  { %10795 = vmatpush.bf16.msrb.mxu2 %v16606_v57  ;;  %v10363_v18 = vpack.c.bf16 %v10357_v46, %v10357_v46 }
0x145d   :  { %10771 = vmatpush.bf16.msrb.mxu0 %v16588_v8  ;;  %v16624_v8 = vld [vmem:[#allocation51 + $0x170] sm:$0xff] }
0x145e   :  { %10784 = vmatpush.bf16.msrb.mxu1 %v16596_v30 }
0x145f   :  { %10757 = vmatpush.bf16.msra.mxu3 %v16581_v17  ;;  %v16623_v17 = vld [vmem:[#allocation51 + $0x168] sm:$0xff] }
0x1460   :  { %10796 = vmatpush.bf16.msrb.mxu2 %v16605_v49  ;;  %v16622_v49 = vld [vmem:[#allocation51 + $0x160] sm:$0xff] }
0x1461   :  { %10772 = vmatpush.bf16.msrb.mxu0 %v16587_v25  ;;  %v16621_v25 = vld [vmem:[#allocation51 + $0x158] sm:$0xff] }
0x1462   :  { %10785 = vmatpush.bf16.msrb.mxu1 %v16595_v3 }
0x1463   :  { %10758 = vmatpush.bf16.msra.mxu3 %v16580_v4 }
0x1464   :  { %10797 = vmatpush.bf16.msrb.mxu2 %v16604_v38 }
0x1465   :  { %10773 = vmatpush.bf16.msrb.mxu0 %v16586_v51  ;;  %v10167_v58 = vpop.f32.mrf.mxu0 }
0x1466   :  { %10786 = vmatpush.bf16.msrb.mxu1 %v16594_v20  ;;  %v10180_v36 = vpop.f32.mrf.mxu1 }
0x1467   :  { %10759 = vmatpush.bf16.msra.mxu3 %v16579_v63 }
0x1468   :  { %10798 = vmatpush.bf16.msrb.mxu2 %v16603_v47  ;;  %10774 = vmatmul.bf16.vlgmr.msrb.gmra.mxu0 %v10360_v13 }
0x1469   :  { %10787 = vmatmul.bf16.vlgmr.msrb.gmra.mxu1 %v10361_v40  ;;  %10818 = vmatpush.bf16.msra.mxu0 %v16625_v59 }
0x146b   :  { %10760 = vmatpush.bf16.msra.mxu3 %v16578_v37 }
0x146c   :  { %10799 = vmatpush.bf16.msrb.mxu2 %v16602_v21 }
0x146d   :  { %v10169_v28 = vpop.f32.mrf.mxu0  ;;  %10819 = vmatpush.bf16.msra.mxu0 %v16624_v8 }
0x146e   :  { %10761 = vmatmul.bf16.vlgmr.msra.gmra.mxu3 %v10359_v54  ;;  %v10182_v48 = vpop.f32.mrf.mxu1 }
0x146f   :  { %10805 = vmatpush.bf16.msrb.mxu3 %v16617_v29  ;;  %10800 = vmatmul.bf16.vlgmr.msrb.gmra.mxu2 %v10362_v32 }
0x1471   :  { %v10154_v31 = vpop.f32.mrf.mxu3  ;;  %10820 = vmatpush.bf16.msra.mxu0 %v16623_v17 }
0x1472   :  { %v10155_v24 = vadd.f32 %v10154_v31, %v5258_v7  ;;  %v10193_v6 = vpop.f32.mrf.mxu2 }
0x1473   :  { %10806 = vmatpush.bf16.msrb.mxu3 %v16616_v11 }
0x1474   :  { %v10168_v10 = vadd.f32 %v10167_v58, %v10155_v24 }
0x1475   :  { %10821 = vmatpush.bf16.msra.mxu0 %v16622_v49 }
0x1476   :  { %v10181_v14 = vadd.f32 %v10180_v36, %v10168_v10 }
0x1477   :  { %10807 = vmatpush.bf16.msrb.mxu3 %v16615_v1 }
0x1478   :  { %v10194_v44 = vadd.f32 %v10193_v6, %v10181_v14 }
0x1479   :  { %v10156_v12 = vpop.f32.mrf.mxu3  ;;  %10822 = vmatpush.bf16.msra.mxu0 %v16621_v25 }
0x147a   :  { %v10195_v52 = vpop.f32.mrf.mxu2 }
0x147b   :  { %10808 = vmatpush.bf16.msrb.mxu3 %v16614_v55 }
0x147d   :  { %10823 = vmatpush.bf16.msra.mxu0 %v16620_v41 }
0x147f   :  { %10809 = vmatpush.bf16.msrb.mxu3 %v16613_v27 }
0x1481   :  { %10824 = vmatpush.bf16.msra.mxu0 %v16619_v16 }
0x1483   :  { %10810 = vmatpush.bf16.msrb.mxu3 %v16612_v23 }
0x1485   :  { %v10219_v34 = vpop.f32.mrf.mxu0  ;;  %10825 = vmatpush.bf16.msra.mxu0 %v16618_v35 }
0x1486   :  { %v10232_v56 = vpop.f32.mrf.mxu1 }
0x1487   :  { %10811 = vmatpush.bf16.msrb.mxu3 %v16611_v60 }
0x148b   :  { %10812 = vmatpush.bf16.msrb.mxu3 %v16610_v39 }
0x148d   :  { %v10221_v53 = vpop.f32.mrf.mxu0 }
0x148e   :  { %10813 = vmatmul.bf16.vlgmr.msrb.gmra.mxu3 %v10363_v18  ;;  %v10234_v42 = vpop.f32.mrf.mxu1 }
0x1491   :  { %v10206_v0 = vpop.f32.mrf.mxu3 }
0x1492   :  { %v10245_v5 = vpop.f32.mrf.mxu2  ;;  %v10207_v51 = vadd.f32 %v10206_v0, %v10194_v44 }
0x1494   :  { %v10220_v20 = vadd.f32 %v10219_v34, %v10207_v51 }
0x1496   :  { %v10233_v13 = vadd.f32 %v10232_v56, %v10220_v20 }
0x1498   :  { %v10246_v40 = vadd.f32 %v10245_v5, %v10233_v13 }
0x1499   :  { %v10208_v57 = vpop.f32.mrf.mxu3 }
0x149a   :  { %v10247_v30 = vpop.f32.mrf.mxu2 }
0x14a5   :  { %v10271_v19 = vpop.f32.mrf.mxu0 }
0x14a6   :  { %v10284_v50 = vpop.f32.mrf.mxu1 }
0x14ad   :  { %v10273_v3 = vpop.f32.mrf.mxu0 }
0x14ae   :  { %v10286_v4 = vpop.f32.mrf.mxu1 }
0x14b1   :  { %v10258_v38 = vpop.f32.mrf.mxu3 }
0x14b2   :  { %v10297_v26 = vpop.f32.mrf.mxu2  ;;  %v10259_v37 = vadd.f32 %v10258_v38, %v10246_v40 }
0x14b4   :  { %v10272_v21 = vadd.f32 %v10271_v19, %v10259_v37 }
0x14b6   :  { %v10285_v29 = vadd.f32 %v10284_v50, %v10272_v21 }
0x14b8   :  { %v10298_v54 = vadd.f32 %v10297_v26, %v10285_v29 }
0x14b9   :  { %v10260_v63 = vpop.f32.mrf.mxu3 }
0x14ba   :  { %v10299_v47 = vpop.f32.mrf.mxu2 }
0x14c5   :  { %v10323_v33 = vpop.f32.mrf.mxu0 }
0x14c6   :  { %v10336_v43 = vpop.f32.mrf.mxu1 }
0x14cd   :  { %v10325_v15 = vpop.f32.mrf.mxu0 }
0x14ce   :  { %v10338_v62 = vpop.f32.mrf.mxu1 }
0x14d1   :  { %v10310_v11 = vpop.f32.mrf.mxu3 }
0x14d2   :  { %v10311_v32 = vadd.f32 %v10310_v11, %v10298_v54  ;;  %v10349_v1 = vpop.f32.mrf.mxu2 }
0x14d4   :  { %v10324_v58 = vadd.f32 %v10323_v33, %v10311_v32 }
0x14d6   :  { %v10337_v36 = vadd.f32 %v10336_v43, %v10324_v58 }
0x14d8   :  { %v10350_v45 = vadd.f32 %v10349_v1, %v10337_v36 }
0x14d9   :  { %v10312_v55 = vpop.f32.mrf.mxu3 }
0x14da   :  { %v10358_v2 = vmax.f32 %v10350_v45, 0.0  ;;  %v10351_v27 = vpop.f32.mrf.mxu2 }
0x14dc   :  { %v10364_v22 = vpack.c.bf16 %v10358_v2, %v10358_v2 }
0x14de   :  { %10826 = vmatmul.bf16.vlgmr.msra.gmra.mxu0 %v10364_v22 }
0x14e5   :  { %v10775_v28 = vpop.f32.mrf.mxu0 }
0x14e6   :  { %v10788_v48 = vpop.f32.mrf.mxu1 }
0x14ed   :  { %v10777_v7 = vpop.f32.mrf.mxu0 }
0x14ee   :  { %v10790_v23 = vpop.f32.mrf.mxu1 }
0x14f1   :  { %v10762_v31 = vpop.f32.mrf.mxu3 }
0x14f2   :  { %v10763_v24 = vadd.f32 %v16721_v61, %v10762_v31  ;;  %v10801_v6 = vpop.f32.mrf.mxu2 }
0x14f4   :  { %v10776_v10 = vadd.f32 %v10775_v28, %v10763_v24 }
0x14f6   :  { %v10789_v60 = vadd.f32 %v10788_v48, %v10776_v10 }
0x14f8   :  { %v10802_v9 = vadd.f32 %v10801_v6, %v10789_v60 }
0x14f9   :  { %v10764_v14 = vpop.f32.mrf.mxu3 }
0x14fa   :  { %v10803_v44 = vpop.f32.mrf.mxu2 }
0x1511   :  { %v10814_v39 = vpop.f32.mrf.mxu3 }
0x1512   :  { %v10815_v46 = vadd.f32 %v10814_v39, %v10802_v9 }
0x1519   :  { %v10816_v12 = vpop.f32.mrf.mxu3 }
0x155b   :  { %v10827_v52 = vpop.f32.mrf.mxu0 }
0x155c   :  { %v10828_v18 = vadd.f32 %v10827_v52, %v10815_v46 }
0x155e   :  { %10831 = vst [vmem:[%s17917_s27] sm:$0x3] %v10828_v18 }
0x1563   :  { %v10829_v34 = vpop.f32.mrf.mxu0 }
0x1564   :  { %10836 = vsyncpa [#allocation3], 1 }
0x1565   :  { %10837 = vsyncpa [#allocation5], 1 }
0x1566   :  { %10838 = vsyncpa [#allocation8], 1 }
0x1567   :  { %10839 = vsyncpa [#allocation11], 1 }
0x1568   :  { %10840 = vsyncpa [#allocation14], 1 }
0x1569   :  { %10841 = vsyncpa [#allocation17], 1 }
0x156a   :  { %10842 = vsyncpa [#allocation20], 1 }
0x156b   :  { %10843 = vsyncpa [#allocation23], 1 }
0x156c   :  { %10844 = vsyncpa [#allocation26], 1 }
0x156d   :  { %10845 = vsyncpa [#allocation29], 1 }
0x156e   :  { %10846 = vsyncpa [#allocation32], 1 }
0x156f   :  { %10847 = vsyncpa [#allocation35], 1 }
0x1570   :  { %10848 = vsyncpa [#allocation38], 1 }
0x1571   :  { %10849 = vsyncpa [#allocation41], 1 }
0x1572   :  { %10850 = vsyncpa [#allocation44], 1 }
0x1573   :  { %10851 = vsyncpa [#allocation47], 1 }
0x1574   :  { %10852 = vsyncpa [#allocation50], 1 }
0x1575   :  { %10853 = vsyncpa [#allocation53], 1 }

</bundles_post_ra>
